<compile_context>
chip_gen: v6e
topology: v6e:2x2x1
jax: 0.10.0
libtpu: 0.0.40
codegen_flags: <defaults>
</compile_context>

<pallas_src>
import numpy as np
import jax
import jax.numpy as jnp
from jax.experimental import pallas as pl
from jax.experimental.pallas import tpu as pltpu

POOL = 28
HIDDEN = 1000
LANE = 128
SUBLANE = 8


def _round_up(v, m):
    return ((v + m - 1) // m) * m


# --------------------------- fused MLP Pallas kernel -------------------------

def _fused_mlp_kernel(x_ref, w1_ref, b1_ref, w2_ref, b2_ref, o_ref):
    """out = ReLU(ReLU(x @ W1 + b1) @ W2_tile + b2_tile); bf16 MXU, f32 acc."""
    h = jnp.dot(x_ref[...], w1_ref[...], preferred_element_type=jnp.float32)
    h = jnp.maximum(h + b1_ref[...], 0.0)                       # fc1 + ReLU
    y = jnp.dot(h.astype(jnp.bfloat16), w2_ref[...],
                preferred_element_type=jnp.float32)
    y = jnp.maximum(y + b2_ref[...], 0.0)                       # fc2 + ReLU
    o_ref[...] = y.astype(o_ref.dtype)


def fused_mlp(x_act, w1, b1, w2, b2, *, n_split=2):
    """ReLU(ReLU(x_act @ w1 + b1) @ w2 + b2) with both layers in one pallas_call.

    x_act: (M, K1) bf16 with K1 % 128 == 0.  w1: (K1, Hp) bf16, b1: (1, Hp) f32,
    w2: (Hp, Np) bf16, b2: (1, Np) f32 — all pre-padded at init.
    Returns (M, Np) f32.  fc1 is recomputed per N tile (cheap: a few MFLOP);
    W1's block index is constant so it is DMA'd only once per core.
    """
    M, K1 = x_act.shape
    K1w, Hp = w1.shape
    Hw, Np = w2.shape
    assert K1 == K1w and Hp == Hw and K1 % LANE == 0 and Hp % LANE == 0
    assert Np % (n_split * LANE) == 0
    TN = Np // n_split

    TM = min(128, _round_up(max(M, SUBLANE), SUBLANE))
    M_pad = _round_up(M, TM)
    xb = x_act if M_pad == M else jnp.pad(x_act, ((0, M_pad - M), (0, 0)))

    # Double-buffered block bytes + headroom, capped under ~48 MiB for v7x.
    blk_bytes = (TM * K1 * 2 + K1 * Hp * 2 + Hp * 4
                 + Hp * TN * 2 + TN * 4 + TM * TN * 4)
    vmem_limit = int(min(2 * blk_bytes + (8 << 20), 48 << 20))

    grid = (M_pad // TM, n_split)
    out = pl.pallas_call(
        _fused_mlp_kernel,
        out_shape=jax.ShapeDtypeStruct((M_pad, Np), jnp.float32),
        grid=grid,
        in_specs=[
            pl.BlockSpec((TM, K1), lambda i, j: (i, 0)),    # activation tile
            pl.BlockSpec((K1, Hp), lambda i, j: (0, 0)),    # W1 (VMEM resident)
            pl.BlockSpec((1, Hp), lambda i, j: (0, 0)),     # b1
            pl.BlockSpec((Hp, TN), lambda i, j: (0, j)),    # W2 N-tile
            pl.BlockSpec((1, TN), lambda i, j: (0, j)),     # b2 N-tile
        ],
        out_specs=pl.BlockSpec((TM, TN), lambda i, j: (i, j)),
        compiler_params=pltpu.CompilerParams(
            dimension_semantics=("parallel", "parallel"),
            vmem_limit_bytes=vmem_limit,
        ),
    )(xb, w1, b1, w2, b2)
    return out[:M]


# ----------------------- parameter initialization ----------------------------

def _adaptive_pool_matrix(in_size, out_size):
    """(in_size, out_size) M so that (x @ M) == AdaptiveAvgPool1d(out_size)(x).

    Exact PyTorch window rule: [floor(o*I/O), ceil((o+1)*I/O)).
    """
    m = np.zeros((in_size, out_size), dtype=np.float32)
    for o in range(out_size):
        start = (o * in_size) // out_size
        end = -(-((o + 1) * in_size) // out_size)   # ceil division
        m[start:end, o] = 1.0 / float(end - start)
    return m


def init_baseline_encoder_params(key, input_shape, hidden=HIDDEN, pool_hw=POOL):
    """input_shape = (B, C, H, W).  Weights pre-padded + pre-cast once at init."""
    _, C, H, W = input_shape
    k1, k2, k3, k4 = jax.random.split(key, 4)

    fc1_in = C * pool_hw * pool_hw
    k1_pad = _round_up(fc1_in, LANE)
    h_pad = _round_up(hidden, LANE)

    bnd1 = 1.0 / np.sqrt(fc1_in)
    bnd2 = 1.0 / np.sqrt(hidden)
    w1 = jax.random.uniform(k1, (fc1_in, hidden), jnp.float32, -bnd1, bnd1)
    b1 = jax.random.uniform(k2, (hidden,), jnp.float32, -bnd1, bnd1)
    w2 = jax.random.uniform(k3, (hidden, hidden), jnp.float32, -bnd2, bnd2)
    b2 = jax.random.uniform(k4, (hidden,), jnp.float32, -bnd2, bnd2)

    return {
        # Separable adaptive-pool matrices (f32, ~6 KB total) instead of the
        # previous (H*W, 784) Kronecker matrix (~4.9 MB).
        "pool_h": jnp.asarray(_adaptive_pool_matrix(H, pool_hw)),   # (H, 28)
        "pool_w": jnp.asarray(_adaptive_pool_matrix(W, pool_hw)),   # (W, 28)
        # FC params zero-padded to lane multiples; weights pre-cast to bf16.
        "fc1_w": jnp.pad(w1, ((0, k1_pad - fc1_in), (0, h_pad - hidden))
                         ).astype(jnp.bfloat16),                    # (2432, 1024)
        "fc1_b": jnp.pad(b1, (0, h_pad - hidden)).reshape(1, h_pad),
        "fc2_w": jnp.pad(w2, ((0, h_pad - hidden), (0, h_pad - hidden))
                         ).astype(jnp.bfloat16),                    # (1024, 1024)
        "fc2_b": jnp.pad(b2, (0, h_pad - hidden)).reshape(1, h_pad),
    }


# ------------------------------- forward --------------------------------------

def baseline_encoder_forward(x, params, *, hidden=HIDDEN):
    """pool(28,28) -> flatten -> Linear -> ReLU -> Linear -> ReLU (PyTorch order)."""
    B, C, H, W = x.shape
    # AdaptiveAvgPool2d((28,28)) as two tiny separable contractions on the
    # ~75 KB input (negligible next to streaming ~7 MB of FC weights).
    # TODO(synk): fold the pooling into the fused Pallas kernel once an
    # in-kernel (B,C,28,28)->(B,C*784) flatten lowers dependably in Mosaic.
    t = jnp.einsum("bchw,wj->bchj", x, params["pool_w"],
                   precision=jax.lax.Precision.HIGHEST)
    p = jnp.einsum("bchj,hi->bcij", t, params["pool_h"],
                   precision=jax.lax.Precision.HIGHEST)
    act = p.reshape(B, C * POOL * POOL)                         # nn.Flatten()
    k1_pad = params["fc1_w"].shape[0]
    act = jnp.pad(act, ((0, 0), (0, k1_pad - act.shape[1]))).astype(jnp.bfloat16)
    # Fused Linear(C*784 -> 1000)+ReLU -> Linear(1000 -> 1000)+ReLU, one launch.
    out = fused_mlp(act, params["fc1_w"], params["fc1_b"],
                    params["fc2_w"], params["fc2_b"])
    return out[:, :hidden]                                      # (B, 1000) f32


# --------------------------------- main ---------------------------------------

if __name__ == "__main__":
    # NCHW input, 3 channels (module is built for RGB), spatial 56 so the
    # adaptive pool reduces exact 2x2 windows.
    B, C, H, W = 2, 3, 56, 56
    x = jax.random.normal(jax.random.PRNGKey(0), (B, C, H, W), jnp.float32)
    params = init_baseline_encoder_params(jax.random.PRNGKey(42), (B, C, H, W))

    fwd = jax.jit(baseline_encoder_forward)
    out = jax.block_until_ready(fwd(x, params))

    # Pure-XLA f32 reference on the same (bf16) weights; loose bf16 tolerance.
    def ref_forward(x, params):
        t = jnp.einsum("bchw,wj->bchj", x, params["pool_w"],
                       precision=jax.lax.Precision.HIGHEST)
        p = jnp.einsum("bchj,hi->bcij", t, params["pool_h"],
                       precision=jax.lax.Precision.HIGHEST)
        a = p.reshape(x.shape[0], -1)
        a = jnp.pad(a, ((0, 0), (0, params["fc1_w"].shape[0] - a.shape[1])))
        h1 = jnp.maximum(a @ params["fc1_w"].astype(jnp.float32)
                         + params["fc1_b"], 0.0)
        h2 = jnp.maximum(h1 @ params["fc2_w"].astype(jnp.float32)
                         + params["fc2_b"], 0.0)
        return h2[:, :HIDDEN]

    ref = ref_forward(x, params)

    assert out.shape == (B, 1000), out.shape
    assert bool(jnp.all(jnp.isfinite(out)))
    assert bool(jnp.all(out >= 0.0))                            # final ReLU
    assert bool(jnp.allclose(out, ref, atol=5e-2, rtol=5e-2))   # bf16 MXU tol
    print("KERNEL_OK")
</pallas_src>

<mosaic_0001>
module attributes {stable_mosaic.version = 11 : i64} {
  func.func @_fused_mlp_kernel(%arg0: i32, %arg1: i32, %arg2: memref<8x2432xbf16, #tpu.memory_space<vmem>>, %arg3: memref<2432x1024xbf16, #tpu.memory_space<vmem>>, %arg4: memref<1x1024xf32, #tpu.memory_space<vmem>>, %arg5: memref<1024x512xbf16, #tpu.memory_space<vmem>>, %arg6: memref<1x512xf32, #tpu.memory_space<vmem>>, %arg7: memref<8x512xf32, #tpu.memory_space<vmem>>) attributes {dimension_semantics = [#tpu.dimension_semantics<parallel>, #tpu.dimension_semantics<parallel>], iteration_bounds = array<i64: 1, 2>, scalar_prefetch = 0 : i64, scratch_operands = 0 : i64, tpu.core_type = #tpu.core_type<tc>, window_params = [{transform_indices = @transform_0, window_bounds = array<i64: 8, 2432>}, {pipeline_mode = #tpu.pipeline_mode<synchronous>, transform_indices = @transform_1, window_bounds = array<i64: 2432, 1024>}, {pipeline_mode = #tpu.pipeline_mode<synchronous>, transform_indices = @transform_2, window_bounds = array<i64: 1, 1024>}, {transform_indices = @transform_3, window_bounds = array<i64: 1024, 512>}, {transform_indices = @transform_4, window_bounds = array<i64: 1, 512>}, {transform_indices = @transform_5, window_bounds = array<i64: 8, 512>}]} {
    %c0 = arith.constant 0 : index
    %c0_0 = arith.constant 0 : index
    %0 = vector.load %arg2[%c0, %c0_0] : memref<8x2432xbf16, #tpu.memory_space<vmem>>, vector<8x2432xbf16>
    %c0_1 = arith.constant 0 : index
    %c0_2 = arith.constant 0 : index
    %1 = vector.load %arg3[%c0_1, %c0_2] : memref<2432x1024xbf16, #tpu.memory_space<vmem>>, vector<2432x1024xbf16>
    %cst = arith.constant dense<0.000000e+00> : vector<8x1024xf32>
    %2 = tpu.matmul %0, %1, %cst {dimension_numbers = #tpu.dot_dimension_numbers<[1], [0], [0], [1], [0, 0, 1, 1], [], []>} : vector<8x2432xbf16>, vector<2432x1024xbf16>, vector<8x1024xf32> -> vector<8x1024xf32>
    %c0_3 = arith.constant 0 : index
    %c0_4 = arith.constant 0 : index
    %3 = vector.load %arg4[%c0_3, %c0_4] : memref<1x1024xf32, #tpu.memory_space<vmem>>, vector<1x1024xf32>
    %4 = vector.broadcast %3 : vector<1x1024xf32> to vector<8x1024xf32>
    %5 = arith.addf %2, %4 : vector<8x1024xf32>
    %cst_5 = arith.constant 0.000000e+00 : f32
    %6 = vector.broadcast %cst_5 : f32 to vector<8x1024xf32>
    %7 = arith.maximumf %5, %6 : vector<8x1024xf32>
    %8 = arith.truncf %7 : vector<8x1024xf32> to vector<8x1024xbf16>
    %c0_6 = arith.constant 0 : index
    %c0_7 = arith.constant 0 : index
    %9 = vector.load %arg5[%c0_6, %c0_7] : memref<1024x512xbf16, #tpu.memory_space<vmem>>, vector<1024x512xbf16>
    %cst_8 = arith.constant dense<0.000000e+00> : vector<8x512xf32>
    %10 = tpu.matmul %8, %9, %cst_8 {dimension_numbers = #tpu.dot_dimension_numbers<[1], [0], [0], [1], [0, 0, 1, 1], [], []>} : vector<8x1024xbf16>, vector<1024x512xbf16>, vector<8x512xf32> -> vector<8x512xf32>
    %c0_9 = arith.constant 0 : index
    %c0_10 = arith.constant 0 : index
    %11 = vector.load %arg6[%c0_9, %c0_10] : memref<1x512xf32, #tpu.memory_space<vmem>>, vector<1x512xf32>
    %12 = vector.broadcast %11 : vector<1x512xf32> to vector<8x512xf32>
    %13 = arith.addf %10, %12 : vector<8x512xf32>
    %cst_11 = arith.constant 0.000000e+00 : f32
    %14 = vector.broadcast %cst_11 : f32 to vector<8x512xf32>
    %15 = arith.maximumf %13, %14 : vector<8x512xf32>
    %c0_12 = arith.constant 0 : index
    %c0_13 = arith.constant 0 : index
    %16 = vector.load %arg7[%c0_12, %c0_13] : memref<8x512xf32, #tpu.memory_space<vmem>>, vector<8x512xf32>
    tpu.vector_store %arg7[%c0_12, %c0_13], %15 {strides = array<i32>} : memref<8x512xf32, #tpu.memory_space<vmem>>, vector<8x512xf32>,
    return
  }
  func.func @transform_0(%arg0: i32, %arg1: i32) -> (i32, i32) {
    %c0_i32 = arith.constant 0 : i32
    %c0_i32_0 = arith.constant 0 : i32
    return %arg0, %c0_i32 : i32, i32
  }
  func.func @transform_1(%arg0: i32, %arg1: i32) -> (i32, i32) {
    %c0_i32 = arith.constant 0 : i32
    %c0_i32_0 = arith.constant 0 : i32
    %c0_i32_1 = arith.constant 0 : i32
    return %c0_i32, %c0_i32_0 : i32, i32
  }
  func.func @transform_2(%arg0: i32, %arg1: i32) -> (i32, i32) {
    %c0_i32 = arith.constant 0 : i32
    %c0_i32_0 = arith.constant 0 : i32
    %c0_i32_1 = arith.constant 0 : i32
    return %c0_i32, %c0_i32_0 : i32, i32
  }
  func.func @transform_3(%arg0: i32, %arg1: i32) -> (i32, i32) {
    %c0_i32 = arith.constant 0 : i32
    %c0_i32_0 = arith.constant 0 : i32
    return %c0_i32, %arg1 : i32, i32
  }
  func.func @transform_4(%arg0: i32, %arg1: i32) -> (i32, i32) {
    %c0_i32 = arith.constant 0 : i32
    %c0_i32_0 = arith.constant 0 : i32
    return %c0_i32, %arg1 : i32, i32
  }
  func.func @transform_5(%arg0: i32, %arg1: i32) -> (i32, i32) {
    %c0_i32 = arith.constant 0 : i32
    return %arg0, %arg1 : i32, i32
  }
}

</mosaic_0001>

<bundles_post_ra>
// kernel: baseline_encoder_forward.1
= control target key start
LH: loop header
LB: loop body
LE: loop exit
PB: predicated region body
PF: predicated region fallthrough
CT: control target
= control target key end

     0   :  { %s14555_s0 = inlined_call_operand.vmem [shape: bf16[8,2432], index: 0, kind: input, shape index: {}]   ;;  %s14556_s1 = inlined_call_operand.hbm [shape: bf16[2432,1024], index: 1, kind: input, shape index: {}]   ;;  %s14557_s2 = inlined_call_operand.hbm [shape: f32[1,1024], index: 2, kind: input, shape index: {}]   ;;  %s14558_s3 = inlined_call_operand.hbm [shape: bf16[1024,1024], index: 3, kind: input, shape index: {}]   ;;  %s14559_s4 = inlined_call_operand.hbm [shape: f32[1,1024], index: 4, kind: input, shape index: {}]   ;;  %s14560_s5 = inlined_call_operand.vmem [shape: f32[8,1024], index: 5, kind: output, shape index: {}]  }
   0x1   :  { %14565 = sst [smem:[#allocation11_spill]] %s14556_s1 }
   0x2   :  { %10 = vsyncpa [#allocation3], 0 }
   0x3   :  { %11 = vsyncpa [#allocation5], 0  ;;  %s13679_s18 = smov 0   ;;  %s13681_s19 = smov 0  }
   0x4   :  { %s13683_s20 = smov 0   ;;  %s13685_s21 = smov 0  }
   0x5   :  { %s13687_s22 = smov 0   ;;  %s13689_s23 = smov 0  }
   0x6 LB: > { %s14562_s24 = sadd.s32 4294967295, %s13638_s23   ;;  %p111_p0 = scmp.ne.s32.totalorder %s13626_s20, %s13622_s19  ;;  %s13638_s23 = sphi %s13689_s23, %s17_s23   ;;  %s13634_s22 = sphi %s13687_s22, %s14581_s22   ;;  %s13630_s21 = sphi %s13685_s21, %s14580_s21   ;;  %s13626_s20 = sphi %s13683_s20, %s14579_s20   ;;  %s13622_s19 = sphi %s13681_s19, %s14578_s19   ;;  %s13618_s18 = sphi %s13679_s18, %s14577_s18  }
   0x7   : > { %p112_p1 = scmp.eq.s32.totalorder %s13638_s23, 0  ;;  %p117_p2 = scmp.ne.s32.totalorder %s13622_s19, %s13618_s18 }
   0x8   : > { %p13715_p3 = scmp.eq.s32.totalorder %s14562_s24, 0  ;;  %p11464_p5 = scmp.ge.s32.totalorder %s13638_s23, 1 }
   0x9   : > { %p113_p4 = por %p112_p1, %p111_p0  ;;  %p182_p7 = scmp.lt.s32.totalorder %s13638_s23, 3 }
   0xa   : > { %p13722_p6 = por %p13715_p3, %p117_p2  ;;  %s13640_s29 = smov [#allocation2]  }
   0xb   : > { %p13727_p8 = pnand %p11464_p5, %p182_p7  ;;  %s202_s30 = sshll.u32 %s13640_s29, 4  ;;  %s203_s30 = int_to_ptr.vmem [resolvable:$true] %s202_s30 }
   0xc   : > { %s14567_s27 = scalar_select %p13722_p6, 1, 0 }
   0xd   : > { %p12989_p9 = pneg %p13727_p8  ;;  %p13005_p10 = scmp.lt.s32.totalorder %s13638_s23, 2 }
   0xe   : > { %s26_s8 = sadd.s32 1, %s13634_s22  ;;  %s13483_s9 = scalar_lea.vmem %s203_s30, 155648 }
   0xf   : > { %p13736_p11 = pnand %p12989_p9, %p13715_p3  ;;  %p13740_p12 = pnand %p13005_p10, %p113_p4 }
  0x10   : > { %p13484_p0 = scmp.ne.s32.totalorder %s203_s30, %s13483_s9  ;;  %p13491_p5 = scmp.lt.s32.totalorder %s203_s30, %s203_s30 }
  0x11   : > { %p13474_p13 = pneg %p13736_p11  ;;  %p13492_p7 = scmp.lt.s32.totalorder %s13483_s9, %s13483_s9 }
  0x13   : > { %p13486_p1 = pnand %p13484_p0, %p13474_p13  ;;  %p13493_p9 = por %p13492_p7, %p13491_p5 }
  0x15   : > { %p13487_p2 = pneg %p13486_p1 }
  0x17   : > { %p13494_p6 = pnand %p13493_p9, %p13487_p2 }
  0x19   : > { %13497 = shalt.err (!%p13494_p6)
}
  0x1a   : > { %s14563_s10 = smov 512   ;;  %s13642_s11 = smov 32  }
  0x1b   : > { %s14571_s1 = sld [smem:[#allocation11_spill]]  ;;  %p27_p4 = scmp.ge.s32.totalorder %s26_s8, 2 }
  0x1c   : > { %s227_s14 = sand.u32 1, %s13638_s23   ;;  %s14564_s15 = sand.u32 1, %s13626_s20  }
  0x1d   : > { %s14583_s8 = smov (%p27_p4, %s26_s8), 0  ;;  %s11469_s16 = sshll.u32 %s14564_s15, 11 }
  0x1e   : > { %s101_s17 = ssub.s32 %s13634_s22, %s14583_s8  ;;  %s12975_s18 = sshll.u32 %s13634_s22, 8 }
  0x1f   : > { %p102_p6 = scmp.eq.s32.totalorder %s101_s17, 0  ;;  %s237_s24 = scalar_lea.hbm %s14558_s3, %s12975_s18 }
  0x20   : > { %s231_s25 = scalar_lea.vmem [#allocation6], %s11469_s16  ;;  %s14572_s13 = sadd.s32 1, %s13626_s20 }
  0x21   : > { %12992 = dma.hbm_to_vmem [thread:$0]  (!%p13736_p11), %s14571_s1, 155648, %s203_s30, [#allocation3], %s14563_s10, %s14563_s10, %s13642_s11  }
  0x22   : > { %s238_s12 = sshll.u32 %s231_s25, 4  ;;  %s13774_s11 = scalar_lea.sflag [#allocation3], %s227_s14  ;;  %s239_s12 = int_to_ptr.vmem [resolvable:$true] %s238_s12 }
  0x23   : > { %s13772_s30 = scalar_select %p102_p6, %s13626_s20, %s14572_s13  }
  0x24   : > { %p13500_p10 = pneg %p13740_p12  ;;  %s13511_s10 = scalar_lea.vmem %s239_s12, 32768 }
  0x25   : > { %p13512_p0 = scmp.ne.s32.totalorder %s239_s12, %s13511_s10  ;;  %s13643_s17 = smov [#allocation6]  }
  0x26   : > { %s13516_s15 = sshll.u32 %s13643_s17, 4  ;;  %s13517_s15 = int_to_ptr.vmem [resolvable:$false] %s13516_s15 }
  0x27   : > { %p13514_p1 = pnand %p13512_p0, %p13500_p10  ;;  %s13518_s18 = scalar_lea.vmem %s13517_s15, 65536 }
  0x28   : > { %p13519_p5 = scmp.lt.s32.totalorder %s239_s12, %s13517_s15  ;;  %p13520_p7 = scmp.lt.s32.totalorder %s13518_s18, %s13511_s10 }
  0x29   : > { %p13515_p2 = pneg %p13514_p1 }
  0x2a   : > { %p13521_p9 = por %p13520_p7, %p13519_p5 }
  0x2c   : > { %p13522_p4 = pnand %p13521_p9, %p13515_p2 }
  0x2e   : > { %13525 = shalt.err (!%p13522_p4)
}
  0x2f   : > { %s13644_s25 = smov 256   ;;  %s13645_s14 = smov 16  }
  0x30   : > { %s14573_s16 = smov 512   ;;  %s13646_s29 = smov [#allocation4]  }
  0x31   : > { %12999 = dma.hbm_to_vmem [thread:$0]  (!%p13740_p12), %s237_s24, 32768, %s239_s12, %s13774_s11, %s14573_s16, %s13644_s25, %s13645_s14  }
  0x32   : > { %s216_s9 = sshll.u32 %s13646_s29, 4  ;;  %s14574_s13 = sand.u32 1, %s13626_s20   ;;  %s217_s9 = int_to_ptr.vmem [resolvable:$true] %s216_s9 }
  0x33   : > { %s11472_s17 = sshll.u32 %s14574_s13, 2  ;;  %s13537_s1 = scalar_lea.vmem %s217_s9, 128 }
  0x34   : > { %p13538_p6 = scmp.ne.s32.totalorder %s217_s9, %s13537_s1  ;;  %p13545_p2 = scmp.lt.s32.totalorder %s217_s9, %s217_s9 }
  0x35   : > { %p13546_p5 = scmp.lt.s32.totalorder %s13537_s1, %s13537_s1 }
  0x36   : > { %p13540_p0 = pnand %p13538_p6, %p13474_p13 }
  0x37   : > { %p13547_p7 = por %p13546_p5, %p13545_p2 }
  0x38   : > { %p13541_p1 = pneg %p13540_p0 }
  0x3a   : > { %p13548_p9 = pnand %p13547_p7, %p13541_p1 }
  0x3c   : > { %13551 = shalt.err (!%p13548_p9)
}
  0x3d   : > { %12995 = dma.hbm_to_vmem [thread:$0]  (!%p13736_p11), %s14557_s2, 128, %s217_s9, [#allocation5]  }
  0x3e   : > { %s12976_s15 = sshll.u32 %s13634_s22, 6  ;;  %s252_s12 = scalar_lea.vmem [#allocation7], %s11472_s17 }
  0x3f   : > { %s260_s18 = sshll.u32 %s252_s12, 4  ;;  %s258_s16 = scalar_lea.hbm %s14559_s4, %s12976_s15  ;;  %s261_s18 = int_to_ptr.vmem [resolvable:$true] %s260_s18 }
  0x40   : > { %s13565_s1 = scalar_lea.vmem %s261_s18, 64  ;;  %s13647_s6 = smov [#allocation7]  }
  0x41   : > { %p13566_p13 = scmp.ne.s32.totalorder %s261_s18, %s13565_s1  ;;  %s13570_s29 = sshll.u32 %s13647_s6, 4  ;;  %s13571_s29 = int_to_ptr.vmem [resolvable:$false] %s13570_s29 }
  0x42   : > { %s13572_s13 = scalar_lea.vmem %s13571_s29, 128  ;;  %p13573_p0 = scmp.lt.s32.totalorder %s261_s18, %s13571_s29 }
  0x43   : > { %p13568_p4 = pnand %p13566_p13, %p13500_p10  ;;  %p13574_p11 = scmp.lt.s32.totalorder %s13572_s13, %s13565_s1 }
  0x45   : > { %p13569_p6 = pneg %p13568_p4  ;;  %p13575_p1 = por %p13574_p11, %p13573_p0 }
  0x47   : > { %p13576_p2 = pnand %p13575_p1, %p13569_p6 }
  0x49   : > { %13579 = shalt.err (!%p13576_p2)
}
  0x4a   : > { %13002 = dma.hbm_to_vmem [thread:$0]  (!%p13740_p12), %s258_s16, 64, %s261_s18, %s13774_s11  }
  0x4b   : > { %269 = sbr.rel (%p13727_p8) target bundleno = 1847 (0x737), region = 40 }
  0x50   : > { %13605 = dma.done.wait (%p13715_p3), [#allocation3], 155648  }
  0x51   : > { %13607 = vsyncadd (%p13715_p3), [#allocation3], 4294811648 }
  0x52   : > { %13609 = dma.done.wait (%p13715_p3), [#allocation5], 128  }
  0x53   : > { %13611 = vsyncadd (%p13715_p3), [#allocation5], 4294967168  ;;  %s14575_s9 = sadd.s32 4294967295, %s13638_s23   ;;  %s281_s28 = sand.u32 1, %s13622_s19  }
  0x54   : > { %s279_s7 = sand.u32 1, %s14575_s9   ;;  %s11478_s11 = sshll.u32 %s281_s28, 11 }
  0x55   : > { %s280_s17 = scalar_lea.sflag [#allocation3], %s279_s7  ;;  %s13820_s10 = scalar_lea.vmem [#allocation6], %s11478_s11 }
  0x56   : > { %p14576_p8 = scmp.ne.s32.totalorder %s14567_s27, 0 }
  0x58   : > { %13613 = dma.done.wait (%p14576_p8), %s280_s17, 32832  }
  0x59   : > { %13615 = vsyncadd (%p14576_p8), %s280_s17, 4294934464  ;;  %v417_v0 = vld [vmem:[#allocation2 + $0x1c0] sm:$0xff]  ;;  %v13834_v54 = vld [vmem:[%s14555_s0 + $0x8] sm:$0xff]  ;;  %s11479_s1 = sshll.u32 %s281_s28, 2  ;;  %s11480_s28 = sshll.u32 %s13630_s21, 2 }
  0x5a   : > { %v421_v1 = vld [vmem:[#allocation2 + $0x1e0] sm:$0xff]  ;;  %v13842_v59 = vcombine.high %v13834_v54, %v13834_v54  ;;  %s292_s6 = scalar_lea.vmem [#allocation7], %s11479_s1  ;;  %p343_p3 = scmp.lt.s32.totalorder %s11480_s28, 7 }
  0x5b   : > { %v545_v2 = vld [vmem:[#allocation2 + $0x5c0] sm:$0xff]  ;;  %v11558_v3 = vcombine.high %v417_v0, %v421_v1  ;;  %v11557_v5 = vcombine.low %v417_v0, %v421_v1 }
  0x5c   : > { %v549_v4 = vld [vmem:[#allocation2 + $0x5e0] sm:$0xff]  ;;  %7839 = vmatprep.mubr.bf16.mxu1 %v13842_v59  ;;  %s14585_s28 = smov (!%p343_p3, %s11480_s28), 7 }
  0x5d   : > { %v409_v6 = vld [vmem:[#allocation2 + $0x180] sm:$0xff]  ;;  %v11686_v8 = vcombine.high %v545_v2, %v549_v4  ;;  %v11685_v9 = vcombine.low %v545_v2, %v549_v4  ;;  %7766 = vmatprep.subr.bf16.mxu0 %v11558_v3  ;;  %s11481_s29 = sshll.u32 %s14585_s28, 3 }
  0x5e   : > { %v413_v7 = vld [vmem:[#allocation2 + $0x1a0] sm:$0xff]  ;;  %7767 = vmatpush1.bf16.msra.mxu0 %v11557_v5  ;;  %s14525_s7 = scalar_lea.vmem %s14560_s5, %s11481_s29 }
  0x5f   : > { %v11550_v10 = vcombine.high %v409_v6, %v413_v7  ;;  %v537_v11 = vld [vmem:[#allocation2 + $0x580] sm:$0xff]  ;;  %7807 = vmatprep.subr.bf16.mxu1 %v11686_v8  ;;  %v11549_v18 = vcombine.low %v409_v6, %v413_v7 }
  0x60   : > { %v541_v12 = vld [vmem:[#allocation2 + $0x5a0] sm:$0xff]  ;;  %7808 = vmatpush1.bf16.msra.mxu1 %v11685_v9 }
  0x61   : > { %v401_v13 = vld [vmem:[#allocation2 + $0x140] sm:$0xff]  ;;  %v11678_v14 = vcombine.high %v537_v11, %v541_v12  ;;  %7768 = vmatprep.subr.bf16.mxu0 %v11550_v10  ;;  %v11677_v19 = vcombine.low %v537_v11, %v541_v12 }
  0x62   : > { %v405_v15 = vld [vmem:[#allocation2 + $0x160] sm:$0xff]  ;;  %7769 = vmatpush1.bf16.msra.mxu0 %v11549_v18 }
  0x63   : > { %v529_v16 = vld [vmem:[#allocation2 + $0x540] sm:$0xff]  ;;  %v11542_v20 = vcombine.high %v401_v13, %v405_v15  ;;  %7809 = vmatprep.subr.bf16.mxu1 %v11678_v14  ;;  %v11541_v26 = vcombine.low %v401_v13, %v405_v15 }
  0x64   : > { %v533_v17 = vld [vmem:[#allocation2 + $0x560] sm:$0xff]  ;;  %7810 = vmatpush1.bf16.msra.mxu1 %v11677_v19 }
  0x65   : > { %v11670_v21 = vcombine.high %v529_v16, %v533_v17  ;;  %v393_v22 = vld [vmem:[#allocation2 + $0x100] sm:$0xff]  ;;  %7770 = vmatprep.subr.bf16.mxu0 %v11542_v20  ;;  %v11669_v27 = vcombine.low %v529_v16, %v533_v17 }
  0x66   : > { %v397_v23 = vld [vmem:[#allocation2 + $0x120] sm:$0xff]  ;;  %7771 = vmatpush1.bf16.msra.mxu0 %v11541_v26 }
  0x67   : > { %v521_v24 = vld [vmem:[#allocation2 + $0x500] sm:$0xff]  ;;  %v11534_v28 = vcombine.high %v393_v22, %v397_v23  ;;  %7811 = vmatprep.subr.bf16.mxu1 %v11670_v21  ;;  %v11533_v34 = vcombine.low %v393_v22, %v397_v23 }
  0x68   : > { %v525_v25 = vld [vmem:[#allocation2 + $0x520] sm:$0xff]  ;;  %7812 = vmatpush1.bf16.msra.mxu1 %v11669_v27 }
  0x69   : > { %v11662_v29 = vcombine.high %v521_v24, %v525_v25  ;;  %v385_v30 = vld [vmem:[#allocation2 + $0xc0] sm:$0xff]  ;;  %7772 = vmatprep.subr.bf16.mxu0 %v11534_v28  ;;  %v11661_v35 = vcombine.low %v521_v24, %v525_v25 }
  0x6a   : > { %v389_v31 = vld [vmem:[#allocation2 + $0xe0] sm:$0xff]  ;;  %7773 = vmatpush1.bf16.msra.mxu0 %v11533_v34 }
  0x6b   : > { %v513_v32 = vld [vmem:[#allocation2 + $0x4c0] sm:$0xff]  ;;  %v11526_v36 = vcombine.high %v385_v30, %v389_v31  ;;  %7813 = vmatprep.subr.bf16.mxu1 %v11662_v29  ;;  %v11525_v42 = vcombine.low %v385_v30, %v389_v31 }
  0x6c   : > { %v517_v33 = vld [vmem:[#allocation2 + $0x4e0] sm:$0xff]  ;;  %7814 = vmatpush1.bf16.msra.mxu1 %v11661_v35 }
  0x6d   : > { %v11654_v37 = vcombine.high %v513_v32, %v517_v33  ;;  %v377_v38 = vld [vmem:[#allocation2 + $0x80] sm:$0xff]  ;;  %7774 = vmatprep.subr.bf16.mxu0 %v11526_v36  ;;  %v11653_v43 = vcombine.low %v513_v32, %v517_v33 }
  0x6e   : > { %v381_v39 = vld [vmem:[#allocation2 + $0xa0] sm:$0xff]  ;;  %7775 = vmatpush1.bf16.msra.mxu0 %v11525_v42 }
  0x6f   : > { %v505_v40 = vld [vmem:[#allocation2 + $0x480] sm:$0xff]  ;;  %v11518_v44 = vcombine.high %v377_v38, %v381_v39  ;;  %7815 = vmatprep.subr.bf16.mxu1 %v11654_v37  ;;  %v11517_v50 = vcombine.low %v377_v38, %v381_v39 }
  0x70   : > { %v509_v41 = vld [vmem:[#allocation2 + $0x4a0] sm:$0xff]  ;;  %7816 = vmatpush1.bf16.msra.mxu1 %v11653_v43 }
  0x71   : > { %v11646_v45 = vcombine.high %v505_v40, %v509_v41  ;;  %v369_v46 = vld [vmem:[#allocation2 + $0x40] sm:$0xff]  ;;  %7776 = vmatprep.subr.bf16.mxu0 %v11518_v44  ;;  %v11645_v51 = vcombine.low %v505_v40, %v509_v41 }
  0x72   : > { %v373_v47 = vld [vmem:[#allocation2 + $0x60] sm:$0xff]  ;;  %7777 = vmatpush1.bf16.msra.mxu0 %v11517_v50 }
  0x73   : > { %v497_v48 = vld [vmem:[#allocation2 + $0x440] sm:$0xff]  ;;  %v11510_v52 = vcombine.high %v369_v46, %v373_v47  ;;  %7817 = vmatprep.subr.bf16.mxu1 %v11646_v45  ;;  %v11509_v62 = vcombine.low %v369_v46, %v373_v47 }
  0x74   : > { %v501_v49 = vld [vmem:[#allocation2 + $0x460] sm:$0xff]  ;;  %7818 = vmatpush1.bf16.msra.mxu1 %v11645_v51 }
  0x75   : > { %v13829_v53 = vld [vmem:[%s14555_s0] sm:$0xff]  ;;  %v11638_v55 = vcombine.high %v497_v48, %v501_v49  ;;  %7778 = vmatprep.subr.bf16.mxu0 %v11510_v52  ;;  %v11637_v63 = vcombine.low %v497_v48, %v501_v49 }
  0x76   : > { %v361_v56 = vld [vmem:[#allocation2] sm:$0xff]  ;;  %v13838_v58 = vcombine.high %v13829_v53, %v13829_v53  ;;  %7779 = vmatpush1.bf16.msra.mxu0 %v11509_v62 }
  0x77   : > { %v365_v57 = vld [vmem:[#allocation2 + $0x20] sm:$0xff]  ;;  %7819 = vmatprep.subr.bf16.mxu1 %v11638_v55 }
  0x78   : > { %v489_v60 = vld [vmem:[#allocation2 + $0x400] sm:$0xff]  ;;  %7798 = vmatprep.mubr.bf16.mxu0 %v13838_v58  ;;  %v11502_v0 = vcombine.high %v361_v56, %v365_v57  ;;  %v11501_v6 = vcombine.low %v361_v56, %v365_v57  ;;  %7820 = vmatpush1.bf16.msra.mxu1 %v11637_v63 }
  0x79   : > { %v493_v61 = vld [vmem:[#allocation2 + $0x420] sm:$0xff] }
  0x7a   : > { %v11630_v1 = vcombine.high %v489_v60, %v493_v61  ;;  %v481_v2 = vld [vmem:[#allocation2 + $0x3c0] sm:$0xff]  ;;  %7780 = vmatprep.subr.bf16.mxu0 %v11502_v0  ;;  %v11629_v7 = vcombine.low %v489_v60, %v493_v61 }
  0x7b   : > { %v485_v3 = vld [vmem:[#allocation2 + $0x3e0] sm:$0xff]  ;;  %7781 = vmatpush1.bf16.msra.mxu0 %v11501_v6 }
  0x7c   : > { %v609_v4 = vld [vmem:[#allocation2 + $0x7c0] sm:$0xff]  ;;  %v11622_v8 = vcombine.high %v481_v2, %v485_v3  ;;  %7821 = vmatprep.subr.bf16.mxu1 %v11630_v1  ;;  %v11621_v14 = vcombine.low %v481_v2, %v485_v3 }
  0x7d   : > { %v613_v5 = vld [vmem:[#allocation2 + $0x7e0] sm:$0xff]  ;;  %7822 = vmatpush1.bf16.msra.mxu1 %v11629_v7 }
  0x7e   : > { %v11750_v9 = vcombine.high %v609_v4, %v613_v5  ;;  %v473_v10 = vld [vmem:[#allocation2 + $0x380] sm:$0xff]  ;;  %7782 = vmatprep.subr.bf16.mxu0 %v11622_v8  ;;  %v11749_v15 = vcombine.low %v609_v4, %v613_v5 }
  0x7f   : > { %v477_v11 = vld [vmem:[#allocation2 + $0x3a0] sm:$0xff]  ;;  %7783 = vmatpush2.bf16.msra.mxu0 %v11621_v14 }
  0x80   : > { %v601_v12 = vld [vmem:[#allocation2 + $0x780] sm:$0xff]  ;;  %v11614_v16 = vcombine.high %v473_v10, %v477_v11  ;;  %7823 = vmatprep.subr.bf16.mxu1 %v11750_v9  ;;  %v11613_v22 = vcombine.low %v473_v10, %v477_v11 }
  0x81   : > { %v605_v13 = vld [vmem:[#allocation2 + $0x7a0] sm:$0xff]  ;;  %7824 = vmatpush2.bf16.msra.mxu1 %v11749_v15 }
  0x82   : > { %v11742_v17 = vcombine.high %v601_v12, %v605_v13  ;;  %v465_v18 = vld [vmem:[#allocation2 + $0x340] sm:$0xff]  ;;  %7784 = vmatprep.subr.bf16.mxu0 %v11614_v16  ;;  %v11741_v23 = vcombine.low %v601_v12, %v605_v13  ;;  %v13848_v16 = vcombine.low %v13829_v53, %v13829_v53 }
  0x83   : > { %v469_v19 = vld [vmem:[#allocation2 + $0x360] sm:$0xff]  ;;  %7785 = vmatpush2.bf16.msra.mxu0 %v11613_v22  ;;  %v13862_v22 = vld [vmem:[%s14555_s0 + $0x18] sm:$0xff] }
  0x84   : > { %v593_v20 = vld [vmem:[#allocation2 + $0x740] sm:$0xff]  ;;  %v11606_v24 = vcombine.high %v465_v18, %v469_v19  ;;  %7825 = vmatprep.subr.bf16.mxu1 %v11742_v17  ;;  %v11605_v30 = vcombine.low %v465_v18, %v469_v19  ;;  %v13853_v19 = vld [vmem:[%s14555_s0 + $0x10] sm:$0xff] }
  0x85   : > { %v597_v21 = vld [vmem:[#allocation2 + $0x760] sm:$0xff]  ;;  %7826 = vmatpush2.bf16.msra.mxu1 %v11741_v23 }
  0x86   : > { %v11734_v25 = vcombine.high %v593_v20, %v597_v21  ;;  %v457_v26 = vld [vmem:[#allocation2 + $0x300] sm:$0xff]  ;;  %7786 = vmatprep.subr.bf16.mxu0 %v11606_v24  ;;  %v11733_v31 = vcombine.low %v593_v20, %v597_v21  ;;  %v13857_v20 = vcombine.low %v13834_v54, %v13834_v54 }
  0x87   : > { %v461_v27 = vld [vmem:[#allocation2 + $0x320] sm:$0xff]  ;;  %7787 = vmatpush2.bf16.msra.mxu0 %v11605_v30 }
  0x88   : > { %v585_v28 = vld [vmem:[#allocation2 + $0x700] sm:$0xff]  ;;  %v11598_v32 = vcombine.high %v457_v26, %v461_v27  ;;  %7827 = vmatprep.subr.bf16.mxu1 %v11734_v25  ;;  %v11597_v38 = vcombine.low %v457_v26, %v461_v27 }
  0x89   : > { %v589_v29 = vld [vmem:[#allocation2 + $0x720] sm:$0xff]  ;;  %7828 = vmatpush2.bf16.msra.mxu1 %v11733_v31 }
  0x8a   : > { %v11726_v33 = vcombine.high %v585_v28, %v589_v29  ;;  %v449_v34 = vld [vmem:[#allocation2 + $0x2c0] sm:$0xff]  ;;  %7788 = vmatprep.subr.bf16.mxu0 %v11598_v32  ;;  %v11725_v39 = vcombine.low %v585_v28, %v589_v29  ;;  %v13866_v28 = vcombine.high %v13853_v19, %v13853_v19  ;;  %v13871_v29 = vcombine.high %v13862_v22, %v13862_v22 }
  0x8b   : > { %v453_v35 = vld [vmem:[#allocation2 + $0x2e0] sm:$0xff]  ;;  %7789 = vmatpush2.bf16.msra.mxu0 %v11597_v38 }
  0x8c   : > { %v577_v36 = vld [vmem:[#allocation2 + $0x6c0] sm:$0xff]  ;;  %v11590_v40 = vcombine.high %v449_v34, %v453_v35  ;;  %7829 = vmatprep.subr.bf16.mxu1 %v11726_v33  ;;  %v11589_v46 = vcombine.low %v449_v34, %v453_v35 }
  0x8d   : > { %v581_v37 = vld [vmem:[#allocation2 + $0x6e0] sm:$0xff]  ;;  %7830 = vmatpush2.bf16.msra.mxu1 %v11725_v39 }
  0x8e   : > { %v11718_v41 = vcombine.high %v577_v36, %v581_v37  ;;  %v441_v42 = vld [vmem:[#allocation2 + $0x280] sm:$0xff]  ;;  %7790 = vmatprep.subr.bf16.mxu0 %v11590_v40  ;;  %v11717_v47 = vcombine.low %v577_v36, %v581_v37 }
  0x8f   : > { %v445_v43 = vld [vmem:[#allocation2 + $0x2a0] sm:$0xff]  ;;  %7791 = vmatpush2.bf16.msra.mxu0 %v11589_v46 }
  0x90   : > { %v569_v44 = vld [vmem:[#allocation2 + $0x680] sm:$0xff]  ;;  %v11582_v48 = vcombine.high %v441_v42, %v445_v43  ;;  %7831 = vmatprep.subr.bf16.mxu1 %v11718_v41  ;;  %v11581_v56 = vcombine.low %v441_v42, %v445_v43 }
  0x91   : > { %v573_v45 = vld [vmem:[#allocation2 + $0x6a0] sm:$0xff]  ;;  %7832 = vmatpush2.bf16.msra.mxu1 %v11717_v47 }
  0x92   : > { %v11710_v49 = vcombine.high %v569_v44, %v573_v45  ;;  %v433_v50 = vld [vmem:[#allocation2 + $0x240] sm:$0xff]  ;;  %7792 = vmatprep.subr.bf16.mxu0 %v11582_v48  ;;  %v11709_v57 = vcombine.low %v569_v44, %v573_v45 }
  0x93   : > { %v437_v51 = vld [vmem:[#allocation2 + $0x260] sm:$0xff]  ;;  %7793 = vmatpush2.bf16.msra.mxu0 %v11581_v56 }
  0x94   : > { %v561_v52 = vld [vmem:[#allocation2 + $0x640] sm:$0xff]  ;;  %v11574_v60 = vcombine.high %v433_v50, %v437_v51  ;;  %7833 = vmatprep.subr.bf16.mxu1 %v11710_v49  ;;  %v11573_v2 = vcombine.low %v433_v50, %v437_v51 }
  0x95   : > { %v565_v55 = vld [vmem:[#allocation2 + $0x660] sm:$0xff]  ;;  %7834 = vmatpush2.bf16.msra.mxu1 %v11709_v57 }
  0x96   : > { %v11702_v61 = vcombine.high %v561_v52, %v565_v55  ;;  %v425_v62 = vld [vmem:[#allocation2 + $0x200] sm:$0xff]  ;;  %7794 = vmatprep.subr.bf16.mxu0 %v11574_v60  ;;  %v11701_v3 = vcombine.low %v561_v52, %v565_v55 }
  0x97   : > { %v429_v63 = vld [vmem:[#allocation2 + $0x220] sm:$0xff]  ;;  %7795 = vmatpush2.bf16.msra.mxu0 %v11573_v2 }
  0x98   : > { %v553_v0 = vld [vmem:[#allocation2 + $0x600] sm:$0xff]  ;;  %v11566_v4 = vcombine.high %v425_v62, %v429_v63  ;;  %7835 = vmatprep.subr.bf16.mxu1 %v11702_v61  ;;  %v11565_v10 = vcombine.low %v425_v62, %v429_v63 }
  0x99   : > { %v557_v1 = vld [vmem:[#allocation2 + $0x620] sm:$0xff]  ;;  %7836 = vmatpush2.bf16.msra.mxu1 %v11701_v3 }
  0x9a   : > { %v11694_v5 = vcombine.high %v553_v0, %v557_v1  ;;  %v673_v6 = vld [vmem:[#allocation2 + $0x9c0] sm:$0xff]  ;;  %7796 = vmatprep.subr.bf16.mxu0 %v11566_v4  ;;  %v11693_v11 = vcombine.low %v553_v0, %v557_v1 }
  0x9b   : > { %v677_v7 = vld [vmem:[#allocation2 + $0x9e0] sm:$0xff]  ;;  %7797 = vmatpush2.bf16.msra.mxu0 %v11565_v10 }
  0x9c   : > { %v801_v8 = vld [vmem:[#allocation2 + $0xdc0] sm:$0xff]  ;;  %v11814_v12 = vcombine.high %v673_v6, %v677_v7  ;;  %7837 = vmatprep.subr.bf16.mxu1 %v11694_v5  ;;  %v11813_v21 = vcombine.low %v673_v6, %v677_v7 }
  0x9d   : > { %v805_v9 = vld [vmem:[#allocation2 + $0xde0] sm:$0xff]  ;;  %7838 = vmatpush2.bf16.msra.mxu1 %v11693_v11 }
  0x9e   : > { %v11942_v13 = vcombine.high %v801_v8, %v805_v9  ;;  %v665_v14 = vld [vmem:[#allocation2 + $0x980] sm:$0xff]  ;;  %7848 = vmatprep.subr.bf16.mxu0 %v11814_v12  ;;  %v11941_v53 = vcombine.low %v801_v8, %v805_v9  ;;  %7799 = vmatmul.mubr.bf16.vlgmr.msra.gmra.mxu0 %v13848_v16 }
  0x9f   : > { %v669_v15 = vld [vmem:[#allocation2 + $0x9a0] sm:$0xff]  ;;  %7849 = vmatpush1.bf16.msra.mxu0 %v11813_v21  ;;  %7880 = vmatprep.mubr.bf16.mxu0 %v13866_v28 }
  0xa0   : > { %v793_v17 = vld [vmem:[#allocation2 + $0xd80] sm:$0xff]  ;;  %v11806_v23 = vcombine.high %v665_v14, %v669_v15  ;;  %7889 = vmatprep.subr.bf16.mxu1 %v11942_v13  ;;  %7840 = vmatmul.mubr.bf16.vlgmr.msra.gmra.mxu1 %v13857_v20  ;;  %v11805_v30 = vcombine.low %v665_v14, %v669_v15 }
  0xa1   : > { %v797_v18 = vld [vmem:[#allocation2 + $0xda0] sm:$0xff]  ;;  %7890 = vmatpush1.bf16.msra.mxu1 %v11941_v53  ;;  %7921 = vmatprep.mubr.bf16.mxu1 %v13871_v29 }
  0xa2   : > { %v11934_v24 = vcombine.high %v793_v17, %v797_v18  ;;  %v657_v25 = vld [vmem:[#allocation2 + $0x940] sm:$0xff]  ;;  %7850 = vmatprep.subr.bf16.mxu0 %v11806_v23  ;;  %v11933_v31 = vcombine.low %v793_v17, %v797_v18 }
  0xa3   : > { %v661_v26 = vld [vmem:[#allocation2 + $0x960] sm:$0xff]  ;;  %7851 = vmatpush1.bf16.msra.mxu0 %v11805_v30 }
  0xa4   : > { %v785_v27 = vld [vmem:[#allocation2 + $0xd40] sm:$0xff]  ;;  %v11798_v32 = vcombine.high %v657_v25, %v661_v26  ;;  %7891 = vmatprep.subr.bf16.mxu1 %v11934_v24  ;;  %v11797_v38 = vcombine.low %v657_v25, %v661_v26 }
  0xa5   : > { %v789_v54 = vld [vmem:[#allocation2 + $0xd60] sm:$0xff]  ;;  %7892 = vmatpush1.bf16.msra.mxu1 %v11933_v31 }
  0xa6   : > { %v649_v33 = vld [vmem:[#allocation2 + $0x900] sm:$0xff]  ;;  %v11926_v36 = vcombine.high %v785_v27, %v789_v54  ;;  %7852 = vmatprep.subr.bf16.mxu0 %v11798_v32  ;;  %v11925_v39 = vcombine.low %v785_v27, %v789_v54 }
  0xa7   : > { %v653_v34 = vld [vmem:[#allocation2 + $0x920] sm:$0xff]  ;;  %7853 = vmatpush1.bf16.msra.mxu0 %v11797_v38 }
  0xa8   : > { %v777_v35 = vld [vmem:[#allocation2 + $0xd00] sm:$0xff]  ;;  %v11790_v40 = vcombine.high %v649_v33, %v653_v34  ;;  %7893 = vmatprep.subr.bf16.mxu1 %v11926_v36  ;;  %v11789_v46 = vcombine.low %v649_v33, %v653_v34 }
  0xa9   : > { %v781_v37 = vld [vmem:[#allocation2 + $0xd20] sm:$0xff]  ;;  %7894 = vmatpush1.bf16.msra.mxu1 %v11925_v39 }
  0xaa   : > { %v641_v41 = vld [vmem:[#allocation2 + $0x8c0] sm:$0xff]  ;;  %v11918_v44 = vcombine.high %v777_v35, %v781_v37  ;;  %7854 = vmatprep.subr.bf16.mxu0 %v11790_v40  ;;  %v11917_v47 = vcombine.low %v777_v35, %v781_v37 }
  0xab   : > { %v645_v42 = vld [vmem:[#allocation2 + $0x8e0] sm:$0xff]  ;;  %7855 = vmatpush1.bf16.msra.mxu0 %v11789_v46 }
  0xac   : > { %v769_v43 = vld [vmem:[#allocation2 + $0xcc0] sm:$0xff]  ;;  %v11782_v48 = vcombine.high %v641_v41, %v645_v42  ;;  %7895 = vmatprep.subr.bf16.mxu1 %v11918_v44  ;;  %v11781_v56 = vcombine.low %v641_v41, %v645_v42 }
  0xad   : > { %v773_v45 = vld [vmem:[#allocation2 + $0xce0] sm:$0xff]  ;;  %7896 = vmatpush1.bf16.msra.mxu1 %v11917_v47 }
  0xae   : > { %v633_v49 = vld [vmem:[#allocation2 + $0x880] sm:$0xff]  ;;  %v11910_v52 = vcombine.high %v769_v43, %v773_v45  ;;  %7856 = vmatprep.subr.bf16.mxu0 %v11782_v48  ;;  %v11909_v57 = vcombine.low %v769_v43, %v773_v45 }
  0xaf   : > { %v637_v50 = vld [vmem:[#allocation2 + $0x8a0] sm:$0xff]  ;;  %7857 = vmatpush1.bf16.msra.mxu0 %v11781_v56 }
  0xb0   : > { %v761_v51 = vld [vmem:[#allocation2 + $0xc80] sm:$0xff]  ;;  %v11774_v60 = vcombine.high %v633_v49, %v637_v50  ;;  %7897 = vmatprep.subr.bf16.mxu1 %v11910_v52  ;;  %v11773_v2 = vcombine.low %v633_v49, %v637_v50 }
  0xb1   : > { %v765_v55 = vld [vmem:[#allocation2 + $0xca0] sm:$0xff]  ;;  %7898 = vmatpush1.bf16.msra.mxu1 %v11909_v57 }
  0xb2   : > { %v625_v61 = vld [vmem:[#allocation2 + $0x840] sm:$0xff]  ;;  %v11902_v0 = vcombine.high %v761_v51, %v765_v55  ;;  %7858 = vmatprep.subr.bf16.mxu0 %v11774_v60  ;;  %v11901_v3 = vcombine.low %v761_v51, %v765_v55 }
  0xb3   : > { %v629_v62 = vld [vmem:[#allocation2 + $0x860] sm:$0xff]  ;;  %7859 = vmatpush1.bf16.msra.mxu0 %v11773_v2 }
  0xb4   : > { %v753_v63 = vld [vmem:[#allocation2 + $0xc40] sm:$0xff]  ;;  %v11766_v4 = vcombine.high %v625_v61, %v629_v62  ;;  %7899 = vmatprep.subr.bf16.mxu1 %v11902_v0  ;;  %v11765_v10 = vcombine.low %v625_v61, %v629_v62 }
  0xb5   : > { %v757_v1 = vld [vmem:[#allocation2 + $0xc60] sm:$0xff]  ;;  %7900 = vmatpush1.bf16.msra.mxu1 %v11901_v3 }
  0xb6   : > { %v617_v5 = vld [vmem:[#allocation2 + $0x800] sm:$0xff]  ;;  %v11894_v8 = vcombine.high %v753_v63, %v757_v1  ;;  %7860 = vmatprep.subr.bf16.mxu0 %v11766_v4  ;;  %v11893_v11 = vcombine.low %v753_v63, %v757_v1 }
  0xb7   : > { %v621_v6 = vld [vmem:[#allocation2 + $0x820] sm:$0xff]  ;;  %7861 = vmatpush1.bf16.msra.mxu0 %v11765_v10 }
  0xb8   : > { %v745_v7 = vld [vmem:[#allocation2 + $0xc00] sm:$0xff]  ;;  %v11758_v12 = vcombine.high %v617_v5, %v621_v6  ;;  %7901 = vmatprep.subr.bf16.mxu1 %v11894_v8  ;;  %v11757_v21 = vcombine.low %v617_v5, %v621_v6 }
  0xb9   : > { %v749_v9 = vld [vmem:[#allocation2 + $0xc20] sm:$0xff]  ;;  %7902 = vmatpush1.bf16.msra.mxu1 %v11893_v11 }
  0xba   : > { %v737_v13 = vld [vmem:[#allocation2 + $0xbc0] sm:$0xff]  ;;  %v11886_v17 = vcombine.high %v745_v7, %v749_v9  ;;  %7862 = vmatprep.subr.bf16.mxu0 %v11758_v12  ;;  %v11885_v53 = vcombine.low %v745_v7, %v749_v9 }
  0xbb   : > { %v741_v14 = vld [vmem:[#allocation2 + $0xbe0] sm:$0xff]  ;;  %7863 = vmatpush1.bf16.msra.mxu0 %v11757_v21 }
  0xbc   : > { %v865_v15 = vld [vmem:[#allocation2 + $0xfc0] sm:$0xff]  ;;  %v11878_v23 = vcombine.high %v737_v13, %v741_v14  ;;  %7903 = vmatprep.subr.bf16.mxu1 %v11886_v17  ;;  %v11877_v30 = vcombine.low %v737_v13, %v741_v14 }
  0xbd   : > { %v869_v18 = vld [vmem:[#allocation2 + $0xfe0] sm:$0xff]  ;;  %7904 = vmatpush1.bf16.msra.mxu1 %v11885_v53 }
  0xbe   : > { %v729_v24 = vld [vmem:[#allocation2 + $0xb80] sm:$0xff]  ;;  %v12006_v27 = vcombine.high %v865_v15, %v869_v18  ;;  %7864 = vmatprep.subr.bf16.mxu0 %v11878_v23  ;;  %v12005_v31 = vcombine.low %v865_v15, %v869_v18 }
  0xbf   : > { %v733_v25 = vld [vmem:[#allocation2 + $0xba0] sm:$0xff]  ;;  %7865 = vmatpush2.bf16.msra.mxu0 %v11877_v30 }
  0xc0   : > { %v857_v26 = vld [vmem:[#allocation2 + $0xf80] sm:$0xff]  ;;  %v11870_v32 = vcombine.high %v729_v24, %v733_v25  ;;  %7905 = vmatprep.subr.bf16.mxu1 %v12006_v27  ;;  %v11869_v38 = vcombine.low %v729_v24, %v733_v25 }
  0xc1   : > { %v861_v54 = vld [vmem:[#allocation2 + $0xfa0] sm:$0xff]  ;;  %7906 = vmatpush2.bf16.msra.mxu1 %v12005_v31 }
  0xc2   : > { %v721_v33 = vld [vmem:[#allocation2 + $0xb40] sm:$0xff]  ;;  %v11998_v36 = vcombine.high %v857_v26, %v861_v54  ;;  %7866 = vmatprep.subr.bf16.mxu0 %v11870_v32  ;;  %v11997_v39 = vcombine.low %v857_v26, %v861_v54 }
  0xc3   : > { %v725_v34 = vld [vmem:[#allocation2 + $0xb60] sm:$0xff]  ;;  %7867 = vmatpush2.bf16.msra.mxu0 %v11869_v38 }
  0xc4   : > { %v849_v35 = vld [vmem:[#allocation2 + $0xf40] sm:$0xff]  ;;  %v11862_v40 = vcombine.high %v721_v33, %v725_v34  ;;  %7907 = vmatprep.subr.bf16.mxu1 %v11998_v36  ;;  %v11861_v46 = vcombine.low %v721_v33, %v725_v34 }
  0xc5   : > { %v853_v37 = vld [vmem:[#allocation2 + $0xf60] sm:$0xff]  ;;  %7908 = vmatpush2.bf16.msra.mxu1 %v11997_v39  ;;  %v13883_v39 = vcombine.low %v13853_v19, %v13853_v19 }
  0xc6   : > { %v713_v41 = vld [vmem:[#allocation2 + $0xb00] sm:$0xff]  ;;  %v11990_v44 = vcombine.high %v849_v35, %v853_v37  ;;  %7868 = vmatprep.subr.bf16.mxu0 %v11862_v40  ;;  %v11989_v47 = vcombine.low %v849_v35, %v853_v37  ;;  %v13887_v40 = vcombine.low %v13862_v22, %v13862_v22 }
  0xc7   : > { %v717_v42 = vld [vmem:[#allocation2 + $0xb20] sm:$0xff]  ;;  %7869 = vmatpush2.bf16.msra.mxu0 %v11861_v46 }
  0xc8   : > { %v841_v43 = vld [vmem:[#allocation2 + $0xf00] sm:$0xff]  ;;  %v11854_v48 = vcombine.high %v713_v41, %v717_v42  ;;  %7909 = vmatprep.subr.bf16.mxu1 %v11990_v44  ;;  %v11853_v56 = vcombine.low %v713_v41, %v717_v42  ;;  %v13892_v42 = vld [vmem:[%s14555_s0 + $0x28] sm:$0xff] }
  0xc9   : > { %v845_v45 = vld [vmem:[#allocation2 + $0xf20] sm:$0xff]  ;;  %7910 = vmatpush2.bf16.msra.mxu1 %v11989_v47 }
  0xca   : > { %v705_v49 = vld [vmem:[#allocation2 + $0xac0] sm:$0xff]  ;;  %v11982_v52 = vcombine.high %v841_v43, %v845_v45  ;;  %7870 = vmatprep.subr.bf16.mxu0 %v11854_v48  ;;  %v11981_v57 = vcombine.low %v841_v43, %v845_v45 }
  0xcb   : > { %v709_v50 = vld [vmem:[#allocation2 + $0xae0] sm:$0xff]  ;;  %7871 = vmatpush2.bf16.msra.mxu0 %v11853_v56 }
  0xcc   : > { %v833_v51 = vld [vmem:[#allocation2 + $0xec0] sm:$0xff]  ;;  %v11846_v60 = vcombine.high %v705_v49, %v709_v50  ;;  %7911 = vmatprep.subr.bf16.mxu1 %v11982_v52  ;;  %v11845_v2 = vcombine.low %v705_v49, %v709_v50  ;;  %v13901_v49 = vcombine.high %v13892_v42, %v13892_v42 }
  0xcd   : > { %v837_v55 = vld [vmem:[#allocation2 + $0xee0] sm:$0xff]  ;;  %7912 = vmatpush2.bf16.msra.mxu1 %v11981_v57 }
  0xce   : > { %v697_v61 = vld [vmem:[#allocation2 + $0xa80] sm:$0xff]  ;;  %v11974_v0 = vcombine.high %v833_v51, %v837_v55  ;;  %7872 = vmatprep.subr.bf16.mxu0 %v11846_v60  ;;  %v11973_v3 = vcombine.low %v833_v51, %v837_v55 }
  0xcf   : > { %v701_v62 = vld [vmem:[#allocation2 + $0xaa0] sm:$0xff]  ;;  %7873 = vmatpush2.bf16.msra.mxu0 %v11845_v2 }
  0xd0   : > { %v825_v63 = vld [vmem:[#allocation2 + $0xe80] sm:$0xff]  ;;  %v11838_v4 = vcombine.high %v697_v61, %v701_v62  ;;  %7913 = vmatprep.subr.bf16.mxu1 %v11974_v0  ;;  %v11837_v10 = vcombine.low %v697_v61, %v701_v62 }
  0xd1   : > { %v829_v1 = vld [vmem:[#allocation2 + $0xea0] sm:$0xff]  ;;  %7914 = vmatpush2.bf16.msra.mxu1 %v11973_v3 }
  0xd2   : > { %v689_v5 = vld [vmem:[#allocation2 + $0xa40] sm:$0xff]  ;;  %v11966_v8 = vcombine.high %v825_v63, %v829_v1  ;;  %7874 = vmatprep.subr.bf16.mxu0 %v11838_v4  ;;  %v11965_v11 = vcombine.low %v825_v63, %v829_v1 }
  0xd3   : > { %v693_v6 = vld [vmem:[#allocation2 + $0xa60] sm:$0xff]  ;;  %7875 = vmatpush2.bf16.msra.mxu0 %v11837_v10 }
  0xd4   : > { %v817_v7 = vld [vmem:[#allocation2 + $0xe40] sm:$0xff]  ;;  %v11830_v12 = vcombine.high %v689_v5, %v693_v6  ;;  %7915 = vmatprep.subr.bf16.mxu1 %v11966_v8  ;;  %v11829_v21 = vcombine.low %v689_v5, %v693_v6 }
  0xd5   : > { %v821_v9 = vld [vmem:[#allocation2 + $0xe60] sm:$0xff]  ;;  %7916 = vmatpush2.bf16.msra.mxu1 %v11965_v11 }
  0xd6   : > { %v681_v13 = vld [vmem:[#allocation2 + $0xa00] sm:$0xff]  ;;  %v11958_v17 = vcombine.high %v817_v7, %v821_v9  ;;  %7876 = vmatprep.subr.bf16.mxu0 %v11830_v12  ;;  %v11957_v53 = vcombine.low %v817_v7, %v821_v9 }
  0xd7   : > { %v685_v14 = vld [vmem:[#allocation2 + $0xa20] sm:$0xff]  ;;  %7877 = vmatpush2.bf16.msra.mxu0 %v11829_v21 }
  0xd8   : > { %v809_v15 = vld [vmem:[#allocation2 + $0xe00] sm:$0xff]  ;;  %v11822_v23 = vcombine.high %v681_v13, %v685_v14  ;;  %7917 = vmatprep.subr.bf16.mxu1 %v11958_v17  ;;  %v11821_v30 = vcombine.low %v681_v13, %v685_v14 }
  0xd9   : > { %v813_v18 = vld [vmem:[#allocation2 + $0xe20] sm:$0xff]  ;;  %7918 = vmatpush2.bf16.msra.mxu1 %v11957_v53 }
  0xda   : > { %v929_v24 = vld [vmem:[#allocation2 + $0x11c0] sm:$0xff]  ;;  %v11950_v27 = vcombine.high %v809_v15, %v813_v18  ;;  %7878 = vmatprep.subr.bf16.mxu0 %v11822_v23  ;;  %v11949_v32 = vcombine.low %v809_v15, %v813_v18 }
  0xdb   : > { %v933_v25 = vld [vmem:[#allocation2 + $0x11e0] sm:$0xff]  ;;  %7879 = vmatpush2.bf16.msra.mxu0 %v11821_v30 }
  0xdc   : > { %v1057_v26 = vld [vmem:[#allocation2 + $0x15c0] sm:$0xff]  ;;  %v12070_v33 = vcombine.high %v929_v24, %v933_v25  ;;  %7919 = vmatprep.subr.bf16.mxu1 %v11950_v27  ;;  %v12069_v41 = vcombine.low %v929_v24, %v933_v25 }
  0xdd   : > { %v1061_v54 = vld [vmem:[#allocation2 + $0x15e0] sm:$0xff]  ;;  %7920 = vmatpush2.bf16.msra.mxu1 %v11949_v32 }
  0xde   : > { %v921_v31 = vld [vmem:[#allocation2 + $0x1180] sm:$0xff]  ;;  %v12198_v37 = vcombine.high %v1057_v26, %v1061_v54  ;;  %7930 = vmatprep.subr.bf16.mxu0 %v12070_v33  ;;  %v12197_v43 = vcombine.low %v1057_v26, %v1061_v54  ;;  %7881 = vmatmul.mubr.bf16.vlgmr.msra.gmra.mxu0 %v13883_v39 }
  0xdf   : > { %v925_v34 = vld [vmem:[#allocation2 + $0x11a0] sm:$0xff]  ;;  %7931 = vmatpush1.bf16.msra.mxu0 %v12069_v41 }
  0xe0   : > { %v1049_v35 = vld [vmem:[#allocation2 + $0x1580] sm:$0xff]  ;;  %v12062_v44 = vcombine.high %v921_v31, %v925_v34  ;;  %7971 = vmatprep.subr.bf16.mxu1 %v12198_v37  ;;  %7922 = vmatmul.mubr.bf16.vlgmr.msra.gmra.mxu1 %v13887_v40  ;;  %v12061_v50 = vcombine.low %v921_v31, %v925_v34 }
  0xe1   : > { %v1053_v36 = vld [vmem:[#allocation2 + $0x15a0] sm:$0xff]  ;;  %7972 = vmatpush1.bf16.msra.mxu1 %v12197_v43  ;;  %8003 = vmatprep.mubr.bf16.mxu1 %v13901_v49 }
  0xe2   : > { %v13879_v38 = vld [vmem:[%s14555_s0 + $0x20] sm:$0xff]  ;;  %v12190_v19 = vcombine.high %v1049_v35, %v1053_v36  ;;  %7932 = vmatprep.subr.bf16.mxu0 %v12062_v44  ;;  %v12189_v51 = vcombine.low %v1049_v35, %v1053_v36 }
  0xe3   : > { %v913_v45 = vld [vmem:[#allocation2 + $0x1140] sm:$0xff]  ;;  %v13896_v22 = vcombine.high %v13879_v38, %v13879_v38  ;;  %7933 = vmatpush1.bf16.msra.mxu0 %v12061_v50 }
  0xe4   : > { %v917_v46 = vld [vmem:[#allocation2 + $0x1160] sm:$0xff]  ;;  %7973 = vmatprep.subr.bf16.mxu1 %v12190_v19 }
  0xe5   : > { %v1041_v47 = vld [vmem:[#allocation2 + $0x1540] sm:$0xff]  ;;  %v12054_v52 = vcombine.high %v913_v45, %v917_v46  ;;  %7962 = vmatprep.mubr.bf16.mxu0 %v13896_v22  ;;  %v12053_v62 = vcombine.low %v913_v45, %v917_v46  ;;  %7974 = vmatpush1.bf16.msra.mxu1 %v12189_v51 }
  0xe6   : > { %v1045_v48 = vld [vmem:[#allocation2 + $0x1560] sm:$0xff] }
  0xe7   : > { %v905_v55 = vld [vmem:[#allocation2 + $0x1100] sm:$0xff]  ;;  %v12182_v60 = vcombine.high %v1041_v47, %v1045_v48  ;;  %7934 = vmatprep.subr.bf16.mxu0 %v12054_v52  ;;  %v12181_v63 = vcombine.low %v1041_v47, %v1045_v48 }
  0xe8   : > { %v909_v56 = vld [vmem:[#allocation2 + $0x1120] sm:$0xff]  ;;  %7935 = vmatpush1.bf16.msra.mxu0 %v12053_v62 }
  0xe9   : > { %v1033_v57 = vld [vmem:[#allocation2 + $0x1500] sm:$0xff]  ;;  %v12046_v0 = vcombine.high %v905_v55, %v909_v56  ;;  %7975 = vmatprep.subr.bf16.mxu1 %v12182_v60  ;;  %v12045_v6 = vcombine.low %v905_v55, %v909_v56 }
  0xea   : > { %v1037_v61 = vld [vmem:[#allocation2 + $0x1520] sm:$0xff]  ;;  %7976 = vmatpush1.bf16.msra.mxu1 %v12181_v63 }
  0xeb   : > { %v897_v1 = vld [vmem:[#allocation2 + $0x10c0] sm:$0xff]  ;;  %v12174_v4 = vcombine.high %v1033_v57, %v1037_v61  ;;  %7936 = vmatprep.subr.bf16.mxu0 %v12046_v0  ;;  %v12173_v7 = vcombine.low %v1033_v57, %v1037_v61 }
  0xec   : > { %v901_v2 = vld [vmem:[#allocation2 + $0x10e0] sm:$0xff]  ;;  %7937 = vmatpush1.bf16.msra.mxu0 %v12045_v6 }
  0xed   : > { %v1025_v3 = vld [vmem:[#allocation2 + $0x14c0] sm:$0xff]  ;;  %v12038_v8 = vcombine.high %v897_v1, %v901_v2  ;;  %7977 = vmatprep.subr.bf16.mxu1 %v12174_v4  ;;  %v12037_v14 = vcombine.low %v897_v1, %v901_v2 }
  0xee   : > { %v1029_v5 = vld [vmem:[#allocation2 + $0x14e0] sm:$0xff]  ;;  %7978 = vmatpush1.bf16.msra.mxu1 %v12173_v7 }
  0xef   : > { %v889_v9 = vld [vmem:[#allocation2 + $0x1080] sm:$0xff]  ;;  %v12166_v12 = vcombine.high %v1025_v3, %v1029_v5  ;;  %7938 = vmatprep.subr.bf16.mxu0 %v12038_v8  ;;  %v12165_v15 = vcombine.low %v1025_v3, %v1029_v5 }
  0xf0   : > { %v893_v10 = vld [vmem:[#allocation2 + $0x10a0] sm:$0xff]  ;;  %7939 = vmatpush1.bf16.msra.mxu0 %v12037_v14 }
  0xf1   : > { %v1017_v11 = vld [vmem:[#allocation2 + $0x1480] sm:$0xff]  ;;  %v12030_v17 = vcombine.high %v889_v9, %v893_v10  ;;  %7979 = vmatprep.subr.bf16.mxu1 %v12166_v12  ;;  %v12029_v25 = vcombine.low %v889_v9, %v893_v10 }
  0xf2   : > { %v1021_v13 = vld [vmem:[#allocation2 + $0x14a0] sm:$0xff]  ;;  %7980 = vmatpush1.bf16.msra.mxu1 %v12165_v15 }
  0xf3   : > { %v881_v18 = vld [vmem:[#allocation2 + $0x1040] sm:$0xff]  ;;  %v12158_v23 = vcombine.high %v1017_v11, %v1021_v13  ;;  %7940 = vmatprep.subr.bf16.mxu0 %v12030_v17  ;;  %v12157_v26 = vcombine.low %v1017_v11, %v1021_v13 }
  0xf4   : > { %v885_v21 = vld [vmem:[#allocation2 + $0x1060] sm:$0xff]  ;;  %7941 = vmatpush1.bf16.msra.mxu0 %v12029_v25 }
  0xf5   : > { %v1009_v53 = vld [vmem:[#allocation2 + $0x1440] sm:$0xff]  ;;  %v12022_v27 = vcombine.high %v881_v18, %v885_v21  ;;  %7981 = vmatprep.subr.bf16.mxu1 %v12158_v23  ;;  %v12021_v34 = vcombine.low %v881_v18, %v885_v21 }
  0xf6   : > { %v1013_v24 = vld [vmem:[#allocation2 + $0x1460] sm:$0xff]  ;;  %7982 = vmatpush1.bf16.msra.mxu1 %v12157_v26 }
  0xf7   : > { %v873_v54 = vld [vmem:[#allocation2 + $0x1000] sm:$0xff]  ;;  %v12150_v32 = vcombine.high %v1009_v53, %v1013_v24  ;;  %7942 = vmatprep.subr.bf16.mxu0 %v12022_v27  ;;  %v12149_v35 = vcombine.low %v1009_v53, %v1013_v24 }
  0xf8   : > { %v877_v30 = vld [vmem:[#allocation2 + $0x1020] sm:$0xff]  ;;  %7943 = vmatpush1.bf16.msra.mxu0 %v12021_v34 }
  0xf9   : > { %v1001_v31 = vld [vmem:[#allocation2 + $0x1400] sm:$0xff]  ;;  %v12014_v36 = vcombine.high %v873_v54, %v877_v30  ;;  %7983 = vmatprep.subr.bf16.mxu1 %v12150_v32  ;;  %v12013_v46 = vcombine.low %v873_v54, %v877_v30 }
  0xfa   : > { %v1005_v33 = vld [vmem:[#allocation2 + $0x1420] sm:$0xff]  ;;  %7984 = vmatpush1.bf16.msra.mxu1 %v12149_v35 }
  0xfb   : > { %v993_v37 = vld [vmem:[#allocation2 + $0x13c0] sm:$0xff]  ;;  %v12142_v44 = vcombine.high %v1001_v31, %v1005_v33  ;;  %7944 = vmatprep.subr.bf16.mxu0 %v12014_v36  ;;  %v12141_v19 = vcombine.low %v1001_v31, %v1005_v33 }
  0xfc   : > { %v997_v41 = vld [vmem:[#allocation2 + $0x13e0] sm:$0xff]  ;;  %7945 = vmatpush1.bf16.msra.mxu0 %v12013_v46 }
  0xfd   : > { %v1121_v43 = vld [vmem:[#allocation2 + $0x17c0] sm:$0xff]  ;;  %v12134_v47 = vcombine.high %v993_v37, %v997_v41  ;;  %7985 = vmatprep.subr.bf16.mxu1 %v12142_v44  ;;  %v12133_v56 = vcombine.low %v993_v37, %v997_v41 }
  0xfe   : > { %v1125_v45 = vld [vmem:[#allocation2 + $0x17e0] sm:$0xff]  ;;  %7986 = vmatpush1.bf16.msra.mxu1 %v12141_v19 }
  0xff   : > { %v985_v48 = vld [vmem:[#allocation2 + $0x1380] sm:$0xff]  ;;  %v12262_v52 = vcombine.high %v1121_v43, %v1125_v45  ;;  %7946 = vmatprep.subr.bf16.mxu0 %v12134_v47  ;;  %v12261_v57 = vcombine.low %v1121_v43, %v1125_v45 }
 0x100   : > { %v989_v50 = vld [vmem:[#allocation2 + $0x13a0] sm:$0xff]  ;;  %7947 = vmatpush2.bf16.msra.mxu0 %v12133_v56 }
 0x101   : > { %v1113_v51 = vld [vmem:[#allocation2 + $0x1780] sm:$0xff]  ;;  %v12126_v60 = vcombine.high %v985_v48, %v989_v50  ;;  %7987 = vmatprep.subr.bf16.mxu1 %v12262_v52  ;;  %v12125_v2 = vcombine.low %v985_v48, %v989_v50 }
 0x102   : > { %v1117_v55 = vld [vmem:[#allocation2 + $0x17a0] sm:$0xff]  ;;  %7988 = vmatpush2.bf16.msra.mxu1 %v12261_v57 }
 0x103   : > { %v977_v61 = vld [vmem:[#allocation2 + $0x1340] sm:$0xff]  ;;  %v12254_v63 = vcombine.high %v1113_v51, %v1117_v55  ;;  %7948 = vmatprep.subr.bf16.mxu0 %v12126_v60  ;;  %v12253_v3 = vcombine.low %v1113_v51, %v1117_v55 }
 0x104   : > { %v981_v62 = vld [vmem:[#allocation2 + $0x1360] sm:$0xff]  ;;  %7949 = vmatpush2.bf16.msra.mxu0 %v12125_v2 }
 0x105   : > { %v1105_v0 = vld [vmem:[#allocation2 + $0x1740] sm:$0xff]  ;;  %v12118_v4 = vcombine.high %v977_v61, %v981_v62  ;;  %7989 = vmatprep.subr.bf16.mxu1 %v12254_v63  ;;  %v12117_v10 = vcombine.low %v977_v61, %v981_v62 }
 0x106   : > { %v1109_v1 = vld [vmem:[#allocation2 + $0x1760] sm:$0xff]  ;;  %7990 = vmatpush2.bf16.msra.mxu1 %v12253_v3 }
 0x107   : > { %v969_v5 = vld [vmem:[#allocation2 + $0x1300] sm:$0xff]  ;;  %v12246_v8 = vcombine.high %v1105_v0, %v1109_v1  ;;  %7950 = vmatprep.subr.bf16.mxu0 %v12118_v4  ;;  %v12245_v11 = vcombine.low %v1105_v0, %v1109_v1 }
 0x108   : > { %v973_v6 = vld [vmem:[#allocation2 + $0x1320] sm:$0xff]  ;;  %7951 = vmatpush2.bf16.msra.mxu0 %v12117_v10  ;;  %v13922_v10 = vld [vmem:[%s14555_s0 + $0x38] sm:$0xff] }
 0x109   : > { %v1097_v7 = vld [vmem:[#allocation2 + $0x1700] sm:$0xff]  ;;  %v12110_v12 = vcombine.high %v969_v5, %v973_v6  ;;  %7991 = vmatprep.subr.bf16.mxu1 %v12246_v8  ;;  %v12109_v21 = vcombine.low %v969_v5, %v973_v6  ;;  %v13909_v6 = vld [vmem:[%s14555_s0 + $0x30] sm:$0xff]  ;;  %v13917_v8 = vcombine.low %v13892_v42, %v13892_v42 }
 0x10a   : > { %v1101_v9 = vld [vmem:[#allocation2 + $0x1720] sm:$0xff]  ;;  %7992 = vmatpush2.bf16.msra.mxu1 %v12245_v11  ;;  %v13926_v42 = vcombine.high %v13909_v6, %v13909_v6 }
 0x10b   : > { %v961_v13 = vld [vmem:[#allocation2 + $0x12c0] sm:$0xff]  ;;  %v12238_v17 = vcombine.high %v1097_v7, %v1101_v9  ;;  %7952 = vmatprep.subr.bf16.mxu0 %v12110_v12  ;;  %v12237_v53 = vcombine.low %v1097_v7, %v1101_v9  ;;  %v13913_v7 = vcombine.low %v13879_v38, %v13879_v38 }
 0x10c   : > { %v965_v14 = vld [vmem:[#allocation2 + $0x12e0] sm:$0xff]  ;;  %7953 = vmatpush2.bf16.msra.mxu0 %v12109_v21 }
 0x10d   : > { %v1089_v15 = vld [vmem:[#allocation2 + $0x16c0] sm:$0xff]  ;;  %v12102_v23 = vcombine.high %v961_v13, %v965_v14  ;;  %7993 = vmatprep.subr.bf16.mxu1 %v12238_v17  ;;  %v12101_v30 = vcombine.low %v961_v13, %v965_v14 }
 0x10e   : > { %v1093_v18 = vld [vmem:[#allocation2 + $0x16e0] sm:$0xff]  ;;  %7994 = vmatpush2.bf16.msra.mxu1 %v12237_v53 }
 0x10f   : > { %v953_v24 = vld [vmem:[#allocation2 + $0x1280] sm:$0xff]  ;;  %v12230_v27 = vcombine.high %v1089_v15, %v1093_v18  ;;  %7954 = vmatprep.subr.bf16.mxu0 %v12102_v23  ;;  %v12229_v31 = vcombine.low %v1089_v15, %v1093_v18  ;;  %v13931_v18 = vcombine.high %v13922_v10, %v13922_v10 }
 0x110   : > { %v957_v25 = vld [vmem:[#allocation2 + $0x12a0] sm:$0xff]  ;;  %7955 = vmatpush2.bf16.msra.mxu0 %v12101_v30 }
 0x111   : > { %v1081_v26 = vld [vmem:[#allocation2 + $0x1680] sm:$0xff]  ;;  %v12094_v32 = vcombine.high %v953_v24, %v957_v25  ;;  %7995 = vmatprep.subr.bf16.mxu1 %v12230_v27  ;;  %v12093_v41 = vcombine.low %v953_v24, %v957_v25 }
 0x112   : > { %v1085_v54 = vld [vmem:[#allocation2 + $0x16a0] sm:$0xff]  ;;  %7996 = vmatpush2.bf16.msra.mxu1 %v12229_v31 }
 0x113   : > { %v945_v33 = vld [vmem:[#allocation2 + $0x1240] sm:$0xff]  ;;  %v12222_v36 = vcombine.high %v1081_v26, %v1085_v54  ;;  %7956 = vmatprep.subr.bf16.mxu0 %v12094_v32  ;;  %v12221_v43 = vcombine.low %v1081_v26, %v1085_v54 }
 0x114   : > { %v949_v34 = vld [vmem:[#allocation2 + $0x1260] sm:$0xff]  ;;  %7957 = vmatpush2.bf16.msra.mxu0 %v12093_v41 }
 0x115   : > { %v1073_v35 = vld [vmem:[#allocation2 + $0x1640] sm:$0xff]  ;;  %v12086_v44 = vcombine.high %v945_v33, %v949_v34  ;;  %7997 = vmatprep.subr.bf16.mxu1 %v12222_v36  ;;  %v12085_v50 = vcombine.low %v945_v33, %v949_v34 }
 0x116   : > { %v1077_v37 = vld [vmem:[#allocation2 + $0x1660] sm:$0xff]  ;;  %7998 = vmatpush2.bf16.msra.mxu1 %v12221_v43 }
 0x117   : > { %v937_v45 = vld [vmem:[#allocation2 + $0x1200] sm:$0xff]  ;;  %v12214_v47 = vcombine.high %v1073_v35, %v1077_v37  ;;  %7958 = vmatprep.subr.bf16.mxu0 %v12086_v44  ;;  %v12213_v51 = vcombine.low %v1073_v35, %v1077_v37 }
 0x118   : > { %v941_v46 = vld [vmem:[#allocation2 + $0x1220] sm:$0xff]  ;;  %7959 = vmatpush2.bf16.msra.mxu0 %v12085_v50 }
 0x119   : > { %v1065_v19 = vld [vmem:[#allocation2 + $0x1600] sm:$0xff]  ;;  %v12078_v52 = vcombine.high %v937_v45, %v941_v46  ;;  %7999 = vmatprep.subr.bf16.mxu1 %v12214_v47  ;;  %v12077_v62 = vcombine.low %v937_v45, %v941_v46 }
 0x11a   : > { %v1069_v48 = vld [vmem:[#allocation2 + $0x1620] sm:$0xff]  ;;  %8000 = vmatpush2.bf16.msra.mxu1 %v12213_v51 }
 0x11b   : > { %v1185_v55 = vld [vmem:[#allocation2 + $0x19c0] sm:$0xff]  ;;  %v12206_v60 = vcombine.high %v1065_v19, %v1069_v48  ;;  %7960 = vmatprep.subr.bf16.mxu0 %v12078_v52  ;;  %v12205_v0 = vcombine.low %v1065_v19, %v1069_v48 }
 0x11c   : > { %v1189_v56 = vld [vmem:[#allocation2 + $0x19e0] sm:$0xff]  ;;  %7961 = vmatpush2.bf16.msra.mxu0 %v12077_v62 }
 0x11d   : > { %v1313_v57 = vld [vmem:[#allocation2 + $0x1dc0] sm:$0xff]  ;;  %v12326_v1 = vcombine.high %v1185_v55, %v1189_v56  ;;  %8001 = vmatprep.subr.bf16.mxu1 %v12206_v60  ;;  %v12325_v9 = vcombine.low %v1185_v55, %v1189_v56 }
 0x11e   : > { %v1317_v61 = vld [vmem:[#allocation2 + $0x1de0] sm:$0xff]  ;;  %8002 = vmatpush2.bf16.msra.mxu1 %v12205_v0 }
 0x11f   : > { %v1177_v63 = vld [vmem:[#allocation2 + $0x1980] sm:$0xff]  ;;  %v12454_v5 = vcombine.high %v1313_v57, %v1317_v61  ;;  %8012 = vmatprep.subr.bf16.mxu0 %v12326_v1  ;;  %v12453_v11 = vcombine.low %v1313_v57, %v1317_v61  ;;  %7963 = vmatmul.mubr.bf16.vlgmr.msra.gmra.mxu0 %v13913_v7 }
 0x120   : > { %v1181_v2 = vld [vmem:[#allocation2 + $0x19a0] sm:$0xff]  ;;  %8013 = vmatpush1.bf16.msra.mxu0 %v12325_v9  ;;  %8044 = vmatprep.mubr.bf16.mxu0 %v13926_v42 }
 0x121   : > { %v1305_v3 = vld [vmem:[#allocation2 + $0x1d80] sm:$0xff]  ;;  %v12318_v12 = vcombine.high %v1177_v63, %v1181_v2  ;;  %8053 = vmatprep.subr.bf16.mxu1 %v12454_v5  ;;  %8004 = vmatmul.mubr.bf16.vlgmr.msra.gmra.mxu1 %v13917_v8  ;;  %v12317_v21 = vcombine.low %v1177_v63, %v1181_v2 }
 0x122   : > { %v1309_v4 = vld [vmem:[#allocation2 + $0x1da0] sm:$0xff]  ;;  %8054 = vmatpush1.bf16.msra.mxu1 %v12453_v11  ;;  %8085 = vmatprep.mubr.bf16.mxu1 %v13931_v18 }
 0x123   : > { %v1169_v13 = vld [vmem:[#allocation2 + $0x1940] sm:$0xff]  ;;  %v12446_v38 = vcombine.high %v1305_v3, %v1309_v4  ;;  %8014 = vmatprep.subr.bf16.mxu0 %v12318_v12  ;;  %v12445_v53 = vcombine.low %v1305_v3, %v1309_v4 }
 0x124   : > { %v1173_v14 = vld [vmem:[#allocation2 + $0x1960] sm:$0xff]  ;;  %8015 = vmatpush1.bf16.msra.mxu0 %v12317_v21 }
 0x125   : > { %v1297_v15 = vld [vmem:[#allocation2 + $0x1d40] sm:$0xff]  ;;  %v12310_v23 = vcombine.high %v1169_v13, %v1173_v14  ;;  %8055 = vmatprep.subr.bf16.mxu1 %v12446_v38  ;;  %v12309_v30 = vcombine.low %v1169_v13, %v1173_v14 }
 0x126   : > { %v1301_v17 = vld [vmem:[#allocation2 + $0x1d60] sm:$0xff]  ;;  %8056 = vmatpush1.bf16.msra.mxu1 %v12445_v53 }
 0x127   : > { %v12438_v24 = vcombine.high %v1297_v15, %v1301_v17  ;;  %v1161_v25 = vld [vmem:[#allocation2 + $0x1900] sm:$0xff]  ;;  %8016 = vmatprep.subr.bf16.mxu0 %v12310_v23  ;;  %v12437_v31 = vcombine.low %v1297_v15, %v1301_v17 }
 0x128   : > { %v1165_v26 = vld [vmem:[#allocation2 + $0x1920] sm:$0xff]  ;;  %8017 = vmatpush1.bf16.msra.mxu0 %v12309_v30 }
 0x129   : > { %v1289_v27 = vld [vmem:[#allocation2 + $0x1d00] sm:$0xff]  ;;  %v12302_v32 = vcombine.high %v1161_v25, %v1165_v26  ;;  %8057 = vmatprep.subr.bf16.mxu1 %v12438_v24  ;;  %v12301_v41 = vcombine.low %v1161_v25, %v1165_v26 }
 0x12a   : > { %v1293_v54 = vld [vmem:[#allocation2 + $0x1d20] sm:$0xff]  ;;  %8058 = vmatpush1.bf16.msra.mxu1 %v12437_v31 }
 0x12b   : > { %v12430_v33 = vcombine.high %v1289_v27, %v1293_v54  ;;  %v1153_v34 = vld [vmem:[#allocation2 + $0x18c0] sm:$0xff]  ;;  %8018 = vmatprep.subr.bf16.mxu0 %v12302_v32  ;;  %v12429_v43 = vcombine.low %v1289_v27, %v1293_v54 }
 0x12c   : > { %v1157_v35 = vld [vmem:[#allocation2 + $0x18e0] sm:$0xff]  ;;  %8019 = vmatpush1.bf16.msra.mxu0 %v12301_v41 }
 0x12d   : > { %v1281_v36 = vld [vmem:[#allocation2 + $0x1cc0] sm:$0xff]  ;;  %v12294_v44 = vcombine.high %v1153_v34, %v1157_v35  ;;  %8059 = vmatprep.subr.bf16.mxu1 %v12430_v33  ;;  %v12293_v50 = vcombine.low %v1153_v34, %v1157_v35 }
 0x12e   : > { %v1285_v37 = vld [vmem:[#allocation2 + $0x1ce0] sm:$0xff]  ;;  %8060 = vmatpush1.bf16.msra.mxu1 %v12429_v43 }
 0x12f   : > { %v12422_v45 = vcombine.high %v1281_v36, %v1285_v37  ;;  %v1145_v46 = vld [vmem:[#allocation2 + $0x1880] sm:$0xff]  ;;  %8020 = vmatprep.subr.bf16.mxu0 %v12294_v44  ;;  %v12421_v51 = vcombine.low %v1281_v36, %v1285_v37 }
 0x130   : > { %v1149_v19 = vld [vmem:[#allocation2 + $0x18a0] sm:$0xff]  ;;  %8021 = vmatpush1.bf16.msra.mxu0 %v12293_v50 }
 0x131   : > { %v1273_v47 = vld [vmem:[#allocation2 + $0x1c80] sm:$0xff]  ;;  %v12286_v52 = vcombine.high %v1145_v46, %v1149_v19  ;;  %8061 = vmatprep.subr.bf16.mxu1 %v12422_v45  ;;  %v12285_v62 = vcombine.low %v1145_v46, %v1149_v19 }
 0x132   : > { %v1277_v48 = vld [vmem:[#allocation2 + $0x1ca0] sm:$0xff]  ;;  %8062 = vmatpush1.bf16.msra.mxu1 %v12421_v51 }
 0x133   : > { %v12414_v55 = vcombine.high %v1273_v47, %v1277_v48  ;;  %v1137_v56 = vld [vmem:[#allocation2 + $0x1840] sm:$0xff]  ;;  %8022 = vmatprep.subr.bf16.mxu0 %v12286_v52  ;;  %v12413_v63 = vcombine.low %v1273_v47, %v1277_v48 }
 0x134   : > { %v1141_v57 = vld [vmem:[#allocation2 + $0x1860] sm:$0xff]  ;;  %8023 = vmatpush1.bf16.msra.mxu0 %v12285_v62 }
 0x135   : > { %v1265_v60 = vld [vmem:[#allocation2 + $0x1c40] sm:$0xff]  ;;  %v12278_v0 = vcombine.high %v1137_v56, %v1141_v57  ;;  %8063 = vmatprep.subr.bf16.mxu1 %v12414_v55  ;;  %v12277_v9 = vcombine.low %v1137_v56, %v1141_v57 }
 0x136   : > { %v1269_v61 = vld [vmem:[#allocation2 + $0x1c60] sm:$0xff]  ;;  %8064 = vmatpush1.bf16.msra.mxu1 %v12413_v63 }
 0x137   : > { %v12406_v1 = vcombine.high %v1265_v60, %v1269_v61  ;;  %v1129_v2 = vld [vmem:[#allocation2 + $0x1800] sm:$0xff]  ;;  %8024 = vmatprep.subr.bf16.mxu0 %v12278_v0  ;;  %v12405_v11 = vcombine.low %v1265_v60, %v1269_v61 }
 0x138   : > { %v1133_v3 = vld [vmem:[#allocation2 + $0x1820] sm:$0xff]  ;;  %8025 = vmatpush1.bf16.msra.mxu0 %v12277_v9 }
 0x139   : > { %v1257_v4 = vld [vmem:[#allocation2 + $0x1c00] sm:$0xff]  ;;  %v12270_v12 = vcombine.high %v1129_v2, %v1133_v3  ;;  %8065 = vmatprep.subr.bf16.mxu1 %v12406_v1  ;;  %v12269_v21 = vcombine.low %v1129_v2, %v1133_v3 }
 0x13a   : > { %v1261_v5 = vld [vmem:[#allocation2 + $0x1c20] sm:$0xff]  ;;  %8066 = vmatpush1.bf16.msra.mxu1 %v12405_v11 }
 0x13b   : > { %v12398_v13 = vcombine.high %v1257_v4, %v1261_v5  ;;  %v1249_v14 = vld [vmem:[#allocation2 + $0x1bc0] sm:$0xff]  ;;  %8026 = vmatprep.subr.bf16.mxu0 %v12270_v12  ;;  %v12397_v53 = vcombine.low %v1257_v4, %v1261_v5 }
 0x13c   : > { %v1253_v15 = vld [vmem:[#allocation2 + $0x1be0] sm:$0xff]  ;;  %8027 = vmatpush1.bf16.msra.mxu0 %v12269_v21 }
 0x13d   : > { %v1377_v38 = vld [vmem:[#allocation2 + $0x1fc0] sm:$0xff]  ;;  %v12390_v23 = vcombine.high %v1249_v14, %v1253_v15  ;;  %8067 = vmatprep.subr.bf16.mxu1 %v12398_v13  ;;  %v12389_v30 = vcombine.low %v1249_v14, %v1253_v15 }
 0x13e   : > { %v1381_v17 = vld [vmem:[#allocation2 + $0x1fe0] sm:$0xff]  ;;  %8068 = vmatpush1.bf16.msra.mxu1 %v12397_v53  ;;  %v1579_v53 = vlaneseq }
 0x13f   : > { %v12518_v24 = vcombine.high %v1377_v38, %v1381_v17  ;;  %v1241_v25 = vld [vmem:[#allocation2 + $0x1b80] sm:$0xff]  ;;  %8028 = vmatprep.subr.bf16.mxu0 %v12390_v23  ;;  %v12517_v31 = vcombine.low %v1377_v38, %v1381_v17 }
 0x140   : > { %v1245_v26 = vld [vmem:[#allocation2 + $0x1ba0] sm:$0xff]  ;;  %8029 = vmatpush2.bf16.msra.mxu0 %v12389_v30 }
 0x141   : > { %v1369_v27 = vld [vmem:[#allocation2 + $0x1f80] sm:$0xff]  ;;  %v12382_v32 = vcombine.high %v1241_v25, %v1245_v26  ;;  %8069 = vmatprep.subr.bf16.mxu1 %v12518_v24  ;;  %v12381_v41 = vcombine.low %v1241_v25, %v1245_v26 }
 0x142   : > { %v1373_v54 = vld [vmem:[#allocation2 + $0x1fa0] sm:$0xff]  ;;  %8070 = vmatpush2.bf16.msra.mxu1 %v12517_v31 }
 0x143   : > { %v12510_v33 = vcombine.high %v1369_v27, %v1373_v54  ;;  %v1233_v34 = vld [vmem:[#allocation2 + $0x1b40] sm:$0xff]  ;;  %8030 = vmatprep.subr.bf16.mxu0 %v12382_v32  ;;  %v12509_v43 = vcombine.low %v1369_v27, %v1373_v54  ;;  %v13936_v32 = vshrl.u32 %v1579_v53, 7 }
 0x144   : > { %v1237_v35 = vld [vmem:[#allocation2 + $0x1b60] sm:$0xff]  ;;  %8031 = vmatpush2.bf16.msra.mxu0 %v12381_v41 }
 0x145   : > { %v1361_v36 = vld [vmem:[#allocation2 + $0x1f40] sm:$0xff]  ;;  %v12374_v44 = vcombine.high %v1233_v34, %v1237_v35  ;;  %8071 = vmatprep.subr.bf16.mxu1 %v12510_v33  ;;  %v12373_v50 = vcombine.low %v1233_v34, %v1237_v35 }
 0x146   : > { %v1365_v37 = vld [vmem:[#allocation2 + $0x1f60] sm:$0xff]  ;;  %8072 = vmatpush2.bf16.msra.mxu1 %v12509_v43 }
 0x147   : > { %v12502_v45 = vcombine.high %v1361_v36, %v1365_v37  ;;  %v1225_v46 = vld [vmem:[#allocation2 + $0x1b00] sm:$0xff]  ;;  %8032 = vmatprep.subr.bf16.mxu0 %v12374_v44  ;;  %v12501_v51 = vcombine.low %v1361_v36, %v1365_v37 }
 0x148   : > { %v1229_v19 = vld [vmem:[#allocation2 + $0x1b20] sm:$0xff]  ;;  %8033 = vmatpush2.bf16.msra.mxu0 %v12373_v50  ;;  %v1585_v50 = vsub.s32 1, %v13936_v32 }
 0x149   : > { %v1353_v47 = vld [vmem:[#allocation2 + $0x1f00] sm:$0xff]  ;;  %v12366_v52 = vcombine.high %v1225_v46, %v1229_v19  ;;  %8073 = vmatprep.subr.bf16.mxu1 %v12502_v45  ;;  %v12365_v62 = vcombine.low %v1225_v46, %v1229_v19  ;;  %v1581_v45 = vsub.s32 0, %v13936_v32 }
 0x14a   : > { %v1357_v48 = vld [vmem:[#allocation2 + $0x1f20] sm:$0xff]  ;;  %8074 = vmatpush2.bf16.msra.mxu1 %v12501_v51 }
 0x14b   : > { %v12494_v55 = vcombine.high %v1353_v47, %v1357_v48  ;;  %v1217_v56 = vld [vmem:[#allocation2 + $0x1ac0] sm:$0xff]  ;;  %8034 = vmatprep.subr.bf16.mxu0 %v12366_v52  ;;  %v12493_v63 = vcombine.low %v1353_v47, %v1357_v48 }
 0x14c   : > { %v1221_v57 = vld [vmem:[#allocation2 + $0x1ae0] sm:$0xff]  ;;  %8035 = vmatpush2.bf16.msra.mxu0 %v12365_v62 }
 0x14d   : > { %v1345_v60 = vld [vmem:[#allocation2 + $0x1ec0] sm:$0xff]  ;;  %v12358_v0 = vcombine.high %v1217_v56, %v1221_v57  ;;  %8075 = vmatprep.subr.bf16.mxu1 %v12494_v55  ;;  %v12357_v9 = vcombine.low %v1217_v56, %v1221_v57  ;;  %v13942_v55 = vcombine.low %v13909_v6, %v13909_v6 }
 0x14e   : > { %v1349_v61 = vld [vmem:[#allocation2 + $0x1ee0] sm:$0xff]  ;;  %8076 = vmatpush2.bf16.msra.mxu1 %v12493_v63 }
 0x14f   : > { %v12486_v1 = vcombine.high %v1345_v60, %v1349_v61  ;;  %v1209_v2 = vld [vmem:[#allocation2 + $0x1a80] sm:$0xff]  ;;  %8036 = vmatprep.subr.bf16.mxu0 %v12358_v0  ;;  %v12485_v11 = vcombine.low %v1345_v60, %v1349_v61  ;;  %v13948_v61 = vcombine.low %v13922_v10, %v13922_v10 }
 0x150   : > { %v1213_v3 = vld [vmem:[#allocation2 + $0x1aa0] sm:$0xff]  ;;  %8037 = vmatpush2.bf16.msra.mxu0 %v12357_v9 }
 0x151   : > { %v1337_v4 = vld [vmem:[#allocation2 + $0x1e80] sm:$0xff]  ;;  %v12350_v12 = vcombine.high %v1209_v2, %v1213_v3  ;;  %8077 = vmatprep.subr.bf16.mxu1 %v12486_v1  ;;  %v12349_v21 = vcombine.low %v1209_v2, %v1213_v3 }
 0x152   : > { %v1341_v5 = vld [vmem:[#allocation2 + $0x1ea0] sm:$0xff]  ;;  %8078 = vmatpush2.bf16.msra.mxu1 %v12485_v11 }
 0x153   : > { %v12478_v13 = vcombine.high %v1337_v4, %v1341_v5  ;;  %v1201_v14 = vld [vmem:[#allocation2 + $0x1a40] sm:$0xff]  ;;  %8038 = vmatprep.subr.bf16.mxu0 %v12350_v12  ;;  %v12477_v23 = vcombine.low %v1337_v4, %v1341_v5 }
 0x154   : > { %v1205_v15 = vld [vmem:[#allocation2 + $0x1a60] sm:$0xff]  ;;  %8039 = vmatpush2.bf16.msra.mxu0 %v12349_v21 }
 0x155   : > { %v1329_v38 = vld [vmem:[#allocation2 + $0x1e40] sm:$0xff]  ;;  %v12342_v24 = vcombine.high %v1201_v14, %v1205_v15  ;;  %8079 = vmatprep.subr.bf16.mxu1 %v12478_v13  ;;  %v12341_v31 = vcombine.low %v1201_v14, %v1205_v15 }
 0x156   : > { %v1333_v17 = vld [vmem:[#allocation2 + $0x1e60] sm:$0xff]  ;;  %8080 = vmatpush2.bf16.msra.mxu1 %v12477_v23 }
 0x157   : > { %v12470_v25 = vcombine.high %v1329_v38, %v1333_v17  ;;  %v1193_v26 = vld [vmem:[#allocation2 + $0x1a00] sm:$0xff]  ;;  %8040 = vmatprep.subr.bf16.mxu0 %v12342_v24  ;;  %v12469_v33 = vcombine.low %v1329_v38, %v1333_v17 }
 0x158   : > { %v1197_v27 = vld [vmem:[#allocation2 + $0x1a20] sm:$0xff]  ;;  %8041 = vmatpush2.bf16.msra.mxu0 %v12341_v31 }
 0x159   : > { %v1321_v54 = vld [vmem:[#allocation2 + $0x1e00] sm:$0xff]  ;;  %v12334_v34 = vcombine.high %v1193_v26, %v1197_v27  ;;  %8081 = vmatprep.subr.bf16.mxu1 %v12470_v25  ;;  %v12333_v44 = vcombine.low %v1193_v26, %v1197_v27  ;;  %v13648_v27 = vmov 0  }
 0x15a   : > { %v1325_v30 = vld [vmem:[#allocation2 + $0x1e20] sm:$0xff]  ;;  %8082 = vmatpush2.bf16.msra.mxu1 %v12469_v33 }
 0x15b   : > { %v12462_v35 = vcombine.high %v1321_v54, %v1325_v30  ;;  %v1441_v36 = vld [vmem:[#allocation2 + $0x21c0] sm:$0xff]  ;;  %8042 = vmatprep.subr.bf16.mxu0 %v12334_v34  ;;  %v12461_v46 = vcombine.low %v1321_v54, %v1325_v30 }
 0x15c   : > { %v1445_v37 = vld [vmem:[#allocation2 + $0x21e0] sm:$0xff]  ;;  %8043 = vmatpush2.bf16.msra.mxu0 %v12333_v44 }
 0x15d   : > { %v1569_v41 = vld [vmem:[#allocation2 + $0x25c0] sm:$0xff]  ;;  %v12582_v47 = vcombine.high %v1441_v36, %v1445_v37  ;;  %8083 = vmatprep.subr.bf16.mxu1 %v12462_v35  ;;  %v12581_v62 = vcombine.low %v1441_v36, %v1445_v37 }
 0x15e   : > { %v1573_v43 = vld [vmem:[#allocation2 + $0x25e0] sm:$0xff]  ;;  %8084 = vmatpush2.bf16.msra.mxu1 %v12461_v46  ;;  %v7800_v5 = vpop.f32.mrf.mxu0 }
 0x15f   : > { %v1577_v19 = vld [vmem:[#allocation4] sm:$0xff]  ;;  %v12710_v48 = vcombine.high %v1569_v41, %v1573_v43  ;;  %8094 = vmatprep.subr.bf16.mxu0 %v12582_v47  ;;  %v12709_v6 = vcombine.low %v1569_v41, %v1573_v43  ;;  %8045 = vmatmul.mubr.bf16.vlgmr.msra.gmra.mxu0 %v13942_v55 }
 0x160   : > { %v1433_v51 = vld [vmem:[#allocation2 + $0x2180] sm:$0xff]  ;;  %v1582_v60 = vrot.slane %v1577_v19, %v1581_v45  ;;  %v1586_v1 = vrot.slane %v1577_v19, %v1585_v50  ;;  %v7841_v13 = vpop.f32.mrf.mxu1  ;;  %8095 = vmatpush1.bf16.msra.mxu0 %v12581_v62  ;;  %v7802_v15 = vpop.f32.mrf.mxu0 }
 0x161   : > { %v1437_v52 = vld [vmem:[#allocation2 + $0x21a0] sm:$0xff]  ;;  %8135 = vmatprep.subr.bf16.mxu1 %v12710_v48  ;;  %8086 = vmatmul.mubr.bf16.vlgmr.msra.gmra.mxu1 %v13948_v61 }
 0x162   : > { %v1561_v56 = vld [vmem:[#allocation2 + $0x2580] sm:$0xff]  ;;  %v12574_v0 = vcombine.high %v1433_v51, %v1437_v52  ;;  %v7801_v12 = vadd.f32 %v7800_v5, %v1582_v60  ;;  %v12573_v14 = vcombine.low %v1433_v51, %v1437_v52  ;;  %8136 = vmatpush1.bf16.msra.mxu1 %v12709_v6  ;;  %v7803_v53 = vadd.f32 %v7802_v15, %v1586_v1  ;;  %v7843_v23 = vpop.f32.mrf.mxu1  ;;  %v7804_v54 = vpop.f32.mrf.mxu0 }
 0x163   : > { %v1565_v57 = vld [vmem:[#allocation2 + $0x25a0] sm:$0xff]  ;;  %8167 = vmatprep.mubr.bf16.mxu1 %v13648_v27 }
 0x164   : > { %v13953_v63 = vld [vmem:[%s14555_s0 + $0x40] sm:$0xff]  ;;  %v12702_v2 = vcombine.high %v1561_v56, %v1565_v57  ;;  %8096 = vmatprep.subr.bf16.mxu0 %v12574_v0  ;;  %v12701_v38 = vcombine.low %v1561_v56, %v1565_v57  ;;  %v13963_v21 = vadd.f32 %v7841_v13, %v7801_v12  ;;  %v13967_v33 = vadd.f32 %v7843_v23, %v7803_v53  ;;  %v7845_v34 = vpop.f32.mrf.mxu1  ;;  %v7805_v36 = vpop.f32.mrf.mxu0 }
 0x165   : > { %v1425_v3 = vld [vmem:[#allocation2 + $0x2140] sm:$0xff]  ;;  %v13960_v11 = vcombine.high %v13953_v63, %v13953_v63  ;;  %8097 = vmatpush1.bf16.msra.mxu0 %v12573_v14  ;;  %v422_v36 = vld [vmem:[#allocation2 + $0x1e8] sm:$0xff] }
 0x166   : > { %v1429_v4 = vld [vmem:[#allocation2 + $0x2160] sm:$0xff]  ;;  %8137 = vmatprep.subr.bf16.mxu1 %v12702_v2  ;;  %v7846_v43 = vpop.f32.mrf.mxu1 }
 0x167   : > { %v1553_v10 = vld [vmem:[#allocation2 + $0x2540] sm:$0xff]  ;;  %v12566_v17 = vcombine.high %v1425_v3, %v1429_v4  ;;  %8126 = vmatprep.mubr.bf16.mxu0 %v13960_v11  ;;  %v12565_v35 = vcombine.low %v1425_v3, %v1429_v4  ;;  %8138 = vmatpush1.bf16.msra.mxu1 %v12701_v38 }
 0x168   : > { %v1557_v9 = vld [vmem:[#allocation2 + $0x2560] sm:$0xff] }
 0x169   : > { %v12694_v24 = vcombine.high %v1553_v10, %v1557_v9  ;;  %v1417_v25 = vld [vmem:[#allocation2 + $0x2100] sm:$0xff]  ;;  %8098 = vmatprep.subr.bf16.mxu0 %v12566_v17  ;;  %v12693_v37 = vcombine.low %v1553_v10, %v1557_v9 }
 0x16a   : > { %v1421_v26 = vld [vmem:[#allocation2 + $0x2120] sm:$0xff]  ;;  %8099 = vmatpush1.bf16.msra.mxu0 %v12565_v35  ;;  %v418_v35 = vld [vmem:[#allocation2 + $0x1c8] sm:$0xff] }
 0x16b   : > { %v1545_v30 = vld [vmem:[#allocation2 + $0x2500] sm:$0xff]  ;;  %v12558_v41 = vcombine.high %v1417_v25, %v1421_v26  ;;  %8139 = vmatprep.subr.bf16.mxu1 %v12694_v24  ;;  %v12557_v51 = vcombine.low %v1417_v25, %v1421_v26 }
 0x16c   : > { %v1549_v31 = vld [vmem:[#allocation2 + $0x2520] sm:$0xff]  ;;  %8140 = vmatpush1.bf16.msra.mxu1 %v12693_v37 }
 0x16d   : > { %v12686_v44 = vcombine.high %v1545_v30, %v1549_v31  ;;  %v1409_v46 = vld [vmem:[#allocation2 + $0x20c0] sm:$0xff]  ;;  %8100 = vmatprep.subr.bf16.mxu0 %v12558_v41  ;;  %v12685_v52 = vcombine.low %v1545_v30, %v1549_v31 }
 0x16e   : > { %v1413_v19 = vld [vmem:[#allocation2 + $0x20e0] sm:$0xff]  ;;  %8101 = vmatpush1.bf16.msra.mxu0 %v12557_v51 }
 0x16f   : > { %v1537_v47 = vld [vmem:[#allocation2 + $0x24c0] sm:$0xff]  ;;  %v12550_v56 = vcombine.high %v1409_v46, %v1413_v19  ;;  %8141 = vmatprep.subr.bf16.mxu1 %v12686_v44  ;;  %v12549_v1 = vcombine.low %v1409_v46, %v1413_v19  ;;  %v11560_v44 = vcombine.high %v418_v35, %v422_v36 }
 0x170   : > { %v1541_v48 = vld [vmem:[#allocation2 + $0x24e0] sm:$0xff]  ;;  %8142 = vmatpush1.bf16.msra.mxu1 %v12685_v52  ;;  %v13079_v52 = vld [vmem:[%s14555_s0 + $0x48] ss:$0 sps:$4 sm:$0xff]  }
 0x171   : > { %v12678_v57 = vcombine.high %v1537_v47, %v1541_v48  ;;  %v1401_v60 = vld [vmem:[#allocation2 + $0x2080] sm:$0xff]  ;;  %8102 = vmatprep.subr.bf16.mxu0 %v12550_v56  ;;  %v12677_v2 = vcombine.low %v1537_v47, %v1541_v48  ;;  %v410_v47 = vld [vmem:[#allocation2 + $0x188] sm:$0xff]  ;;  %v11559_v56 = vcombine.low %v418_v35, %v422_v36 }
 0x172   : > { %v1405_v62 = vld [vmem:[#allocation2 + $0x20a0] sm:$0xff]  ;;  %8103 = vmatpush1.bf16.msra.mxu0 %v12549_v1  ;;  %v414_v48 = vld [vmem:[#allocation2 + $0x1a8] sm:$0xff] }
 0x173   : > { %v1529_v6 = vld [vmem:[#allocation2 + $0x2480] sm:$0xff]  ;;  %v12542_v3 = vcombine.high %v1401_v60, %v1405_v62  ;;  %8143 = vmatprep.subr.bf16.mxu1 %v12678_v57  ;;  %v12541_v13 = vcombine.low %v1401_v60, %v1405_v62  ;;  %v11552_v60 = vcombine.high %v410_v47, %v414_v48  ;;  %v406_v1 = vld [vmem:[#allocation2 + $0x168] sm:$0xff] }
 0x174   : > { %v1533_v0 = vld [vmem:[#allocation2 + $0x24a0] sm:$0xff]  ;;  %8144 = vmatpush1.bf16.msra.mxu1 %v12677_v2  ;;  %v378_v36 = vld [vmem:[#allocation2 + $0x88] sm:$0xff] }
 0x175   : > { %v12670_v4 = vcombine.high %v1529_v6, %v1533_v0  ;;  %v1393_v5 = vld [vmem:[#allocation2 + $0x2040] sm:$0xff]  ;;  %8104 = vmatprep.subr.bf16.mxu0 %v12542_v3  ;;  %v12669_v14 = vcombine.low %v1529_v6, %v1533_v0  ;;  %v402_v0 = vld [vmem:[#allocation2 + $0x148] sm:$0xff]  ;;  %v11551_v3 = vcombine.low %v410_v47, %v414_v48 }
 0x176   : > { %v1397_v10 = vld [vmem:[#allocation2 + $0x2060] sm:$0xff]  ;;  %8105 = vmatpush1.bf16.msra.mxu0 %v12541_v13  ;;  %v398_v13 = vld [vmem:[#allocation2 + $0x128] sm:$0xff] }
 0x177   : > { %v1521_v9 = vld [vmem:[#allocation2 + $0x2440] sm:$0xff]  ;;  %v12534_v15 = vcombine.high %v1393_v5, %v1397_v10  ;;  %8145 = vmatprep.subr.bf16.mxu1 %v12670_v4  ;;  %v12533_v25 = vcombine.low %v1393_v5, %v1397_v10  ;;  %v11544_v5 = vcombine.high %v402_v0, %v406_v1  ;;  %v370_v48 = vld [vmem:[#allocation2 + $0x48] sm:$0xff] }
 0x178   : > { %v1525_v12 = vld [vmem:[#allocation2 + $0x2460] sm:$0xff]  ;;  %8146 = vmatpush1.bf16.msra.mxu1 %v12669_v14 }
 0x179   : > { %v12662_v38 = vcombine.high %v1521_v9, %v1525_v12  ;;  %v1385_v17 = vld [vmem:[#allocation2 + $0x2000] sm:$0xff]  ;;  %8106 = vmatprep.subr.bf16.mxu0 %v12534_v15  ;;  %v12661_v26 = vcombine.low %v1521_v9, %v1525_v12  ;;  %v394_v12 = vld [vmem:[#allocation2 + $0x108] sm:$0xff]  ;;  %v11543_v15 = vcombine.low %v402_v0, %v406_v1 }
 0x17a   : > { %v1389_v53 = vld [vmem:[#allocation2 + $0x2020] sm:$0xff]  ;;  %8107 = vmatpush1.bf16.msra.mxu0 %v12533_v25  ;;  %v390_v25 = vld [vmem:[#allocation2 + $0xe8] sm:$0xff] }
 0x17b   : > { %v1513_v23 = vld [vmem:[#allocation2 + $0x2400] sm:$0xff]  ;;  %v12526_v54 = vcombine.high %v1385_v17, %v1389_v53  ;;  %8147 = vmatprep.subr.bf16.mxu1 %v12662_v38  ;;  %v12525_v37 = vcombine.low %v1385_v17, %v1389_v53  ;;  %v11536_v17 = vcombine.high %v394_v12, %v398_v13  ;;  %v362_v0 = vld [vmem:[#allocation2 + $0x8] sm:$0xff] }
 0x17c   : > { %v1517_v24 = vld [vmem:[#allocation2 + $0x2420] sm:$0xff]  ;;  %8148 = vmatpush1.bf16.msra.mxu1 %v12661_v26  ;;  %v366_v1 = vld [vmem:[#allocation2 + $0x28] sm:$0xff] }
 0x17d   : > { %v12654_v30 = vcombine.high %v1513_v23, %v1517_v24  ;;  %v1505_v31 = vld [vmem:[#allocation2 + $0x23c0] sm:$0xff]  ;;  %8108 = vmatprep.subr.bf16.mxu0 %v12526_v54  ;;  %v12653_v41 = vcombine.low %v1513_v23, %v1517_v24  ;;  %v386_v24 = vld [vmem:[#allocation2 + $0xc8] sm:$0xff]  ;;  %v11535_v54 = vcombine.low %v394_v12, %v398_v13 }
 0x17e   : > { %v1509_v34 = vld [vmem:[#allocation2 + $0x23e0] sm:$0xff]  ;;  %8109 = vmatpush1.bf16.msra.mxu0 %v12525_v37  ;;  %v382_v37 = vld [vmem:[#allocation2 + $0xa8] sm:$0xff] }
 0x17f   : > { %v12646_v43 = vcombine.high %v1505_v31, %v1509_v34  ;;  %8149 = vmatprep.subr.bf16.mxu1 %v12654_v30  ;;  %v1497_v46 = vld [vmem:[#allocation2 + $0x2380] sm:$0xff]  ;;  %v12645_v51 = vcombine.low %v1505_v31, %v1509_v34  ;;  %v11528_v31 = vcombine.high %v386_v24, %v390_v25  ;;  %v482_v12 = vld [vmem:[#allocation2 + $0x3c8] sm:$0xff] }
 0x180   : > { %v1501_v19 = vld [vmem:[#allocation2 + $0x23a0] sm:$0xff]  ;;  %8150 = vmatpush1.bf16.msra.mxu1 %v12653_v41  ;;  %v486_v13 = vld [vmem:[#allocation2 + $0x3e8] sm:$0xff] }
 0x181   : > { %8110 = vmatprep.subr.bf16.mxu0 %v12646_v43  ;;  %v12638_v57 = vcombine.high %v1497_v46, %v1501_v19  ;;  %8176 = vmatprep.subr.bf16.mxu1 %v11560_v44  ;;  %v1489_v62 = vld [vmem:[#allocation2 + $0x2340] sm:$0xff]  ;;  %v12637_v2 = vcombine.low %v1497_v46, %v1501_v19  ;;  %v11527_v43 = vcombine.low %v386_v24, %v390_v25  ;;  %v474_v25 = vld [vmem:[#allocation2 + $0x388] sm:$0xff] }
 0x182   : > { %v1493_v6 = vld [vmem:[#allocation2 + $0x2360] sm:$0xff]  ;;  %8111 = vmatpush2.bf16.msra.mxu0 %v12645_v51  ;;  %v11520_v46 = vcombine.high %v378_v36, %v382_v37  ;;  %v374_v51 = vld [vmem:[#allocation2 + $0x68] sm:$0xff]  ;;  %v13975_v24 = vcombine.low %v13953_v63, %v13953_v63 }
 0x183   : > { %8168 = vmatmul.mubr.bf16.vlgmr.msra.gmra.mxu1 %v13079_v52  ;;  %8112 = vmatprep.subr.bf16.mxu0 %v12638_v57  ;;  %v12630_v4 = vcombine.high %v1489_v62, %v1493_v6  ;;  %v1481_v10 = vld [vmem:[#allocation2 + $0x2300] sm:$0xff]  ;;  %v12629_v14 = vcombine.low %v1489_v62, %v1493_v6 }
 0x184   : > { %8177 = vmatpush1.bf16.msra.mxu1 %v11559_v56  ;;  %v1485_v9 = vld [vmem:[#allocation2 + $0x2320] sm:$0xff]  ;;  %8208 = vmatprep.mubr.bf16.mxu1 %v13838_v58  ;;  %v11519_v56 = vcombine.low %v378_v36, %v382_v37  ;;  %v534_v36 = vld [vmem:[#allocation2 + $0x568] sm:$0xff] }
 0x185   : > { %8178 = vmatprep.subr.bf16.mxu1 %v11552_v60  ;;  %v12622_v38 = vcombine.high %v1481_v10, %v1485_v9  ;;  %v1473_v53 = vld [vmem:[#allocation2 + $0x22c0] sm:$0xff]  ;;  %v12621_v26 = vcombine.low %v1481_v10, %v1485_v9  ;;  %v11512_v60 = vcombine.high %v370_v48, %v374_v51  ;;  %v546_v10 = vld [vmem:[#allocation2 + $0x5c8] sm:$0xff] }
 0x186   : > { %8113 = vmatpush2.bf16.msra.mxu0 %v12637_v2  ;;  %v1477_v23 = vld [vmem:[#allocation2 + $0x22e0] sm:$0xff]  ;;  %v550_v9 = vld [vmem:[#allocation2 + $0x5e8] sm:$0xff] }
 0x187   : > { %8114 = vmatprep.subr.bf16.mxu0 %v12630_v4  ;;  %v12614_v30 = vcombine.high %v1473_v53, %v1477_v23  ;;  %v1465_v34 = vld [vmem:[#allocation2 + $0x2280] sm:$0xff]  ;;  %v12613_v41 = vcombine.low %v1473_v53, %v1477_v23  ;;  %v538_v53 = vld [vmem:[#allocation2 + $0x588] sm:$0xff] }
 0x188   : > { %8179 = vmatpush1.bf16.msra.mxu1 %v11551_v3  ;;  %v1469_v35 = vld [vmem:[#allocation2 + $0x22a0] sm:$0xff]  ;;  %v11511_v3 = vcombine.low %v370_v48, %v374_v51  ;;  %v542_v23 = vld [vmem:[#allocation2 + $0x5a8] sm:$0xff] }
 0x189   : > { %8180 = vmatprep.subr.bf16.mxu1 %v11544_v5  ;;  %v12606_v44 = vcombine.high %v1465_v34, %v1469_v35  ;;  %v1457_v19 = vld [vmem:[#allocation2 + $0x2240] sm:$0xff]  ;;  %v12605_v52 = vcombine.low %v1465_v34, %v1469_v35  ;;  %v11504_v5 = vcombine.high %v362_v0, %v366_v1  ;;  %v530_v35 = vld [vmem:[#allocation2 + $0x548] sm:$0xff] }
 0x18a   : > { %8115 = vmatpush2.bf16.msra.mxu0 %v12629_v14  ;;  %v1461_v47 = vld [vmem:[#allocation2 + $0x2260] sm:$0xff]  ;;  %v11672_v48 = vcombine.high %v530_v35, %v534_v36 }
 0x18b   : > { %8116 = vmatprep.subr.bf16.mxu0 %v12622_v38  ;;  %v12598_v57 = vcombine.high %v1457_v19, %v1461_v47  ;;  %v1449_v62 = vld [vmem:[#allocation2 + $0x2200] sm:$0xff]  ;;  %v12597_v2 = vcombine.low %v1457_v19, %v1461_v47  ;;  %v11688_v38 = vcombine.high %v546_v10, %v550_v9 }
 0x18c   : > { %8181 = vmatpush1.bf16.msra.mxu1 %v11543_v15  ;;  %v1453_v6 = vld [vmem:[#allocation2 + $0x2220] sm:$0xff]  ;;  %v11503_v15 = vcombine.low %v362_v0, %v366_v1  ;;  %v462_v0 = vld [vmem:[#allocation2 + $0x328] sm:$0xff] }
 0x18d   : > { %8182 = vmatprep.subr.bf16.mxu1 %v11536_v17  ;;  %v12590_v4 = vcombine.high %v1449_v62, %v1453_v6  ;;  %v12589_v14 = vcombine.low %v1449_v62, %v1453_v6  ;;  %v11624_v17 = vcombine.high %v482_v12, %v486_v13  ;;  %v526_v62 = vld [vmem:[#allocation2 + $0x528] sm:$0xff] }
 0x18e   : > { %8117 = vmatpush2.bf16.msra.mxu0 %v12621_v26  ;;  %v478_v26 = vld [vmem:[#allocation2 + $0x3a8] sm:$0xff] }
 0x18f   : > { %8118 = vmatprep.subr.bf16.mxu0 %v12614_v30  ;;  %v11623_v30 = vcombine.low %v482_v12, %v486_v13  ;;  %v11616_v34 = vcombine.high %v474_v25, %v478_v26  ;;  %v11615_v47 = vcombine.low %v474_v25, %v478_v26  ;;  %v458_v6 = vld [vmem:[#allocation2 + $0x308] sm:$0xff] }
 0x190   : > { %8183 = vmatpush1.bf16.msra.mxu1 %v11535_v54  ;;  %v11687_v54 = vcombine.low %v546_v10, %v550_v9  ;;  %v514_v12 = vld [vmem:[#allocation2 + $0x4c8] sm:$0xff] }
 0x191   : > { %8184 = vmatprep.subr.bf16.mxu1 %v11528_v31  ;;  %v11680_v31 = vcombine.high %v538_v53, %v542_v23  ;;  %v518_v13 = vld [vmem:[#allocation2 + $0x4e8] sm:$0xff] }
 0x192   : > { %8119 = vmatpush2.bf16.msra.mxu0 %v12613_v41  ;;  %v466_v41 = vld [vmem:[#allocation2 + $0x348] sm:$0xff] }
 0x193   : > { %8120 = vmatprep.subr.bf16.mxu0 %v12606_v44  ;;  %v506_v25 = vld [vmem:[#allocation2 + $0x488] sm:$0xff] }
 0x194   : > { %8185 = vmatpush1.bf16.msra.mxu1 %v11527_v43  ;;  %v470_v43 = vld [vmem:[#allocation2 + $0x368] sm:$0xff] }
 0x195   : > { %8186 = vmatprep.subr.bf16.mxu1 %v11520_v46  ;;  %v11679_v46 = vcombine.low %v538_v53, %v542_v23  ;;  %v11656_v53 = vcombine.high %v514_v12, %v518_v13  ;;  %v510_v26 = vld [vmem:[#allocation2 + $0x4a8] sm:$0xff] }
 0x196   : > { %8121 = vmatpush2.bf16.msra.mxu0 %v12605_v52 }
 0x197   : > { %8122 = vmatprep.subr.bf16.mxu0 %v12598_v57  ;;  %v11608_v57 = vcombine.high %v466_v41, %v470_v43 }
 0x198   : > { %8187 = vmatpush1.bf16.msra.mxu1 %v11519_v56 }
 0x199   : > { %8188 = vmatprep.subr.bf16.mxu1 %v11512_v60  ;;  %v522_v60 = vld [vmem:[#allocation2 + $0x508] sm:$0xff] }
 0x19a   : > { %8123 = vmatpush2.bf16.msra.mxu0 %v12597_v2  ;;  %v11664_v10 = vcombine.high %v522_v60, %v526_v62 }
 0x19b   : > { %8124 = vmatprep.subr.bf16.mxu0 %v12590_v4 }
 0x19c   : > { %8189 = vmatpush1.bf16.msra.mxu1 %v11511_v3  ;;  %v11671_v3 = vcombine.low %v530_v35, %v534_v36  ;;  %v11648_v35 = vcombine.high %v506_v25, %v510_v26 }
 0x19d   : > { %8190 = vmatprep.subr.bf16.mxu1 %v11504_v5  ;;  %v11607_v5 = vcombine.low %v466_v41, %v470_v43  ;;  %v502_v41 = vld [vmem:[#allocation2 + $0x468] sm:$0xff] }
 0x19e   : > { %8125 = vmatpush2.bf16.msra.mxu0 %v12589_v14  ;;  %v7882_v37 = vpop.f32.mrf.mxu0  ;;  %v450_v14 = vld [vmem:[#allocation2 + $0x2c8] sm:$0xff] }
 0x19f   : > { %8217 = vmatprep.subr.bf16.mxu0 %v11688_v38  ;;  %v7883_v63 = vadd.f32 %v7882_v37, %v13963_v21  ;;  %v11663_v38 = vcombine.low %v522_v60, %v526_v62  ;;  %v498_v37 = vld [vmem:[#allocation2 + $0x448] sm:$0xff] }
 0x1a0   : > { %8191 = vmatpush1.bf16.msra.mxu1 %v11503_v15  ;;  %v7923_v44 = vpop.f32.mrf.mxu1  ;;  %v7884_v19 = vpop.f32.mrf.mxu0  ;;  %v454_v15 = vld [vmem:[#allocation2 + $0x2e8] sm:$0xff]  ;;  %v11639_v60 = vcombine.low %v498_v37, %v502_v41 }
 0x1a1   : > { %8192 = vmatprep.subr.bf16.mxu1 %v11624_v17  ;;  %8127 = vmatmul.mubr.bf16.vlgmr.msra.gmra.mxu0 %v13975_v24  ;;  %v13980_v51 = vadd.f32 %v7923_v44, %v7883_v63  ;;  %v7885_v52 = vadd.f32 %v7884_v19, %v13967_v33  ;;  %v11600_v33 = vcombine.high %v458_v6, %v462_v0  ;;  %v434_v43 = vld [vmem:[#allocation2 + $0x248] sm:$0xff] }
 0x1a2   : > { %8218 = vmatpush1.bf16.msra.mxu0 %v11687_v54  ;;  %8249 = vmatprep.mubr.bf16.mxu0 %v13842_v59  ;;  %v7925_v56 = vpop.f32.mrf.mxu1  ;;  %v7886_v21 = vpop.f32.mrf.mxu0  ;;  %v11599_v17 = vcombine.low %v458_v6, %v462_v0  ;;  %v11592_v23 = vcombine.high %v450_v14, %v454_v15  ;;  %v442_v54 = vld [vmem:[#allocation2 + $0x288] sm:$0xff]  ;;  %v11647_v44 = vcombine.low %v506_v25, %v510_v26 }
 0x1a3   : > { %8219 = vmatprep.subr.bf16.mxu0 %v11680_v31  ;;  %v13983_v1 = vadd.f32 %v7925_v56, %v7885_v52  ;;  %v11655_v31 = vcombine.low %v514_v12, %v518_v13  ;;  %v438_v63 = vld [vmem:[#allocation2 + $0x268] sm:$0xff]  ;;  %v11640_v19 = vcombine.high %v498_v37, %v502_v41 }
 0x1a4   : > { %8193 = vmatpush2.bf16.msra.mxu1 %v11623_v30  ;;  %v7927_v2 = vpop.f32.mrf.mxu1  ;;  %v7887_v4 = vpop.f32.mrf.mxu0  ;;  %v446_v30 = vld [vmem:[#allocation2 + $0x2a8] sm:$0xff]  ;;  %v11575_v62 = vcombine.low %v434_v43, %v438_v63 }
 0x1a5   : > { %8194 = vmatprep.subr.bf16.mxu1 %v11616_v34  ;;  %v11591_v34 = vcombine.low %v450_v14, %v454_v15  ;;  %v11584_v36 = vcombine.high %v442_v54, %v446_v30  ;;  %v494_v52 = vld [vmem:[#allocation2 + $0x428] sm:$0xff] }
 0x1a6   : > { %8220 = vmatpush1.bf16.msra.mxu0 %v11679_v46  ;;  %v7928_v9 = vpop.f32.mrf.mxu1  ;;  %v11583_v46 = vcombine.low %v442_v54, %v446_v30  ;;  %v426_v56 = vld [vmem:[#allocation2 + $0x208] sm:$0xff] }
 0x1a7   : > { %8221 = vmatprep.subr.bf16.mxu0 %v11672_v48  ;;  %v490_v48 = vld [vmem:[#allocation2 + $0x408] sm:$0xff] }
 0x1a8   : > { %8195 = vmatpush2.bf16.msra.mxu1 %v11615_v47  ;;  %v11576_v47 = vcombine.high %v434_v43, %v438_v63  ;;  %v11632_v21 = vcombine.high %v490_v48, %v494_v52  ;;  %v610_v0 = vld [vmem:[#allocation2 + $0x7c8] sm:$0xff] }
 0x1a9   : > { %8196 = vmatprep.subr.bf16.mxu1 %v11608_v57  ;;  %v430_v57 = vld [vmem:[#allocation2 + $0x228] sm:$0xff] }
 0x1aa   : > { %8222 = vmatpush1.bf16.msra.mxu0 %v11671_v3  ;;  %v11568_v6 = vcombine.high %v426_v56, %v430_v57  ;;  %v614_v2 = vld [vmem:[#allocation2 + $0x7e8] sm:$0xff] }
 0x1ab   : > { %8223 = vmatprep.subr.bf16.mxu0 %v11664_v10  ;;  %v674_v3 = vld [vmem:[#allocation2 + $0x9c8] sm:$0xff]  ;;  %v11567_v10 = vcombine.low %v426_v56, %v430_v57  ;;  %v11752_v9 = vcombine.high %v610_v0, %v614_v2 }
 0x1ac   : > { %8197 = vmatpush2.bf16.msra.mxu1 %v11607_v5  ;;  %v678_v4 = vld [vmem:[#allocation2 + $0x9e8] sm:$0xff]  ;;  %v11631_v5 = vcombine.low %v490_v48, %v494_v52 }
 0x1ad   : > { %8198 = vmatprep.subr.bf16.mxu1 %v11600_v33  ;;  %v11816_v33 = vcombine.high %v674_v3, %v678_v4  ;;  %v602_v12 = vld [vmem:[#allocation2 + $0x788] sm:$0xff] }
 0x1ae   : > { %8224 = vmatpush1.bf16.msra.mxu0 %v11663_v38  ;;  %v606_v13 = vld [vmem:[#allocation2 + $0x7a8] sm:$0xff]  ;;  %v11751_v38 = vcombine.low %v610_v0, %v614_v2 }
 0x1af   : > { %8225 = vmatprep.subr.bf16.mxu0 %v11656_v53  ;;  %v666_v14 = vld [vmem:[#allocation2 + $0x988] sm:$0xff]  ;;  %v11744_v53 = vcombine.high %v602_v12, %v606_v13 }
 0x1b0   : > { %8199 = vmatpush2.bf16.msra.mxu1 %v11599_v17  ;;  %v670_v15 = vld [vmem:[#allocation2 + $0x9a8] sm:$0xff]  ;;  %v11815_v17 = vcombine.low %v674_v3, %v678_v4 }
 0x1b1   : > { %8200 = vmatprep.subr.bf16.mxu1 %v11592_v23  ;;  %v11808_v23 = vcombine.high %v666_v14, %v670_v15  ;;  %v594_v25 = vld [vmem:[#allocation2 + $0x748] sm:$0xff] }
 0x1b2   : > { %8226 = vmatpush1.bf16.msra.mxu0 %v11655_v31  ;;  %v598_v26 = vld [vmem:[#allocation2 + $0x768] sm:$0xff]  ;;  %v11743_v31 = vcombine.low %v602_v12, %v606_v13 }
 0x1b3   : > { %8227 = vmatprep.subr.bf16.mxu0 %v11648_v35  ;;  %v658_v54 = vld [vmem:[#allocation2 + $0x948] sm:$0xff]  ;;  %v11736_v35 = vcombine.high %v594_v25, %v598_v26 }
 0x1b4   : > { %8201 = vmatpush2.bf16.msra.mxu1 %v11591_v34  ;;  %v662_v30 = vld [vmem:[#allocation2 + $0x968] sm:$0xff]  ;;  %v11807_v34 = vcombine.low %v666_v14, %v670_v15 }
 0x1b5   : > { %8202 = vmatprep.subr.bf16.mxu1 %v11584_v36  ;;  %v11800_v36 = vcombine.high %v658_v54, %v662_v30  ;;  %v586_v37 = vld [vmem:[#allocation2 + $0x708] sm:$0xff] }
 0x1b6   : > { %8228 = vmatpush1.bf16.msra.mxu0 %v11647_v44  ;;  %v590_v41 = vld [vmem:[#allocation2 + $0x728] sm:$0xff]  ;;  %v11735_v44 = vcombine.low %v594_v25, %v598_v26 }
 0x1b7   : > { %8229 = vmatprep.subr.bf16.mxu0 %v11640_v19  ;;  %v650_v43 = vld [vmem:[#allocation2 + $0x908] sm:$0xff]  ;;  %v11728_v19 = vcombine.high %v586_v37, %v590_v41 }
 0x1b8   : > { %8203 = vmatpush2.bf16.msra.mxu1 %v11583_v46  ;;  %v654_v63 = vld [vmem:[#allocation2 + $0x928] sm:$0xff]  ;;  %v11799_v46 = vcombine.low %v658_v54, %v662_v30 }
 0x1b9   : > { %8204 = vmatprep.subr.bf16.mxu1 %v11576_v47  ;;  %v11792_v47 = vcombine.high %v650_v43, %v654_v63  ;;  %v578_v48 = vld [vmem:[#allocation2 + $0x6c8] sm:$0xff] }
 0x1ba   : > { %8230 = vmatpush1.bf16.msra.mxu0 %v11639_v60  ;;  %v582_v52 = vld [vmem:[#allocation2 + $0x6e8] sm:$0xff]  ;;  %v11727_v60 = vcombine.low %v586_v37, %v590_v41 }
 0x1bb   : > { %8231 = vmatprep.subr.bf16.mxu0 %v11632_v21  ;;  %v642_v56 = vld [vmem:[#allocation2 + $0x8c8] sm:$0xff]  ;;  %v11720_v21 = vcombine.high %v578_v48, %v582_v52 }
 0x1bc   : > { %8205 = vmatpush2.bf16.msra.mxu1 %v11575_v62  ;;  %v646_v57 = vld [vmem:[#allocation2 + $0x8e8] sm:$0xff]  ;;  %v11791_v62 = vcombine.low %v650_v43, %v654_v63 }
 0x1bd   : > { %8206 = vmatprep.subr.bf16.mxu1 %v11568_v6  ;;  %v11784_v6 = vcombine.high %v642_v56, %v646_v57  ;;  %v570_v0 = vld [vmem:[#allocation2 + $0x688] sm:$0xff] }
 0x1be   : > { %8232 = vmatpush1.bf16.msra.mxu0 %v11631_v5  ;;  %v574_v2 = vld [vmem:[#allocation2 + $0x6a8] sm:$0xff]  ;;  %v11719_v5 = vcombine.low %v578_v48, %v582_v52 }
 0x1bf   : > { %8233 = vmatprep.subr.bf16.mxu0 %v11752_v9  ;;  %v634_v3 = vld [vmem:[#allocation2 + $0x888] sm:$0xff]  ;;  %v11712_v9 = vcombine.high %v570_v0, %v574_v2 }
 0x1c0   : > { %8207 = vmatpush2.bf16.msra.mxu1 %v11567_v10  ;;  %v638_v4 = vld [vmem:[#allocation2 + $0x8a8] sm:$0xff]  ;;  %v11783_v10 = vcombine.low %v642_v56, %v646_v57 }
 0x1c1   : > { %8258 = vmatprep.subr.bf16.mxu1 %v11816_v33  ;;  %v11776_v33 = vcombine.high %v634_v3, %v638_v4  ;;  %v562_v12 = vld [vmem:[#allocation2 + $0x648] sm:$0xff] }
 0x1c2   : > { %8234 = vmatpush2.bf16.msra.mxu0 %v11751_v38  ;;  %v566_v13 = vld [vmem:[#allocation2 + $0x668] sm:$0xff]  ;;  %v11711_v38 = vcombine.low %v570_v0, %v574_v2 }
 0x1c3   : > { %8209 = vmatmul.mubr.bf16.vlgmr.msra.gmra.mxu1 %v13848_v16  ;;  %8235 = vmatprep.subr.bf16.mxu0 %v11744_v53  ;;  %v626_v14 = vld [vmem:[#allocation2 + $0x848] sm:$0xff]  ;;  %v11704_v53 = vcombine.high %v562_v12, %v566_v13 }
 0x1c4   : > { %8259 = vmatpush1.bf16.msra.mxu1 %v11815_v17  ;;  %8290 = vmatprep.mubr.bf16.mxu1 %v13866_v28  ;;  %v630_v15 = vld [vmem:[#allocation2 + $0x868] sm:$0xff]  ;;  %v11775_v17 = vcombine.low %v634_v3, %v638_v4 }
 0x1c5   : > { %8260 = vmatprep.subr.bf16.mxu1 %v11808_v23  ;;  %v11768_v23 = vcombine.high %v626_v14, %v630_v15  ;;  %v554_v25 = vld [vmem:[#allocation2 + $0x608] sm:$0xff] }
 0x1c6   : > { %8236 = vmatpush2.bf16.msra.mxu0 %v11743_v31  ;;  %v558_v26 = vld [vmem:[#allocation2 + $0x628] sm:$0xff]  ;;  %v11703_v31 = vcombine.low %v562_v12, %v566_v13 }
 0x1c7   : > { %8237 = vmatprep.subr.bf16.mxu0 %v11736_v35  ;;  %v618_v54 = vld [vmem:[#allocation2 + $0x808] sm:$0xff]  ;;  %v11696_v35 = vcombine.high %v554_v25, %v558_v26 }
 0x1c8   : > { %8261 = vmatpush1.bf16.msra.mxu1 %v11807_v34  ;;  %v622_v30 = vld [vmem:[#allocation2 + $0x828] sm:$0xff]  ;;  %v11767_v34 = vcombine.low %v626_v14, %v630_v15 }
 0x1c9   : > { %8262 = vmatprep.subr.bf16.mxu1 %v11800_v36  ;;  %v11760_v36 = vcombine.high %v618_v54, %v622_v30  ;;  %v802_v37 = vld [vmem:[#allocation2 + $0xdc8] sm:$0xff] }
 0x1ca   : > { %8238 = vmatpush2.bf16.msra.mxu0 %v11735_v44  ;;  %v806_v41 = vld [vmem:[#allocation2 + $0xde8] sm:$0xff]  ;;  %v11695_v44 = vcombine.low %v554_v25, %v558_v26 }
 0x1cb   : > { %8239 = vmatprep.subr.bf16.mxu0 %v11728_v19  ;;  %v738_v43 = vld [vmem:[#allocation2 + $0xbc8] sm:$0xff]  ;;  %v11944_v19 = vcombine.high %v802_v37, %v806_v41 }
 0x1cc   : > { %8263 = vmatpush1.bf16.msra.mxu1 %v11799_v46  ;;  %v742_v63 = vld [vmem:[#allocation2 + $0xbe8] sm:$0xff]  ;;  %v11759_v46 = vcombine.low %v618_v54, %v622_v30 }
 0x1cd   : > { %8264 = vmatprep.subr.bf16.mxu1 %v11792_v47  ;;  %v11880_v47 = vcombine.high %v738_v43, %v742_v63  ;;  %v794_v48 = vld [vmem:[#allocation2 + $0xd88] sm:$0xff] }
 0x1ce   : > { %8240 = vmatpush2.bf16.msra.mxu0 %v11727_v60  ;;  %v798_v52 = vld [vmem:[#allocation2 + $0xda8] sm:$0xff]  ;;  %v11943_v60 = vcombine.low %v802_v37, %v806_v41 }
 0x1cf   : > { %8241 = vmatprep.subr.bf16.mxu0 %v11720_v21  ;;  %v730_v56 = vld [vmem:[#allocation2 + $0xb88] sm:$0xff]  ;;  %v11936_v21 = vcombine.high %v794_v48, %v798_v52 }
 0x1d0   : > { %8265 = vmatpush1.bf16.msra.mxu1 %v11791_v62  ;;  %v734_v57 = vld [vmem:[#allocation2 + $0xba8] sm:$0xff]  ;;  %v11879_v62 = vcombine.low %v738_v43, %v742_v63 }
 0x1d1   : > { %8266 = vmatprep.subr.bf16.mxu1 %v11784_v6  ;;  %v11872_v6 = vcombine.high %v730_v56, %v734_v57  ;;  %v786_v0 = vld [vmem:[#allocation2 + $0xd48] sm:$0xff]  ;;  %v11871_v13 = vcombine.low %v730_v56, %v734_v57 }
 0x1d2   : > { %8242 = vmatpush2.bf16.msra.mxu0 %v11719_v5  ;;  %v790_v2 = vld [vmem:[#allocation2 + $0xd68] sm:$0xff] }
 0x1d3   : > { %8243 = vmatprep.subr.bf16.mxu0 %v11712_v9  ;;  %v722_v4 = vld [vmem:[#allocation2 + $0xb48] sm:$0xff]  ;;  %v11928_v14 = vcombine.high %v786_v0, %v790_v2 }
 0x1d4   : > { %8267 = vmatpush1.bf16.msra.mxu1 %v11783_v10  ;;  %v726_v5 = vld [vmem:[#allocation2 + $0xb68] sm:$0xff] }
 0x1d5   : > { %8268 = vmatprep.subr.bf16.mxu1 %v11776_v33  ;;  %v11935_v33 = vcombine.low %v794_v48, %v798_v52  ;;  %v782_v25 = vld [vmem:[#allocation2 + $0xd28] sm:$0xff] }
 0x1d6   : > { %8244 = vmatpush2.bf16.msra.mxu0 %v11711_v38  ;;  %v714_v26 = vld [vmem:[#allocation2 + $0xb08] sm:$0xff] }
 0x1d7   : > { %8245 = vmatprep.subr.bf16.mxu0 %v11704_v53  ;;  %v11864_v53 = vcombine.high %v722_v4, %v726_v5  ;;  %v718_v54 = vld [vmem:[#allocation2 + $0xb28] sm:$0xff] }
 0x1d8   : > { %8269 = vmatpush1.bf16.msra.mxu1 %v11775_v17  ;;  %v770_v43 = vld [vmem:[#allocation2 + $0xcc8] sm:$0xff] }
 0x1d9   : > { %8270 = vmatprep.subr.bf16.mxu1 %v11768_v23  ;;  %v778_v23 = vld [vmem:[#allocation2 + $0xd08] sm:$0xff] }
 0x1da   : > { %8246 = vmatpush2.bf16.msra.mxu0 %v11703_v31  ;;  %v11920_v37 = vcombine.high %v778_v23, %v782_v25  ;;  %v774_v63 = vld [vmem:[#allocation2 + $0xce8] sm:$0xff] }
 0x1db   : > { %8247 = vmatprep.subr.bf16.mxu0 %v11696_v35  ;;  %v11912_v48 = vcombine.high %v770_v43, %v774_v63  ;;  %v762_v56 = vld [vmem:[#allocation2 + $0xc88] sm:$0xff] }
 0x1dc   : > { %8271 = vmatpush1.bf16.msra.mxu1 %v11767_v34  ;;  %v11927_v34 = vcombine.low %v786_v0, %v790_v2  ;;  %v766_v57 = vld [vmem:[#allocation2 + $0xca8] sm:$0xff] }
 0x1dd   : > { %8272 = vmatprep.subr.bf16.mxu1 %v11760_v36  ;;  %v11863_v36 = vcombine.low %v722_v4, %v726_v5  ;;  %v11904_v0 = vcombine.high %v762_v56, %v766_v57  ;;  %v758_v4 = vld [vmem:[#allocation2 + $0xc68] sm:$0xff] }
 0x1de   : > { %8248 = vmatpush2.bf16.msra.mxu0 %v11695_v44  ;;  %v706_v44 = vld [vmem:[#allocation2 + $0xac8] sm:$0xff] }
 0x1df   : > { %8299 = vmatprep.subr.bf16.mxu0 %v11944_v19  ;;  %v7964_v3 = vpop.f32.mrf.mxu0  ;;  %v11919_v19 = vcombine.low %v778_v23, %v782_v25  ;;  %v690_v5 = vld [vmem:[#allocation2 + $0xa48] sm:$0xff] }
 0x1e0   : > { %8273 = vmatpush1.bf16.msra.mxu1 %v11759_v46  ;;  %v7965_v10 = vadd.f32 %v7964_v3, %v13980_v51  ;;  %v710_v46 = vld [vmem:[#allocation2 + $0xae8] sm:$0xff] }
 0x1e1   : > { %8274 = vmatprep.subr.bf16.mxu1 %v11880_v47  ;;  %8250 = vmatmul.mubr.bf16.vlgmr.msra.gmra.mxu0 %v13857_v20  ;;  %v8005_v9 = vpop.f32.mrf.mxu1  ;;  %v7966_v12 = vpop.f32.mrf.mxu0  ;;  %v11855_v47 = vcombine.low %v714_v26, %v718_v54  ;;  %v11848_v52 = vcombine.high %v706_v44, %v710_v46  ;;  %v754_v3 = vld [vmem:[#allocation2 + $0xc48] sm:$0xff] }
 0x1e2   : > { %8300 = vmatpush1.bf16.msra.mxu0 %v11943_v60  ;;  %8331 = vmatprep.mubr.bf16.mxu0 %v13871_v29  ;;  %v13990_v15 = vadd.f32 %v8005_v9, %v7965_v10  ;;  %v7967_v38 = vadd.f32 %v7966_v12, %v13983_v1  ;;  %v11856_v1 = vcombine.high %v714_v26, %v718_v54  ;;  %v698_v60 = vld [vmem:[#allocation2 + $0xa88] sm:$0xff] }
 0x1e3   : > { %8301 = vmatprep.subr.bf16.mxu0 %v11936_v21  ;;  %v8007_v17 = vpop.f32.mrf.mxu1  ;;  %v7968_v51 = vpop.f32.mrf.mxu0  ;;  %v11911_v21 = vcombine.low %v770_v43, %v774_v63  ;;  %v694_v10 = vld [vmem:[#allocation2 + $0xa68] sm:$0xff]  ;;  %v11903_v9 = vcombine.low %v762_v56, %v766_v57  ;;  %v11896_v12 = vcombine.high %v754_v3, %v758_v4  ;;  %v11895_v23 = vcombine.low %v754_v3, %v758_v4 }
 0x1e4   : > { %8275 = vmatpush2.bf16.msra.mxu1 %v11879_v62  ;;  %v13993_v30 = vadd.f32 %v8007_v17, %v7967_v38  ;;  %v702_v62 = vld [vmem:[#allocation2 + $0xaa8] sm:$0xff]  ;;  %v11831_v25 = vcombine.low %v690_v5, %v694_v10 }
 0x1e5   : > { %8276 = vmatprep.subr.bf16.mxu1 %v11872_v6  ;;  %v8009_v31 = vpop.f32.mrf.mxu1  ;;  %v7969_v35 = vpop.f32.mrf.mxu0  ;;  %v11847_v6 = vcombine.low %v706_v44, %v710_v46  ;;  %v11840_v2 = vcombine.high %v698_v60, %v702_v62  ;;  %v750_v38 = vld [vmem:[#allocation2 + $0xc28] sm:$0xff] }
 0x1e6   : > { %8302 = vmatpush1.bf16.msra.mxu0 %v11935_v33  ;;  %v11839_v33 = vcombine.low %v698_v60, %v702_v62  ;;  %v682_v17 = vld [vmem:[#allocation2 + $0xa08] sm:$0xff] }
 0x1e7   : > { %8303 = vmatprep.subr.bf16.mxu0 %v11928_v14  ;;  %v8010_v41 = vpop.f32.mrf.mxu1  ;;  %v746_v14 = vld [vmem:[#allocation2 + $0xc08] sm:$0xff] }
 0x1e8   : > { %8277 = vmatpush2.bf16.msra.mxu1 %v11871_v13  ;;  %v11832_v13 = vcombine.high %v690_v5, %v694_v10  ;;  %v11888_v51 = vcombine.high %v746_v14, %v750_v38  ;;  %v866_v54 = vld [vmem:[#allocation2 + $0xfc8] sm:$0xff] }
 0x1e9   : > { %8278 = vmatprep.subr.bf16.mxu1 %v11864_v53  ;;  %v686_v53 = vld [vmem:[#allocation2 + $0xa28] sm:$0xff] }
 0x1ea   : > { %8304 = vmatpush1.bf16.msra.mxu0 %v11927_v34  ;;  %v11824_v26 = vcombine.high %v682_v17, %v686_v53  ;;  %v870_v31 = vld [vmem:[#allocation2 + $0xfe8] sm:$0xff] }
 0x1eb   : > { %8305 = vmatprep.subr.bf16.mxu0 %v11920_v37  ;;  %v930_v34 = vld [vmem:[#allocation2 + $0x11c8] sm:$0xff]  ;;  %v11823_v37 = vcombine.low %v682_v17, %v686_v53  ;;  %v12008_v41 = vcombine.high %v866_v54, %v870_v31 }
 0x1ec   : > { %8279 = vmatpush2.bf16.msra.mxu1 %v11863_v36  ;;  %v934_v35 = vld [vmem:[#allocation2 + $0x11e8] sm:$0xff]  ;;  %v11887_v36 = vcombine.low %v746_v14, %v750_v38 }
 0x1ed   : > { %8280 = vmatprep.subr.bf16.mxu1 %v11856_v1  ;;  %v12072_v1 = vcombine.high %v930_v34, %v934_v35  ;;  %v858_v43 = vld [vmem:[#allocation2 + $0xf88] sm:$0xff] }
 0x1ee   : > { %8306 = vmatpush1.bf16.msra.mxu0 %v11919_v19  ;;  %v862_v63 = vld [vmem:[#allocation2 + $0xfa8] sm:$0xff]  ;;  %v12007_v19 = vcombine.low %v866_v54, %v870_v31 }
 0x1ef   : > { %8307 = vmatprep.subr.bf16.mxu0 %v11912_v48  ;;  %v922_v44 = vld [vmem:[#allocation2 + $0x1188] sm:$0xff]  ;;  %v12000_v48 = vcombine.high %v858_v43, %v862_v63 }
 0x1f0   : > { %8281 = vmatpush2.bf16.msra.mxu1 %v11855_v47  ;;  %v926_v46 = vld [vmem:[#allocation2 + $0x11a8] sm:$0xff]  ;;  %v12071_v47 = vcombine.low %v930_v34, %v934_v35 }
 0x1f1   : > { %8282 = vmatprep.subr.bf16.mxu1 %v11848_v52  ;;  %v12064_v52 = vcombine.high %v922_v44, %v926_v46  ;;  %v850_v56 = vld [vmem:[#allocation2 + $0xf48] sm:$0xff] }
 0x1f2   : > { %8308 = vmatpush1.bf16.msra.mxu0 %v11911_v21  ;;  %v854_v57 = vld [vmem:[#allocation2 + $0xf68] sm:$0xff]  ;;  %v11999_v21 = vcombine.low %v858_v43, %v862_v63 }
 0x1f3   : > { %8309 = vmatprep.subr.bf16.mxu0 %v11904_v0  ;;  %v914_v60 = vld [vmem:[#allocation2 + $0x1148] sm:$0xff]  ;;  %v11992_v0 = vcombine.high %v850_v56, %v854_v57 }
 0x1f4   : > { %8283 = vmatpush2.bf16.msra.mxu1 %v11847_v6  ;;  %v918_v62 = vld [vmem:[#allocation2 + $0x1168] sm:$0xff]  ;;  %v12063_v6 = vcombine.low %v922_v44, %v926_v46 }
 0x1f5   : > { %8284 = vmatprep.subr.bf16.mxu1 %v11840_v2  ;;  %v12056_v2 = vcombine.high %v914_v60, %v918_v62  ;;  %v842_v3 = vld [vmem:[#allocation2 + $0xf08] sm:$0xff] }
 0x1f6   : > { %8310 = vmatpush1.bf16.msra.mxu0 %v11903_v9  ;;  %v846_v4 = vld [vmem:[#allocation2 + $0xf28] sm:$0xff]  ;;  %v11991_v9 = vcombine.low %v850_v56, %v854_v57 }
 0x1f7   : > { %8311 = vmatprep.subr.bf16.mxu0 %v11896_v12  ;;  %v906_v5 = vld [vmem:[#allocation2 + $0x1108] sm:$0xff]  ;;  %v11984_v12 = vcombine.high %v842_v3, %v846_v4 }
 0x1f8   : > { %8285 = vmatpush2.bf16.msra.mxu1 %v11839_v33  ;;  %v910_v10 = vld [vmem:[#allocation2 + $0x1128] sm:$0xff]  ;;  %v12055_v33 = vcombine.low %v914_v60, %v918_v62 }
 0x1f9   : > { %8286 = vmatprep.subr.bf16.mxu1 %v11832_v13  ;;  %v12048_v13 = vcombine.high %v906_v5, %v910_v10  ;;  %v834_v14 = vld [vmem:[#allocation2 + $0xec8] sm:$0xff] }
 0x1fa   : > { %8312 = vmatpush1.bf16.msra.mxu0 %v11895_v23  ;;  %v838_v38 = vld [vmem:[#allocation2 + $0xee8] sm:$0xff]  ;;  %v11983_v23 = vcombine.low %v842_v3, %v846_v4 }
 0x1fb   : > { %8313 = vmatprep.subr.bf16.mxu0 %v11888_v51  ;;  %v898_v17 = vld [vmem:[#allocation2 + $0x10c8] sm:$0xff]  ;;  %v11976_v51 = vcombine.high %v834_v14, %v838_v38 }
 0x1fc   : > { %8287 = vmatpush2.bf16.msra.mxu1 %v11831_v25  ;;  %v902_v53 = vld [vmem:[#allocation2 + $0x10e8] sm:$0xff]  ;;  %v12047_v25 = vcombine.low %v906_v5, %v910_v10 }
 0x1fd   : > { %8288 = vmatprep.subr.bf16.mxu1 %v11824_v26  ;;  %v12040_v26 = vcombine.high %v898_v17, %v902_v53  ;;  %v826_v54 = vld [vmem:[#allocation2 + $0xe88] sm:$0xff] }
 0x1fe   : > { %8314 = vmatpush1.bf16.msra.mxu0 %v11887_v36  ;;  %v830_v31 = vld [vmem:[#allocation2 + $0xea8] sm:$0xff]  ;;  %v11975_v36 = vcombine.low %v834_v14, %v838_v38 }
 0x1ff   : > { %8315 = vmatprep.subr.bf16.mxu0 %v12008_v41  ;;  %v890_v34 = vld [vmem:[#allocation2 + $0x1088] sm:$0xff]  ;;  %v11968_v41 = vcombine.high %v826_v54, %v830_v31 }
 0x200   : > { %8289 = vmatpush2.bf16.msra.mxu1 %v11823_v37  ;;  %v894_v35 = vld [vmem:[#allocation2 + $0x10a8] sm:$0xff]  ;;  %v12039_v37 = vcombine.low %v898_v17, %v902_v53 }
 0x201   : > { %8340 = vmatprep.subr.bf16.mxu1 %v12072_v1  ;;  %v12032_v1 = vcombine.high %v890_v34, %v894_v35  ;;  %v818_v43 = vld [vmem:[#allocation2 + $0xe48] sm:$0xff] }
 0x202   : > { %8316 = vmatpush2.bf16.msra.mxu0 %v12007_v19  ;;  %v822_v63 = vld [vmem:[#allocation2 + $0xe68] sm:$0xff]  ;;  %v11967_v19 = vcombine.low %v826_v54, %v830_v31 }
 0x203   : > { %8291 = vmatmul.mubr.bf16.vlgmr.msra.gmra.mxu1 %v13883_v39  ;;  %8317 = vmatprep.subr.bf16.mxu0 %v12000_v48  ;;  %v882_v44 = vld [vmem:[#allocation2 + $0x1048] sm:$0xff]  ;;  %v11960_v48 = vcombine.high %v818_v43, %v822_v63 }
 0x204   : > { %8341 = vmatpush1.bf16.msra.mxu1 %v12071_v47  ;;  %8372 = vmatprep.mubr.bf16.mxu1 %v13896_v22  ;;  %v886_v46 = vld [vmem:[#allocation2 + $0x1068] sm:$0xff]  ;;  %v12031_v47 = vcombine.low %v890_v34, %v894_v35 }
 0x205   : > { %8342 = vmatprep.subr.bf16.mxu1 %v12064_v52  ;;  %v12024_v52 = vcombine.high %v882_v44, %v886_v46  ;;  %v810_v56 = vld [vmem:[#allocation2 + $0xe08] sm:$0xff] }
 0x206   : > { %8318 = vmatpush2.bf16.msra.mxu0 %v11999_v21  ;;  %v814_v57 = vld [vmem:[#allocation2 + $0xe28] sm:$0xff]  ;;  %v11959_v21 = vcombine.low %v818_v43, %v822_v63 }
 0x207   : > { %8319 = vmatprep.subr.bf16.mxu0 %v11992_v0  ;;  %v874_v60 = vld [vmem:[#allocation2 + $0x1008] sm:$0xff]  ;;  %v11952_v0 = vcombine.high %v810_v56, %v814_v57 }
 0x208   : > { %8343 = vmatpush1.bf16.msra.mxu1 %v12063_v6  ;;  %v878_v62 = vld [vmem:[#allocation2 + $0x1028] sm:$0xff]  ;;  %v12023_v6 = vcombine.low %v882_v44, %v886_v46 }
 0x209   : > { %8344 = vmatprep.subr.bf16.mxu1 %v12056_v2  ;;  %v12016_v2 = vcombine.high %v874_v60, %v878_v62  ;;  %v1058_v3 = vld [vmem:[#allocation2 + $0x15c8] sm:$0xff] }
 0x20a   : > { %8320 = vmatpush2.bf16.msra.mxu0 %v11991_v9  ;;  %v1062_v4 = vld [vmem:[#allocation2 + $0x15e8] sm:$0xff]  ;;  %v11951_v9 = vcombine.low %v810_v56, %v814_v57 }
 0x20b   : > { %8321 = vmatprep.subr.bf16.mxu0 %v11984_v12  ;;  %v994_v5 = vld [vmem:[#allocation2 + $0x13c8] sm:$0xff]  ;;  %v12200_v12 = vcombine.high %v1058_v3, %v1062_v4 }
 0x20c   : > { %8345 = vmatpush1.bf16.msra.mxu1 %v12055_v33  ;;  %v998_v10 = vld [vmem:[#allocation2 + $0x13e8] sm:$0xff]  ;;  %v12015_v33 = vcombine.low %v874_v60, %v878_v62 }
 0x20d   : > { %8346 = vmatprep.subr.bf16.mxu1 %v12048_v13  ;;  %v12136_v13 = vcombine.high %v994_v5, %v998_v10  ;;  %v1050_v14 = vld [vmem:[#allocation2 + $0x1588] sm:$0xff] }
 0x20e   : > { %8322 = vmatpush2.bf16.msra.mxu0 %v11983_v23  ;;  %v1054_v38 = vld [vmem:[#allocation2 + $0x15a8] sm:$0xff]  ;;  %v12199_v23 = vcombine.low %v1058_v3, %v1062_v4 }
 0x20f   : > { %8323 = vmatprep.subr.bf16.mxu0 %v11976_v51  ;;  %v986_v17 = vld [vmem:[#allocation2 + $0x1388] sm:$0xff]  ;;  %v12192_v51 = vcombine.high %v1050_v14, %v1054_v38 }
 0x210   : > { %8347 = vmatpush1.bf16.msra.mxu1 %v12047_v25  ;;  %v990_v53 = vld [vmem:[#allocation2 + $0x13a8] sm:$0xff]  ;;  %v12135_v25 = vcombine.low %v994_v5, %v998_v10 }
 0x211   : > { %8348 = vmatprep.subr.bf16.mxu1 %v12040_v26  ;;  %v12128_v26 = vcombine.high %v986_v17, %v990_v53  ;;  %v1042_v54 = vld [vmem:[#allocation2 + $0x1548] sm:$0xff]  ;;  %v12127_v63 = vcombine.low %v986_v17, %v990_v53 }
 0x212   : > { %8324 = vmatpush2.bf16.msra.mxu0 %v11975_v36  ;;  %v1046_v31 = vld [vmem:[#allocation2 + $0x1568] sm:$0xff] }
 0x213   : > { %8325 = vmatprep.subr.bf16.mxu0 %v11968_v41  ;;  %v978_v35 = vld [vmem:[#allocation2 + $0x1348] sm:$0xff]  ;;  %v12184_v44 = vcombine.high %v1042_v54, %v1046_v31 }
 0x214   : > { %8349 = vmatpush1.bf16.msra.mxu1 %v12039_v37  ;;  %v982_v36 = vld [vmem:[#allocation2 + $0x1368] sm:$0xff] }
 0x215   : > { %8350 = vmatprep.subr.bf16.mxu1 %v12032_v1  ;;  %v12191_v1 = vcombine.low %v1050_v14, %v1054_v38  ;;  %v1038_v56 = vld [vmem:[#allocation2 + $0x1528] sm:$0xff] }
 0x216   : > { %8326 = vmatpush2.bf16.msra.mxu0 %v11967_v19  ;;  %v970_v57 = vld [vmem:[#allocation2 + $0x1308] sm:$0xff] }
 0x217   : > { %8327 = vmatprep.subr.bf16.mxu0 %v11960_v48  ;;  %v12120_v48 = vcombine.high %v978_v35, %v982_v36  ;;  %v974_v60 = vld [vmem:[#allocation2 + $0x1328] sm:$0xff] }
 0x218   : > { %8351 = vmatpush1.bf16.msra.mxu1 %v12031_v47  ;;  %v1026_v5 = vld [vmem:[#allocation2 + $0x14c8] sm:$0xff] }
 0x219   : > { %8352 = vmatprep.subr.bf16.mxu1 %v12024_v52  ;;  %v1034_v52 = vld [vmem:[#allocation2 + $0x1508] sm:$0xff] }
 0x21a   : > { %8328 = vmatpush2.bf16.msra.mxu0 %v11959_v21  ;;  %v12176_v3 = vcombine.high %v1034_v52, %v1038_v56  ;;  %v1030_v10 = vld [vmem:[#allocation2 + $0x14e8] sm:$0xff] }
 0x21b   : > { %8329 = vmatprep.subr.bf16.mxu0 %v11952_v0  ;;  %v12168_v14 = vcombine.high %v1026_v5, %v1030_v10  ;;  %v1018_v17 = vld [vmem:[#allocation2 + $0x1488] sm:$0xff] }
 0x21c   : > { %8353 = vmatpush1.bf16.msra.mxu1 %v12023_v6  ;;  %v12183_v6 = vcombine.low %v1042_v54, %v1046_v31  ;;  %v1022_v53 = vld [vmem:[#allocation2 + $0x14a8] sm:$0xff] }
 0x21d   : > { %8354 = vmatprep.subr.bf16.mxu1 %v12016_v2  ;;  %v12119_v2 = vcombine.low %v978_v35, %v982_v36  ;;  %v12160_v54 = vcombine.high %v1018_v17, %v1022_v53  ;;  %v1014_v35 = vld [vmem:[#allocation2 + $0x1468] sm:$0xff] }
 0x21e   : > { %8330 = vmatpush2.bf16.msra.mxu0 %v11951_v9  ;;  %v962_v9 = vld [vmem:[#allocation2 + $0x12c8] sm:$0xff] }
 0x21f   : > { %8381 = vmatprep.subr.bf16.mxu0 %v12200_v12  ;;  %v8046_v34 = vpop.f32.mrf.mxu0  ;;  %v12175_v12 = vcombine.low %v1034_v52, %v1038_v56  ;;  %v946_v36 = vld [vmem:[#allocation2 + $0x1248] sm:$0xff] }
 0x220   : > { %8355 = vmatpush1.bf16.msra.mxu1 %v12015_v33  ;;  %v8047_v37 = vadd.f32 %v8046_v34, %v13990_v15  ;;  %v966_v33 = vld [vmem:[#allocation2 + $0x12e8] sm:$0xff] }
 0x221   : > { %8356 = vmatprep.subr.bf16.mxu1 %v12136_v13  ;;  %8332 = vmatmul.mubr.bf16.vlgmr.msra.gmra.mxu0 %v13887_v40  ;;  %v8087_v41 = vpop.f32.mrf.mxu1  ;;  %v8048_v43 = vpop.f32.mrf.mxu0  ;;  %v12111_v13 = vcombine.low %v970_v57, %v974_v60  ;;  %v12104_v38 = vcombine.high %v962_v9, %v966_v33  ;;  %v1010_v34 = vld [vmem:[#allocation2 + $0x1448] sm:$0xff] }
 0x222   : > { %8382 = vmatpush1.bf16.msra.mxu0 %v12199_v23  ;;  %8413 = vmatprep.mubr.bf16.mxu0 %v13901_v49  ;;  %v14000_v46 = vadd.f32 %v8087_v41, %v8047_v37  ;;  %v8049_v19 = vadd.f32 %v8048_v43, %v13993_v30  ;;  %v12112_v30 = vcombine.high %v970_v57, %v974_v60  ;;  %v954_v23 = vld [vmem:[#allocation2 + $0x1288] sm:$0xff] }
 0x223   : > { %8383 = vmatprep.subr.bf16.mxu0 %v12192_v51  ;;  %v8089_v47 = vpop.f32.mrf.mxu1  ;;  %v8050_v15 = vpop.f32.mrf.mxu0  ;;  %v12167_v51 = vcombine.low %v1026_v5, %v1030_v10  ;;  %v950_v37 = vld [vmem:[#allocation2 + $0x1268] sm:$0xff]  ;;  %v12159_v41 = vcombine.low %v1018_v17, %v1022_v53  ;;  %v12152_v43 = vcombine.high %v1010_v34, %v1014_v35  ;;  %v12151_v52 = vcombine.low %v1010_v34, %v1014_v35 }
 0x224   : > { %8357 = vmatpush2.bf16.msra.mxu1 %v12135_v25  ;;  %v14003_v62 = vadd.f32 %v8089_v47, %v8049_v19  ;;  %v958_v25 = vld [vmem:[#allocation2 + $0x12a8] sm:$0xff]  ;;  %v12087_v56 = vcombine.low %v946_v36, %v950_v37 }
 0x225   : > { %8358 = vmatprep.subr.bf16.mxu1 %v12128_v26  ;;  %v8091_v21 = vpop.f32.mrf.mxu1  ;;  %v8051_v0 = vpop.f32.mrf.mxu0  ;;  %v12103_v26 = vcombine.low %v962_v9, %v966_v33  ;;  %v12096_v31 = vcombine.high %v954_v23, %v958_v25  ;;  %v1006_v19 = vld [vmem:[#allocation2 + $0x1428] sm:$0xff] }
 0x226   : > { %8384 = vmatpush1.bf16.msra.mxu0 %v12191_v1  ;;  %v12095_v1 = vcombine.low %v954_v23, %v958_v25  ;;  %v938_v47 = vld [vmem:[#allocation2 + $0x1208] sm:$0xff] }
 0x227   : > { %8385 = vmatprep.subr.bf16.mxu0 %v12184_v44  ;;  %v8092_v4 = vpop.f32.mrf.mxu1  ;;  %v1002_v44 = vld [vmem:[#allocation2 + $0x1408] sm:$0xff] }
 0x228   : > { %8359 = vmatpush2.bf16.msra.mxu1 %v12127_v63  ;;  %v12088_v63 = vcombine.high %v946_v36, %v950_v37  ;;  %v12144_v15 = vcombine.high %v1002_v44, %v1006_v19  ;;  %v1122_v60 = vld [vmem:[#allocation2 + $0x17c8] sm:$0xff] }
 0x229   : > { %8360 = vmatprep.subr.bf16.mxu1 %v12120_v48  ;;  %v942_v48 = vld [vmem:[#allocation2 + $0x1228] sm:$0xff] }
 0x22a   : > { %8386 = vmatpush1.bf16.msra.mxu0 %v12183_v6  ;;  %v12080_v57 = vcombine.high %v938_v47, %v942_v48  ;;  %v1126_v21 = vld [vmem:[#allocation2 + $0x17e8] sm:$0xff] }
 0x22b   : > { %8387 = vmatprep.subr.bf16.mxu0 %v12176_v3  ;;  %v1186_v6 = vld [vmem:[#allocation2 + $0x19c8] sm:$0xff]  ;;  %v12079_v3 = vcombine.low %v938_v47, %v942_v48  ;;  %v12264_v4 = vcombine.high %v1122_v60, %v1126_v21 }
 0x22c   : > { %8361 = vmatpush2.bf16.msra.mxu1 %v12119_v2  ;;  %v1190_v0 = vld [vmem:[#allocation2 + $0x19e8] sm:$0xff]  ;;  %v12143_v2 = vcombine.low %v1002_v44, %v1006_v19 }
 0x22d   : > { %8362 = vmatprep.subr.bf16.mxu1 %v12112_v30  ;;  %v12328_v30 = vcombine.high %v1186_v6, %v1190_v0  ;;  %v1114_v5 = vld [vmem:[#allocation2 + $0x1788] sm:$0xff] }
 0x22e   : > { %8388 = vmatpush1.bf16.msra.mxu0 %v12175_v12  ;;  %v1118_v10 = vld [vmem:[#allocation2 + $0x17a8] sm:$0xff]  ;;  %v12263_v12 = vcombine.low %v1122_v60, %v1126_v21 }
 0x22f   : > { %8389 = vmatprep.subr.bf16.mxu0 %v12168_v14  ;;  %v1178_v9 = vld [vmem:[#allocation2 + $0x1988] sm:$0xff]  ;;  %v12256_v14 = vcombine.high %v1114_v5, %v1118_v10 }
 0x230   : > { %8363 = vmatpush2.bf16.msra.mxu1 %v12111_v13  ;;  %v1182_v33 = vld [vmem:[#allocation2 + $0x19a8] sm:$0xff]  ;;  %v12327_v13 = vcombine.low %v1186_v6, %v1190_v0 }
 0x231   : > { %8364 = vmatprep.subr.bf16.mxu1 %v12104_v38  ;;  %v12320_v38 = vcombine.high %v1178_v9, %v1182_v33  ;;  %v1106_v17 = vld [vmem:[#allocation2 + $0x1748] sm:$0xff] }
 0x232   : > { %8390 = vmatpush1.bf16.msra.mxu0 %v12167_v51  ;;  %v1110_v53 = vld [vmem:[#allocation2 + $0x1768] sm:$0xff] }
 0x233   : > { %8391 = vmatprep.subr.bf16.mxu0 %v12160_v54  ;;  %v1170_v23 = vld [vmem:[#allocation2 + $0x1948] sm:$0xff]  ;;  %v12319_v54 = vcombine.low %v1178_v9, %v1182_v33 }
 0x234   : > { %8365 = vmatpush2.bf16.msra.mxu1 %v12103_v26  ;;  %v1174_v25 = vld [vmem:[#allocation2 + $0x1968] sm:$0xff]  ;;  %v12255_v26 = vcombine.low %v1114_v5, %v1118_v10 }
 0x235   : > { %8366 = vmatprep.subr.bf16.mxu1 %v12096_v31  ;;  %v12248_v31 = vcombine.high %v1106_v17, %v1110_v53  ;;  %v12312_v35 = vcombine.high %v1170_v23, %v1174_v25  ;;  %v1098_v36 = vld [vmem:[#allocation2 + $0x1708] sm:$0xff]  ;;  %v12311_v44 = vcombine.low %v1170_v23, %v1174_v25 }
 0x236   : > { %8392 = vmatpush1.bf16.msra.mxu0 %v12159_v41  ;;  %v1102_v37 = vld [vmem:[#allocation2 + $0x1728] sm:$0xff] }
 0x237   : > { %8393 = vmatprep.subr.bf16.mxu0 %v12152_v43  ;;  %v1162_v41 = vld [vmem:[#allocation2 + $0x1908] sm:$0xff]  ;;  %v12240_v19 = vcombine.high %v1098_v36, %v1102_v37  ;;  %v12239_v60 = vcombine.low %v1098_v36, %v1102_v37 }
 0x238   : > { %8367 = vmatpush2.bf16.msra.mxu1 %v12095_v1  ;;  %v1166_v1 = vld [vmem:[#allocation2 + $0x1928] sm:$0xff] }
 0x239   : > { %8368 = vmatprep.subr.bf16.mxu1 %v12088_v63  ;;  %v12247_v63 = vcombine.low %v1106_v17, %v1110_v53  ;;  %v12304_v48 = vcombine.high %v1162_v41, %v1166_v1  ;;  %v12303_v21 = vcombine.low %v1162_v41, %v1166_v1 }
 0x23a   : > { %8394 = vmatpush1.bf16.msra.mxu0 %v12151_v52  ;;  %v1090_v52 = vld [vmem:[#allocation2 + $0x16c8] sm:$0xff] }
 0x23b   : > { %8395 = vmatprep.subr.bf16.mxu0 %v12144_v15  ;;  %v1154_v15 = vld [vmem:[#allocation2 + $0x18c8] sm:$0xff] }
 0x23c   : > { %8369 = vmatpush2.bf16.msra.mxu1 %v12087_v56  ;;  %v1094_v56 = vld [vmem:[#allocation2 + $0x16e8] sm:$0xff] }
 0x23d   : > { %8370 = vmatprep.subr.bf16.mxu1 %v12080_v57  ;;  %v1158_v57 = vld [vmem:[#allocation2 + $0x18e8] sm:$0xff]  ;;  %v12232_v6 = vcombine.high %v1090_v52, %v1094_v56  ;;  %v12231_v5 = vcombine.low %v1090_v52, %v1094_v56 }
 0x23e   : > { %8396 = vmatpush1.bf16.msra.mxu0 %v12143_v2  ;;  %v12296_v0 = vcombine.high %v1154_v15, %v1158_v57  ;;  %v1082_v2 = vld [vmem:[#allocation2 + $0x1688] sm:$0xff]  ;;  %v12295_v10 = vcombine.low %v1154_v15, %v1158_v57 }
 0x23f   : > { %8397 = vmatprep.subr.bf16.mxu0 %v12264_v4  ;;  %v1146_v4 = vld [vmem:[#allocation2 + $0x1888] sm:$0xff] }
 0x240   : > { %8371 = vmatpush2.bf16.msra.mxu1 %v12079_v3  ;;  %v1086_v3 = vld [vmem:[#allocation2 + $0x16a8] sm:$0xff] }
 0x241   : > { %8422 = vmatprep.subr.bf16.mxu1 %v12328_v30  ;;  %v1150_v30 = vld [vmem:[#allocation2 + $0x18a8] sm:$0xff]  ;;  %v12224_v9 = vcombine.high %v1082_v2, %v1086_v3  ;;  %v12223_v17 = vcombine.low %v1082_v2, %v1086_v3 }
 0x242   : > { %8398 = vmatpush2.bf16.msra.mxu0 %v12263_v12  ;;  %v12288_v33 = vcombine.high %v1146_v4, %v1150_v30  ;;  %v1074_v12 = vld [vmem:[#allocation2 + $0x1648] sm:$0xff]  ;;  %v12287_v53 = vcombine.low %v1146_v4, %v1150_v30 }
 0x243   : > { %v14005_v51 = vpop.f32.mrf.mxu1  ;;  %8373 = vmatmul.mubr.bf16.vlgmr.msra.gmra.mxu1 %v13913_v7  ;;  %8399 = vmatprep.subr.bf16.mxu0 %v12256_v14  ;;  %v1138_v14 = vld [vmem:[#allocation2 + $0x1848] sm:$0xff] }
 0x244   : > { %8423 = vmatpush1.bf16.msra.mxu1 %v12327_v13  ;;  %8454 = vmatprep.mubr.bf16.mxu1 %v13926_v42  ;;  %v1078_v13 = vld [vmem:[#allocation2 + $0x1668] sm:$0xff] }
 0x245   : > { %v14008_v34 = vpop.f32.mrf.mxu1  ;;  %8424 = vmatprep.subr.bf16.mxu1 %v12320_v38  ;;  %v1142_v38 = vld [vmem:[#allocation2 + $0x1868] sm:$0xff]  ;;  %v12216_v23 = vcombine.high %v1074_v12, %v1078_v13  ;;  %v12215_v36 = vcombine.low %v1074_v12, %v1078_v13 }
 0x246   : > { %8400 = vmatpush2.bf16.msra.mxu0 %v12255_v26  ;;  %v12280_v25 = vcombine.high %v1138_v14, %v1142_v38  ;;  %v1066_v26 = vld [vmem:[#allocation2 + $0x1608] sm:$0xff]  ;;  %v12279_v37 = vcombine.low %v1138_v14, %v1142_v38 }
 0x247   : > { %v8173_v43 = vpop.f32.mrf.mxu1  ;;  %8401 = vmatprep.subr.bf16.mxu0 %v12248_v31  ;;  %v1130_v31 = vld [vmem:[#allocation2 + $0x1808] sm:$0xff] }
 0x248   : > { %8425 = vmatpush1.bf16.msra.mxu1 %v12319_v54  ;;  %v1070_v54 = vld [vmem:[#allocation2 + $0x1628] sm:$0xff] }
 0x249   : > { %v8174_v47 = vpop.f32.mrf.mxu1  ;;  %8426 = vmatprep.subr.bf16.mxu1 %v12312_v35  ;;  %v1134_v35 = vld [vmem:[#allocation2 + $0x1828] sm:$0xff]  ;;  %v12208_v41 = vcombine.high %v1066_v26, %v1070_v54 }
 0x24a   : > { %8402 = vmatpush2.bf16.msra.mxu0 %v12247_v63  ;;  %v12272_v1 = vcombine.high %v1130_v31, %v1134_v35  ;;  %v1314_v43 = vld [vmem:[#allocation2 + $0x1dc8] sm:$0xff]  ;;  %v12207_v47 = vcombine.low %v1066_v26, %v1070_v54 }
 0x24b   : > { %8403 = vmatprep.subr.bf16.mxu0 %v12240_v19  ;;  %v1318_v63 = vld [vmem:[#allocation2 + $0x1de8] sm:$0xff] }
 0x24c   : > { %8427 = vmatpush1.bf16.msra.mxu1 %v12311_v44  ;;  %v1250_v44 = vld [vmem:[#allocation2 + $0x1bc8] sm:$0xff]  ;;  %v12456_v52 = vcombine.high %v1314_v43, %v1318_v63 }
 0x24d   : > { %8428 = vmatprep.subr.bf16.mxu1 %v12304_v48  ;;  %v1254_v19 = vld [vmem:[#allocation2 + $0x1be8] sm:$0xff]  ;;  %v12271_v48 = vcombine.low %v1130_v31, %v1134_v35 }
 0x24e   : > { %8404 = vmatpush2.bf16.msra.mxu0 %v12239_v60  ;;  %v12392_v56 = vcombine.high %v1250_v44, %v1254_v19  ;;  %v1306_v15 = vld [vmem:[#allocation2 + $0x1d88] sm:$0xff] }
 0x24f   : > { %8405 = vmatprep.subr.bf16.mxu0 %v12232_v6  ;;  %v1310_v57 = vld [vmem:[#allocation2 + $0x1da8] sm:$0xff]  ;;  %v12455_v6 = vcombine.low %v1314_v43, %v1318_v63 }
 0x250   : > { %8429 = vmatpush1.bf16.msra.mxu1 %v12303_v21  ;;  %v1242_v60 = vld [vmem:[#allocation2 + $0x1b88] sm:$0xff]  ;;  %v12448_v2 = vcombine.high %v1306_v15, %v1310_v57  ;;  %v12447_v12 = vcombine.low %v1306_v15, %v1310_v57 }
 0x251   : > { %8430 = vmatprep.subr.bf16.mxu1 %v12296_v0  ;;  %v1246_v21 = vld [vmem:[#allocation2 + $0x1ba8] sm:$0xff]  ;;  %v12391_v0 = vcombine.low %v1250_v44, %v1254_v19 }
 0x252   : > { %8406 = vmatpush2.bf16.msra.mxu0 %v12231_v5  ;;  %v12384_v3 = vcombine.high %v1242_v60, %v1246_v21  ;;  %v1298_v4 = vld [vmem:[#allocation2 + $0x1d48] sm:$0xff]  ;;  %v12383_v14 = vcombine.low %v1242_v60, %v1246_v21 }
 0x253   : > { %8407 = vmatprep.subr.bf16.mxu0 %v12224_v9  ;;  %v1302_v30 = vld [vmem:[#allocation2 + $0x1d68] sm:$0xff] }
 0x254   : > { %8431 = vmatpush1.bf16.msra.mxu1 %v12295_v10  ;;  %v1234_v10 = vld [vmem:[#allocation2 + $0x1b48] sm:$0xff]  ;;  %v12440_v38 = vcombine.high %v1298_v4, %v1302_v30 }
 0x255   : > { %8432 = vmatprep.subr.bf16.mxu1 %v12288_v33  ;;  %v1238_v9 = vld [vmem:[#allocation2 + $0x1b68] sm:$0xff] }
 0x256   : > { %8408 = vmatpush2.bf16.msra.mxu0 %v12223_v17  ;;  %v1294_v26 = vld [vmem:[#allocation2 + $0x1d28] sm:$0xff] }
 0x257   : > { %8409 = vmatprep.subr.bf16.mxu0 %v12216_v23  ;;  %v12376_v23 = vcombine.high %v1234_v10, %v1238_v9  ;;  %v1230_v31 = vld [vmem:[#allocation2 + $0x1b28] sm:$0xff] }
 0x258   : > { %8433 = vmatpush1.bf16.msra.mxu1 %v12287_v53  ;;  %v1286_v43 = vld [vmem:[#allocation2 + $0x1ce8] sm:$0xff] }
 0x259   : > { %8434 = vmatprep.subr.bf16.mxu1 %v12280_v25  ;;  %v1290_v25 = vld [vmem:[#allocation2 + $0x1d08] sm:$0xff] }
 0x25a   : > { %8410 = vmatpush2.bf16.msra.mxu0 %v12215_v36  ;;  %v12439_v36 = vcombine.low %v1298_v4, %v1302_v30  ;;  %v1218_v63 = vld [vmem:[#allocation2 + $0x1ac8] sm:$0xff]  ;;  %v12431_v19 = vcombine.low %v1290_v25, %v1294_v26 }
 0x25b   : > { %8411 = vmatprep.subr.bf16.mxu0 %v12208_v41  ;;  %v12375_v41 = vcombine.low %v1234_v10, %v1238_v9  ;;  %v1222_v44 = vld [vmem:[#allocation2 + $0x1ae8] sm:$0xff] }
 0x25c   : > { %8435 = vmatpush1.bf16.msra.mxu1 %v12279_v37  ;;  %v1210_v15 = vld [vmem:[#allocation2 + $0x1a88] sm:$0xff]  ;;  %v12359_v21 = vcombine.low %v1218_v63, %v1222_v44 }
 0x25d   : > { %8436 = vmatprep.subr.bf16.mxu1 %v12272_v1  ;;  %v1214_v57 = vld [vmem:[#allocation2 + $0x1aa8] sm:$0xff] }
 0x25e   : > { %8412 = vmatpush2.bf16.msra.mxu0 %v12207_v47  ;;  %v1202_v4 = vld [vmem:[#allocation2 + $0x1a48] sm:$0xff]  ;;  %v12351_v10 = vcombine.low %v1210_v15, %v1214_v57 }
 0x25f   : > { %8463 = vmatprep.subr.bf16.mxu0 %v12456_v52  ;;  %v1274_v52 = vld [vmem:[#allocation2 + $0x1c88] sm:$0xff] }
 0x260   : > { %8437 = vmatpush1.bf16.msra.mxu1 %v12271_v48  ;;  %v12360_v48 = vcombine.high %v1218_v63, %v1222_v44  ;;  %v1206_v30 = vld [vmem:[#allocation2 + $0x1a68] sm:$0xff] }
 0x261   : > { %8438 = vmatprep.subr.bf16.mxu1 %v12392_v56  ;;  %v8128_v5 = vpop.f32.mrf.mxu0  ;;  %8414 = vmatmul.mubr.bf16.vlgmr.msra.gmra.mxu0 %v13917_v8  ;;  %v1278_v56 = vld [vmem:[#allocation2 + $0x1ca8] sm:$0xff] }
 0x262   : > { %v8129_v33 = vadd.f32 %v8128_v5, %v14000_v46  ;;  %8464 = vmatpush1.bf16.msra.mxu0 %v12455_v6  ;;  %8495 = vmatprep.mubr.bf16.mxu0 %v13931_v18  ;;  %v1226_v46 = vld [vmem:[#allocation2 + $0x1b08] sm:$0xff]  ;;  %v12416_v6 = vcombine.high %v1274_v52, %v1278_v56  ;;  %v12415_v5 = vcombine.low %v1274_v52, %v1278_v56 }
 0x263   : > { %v8130_v13 = vpop.f32.mrf.mxu0  ;;  %8465 = vmatprep.subr.bf16.mxu0 %v12448_v2  ;;  %v12368_v1 = vcombine.high %v1226_v46, %v1230_v31  ;;  %v12367_v47 = vcombine.low %v1226_v46, %v1230_v31  ;;  %v1266_v2 = vld [vmem:[#allocation2 + $0x1c48] sm:$0xff] }
 0x264   : > { %8439 = vmatpush2.bf16.msra.mxu1 %v12391_v0  ;;  %v14015_v17 = vadd.f32 %v14005_v51, %v8129_v33  ;;  %v8131_v53 = vadd.f32 %v8130_v13, %v14003_v62  ;;  %v12432_v51 = vcombine.high %v1290_v25, %v1294_v26  ;;  %v1282_v62 = vld [vmem:[#allocation2 + $0x1cc8] sm:$0xff]  ;;  %v12352_v0 = vcombine.high %v1210_v15, %v1214_v57 }
 0x265   : > { %8440 = vmatprep.subr.bf16.mxu1 %v12384_v3  ;;  %v8132_v54 = vpop.f32.mrf.mxu0  ;;  %v12423_v60 = vcombine.low %v1282_v62, %v1286_v43  ;;  %v1270_v3 = vld [vmem:[#allocation2 + $0x1c68] sm:$0xff]  ;;  %v12344_v33 = vcombine.high %v1202_v4, %v1206_v30 }
 0x266   : > { %v14019_v35 = vadd.f32 %v14008_v34, %v8131_v53  ;;  %8466 = vmatpush1.bf16.msra.mxu0 %v12447_v12  ;;  %v12424_v34 = vcombine.high %v1282_v62, %v1286_v43  ;;  %v12408_v9 = vcombine.high %v1266_v2, %v1270_v3  ;;  %v1258_v12 = vld [vmem:[#allocation2 + $0x1c08] sm:$0xff]  ;;  %v12407_v53 = vcombine.low %v1266_v2, %v1270_v3 }
 0x267   : > { %v8133_v37 = vpop.f32.mrf.mxu0  ;;  %8467 = vmatprep.subr.bf16.mxu0 %v12440_v38  ;;  %v1262_v13 = vld [vmem:[#allocation2 + $0x1c28] sm:$0xff] }
 0x268   : > { %8441 = vmatpush2.bf16.msra.mxu1 %v12383_v14  ;;  %v1194_v14 = vld [vmem:[#allocation2 + $0x1a08] sm:$0xff]  ;;  %v12400_v25 = vcombine.high %v1258_v12, %v1262_v13  ;;  %v12399_v37 = vcombine.low %v1258_v12, %v1262_v13 }
 0x269   : > { %8442 = vmatprep.subr.bf16.mxu1 %v12376_v23  ;;  %v1198_v38 = vld [vmem:[#allocation2 + $0x1a28] sm:$0xff]  ;;  %v12343_v23 = vcombine.low %v1202_v4, %v1206_v30 }
 0x26a   : > { %8468 = vmatpush1.bf16.msra.mxu0 %v12439_v36  ;;  %v12336_v26 = vcombine.high %v1194_v14, %v1198_v38  ;;  %v1378_v54 = vld [vmem:[#allocation2 + $0x1fc8] sm:$0xff] }
 0x26b   : > { %8469 = vmatprep.subr.bf16.mxu0 %v12432_v51  ;;  %v1382_v46 = vld [vmem:[#allocation2 + $0x1fe8] sm:$0xff] }
 0x26c   : > { %8443 = vmatpush2.bf16.msra.mxu1 %v12375_v41  ;;  %v1442_v31 = vld [vmem:[#allocation2 + $0x21c8] sm:$0xff]  ;;  %v12335_v41 = vcombine.low %v1194_v14, %v1198_v38  ;;  %v12520_v51 = vcombine.high %v1378_v54, %v1382_v46 }
 0x26d   : > { %8444 = vmatprep.subr.bf16.mxu1 %v12368_v1  ;;  %v1446_v36 = vld [vmem:[#allocation2 + $0x21e8] sm:$0xff] }
 0x26e   : > { %8470 = vmatpush1.bf16.msra.mxu0 %v12431_v19  ;;  %v12584_v1 = vcombine.high %v1442_v31, %v1446_v36  ;;  %v1370_v62 = vld [vmem:[#allocation2 + $0x1f88] sm:$0xff]  ;;  %v12519_v19 = vcombine.low %v1378_v54, %v1382_v46 }
 0x26f   : > { %8471 = vmatprep.subr.bf16.mxu0 %v12424_v34  ;;  %v1374_v43 = vld [vmem:[#allocation2 + $0x1fa8] sm:$0xff] }
 0x270   : > { %8445 = vmatpush2.bf16.msra.mxu1 %v12367_v47  ;;  %v1434_v63 = vld [vmem:[#allocation2 + $0x2188] sm:$0xff]  ;;  %v12583_v47 = vcombine.low %v1442_v31, %v1446_v36  ;;  %v12512_v34 = vcombine.high %v1370_v62, %v1374_v43 }
 0x271   : > { %8446 = vmatprep.subr.bf16.mxu1 %v12360_v48  ;;  %v1438_v44 = vld [vmem:[#allocation2 + $0x21a8] sm:$0xff] }
 0x272   : > { %8472 = vmatpush1.bf16.msra.mxu0 %v12423_v60  ;;  %v12576_v48 = vcombine.high %v1434_v63, %v1438_v44  ;;  %v1362_v52 = vld [vmem:[#allocation2 + $0x1f48] sm:$0xff] }
 0x273   : > { %8473 = vmatprep.subr.bf16.mxu0 %v12416_v6  ;;  %v1366_v56 = vld [vmem:[#allocation2 + $0x1f68] sm:$0xff]  ;;  %v12575_v6 = vcombine.low %v1434_v63, %v1438_v44 }
 0x274   : > { %8447 = vmatpush2.bf16.msra.mxu1 %v12359_v21  ;;  %v1426_v15 = vld [vmem:[#allocation2 + $0x2148] sm:$0xff]  ;;  %v12511_v21 = vcombine.low %v1370_v62, %v1374_v43 }
 0x275   : > { %8448 = vmatprep.subr.bf16.mxu1 %v12352_v0  ;;  %v1430_v57 = vld [vmem:[#allocation2 + $0x2168] sm:$0xff]  ;;  %v12504_v0 = vcombine.high %v1362_v52, %v1366_v56 }
 0x276   : > { %8474 = vmatpush1.bf16.msra.mxu0 %v12415_v5  ;;  %v12568_v3 = vcombine.high %v1426_v15, %v1430_v57  ;;  %v1354_v4 = vld [vmem:[#allocation2 + $0x1f08] sm:$0xff]  ;;  %v12567_v12 = vcombine.low %v1426_v15, %v1430_v57 }
 0x277   : > { %8475 = vmatprep.subr.bf16.mxu0 %v12408_v9  ;;  %v1358_v30 = vld [vmem:[#allocation2 + $0x1f28] sm:$0xff] }
 0x278   : > { %8449 = vmatpush2.bf16.msra.mxu1 %v12351_v10  ;;  %v1418_v5 = vld [vmem:[#allocation2 + $0x2108] sm:$0xff]  ;;  %v12496_v13 = vcombine.high %v1354_v4, %v1358_v30  ;;  %v12495_v54 = vcombine.low %v1354_v4, %v1358_v30 }
 0x279   : > { %8450 = vmatprep.subr.bf16.mxu1 %v12344_v33  ;;  %v1422_v10 = vld [vmem:[#allocation2 + $0x2128] sm:$0xff]  ;;  %v12503_v33 = vcombine.low %v1362_v52, %v1366_v56 }
 0x27a   : > { %8476 = vmatpush1.bf16.msra.mxu0 %v12407_v53  ;;  %v12560_v38 = vcombine.high %v1418_v5, %v1422_v10  ;;  %v1346_v53 = vld [vmem:[#allocation2 + $0x1ec8] sm:$0xff]  ;;  %v12559_v46 = vcombine.low %v1418_v5, %v1422_v10  ;;  %v1589_v10 = vsub.s32 2, %v13936_v32 }
 0x27b   : > { %8477 = vmatprep.subr.bf16.mxu0 %v12400_v25  ;;  %v1410_v25 = vld [vmem:[#allocation2 + $0x20c8] sm:$0xff] }
 0x27c   : > { %8451 = vmatpush2.bf16.msra.mxu1 %v12343_v23  ;;  %v1350_v23 = vld [vmem:[#allocation2 + $0x1ee8] sm:$0xff] }
 0x27d   : > { %8452 = vmatprep.subr.bf16.mxu1 %v12336_v26  ;;  %v1414_v26 = vld [vmem:[#allocation2 + $0x20e8] sm:$0xff]  ;;  %v12488_v31 = vcombine.high %v1346_v53, %v1350_v23  ;;  %v12487_v62 = vcombine.low %v1346_v53, %v1350_v23 }
 0x27e   : > { %8478 = vmatpush1.bf16.msra.mxu0 %v12399_v37  ;;  %v12552_v36 = vcombine.high %v1410_v25, %v1414_v26  ;;  %v1338_v37 = vld [vmem:[#allocation2 + $0x1e88] sm:$0xff]  ;;  %v12551_v43 = vcombine.low %v1410_v25, %v1414_v26  ;;  %v13466_v26 = vld [vmem:[#allocation4] sm:$0xff] }
 0x27f   : > { %8479 = vmatprep.subr.bf16.mxu0 %v12520_v51  ;;  %v1402_v51 = vld [vmem:[#allocation2 + $0x2088] sm:$0xff] }
 0x280   : > { %8453 = vmatpush2.bf16.msra.mxu1 %v12335_v41  ;;  %v1342_v41 = vld [vmem:[#allocation2 + $0x1ea8] sm:$0xff] }
 0x281   : > { %8504 = vmatprep.subr.bf16.mxu1 %v12584_v1  ;;  %v1406_v1 = vld [vmem:[#allocation2 + $0x20a8] sm:$0xff]  ;;  %v12480_v63 = vcombine.high %v1338_v37, %v1342_v41  ;;  %v12479_v52 = vcombine.low %v1338_v37, %v1342_v41 }
 0x282   : > { %8480 = vmatpush2.bf16.msra.mxu0 %v12519_v19  ;;  %v12544_v44 = vcombine.high %v1402_v51, %v1406_v1  ;;  %v1330_v19 = vld [vmem:[#allocation2 + $0x1e48] sm:$0xff]  ;;  %v12543_v56 = vcombine.low %v1402_v51, %v1406_v1 }
 0x283   : > { %v14021_v60 = vpop.f32.mrf.mxu1  ;;  %8455 = vmatmul.mubr.bf16.vlgmr.msra.gmra.mxu1 %v13942_v55  ;;  %8481 = vmatprep.subr.bf16.mxu0 %v12512_v34  ;;  %v1394_v34 = vld [vmem:[#allocation2 + $0x2048] sm:$0xff] }
 0x284   : > { %8505 = vmatpush1.bf16.msra.mxu1 %v12583_v47  ;;  %8536 = vmatprep.mubr.bf16.mxu1 %v13960_v11  ;;  %v1334_v47 = vld [vmem:[#allocation2 + $0x1e68] sm:$0xff] }
 0x285   : > { %v14024_v2 = vpop.f32.mrf.mxu1  ;;  %8506 = vmatprep.subr.bf16.mxu1 %v12576_v48  ;;  %v1398_v48 = vld [vmem:[#allocation2 + $0x2068] sm:$0xff]  ;;  %v12472_v15 = vcombine.high %v1330_v19, %v1334_v47  ;;  %v12471_v4 = vcombine.low %v1330_v19, %v1334_v47 }
 0x286   : > { %8482 = vmatpush2.bf16.msra.mxu0 %v12511_v21  ;;  %v12536_v57 = vcombine.high %v1394_v34, %v1398_v48  ;;  %v1322_v21 = vld [vmem:[#allocation2 + $0x1e08] sm:$0xff]  ;;  %v12535_v30 = vcombine.low %v1394_v34, %v1398_v48 }
 0x287   : > { %v8214_v9 = vpop.f32.mrf.mxu1  ;;  %8483 = vmatprep.subr.bf16.mxu0 %v12504_v0  ;;  %v1386_v0 = vld [vmem:[#allocation2 + $0x2008] sm:$0xff] }
 0x288   : > { %8507 = vmatpush1.bf16.msra.mxu1 %v12575_v6  ;;  %v1326_v6 = vld [vmem:[#allocation2 + $0x1e28] sm:$0xff] }
 0x289   : > { %v8215_v14 = vpop.f32.mrf.mxu1  ;;  %8508 = vmatprep.subr.bf16.mxu1 %v12568_v3  ;;  %v1390_v3 = vld [vmem:[#allocation2 + $0x2028] sm:$0xff]  ;;  %v12464_v5 = vcombine.high %v1322_v21, %v1326_v6  ;;  %v12463_v53 = vcombine.low %v1322_v21, %v1326_v6 }
 0x28a   : > { %8484 = vmatpush2.bf16.msra.mxu0 %v12503_v33  ;;  %v12528_v9 = vcombine.high %v1386_v0, %v1390_v3  ;;  %v1570_v33 = vld [vmem:[#allocation2 + $0x25c8] sm:$0xff]  ;;  %v12527_v23 = vcombine.low %v1386_v0, %v1390_v3 }
 0x28b   : > { %8485 = vmatprep.subr.bf16.mxu0 %v12496_v13  ;;  %v1506_v13 = vld [vmem:[#allocation2 + $0x23c8] sm:$0xff] }
 0x28c   : > { %8509 = vmatpush1.bf16.msra.mxu1 %v12567_v12  ;;  %v1574_v12 = vld [vmem:[#allocation2 + $0x25e8] sm:$0xff] }
 0x28d   : > { %8510 = vmatprep.subr.bf16.mxu1 %v12560_v38  ;;  %v1510_v14 = vld [vmem:[#allocation2 + $0x23e8] sm:$0xff]  ;;  %v1593_v38 = vsub.s32 3, %v13936_v32  ;;  %v12712_v25 = vcombine.high %v1570_v33, %v1574_v12  ;;  %v12711_v1 = vcombine.low %v1570_v33, %v1574_v12 }
 0x28e   : > { %8486 = vmatpush2.bf16.msra.mxu0 %v12495_v54  ;;  %v1590_v54 = vrot.slane %v13466_v26, %v1589_v10  ;;  %v1498_v37 = vld [vmem:[#allocation2 + $0x2388] sm:$0xff] }
 0x28f   : > { %8487 = vmatprep.subr.bf16.mxu0 %v12488_v31  ;;  %v1562_v31 = vld [vmem:[#allocation2 + $0x2588] sm:$0xff]  ;;  %v1594_v51 = vrot.slane %v13466_v26, %v1593_v38 }
 0x290   : > { %8511 = vmatpush1.bf16.msra.mxu1 %v12559_v46  ;;  %v12648_v46 = vcombine.high %v1506_v13, %v1510_v14  ;;  %v1502_v41 = vld [vmem:[#allocation2 + $0x23a8] sm:$0xff] }
 0x291   : > { %8512 = vmatprep.subr.bf16.mxu1 %v12552_v36  ;;  %v1566_v36 = vld [vmem:[#allocation2 + $0x25a8] sm:$0xff] }
 0x292   : > { %8488 = vmatpush2.bf16.msra.mxu0 %v12487_v62  ;;  %v12647_v62 = vcombine.low %v1506_v13, %v1510_v14  ;;  %v1554_v19 = vld [vmem:[#allocation2 + $0x2548] sm:$0xff] }
 0x293   : > { %8489 = vmatprep.subr.bf16.mxu0 %v12480_v63  ;;  %v8211_v63 = vadd.f32 %v14021_v60, %v1590_v54  ;;  %v1558_v47 = vld [vmem:[#allocation2 + $0x2568] sm:$0xff]  ;;  %v12639_v60 = vcombine.low %v1498_v37, %v1502_v41 }
 0x294   : > { %8513 = vmatpush1.bf16.msra.mxu1 %v12551_v43  ;;  %v12704_v43 = vcombine.high %v1562_v31, %v1566_v36  ;;  %v1490_v48 = vld [vmem:[#allocation2 + $0x2348] sm:$0xff]  ;;  %v12696_v6 = vcombine.high %v1554_v19, %v1558_v47  ;;  %v12695_v33 = vcombine.low %v1554_v19, %v1558_v47 }
 0x295   : > { %8514 = vmatprep.subr.bf16.mxu1 %v12544_v44  ;;  %v12640_v44 = vcombine.high %v1498_v37, %v1502_v41  ;;  %v1474_v26 = vld [vmem:[#allocation2 + $0x22c8] sm:$0xff] }
 0x296   : > { %8490 = vmatpush2.bf16.msra.mxu0 %v12479_v52  ;;  %v1494_v52 = vld [vmem:[#allocation2 + $0x2368] sm:$0xff] }
 0x297   : > { %8491 = vmatprep.subr.bf16.mxu0 %v12472_v15  ;;  %v12632_v3 = vcombine.high %v1490_v48, %v1494_v52  ;;  %v12631_v13 = vcombine.low %v1490_v48, %v1494_v52  ;;  %v1478_v54 = vld [vmem:[#allocation2 + $0x22e8] sm:$0xff] }
 0x298   : > { %8515 = vmatpush1.bf16.msra.mxu1 %v12543_v56  ;;  %v8213_v56 = vadd.f32 %v14024_v2, %v1594_v51  ;;  %v1486_v2 = vld [vmem:[#allocation2 + $0x2328] sm:$0xff]  ;;  %v12616_v37 = vcombine.high %v1474_v26, %v1478_v54 }
 0x299   : > { %8516 = vmatprep.subr.bf16.mxu1 %v12536_v57  ;;  %v12703_v57 = vcombine.low %v1562_v31, %v1566_v36  ;;  %v1530_v41 = vld [vmem:[#allocation2 + $0x2488] sm:$0xff] }
 0x29a   : > { %8492 = vmatpush2.bf16.msra.mxu0 %v12471_v4  ;;  %v1546_v4 = vld [vmem:[#allocation2 + $0x2508] sm:$0xff] }
 0x29b   : > { %8493 = vmatprep.subr.bf16.mxu0 %v12464_v5  ;;  %v1534_v51 = vld [vmem:[#allocation2 + $0x24a8] sm:$0xff] }
 0x29c   : > { %8517 = vmatpush1.bf16.msra.mxu1 %v12535_v30  ;;  %v1550_v30 = vld [vmem:[#allocation2 + $0x2528] sm:$0xff] }
 0x29d   : > { %8518 = vmatprep.subr.bf16.mxu1 %v12528_v9  ;;  %v1482_v9 = vld [vmem:[#allocation2 + $0x2308] sm:$0xff]  ;;  %v12688_v14 = vcombine.high %v1546_v4, %v1550_v30 }
 0x29e   : > { %8494 = vmatpush2.bf16.msra.mxu0 %v12463_v53  ;;  %v12624_v53 = vcombine.high %v1482_v9, %v1486_v2  ;;  %v12623_v31 = vcombine.low %v1482_v9, %v1486_v2  ;;  %v1522_v47 = vld [vmem:[#allocation2 + $0x2448] sm:$0xff] }
 0x29f   : > { %8545 = vmatprep.subr.bf16.mxu0 %v12712_v25  ;;  %v1542_v25 = vld [vmem:[#allocation2 + $0x24e8] sm:$0xff] }
 0x2a0   : > { %8519 = vmatpush1.bf16.msra.mxu1 %v12527_v23  ;;  %v1538_v23 = vld [vmem:[#allocation2 + $0x24c8] sm:$0xff] }
 0x2a1   : > { %8520 = vmatprep.subr.bf16.mxu1 %v12648_v46  ;;  %v8251_v34 = vpop.f32.mrf.mxu0  ;;  %8496 = vmatmul.mubr.bf16.vlgmr.msra.gmra.mxu0 %v13948_v61  ;;  %v12687_v46 = vcombine.low %v1546_v4, %v1550_v30  ;;  %v12680_v36 = vcombine.high %v1538_v23, %v1542_v25  ;;  %v1458_v48 = vld [vmem:[#allocation2 + $0x2248] sm:$0xff] }
 0x2a2   : > { %v14036_v15 = vadd.f32 %v8251_v34, %v8211_v63  ;;  %8546 = vmatpush1.bf16.msra.mxu0 %v12711_v1  ;;  %8577 = vmatprep.mubr.bf16.mxu0 %v13648_v27  ;;  %v1466_v1 = vld [vmem:[#allocation2 + $0x2288] sm:$0xff]  ;;  %v12615_v63 = vcombine.low %v1474_v26, %v1478_v54 }
 0x2a3   : > { %v8253_v21 = vpop.f32.mrf.mxu0  ;;  %8547 = vmatprep.subr.bf16.mxu0 %v12704_v43  ;;  %v12679_v43 = vcombine.low %v1538_v23, %v1542_v25  ;;  %v1526_v34 = vld [vmem:[#allocation2 + $0x2468] sm:$0xff] }
 0x2a4   : > { %8521 = vmatpush2.bf16.msra.mxu1 %v12647_v62  ;;  %v14039_v0 = vadd.f32 %v8253_v21, %v8213_v56  ;;  %v1470_v62 = vld [vmem:[#allocation2 + $0x22a8] sm:$0xff]  ;;  %v12671_v56 = vcombine.low %v1530_v41, %v1534_v51  ;;  %v12664_v21 = vcombine.high %v1522_v47, %v1526_v34 }
 0x2a5   : > { %8522 = vmatprep.subr.bf16.mxu1 %v12640_v44  ;;  %v8255_v5 = vpop.f32.mrf.mxu0  ;;  %v12672_v44 = vcombine.high %v1530_v41, %v1534_v51  ;;  %v12608_v19 = vcombine.high %v1466_v1, %v1470_v62  ;;  %v1462_v52 = vld [vmem:[#allocation2 + $0x2268] sm:$0xff] }
 0x2a6   : > { %8548 = vmatpush1.bf16.msra.mxu0 %v12703_v57  ;;  %v12607_v57 = vcombine.low %v1466_v1, %v1470_v62  ;;  %v1450_v4 = vld [vmem:[#allocation2 + $0x2208] sm:$0xff]  ;;  %v12663_v5 = vcombine.low %v1522_v47, %v1526_v34  ;;  %v12599_v9 = vcombine.low %v1458_v48, %v1462_v52  ;;  %v535_v47 = vld [vmem:[#allocation2 + $0x570] sm:$0xff] }
 0x2a7   : > { %v8256_v12 = vpop.f32.mrf.mxu0  ;;  %8549 = vmatprep.subr.bf16.mxu0 %v12696_v6  ;;  %v1514_v6 = vld [vmem:[#allocation2 + $0x2408] sm:$0xff] }
 0x2a8   : > { %8523 = vmatpush2.bf16.msra.mxu1 %v12639_v60  ;;  %v12600_v60 = vcombine.high %v1458_v48, %v1462_v52  ;;  %v1454_v30 = vld [vmem:[#allocation2 + $0x2228] sm:$0xff]  ;;  %v419_v12 = vld [vmem:[#allocation2 + $0x1d0] sm:$0xff] }
 0x2a9   : > { %8524 = vmatprep.subr.bf16.mxu1 %v12632_v3  ;;  %v1518_v3 = vld [vmem:[#allocation2 + $0x2428] sm:$0xff]  ;;  %v12591_v25 = vcombine.low %v1450_v4, %v1454_v30 }
 0x2aa   : > { %8550 = vmatpush1.bf16.msra.mxu0 %v12695_v33  ;;  %v12656_v2 = vcombine.high %v1514_v6, %v1518_v3  ;;  %v12592_v33 = vcombine.high %v1450_v4, %v1454_v30  ;;  %v12655_v23 = vcombine.low %v1514_v6, %v1518_v3  ;;  %v395_v6 = vld [vmem:[#allocation2 + $0x110] sm:$0xff] }
 0x2ab   : > { %8551 = vmatprep.subr.bf16.mxu0 %v12688_v14  ;;  %v547_v14 = vld [vmem:[#allocation2 + $0x5d0] sm:$0xff] }
 0x2ac   : > { %8525 = vmatpush2.bf16.msra.mxu1 %v12631_v13  ;;  %v423_v13 = vld [vmem:[#allocation2 + $0x1f0] sm:$0xff] }
 0x2ad   : > { %8526 = vmatprep.subr.bf16.mxu1 %v12624_v53  ;;  %v551_v53 = vld [vmem:[#allocation2 + $0x5f0] sm:$0xff]  ;;  %v11562_v26 = vcombine.high %v419_v12, %v423_v13  ;;  %v11561_v41 = vcombine.low %v419_v12, %v423_v13 }
 0x2ae   : > { %8552 = vmatpush1.bf16.msra.mxu0 %v12687_v46  ;;  %v11690_v54 = vcombine.high %v547_v14, %v551_v53  ;;  %v411_v46 = vld [vmem:[#allocation2 + $0x190] sm:$0xff]  ;;  %v11689_v51 = vcombine.low %v547_v14, %v551_v53 }
 0x2af   : > { %8553 = vmatprep.subr.bf16.mxu0 %v12680_v36  ;;  %v539_v36 = vld [vmem:[#allocation2 + $0x590] sm:$0xff] }
 0x2b0   : > { %8527 = vmatpush2.bf16.msra.mxu1 %v12623_v31  ;;  %v415_v31 = vld [vmem:[#allocation2 + $0x1b0] sm:$0xff] }
 0x2b1   : > { %8528 = vmatprep.subr.bf16.mxu1 %v12616_v37  ;;  %v543_v37 = vld [vmem:[#allocation2 + $0x5b0] sm:$0xff]  ;;  %v11554_v1 = vcombine.high %v411_v46, %v415_v31  ;;  %v11553_v48 = vcombine.low %v411_v46, %v415_v31 }
 0x2b2   : > { %8554 = vmatpush1.bf16.msra.mxu0 %v12679_v43  ;;  %v11682_v62 = vcombine.high %v539_v36, %v543_v37  ;;  %v403_v43 = vld [vmem:[#allocation2 + $0x150] sm:$0xff] }
 0x2b3   : > { %8555 = vmatprep.subr.bf16.mxu0 %v12672_v44  ;;  %v13467_v44 = vld [vmem:[%s14555_s0 + $0x48] ss:$0 sps:$4 sm:$0xff]   ;;  %v399_v3 = vld [vmem:[#allocation2 + $0x130] sm:$0xff] }
 0x2b4   : > { %8529 = vmatpush2.bf16.msra.mxu1 %v12615_v63  ;;  %v407_v63 = vld [vmem:[#allocation2 + $0x170] sm:$0xff] }
 0x2b5   : > { %8530 = vmatprep.subr.bf16.mxu1 %v12608_v19  ;;  %v531_v19 = vld [vmem:[#allocation2 + $0x550] sm:$0xff] }
 0x2b6   : > { %8556 = vmatpush1.bf16.msra.mxu0 %v12671_v56  ;;  %v11681_v56 = vcombine.low %v539_v36, %v543_v37  ;;  %v523_v30 = vld [vmem:[#allocation2 + $0x510] sm:$0xff] }
 0x2b7   : > { %8557 = vmatprep.subr.bf16.mxu0 %v12664_v21  ;;  %v387_v14 = vld [vmem:[#allocation2 + $0xd0] sm:$0xff] }
 0x2b8   : > { %8531 = vmatpush2.bf16.msra.mxu1 %v12607_v57  ;;  %v11546_v57 = vcombine.high %v403_v43, %v407_v63  ;;  %v391_v53 = vld [vmem:[#allocation2 + $0xf0] sm:$0xff] }
 0x2b9   : > { %8532 = vmatprep.subr.bf16.mxu1 %v12600_v60  ;;  %v11674_v60 = vcombine.high %v531_v19, %v535_v47  ;;  %v379_v31 = vld [vmem:[#allocation2 + $0x90] sm:$0xff] }
 0x2ba   : > { %8558 = vmatpush1.bf16.msra.mxu0 %v12663_v5  ;;  %v527_v5 = vld [vmem:[#allocation2 + $0x530] sm:$0xff] }
 0x2bb   : > { %8559 = vmatprep.subr.bf16.mxu0 %v12656_v2  ;;  %v11673_v2 = vcombine.low %v531_v19, %v535_v47  ;;  %v11666_v13 = vcombine.high %v523_v30, %v527_v5  ;;  %v383_v36 = vld [vmem:[#allocation2 + $0xb0] sm:$0xff] }
 0x2bc   : > { %8533 = vmatpush2.bf16.msra.mxu1 %v12599_v9  ;;  %v11545_v9 = vcombine.low %v403_v43, %v407_v63  ;;  %v507_v37 = vld [vmem:[#allocation2 + $0x490] sm:$0xff] }
 0x2bd   : > { %8534 = vmatprep.subr.bf16.mxu1 %v12592_v33  ;;  %v11538_v33 = vcombine.high %v395_v6, %v399_v3  ;;  %v371_v63 = vld [vmem:[#allocation2 + $0x50] sm:$0xff] }
 0x2be   : > { %8560 = vmatpush1.bf16.msra.mxu0 %v12655_v23  ;;  %v515_v23 = vld [vmem:[#allocation2 + $0x4d0] sm:$0xff] }
 0x2bf   : > { %8586 = vmatprep.subr.bf16.mxu0 %v11562_v26  ;;  %v11665_v26 = vcombine.low %v523_v30, %v527_v5  ;;  %v499_v19 = vld [vmem:[#allocation2 + $0x450] sm:$0xff] }
 0x2c0   : > { %8535 = vmatpush2.bf16.msra.mxu1 %v12591_v25  ;;  %v519_v25 = vld [vmem:[#allocation2 + $0x4f0] sm:$0xff] }
 0x2c1   : > { %8627 = vmatprep.subr.bf16.mxu1 %v11690_v54  ;;  %8578 = vmatmul.mubr.bf16.vlgmr.msra.gmra.mxu0 %v13467_v44  ;;  %v11530_v54 = vcombine.high %v387_v14, %v391_v53  ;;  %v11658_v46 = vcombine.high %v515_v23, %v519_v25  ;;  %v375_v44 = vld [vmem:[#allocation2 + $0x70] sm:$0xff] }
 0x2c2   : > { %8587 = vmatpush1.bf16.msra.mxu0 %v11561_v41  ;;  %8618 = vmatprep.mubr.bf16.mxu0 %v13838_v58  ;;  %v511_v41 = vld [vmem:[#allocation2 + $0x4b0] sm:$0xff]  ;;  %v11513_v30 = vcombine.low %v371_v63, %v375_v44 }
 0x2c3   : > { %v8292_v34 = vpop.f32.mrf.mxu1  ;;  %8537 = vmatmul.mubr.bf16.vlgmr.msra.gmra.mxu1 %v13975_v24  ;;  %8588 = vmatprep.subr.bf16.mxu0 %v11554_v1  ;;  %v11657_v1 = vcombine.low %v515_v23, %v519_v25  ;;  %v11650_v43 = vcombine.high %v507_v37, %v511_v41  ;;  %v503_v47 = vld [vmem:[#allocation2 + $0x470] sm:$0xff] }
 0x2c4   : > { %v14046_v52 = vadd.f32 %v8292_v34, %v14036_v15  ;;  %8628 = vmatpush1.bf16.msra.mxu1 %v11689_v51  ;;  %8659 = vmatprep.mubr.bf16.mxu1 %v13842_v59  ;;  %v11529_v51 = vcombine.low %v387_v14, %v391_v53  ;;  %v11521_v34 = vcombine.low %v379_v31, %v383_v36 }
 0x2c5   : > { %v8294_v21 = vpop.f32.mrf.mxu1  ;;  %8629 = vmatprep.subr.bf16.mxu1 %v11682_v62  ;;  %v11522_v62 = vcombine.high %v379_v31, %v383_v36  ;;  %v11641_v5 = vcombine.low %v499_v19, %v503_v47 }
 0x2c6   : > { %v14050_v4 = vadd.f32 %v8294_v21, %v14039_v0  ;;  %8589 = vmatpush1.bf16.msra.mxu0 %v11553_v48  ;;  %v11537_v0 = vcombine.low %v395_v6, %v399_v3  ;;  %v11649_v48 = vcombine.low %v507_v37, %v511_v41  ;;  %v363_v21 = vld [vmem:[#allocation2 + $0x10] sm:$0xff] }
 0x2c7   : > { %v8296_v15 = vpop.f32.mrf.mxu1  ;;  %8590 = vmatprep.subr.bf16.mxu0 %v11546_v57  ;;  %v11642_v57 = vcombine.high %v499_v19, %v503_v47  ;;  %v491_v6 = vld [vmem:[#allocation2 + $0x410] sm:$0xff] }
 0x2c8   : > { %8630 = vmatpush1.bf16.msra.mxu1 %v11681_v56  ;;  %v11514_v56 = vcombine.high %v371_v63, %v375_v44  ;;  %v495_v3 = vld [vmem:[#allocation2 + $0x430] sm:$0xff] }
 0x2c9   : > { %v8297_v12 = vpop.f32.mrf.mxu1  ;;  %8631 = vmatprep.subr.bf16.mxu1 %v11674_v60  ;;  %v367_v60 = vld [vmem:[#allocation2 + $0x30] sm:$0xff]  ;;  %v11633_v53 = vcombine.low %v491_v6, %v495_v3 }
 0x2ca   : > { %8591 = vmatpush1.bf16.msra.mxu0 %v11545_v9  ;;  %v11506_v15 = vcombine.high %v363_v21, %v367_v60  ;;  %v11634_v9 = vcombine.high %v491_v6, %v495_v3  ;;  %v611_v12 = vld [vmem:[#allocation2 + $0x7d0] sm:$0xff]  ;;  %v11505_v14 = vcombine.low %v363_v21, %v367_v60 }
 0x2cb   : > { %8592 = vmatprep.subr.bf16.mxu0 %v11538_v33  ;;  %v487_v33 = vld [vmem:[#allocation2 + $0x3f0] sm:$0xff] }
 0x2cc   : > { %8632 = vmatpush1.bf16.msra.mxu1 %v11673_v2  ;;  %v483_v2 = vld [vmem:[#allocation2 + $0x3d0] sm:$0xff] }
 0x2cd   : > { %8633 = vmatprep.subr.bf16.mxu1 %v11666_v13  ;;  %v615_v13 = vld [vmem:[#allocation2 + $0x7f0] sm:$0xff]  ;;  %v11626_v23 = vcombine.high %v483_v2, %v487_v33  ;;  %v11625_v31 = vcombine.low %v483_v2, %v487_v33 }
 0x2ce   : > { %8593 = vmatpush1.bf16.msra.mxu0 %v11537_v0  ;;  %v11754_v25 = vcombine.high %v611_v12, %v615_v13  ;;  %v475_v0 = vld [vmem:[#allocation2 + $0x390] sm:$0xff]  ;;  %v11753_v36 = vcombine.low %v611_v12, %v615_v13 }
 0x2cf   : > { %8594 = vmatprep.subr.bf16.mxu0 %v11530_v54  ;;  %v603_v54 = vld [vmem:[#allocation2 + $0x790] sm:$0xff] }
 0x2d0   : > { %8634 = vmatpush1.bf16.msra.mxu1 %v11665_v26  ;;  %v479_v26 = vld [vmem:[#allocation2 + $0x3b0] sm:$0xff] }
 0x2d1   : > { %8635 = vmatprep.subr.bf16.mxu1 %v11658_v46  ;;  %v607_v46 = vld [vmem:[#allocation2 + $0x7b0] sm:$0xff]  ;;  %v11618_v37 = vcombine.high %v475_v0, %v479_v26  ;;  %v11617_v19 = vcombine.low %v475_v0, %v479_v26 }
 0x2d2   : > { %8595 = vmatpush1.bf16.msra.mxu0 %v11529_v51  ;;  %v11746_v41 = vcombine.high %v603_v54, %v607_v46  ;;  %v467_v51 = vld [vmem:[#allocation2 + $0x350] sm:$0xff] }
 0x2d3   : > { %8596 = vmatprep.subr.bf16.mxu0 %v11522_v62  ;;  %v599_v63 = vld [vmem:[#allocation2 + $0x770] sm:$0xff] }
 0x2d4   : > { %8636 = vmatpush1.bf16.msra.mxu1 %v11657_v1  ;;  %v471_v1 = vld [vmem:[#allocation2 + $0x370] sm:$0xff] }
 0x2d5   : > { %8637 = vmatprep.subr.bf16.mxu1 %v11650_v43  ;;  %v595_v43 = vld [vmem:[#allocation2 + $0x750] sm:$0xff] }
 0x2d6   : > { %8597 = vmatpush1.bf16.msra.mxu0 %v11521_v34  ;;  %v11745_v34 = vcombine.low %v603_v54, %v607_v46  ;;  %v459_v21 = vld [vmem:[#allocation2 + $0x310] sm:$0xff] }
 0x2d7   : > { %8598 = vmatprep.subr.bf16.mxu0 %v11514_v56  ;;  %v463_v60 = vld [vmem:[#allocation2 + $0x330] sm:$0xff] }
 0x2d8   : > { %8638 = vmatpush1.bf16.msra.mxu1 %v11649_v48  ;;  %v11610_v48 = vcombine.high %v467_v51, %v471_v1  ;;  %v587_v3 = vld [vmem:[#allocation2 + $0x710] sm:$0xff] }
 0x2d9   : > { %8639 = vmatprep.subr.bf16.mxu1 %v11642_v57  ;;  %v11738_v57 = vcombine.high %v595_v43, %v599_v63  ;;  %v451_v33 = vld [vmem:[#allocation2 + $0x2d0] sm:$0xff] }
 0x2da   : > { %8599 = vmatpush1.bf16.msra.mxu0 %v11513_v30  ;;  %v591_v30 = vld [vmem:[#allocation2 + $0x730] sm:$0xff] }
 0x2db   : > { %8600 = vmatprep.subr.bf16.mxu0 %v11506_v15  ;;  %v11737_v15 = vcombine.low %v595_v43, %v599_v63  ;;  %v11730_v2 = vcombine.high %v587_v3, %v591_v30  ;;  %v455_v12 = vld [vmem:[#allocation2 + $0x2f0] sm:$0xff] }
 0x2dc   : > { %8640 = vmatpush1.bf16.msra.mxu1 %v11641_v5  ;;  %v583_v13 = vld [vmem:[#allocation2 + $0x6f0] sm:$0xff] }
 0x2dd   : > { %8641 = vmatprep.subr.bf16.mxu1 %v11634_v9  ;;  %v11602_v9 = vcombine.high %v459_v21, %v463_v60  ;;  %v443_v0 = vld [vmem:[#allocation2 + $0x290] sm:$0xff] }
 0x2de   : > { %8601 = vmatpush1.bf16.msra.mxu0 %v11505_v14  ;;  %v11601_v14 = vcombine.low %v459_v21, %v463_v60  ;;  %v447_v26 = vld [vmem:[#allocation2 + $0x2b0] sm:$0xff] }
 0x2df   : > { %8602 = vmatprep.subr.bf16.mxu0 %v11626_v23  ;;  %v11594_v23 = vcombine.high %v451_v33, %v455_v12  ;;  %v571_v54 = vld [vmem:[#allocation2 + $0x690] sm:$0xff]  ;;  %v11585_v63 = vcombine.low %v443_v0, %v447_v26 }
 0x2e0   : > { %8642 = vmatpush1.bf16.msra.mxu1 %v11633_v53  ;;  %v11729_v53 = vcombine.low %v587_v3, %v591_v30  ;;  %v575_v46 = vld [vmem:[#allocation2 + $0x6b0] sm:$0xff] }
 0x2e1   : > { %8643 = vmatprep.subr.bf16.mxu1 %v11754_v25  ;;  %v8333_v62 = vpop.f32.mrf.mxu0  ;;  %v567_v43 = vld [vmem:[#allocation2 + $0x670] sm:$0xff] }
 0x2e2   : > { %v14054_v44 = vadd.f32 %v8333_v62, %v14046_v52  ;;  %8603 = vmatpush2.bf16.msra.mxu0 %v11625_v31  ;;  %v11609_v52 = vcombine.low %v467_v51, %v471_v1  ;;  %v11593_v31 = vcombine.low %v451_v33, %v455_v12  ;;  %v435_v51 = vld [vmem:[#allocation2 + $0x250] sm:$0xff] }
 0x2e3   : > { %v8335_v47 = vpop.f32.mrf.mxu0  ;;  %8604 = vmatprep.subr.bf16.mxu0 %v11618_v37  ;;  %v11586_v37 = vcombine.high %v443_v0, %v447_v26  ;;  %v439_v1 = vld [vmem:[#allocation2 + $0x270] sm:$0xff] }
 0x2e4   : > { %8644 = vmatpush2.bf16.msra.mxu1 %v11753_v36  ;;  %v14057_v56 = vadd.f32 %v8335_v47, %v14050_v4  ;;  %v579_v4 = vld [vmem:[#allocation2 + $0x6d0] sm:$0xff]  ;;  %v11578_v47 = vcombine.high %v435_v51, %v439_v1 }
 0x2e5   : > { %8645 = vmatprep.subr.bf16.mxu1 %v11746_v41  ;;  %v8337_v6 = vpop.f32.mrf.mxu0  ;;  %v11722_v25 = vcombine.high %v579_v4, %v583_v13  ;;  %v11721_v36 = vcombine.low %v579_v4, %v583_v13  ;;  %v11714_v41 = vcombine.high %v571_v54, %v575_v46  ;;  %v563_v62 = vld [vmem:[#allocation2 + $0x650] sm:$0xff] }
 0x2e6   : > { %8605 = vmatpush2.bf16.msra.mxu0 %v11617_v19  ;;  %v11713_v19 = vcombine.low %v571_v54, %v575_v46  ;;  %v555_v21 = vld [vmem:[#allocation2 + $0x610] sm:$0xff]  ;;  %v11577_v6 = vcombine.low %v435_v51, %v439_v1  ;;  %v11705_v3 = vcombine.low %v563_v62, %v567_v43 }
 0x2e7   : > { %v8338_v5 = vpop.f32.mrf.mxu0  ;;  %8606 = vmatprep.subr.bf16.mxu0 %v11610_v48  ;;  %v427_v48 = vld [vmem:[#allocation2 + $0x210] sm:$0xff] }
 0x2e8   : > { %8646 = vmatpush2.bf16.msra.mxu1 %v11745_v34  ;;  %v11706_v34 = vcombine.high %v563_v62, %v567_v43  ;;  %v559_v60 = vld [vmem:[#allocation2 + $0x630] sm:$0xff] }
 0x2e9   : > { %8647 = vmatprep.subr.bf16.mxu1 %v11738_v57  ;;  %v431_v57 = vld [vmem:[#allocation2 + $0x230] sm:$0xff]  ;;  %v11697_v12 = vcombine.low %v555_v21, %v559_v60 }
 0x2ea   : > { %8607 = vmatpush2.bf16.msra.mxu0 %v11609_v52  ;;  %v11570_v30 = vcombine.high %v427_v48, %v431_v57  ;;  %v11698_v52 = vcombine.high %v555_v21, %v559_v60  ;;  %v675_v5 = vld [vmem:[#allocation2 + $0x9d0] sm:$0xff]  ;;  %v11569_v33 = vcombine.low %v427_v48, %v431_v57 }
 0x2eb   : > { %8608 = vmatprep.subr.bf16.mxu0 %v11602_v9  ;;  %v803_v9 = vld [vmem:[#allocation2 + $0xdd0] sm:$0xff] }
 0x2ec   : > { %8648 = vmatpush2.bf16.msra.mxu1 %v11737_v15  ;;  %v679_v15 = vld [vmem:[#allocation2 + $0x9f0] sm:$0xff] }
 0x2ed   : > { %8649 = vmatprep.subr.bf16.mxu1 %v11730_v2  ;;  %v807_v2 = vld [vmem:[#allocation2 + $0xdf0] sm:$0xff]  ;;  %v11818_v4 = vcombine.high %v675_v5, %v679_v15  ;;  %v11817_v0 = vcombine.low %v675_v5, %v679_v15 }
 0x2ee   : > { %8609 = vmatpush2.bf16.msra.mxu0 %v11601_v14  ;;  %v11946_v13 = vcombine.high %v803_v9, %v807_v2  ;;  %v667_v14 = vld [vmem:[#allocation2 + $0x990] sm:$0xff]  ;;  %v11945_v26 = vcombine.low %v803_v9, %v807_v2 }
 0x2ef   : > { %8610 = vmatprep.subr.bf16.mxu0 %v11594_v23  ;;  %v795_v23 = vld [vmem:[#allocation2 + $0xd90] sm:$0xff] }
 0x2f0   : > { %8650 = vmatpush2.bf16.msra.mxu1 %v11729_v53  ;;  %v671_v53 = vld [vmem:[#allocation2 + $0x9b0] sm:$0xff] }
 0x2f1   : > { %8651 = vmatprep.subr.bf16.mxu1 %v11722_v25  ;;  %v799_v25 = vld [vmem:[#allocation2 + $0xdb0] sm:$0xff]  ;;  %v11810_v54 = vcombine.high %v667_v14, %v671_v53  ;;  %v11809_v1 = vcombine.low %v667_v14, %v671_v53 }
 0x2f2   : > { %8611 = vmatpush2.bf16.msra.mxu0 %v11593_v31  ;;  %v11938_v46 = vcombine.high %v795_v23, %v799_v25  ;;  %v659_v31 = vld [vmem:[#allocation2 + $0x950] sm:$0xff]  ;;  %v11937_v43 = vcombine.low %v795_v23, %v799_v25 }
 0x2f3   : > { %8612 = vmatprep.subr.bf16.mxu0 %v11586_v37  ;;  %v787_v37 = vld [vmem:[#allocation2 + $0xd50] sm:$0xff] }
 0x2f4   : > { %8652 = vmatpush2.bf16.msra.mxu1 %v11721_v36  ;;  %v663_v36 = vld [vmem:[#allocation2 + $0x970] sm:$0xff] }
 0x2f5   : > { %8653 = vmatprep.subr.bf16.mxu1 %v11714_v41  ;;  %v791_v41 = vld [vmem:[#allocation2 + $0xd70] sm:$0xff] }
 0x2f6   : > { %8613 = vmatpush2.bf16.msra.mxu0 %v11585_v63  ;;  %v11802_v63 = vcombine.high %v659_v31, %v663_v36  ;;  %v655_v48 = vld [vmem:[#allocation2 + $0x930] sm:$0xff] }
 0x2f7   : > { %8614 = vmatprep.subr.bf16.mxu0 %v11578_v47  ;;  %v11930_v47 = vcombine.high %v787_v37, %v791_v41  ;;  %v779_v21 = vld [vmem:[#allocation2 + $0xd10] sm:$0xff] }
 0x2f8   : > { %8654 = vmatpush2.bf16.msra.mxu1 %v11713_v19  ;;  %v783_v60 = vld [vmem:[#allocation2 + $0xd30] sm:$0xff] }
 0x2f9   : > { %8655 = vmatprep.subr.bf16.mxu1 %v11706_v34  ;;  %v651_v34 = vld [vmem:[#allocation2 + $0x910] sm:$0xff]  ;;  %v11922_v5 = vcombine.high %v779_v21, %v783_v60 }
 0x2fa   : > { %8615 = vmatpush2.bf16.msra.mxu0 %v11577_v6  ;;  %v11801_v6 = vcombine.low %v659_v31, %v663_v36  ;;  %v643_v15 = vld [vmem:[#allocation2 + $0x8d0] sm:$0xff] }
 0x2fb   : > { %8616 = vmatprep.subr.bf16.mxu0 %v11570_v30  ;;  %v11794_v30 = vcombine.high %v651_v34, %v655_v48  ;;  %v647_v9 = vld [vmem:[#allocation2 + $0x8f0] sm:$0xff] }
 0x2fc   : > { %8656 = vmatpush2.bf16.msra.mxu1 %v11705_v3  ;;  %v11929_v3 = vcombine.low %v787_v37, %v791_v41  ;;  %v771_v2 = vld [vmem:[#allocation2 + $0xcd0] sm:$0xff] }
 0x2fd   : > { %8657 = vmatprep.subr.bf16.mxu1 %v11698_v52  ;;  %v635_v14 = vld [vmem:[#allocation2 + $0x890] sm:$0xff] }
 0x2fe   : > { %8617 = vmatpush2.bf16.msra.mxu0 %v11569_v33  ;;  %v775_v33 = vld [vmem:[#allocation2 + $0xcf0] sm:$0xff] }
 0x2ff   : > { %8668 = vmatprep.subr.bf16.mxu0 %v11818_v4  ;;  %v11786_v4 = vcombine.high %v643_v15, %v647_v9  ;;  %v639_v53 = vld [vmem:[#allocation2 + $0x8b0] sm:$0xff] }
 0x300   : > { %8658 = vmatpush2.bf16.msra.mxu1 %v11697_v12  ;;  %v11921_v12 = vcombine.low %v779_v21, %v783_v60  ;;  %v763_v23 = vld [vmem:[#allocation2 + $0xc90] sm:$0xff] }
 0x301   : > { %8709 = vmatprep.subr.bf16.mxu1 %v11946_v13  ;;  %8619 = vmatmul.mubr.bf16.vlgmr.msra.gmra.mxu0 %v13848_v16  ;;  %v11914_v13 = vcombine.high %v771_v2, %v775_v33  ;;  %v767_v25 = vld [vmem:[#allocation2 + $0xcb0] sm:$0xff] }
 0x302   : > { %8669 = vmatpush1.bf16.msra.mxu0 %v11817_v0  ;;  %8700 = vmatprep.mubr.bf16.mxu0 %v13866_v28  ;;  %v11785_v0 = vcombine.low %v643_v15, %v647_v9  ;;  %v627_v31 = vld [vmem:[#allocation2 + $0x850] sm:$0xff] }
 0x303   : > { %v8374_v51 = vpop.f32.mrf.mxu1  ;;  %8660 = vmatmul.mubr.bf16.vlgmr.msra.gmra.mxu1 %v13857_v20  ;;  %8670 = vmatprep.subr.bf16.mxu0 %v11810_v54  ;;  %v11778_v54 = vcombine.high %v635_v14, %v639_v53  ;;  %v631_v36 = vld [vmem:[#allocation2 + $0x870] sm:$0xff] }
 0x304   : > { %v14062_v62 = vadd.f32 %v8374_v51, %v14054_v44  ;;  %8710 = vmatpush1.bf16.msra.mxu1 %v11945_v26  ;;  %8741 = vmatprep.mubr.bf16.mxu1 %v13871_v29  ;;  %v11913_v26 = vcombine.low %v771_v2, %v775_v33  ;;  %v755_v37 = vld [vmem:[#allocation2 + $0xc50] sm:$0xff]  ;;  %v11777_v51 = vcombine.low %v635_v14, %v639_v53 }
 0x305   : > { %v8376_v19 = vpop.f32.mrf.mxu1  ;;  %8711 = vmatprep.subr.bf16.mxu1 %v11938_v46  ;;  %v11906_v46 = vcombine.high %v763_v23, %v767_v25  ;;  %v759_v41 = vld [vmem:[#allocation2 + $0xc70] sm:$0xff]  ;;  %v11769_v21 = vcombine.low %v627_v31, %v631_v36 }
 0x306   : > { %v14066_v57 = vadd.f32 %v8376_v19, %v14057_v56  ;;  %8671 = vmatpush1.bf16.msra.mxu0 %v11809_v1  ;;  %v11793_v56 = vcombine.low %v651_v34, %v655_v48  ;;  %v11905_v1 = vcombine.low %v763_v23, %v767_v25  ;;  %v619_v19 = vld [vmem:[#allocation2 + $0x810] sm:$0xff]  ;;  %v11897_v60 = vcombine.low %v755_v37, %v759_v41 }
 0x307   : > { %v8378_v44 = vpop.f32.mrf.mxu1  ;;  %8672 = vmatprep.subr.bf16.mxu0 %v11802_v63  ;;  %v11898_v63 = vcombine.high %v755_v37, %v759_v41  ;;  %v747_v34 = vld [vmem:[#allocation2 + $0xc10] sm:$0xff] }
 0x308   : > { %8712 = vmatpush1.bf16.msra.mxu1 %v11937_v43  ;;  %v11770_v43 = vcombine.high %v627_v31, %v631_v36  ;;  %v751_v48 = vld [vmem:[#allocation2 + $0xc30] sm:$0xff] }
 0x309   : > { %v8379_v52 = vpop.f32.mrf.mxu1  ;;  %8713 = vmatprep.subr.bf16.mxu1 %v11930_v47  ;;  %v623_v47 = vld [vmem:[#allocation2 + $0x830] sm:$0xff]  ;;  %v11889_v9 = vcombine.low %v747_v34, %v751_v48 }
 0x30a   : > { %8673 = vmatpush1.bf16.msra.mxu0 %v11801_v6  ;;  %v11762_v44 = vcombine.high %v619_v19, %v623_v47  ;;  %v11890_v6 = vcombine.high %v747_v34, %v751_v48  ;;  %v867_v52 = vld [vmem:[#allocation2 + $0xfd0] sm:$0xff]  ;;  %v11761_v15 = vcombine.low %v619_v19, %v623_v47 }
 0x30b   : > { %8674 = vmatprep.subr.bf16.mxu0 %v11794_v30  ;;  %v743_v30 = vld [vmem:[#allocation2 + $0xbf0] sm:$0xff] }
 0x30c   : > { %8714 = vmatpush1.bf16.msra.mxu1 %v11929_v3  ;;  %v739_v3 = vld [vmem:[#allocation2 + $0xbd0] sm:$0xff] }
 0x30d   : > { %8715 = vmatprep.subr.bf16.mxu1 %v11922_v5  ;;  %v871_v5 = vld [vmem:[#allocation2 + $0xff0] sm:$0xff]  ;;  %v11882_v2 = vcombine.high %v739_v3, %v743_v30  ;;  %v11881_v14 = vcombine.low %v739_v3, %v743_v30 }
 0x30e   : > { %8675 = vmatpush1.bf16.msra.mxu0 %v11793_v56  ;;  %v12010_v33 = vcombine.high %v867_v52, %v871_v5  ;;  %v731_v56 = vld [vmem:[#allocation2 + $0xb90] sm:$0xff]  ;;  %v12009_v53 = vcombine.low %v867_v52, %v871_v5 }
 0x30f   : > { %8676 = vmatprep.subr.bf16.mxu0 %v11786_v4  ;;  %v859_v4 = vld [vmem:[#allocation2 + $0xf90] sm:$0xff] }
 0x310   : > { %8716 = vmatpush1.bf16.msra.mxu1 %v11921_v12  ;;  %v735_v12 = vld [vmem:[#allocation2 + $0xbb0] sm:$0xff] }
 0x311   : > { %8717 = vmatprep.subr.bf16.mxu1 %v11914_v13  ;;  %v863_v13 = vld [vmem:[#allocation2 + $0xfb0] sm:$0xff]  ;;  %v11874_v23 = vcombine.high %v731_v56, %v735_v12  ;;  %v11873_v37 = vcombine.low %v731_v56, %v735_v12 }
 0x312   : > { %8677 = vmatpush1.bf16.msra.mxu0 %v11785_v0  ;;  %v12002_v25 = vcombine.high %v859_v4, %v863_v13  ;;  %v723_v0 = vld [vmem:[#allocation2 + $0xb50] sm:$0xff] }
 0x313   : > { %8678 = vmatprep.subr.bf16.mxu0 %v11778_v54  ;;  %v855_v31 = vld [vmem:[#allocation2 + $0xf70] sm:$0xff] }
 0x314   : > { %8718 = vmatpush1.bf16.msra.mxu1 %v11913_v26  ;;  %v727_v26 = vld [vmem:[#allocation2 + $0xb70] sm:$0xff] }
 0x315   : > { %8719 = vmatprep.subr.bf16.mxu1 %v11906_v46  ;;  %v851_v46 = vld [vmem:[#allocation2 + $0xf50] sm:$0xff] }
 0x316   : > { %8679 = vmatpush1.bf16.msra.mxu0 %v11777_v51  ;;  %v12001_v51 = vcombine.low %v859_v4, %v863_v13  ;;  %v715_v19 = vld [vmem:[#allocation2 + $0xb10] sm:$0xff] }
 0x317   : > { %8680 = vmatprep.subr.bf16.mxu0 %v11770_v43  ;;  %v719_v47 = vld [vmem:[#allocation2 + $0xb30] sm:$0xff] }
 0x318   : > { %8720 = vmatpush1.bf16.msra.mxu1 %v11905_v1  ;;  %v11866_v1 = vcombine.high %v723_v0, %v727_v26  ;;  %v843_v48 = vld [vmem:[#allocation2 + $0xf10] sm:$0xff] }
 0x319   : > { %8721 = vmatprep.subr.bf16.mxu1 %v11898_v63  ;;  %v11994_v63 = vcombine.high %v851_v46, %v855_v31  ;;  %v707_v30 = vld [vmem:[#allocation2 + $0xad0] sm:$0xff] }
 0x31a   : > { %8681 = vmatpush1.bf16.msra.mxu0 %v11769_v21  ;;  %v847_v21 = vld [vmem:[#allocation2 + $0xf30] sm:$0xff] }
 0x31b   : > { %8682 = vmatprep.subr.bf16.mxu0 %v11762_v44  ;;  %v11993_v44 = vcombine.low %v851_v46, %v855_v31  ;;  %v11986_v3 = vcombine.high %v843_v48, %v847_v21  ;;  %v711_v52 = vld [vmem:[#allocation2 + $0xaf0] sm:$0xff] }
 0x31c   : > { %8722 = vmatpush1.bf16.msra.mxu1 %v11897_v60  ;;  %v839_v5 = vld [vmem:[#allocation2 + $0xef0] sm:$0xff] }
 0x31d   : > { %8723 = vmatprep.subr.bf16.mxu1 %v11890_v6  ;;  %v11858_v6 = vcombine.high %v715_v19, %v719_v47  ;;  %v699_v56 = vld [vmem:[#allocation2 + $0xa90] sm:$0xff] }
 0x31e   : > { %8683 = vmatpush1.bf16.msra.mxu0 %v11761_v15  ;;  %v11857_v15 = vcombine.low %v715_v19, %v719_v47  ;;  %v703_v12 = vld [vmem:[#allocation2 + $0xab0] sm:$0xff] }
 0x31f   : > { %8684 = vmatprep.subr.bf16.mxu0 %v11882_v2  ;;  %v11850_v2 = vcombine.high %v707_v30, %v711_v52  ;;  %v827_v4 = vld [vmem:[#allocation2 + $0xe90] sm:$0xff]  ;;  %v11841_v31 = vcombine.low %v699_v56, %v703_v12 }
 0x320   : > { %8724 = vmatpush1.bf16.msra.mxu1 %v11889_v9  ;;  %v11985_v9 = vcombine.low %v843_v48, %v847_v21  ;;  %v831_v13 = vld [vmem:[#allocation2 + $0xeb0] sm:$0xff] }
 0x321   : > { %8725 = vmatprep.subr.bf16.mxu1 %v12010_v33  ;;  %v8415_v54 = vpop.f32.mrf.mxu0  ;;  %v823_v46 = vld [vmem:[#allocation2 + $0xe70] sm:$0xff] }
 0x322   : > { %v14070_v36 = vadd.f32 %v8415_v54, %v14062_v62  ;;  %8685 = vmatpush2.bf16.msra.mxu0 %v11881_v14  ;;  %v11865_v62 = vcombine.low %v723_v0, %v727_v26  ;;  %v11849_v14 = vcombine.low %v707_v30, %v711_v52  ;;  %v691_v0 = vld [vmem:[#allocation2 + $0xa50] sm:$0xff] }
 0x323   : > { %v8417_v41 = vpop.f32.mrf.mxu0  ;;  %8686 = vmatprep.subr.bf16.mxu0 %v11874_v23  ;;  %v11842_v23 = vcombine.high %v699_v56, %v703_v12  ;;  %v695_v26 = vld [vmem:[#allocation2 + $0xa70] sm:$0xff] }
 0x324   : > { %8726 = vmatpush2.bf16.msra.mxu1 %v12009_v53  ;;  %v14073_v43 = vadd.f32 %v8417_v41, %v14066_v57  ;;  %v835_v57 = vld [vmem:[#allocation2 + $0xed0] sm:$0xff]  ;;  %v11834_v41 = vcombine.high %v691_v0, %v695_v26 }
 0x325   : > { %8727 = vmatprep.subr.bf16.mxu1 %v12002_v25  ;;  %v8419_v34 = vpop.f32.mrf.mxu0  ;;  %v11978_v33 = vcombine.high %v835_v57, %v839_v5  ;;  %v11977_v53 = vcombine.low %v835_v57, %v839_v5  ;;  %v11970_v25 = vcombine.high %v827_v4, %v831_v13  ;;  %v819_v54 = vld [vmem:[#allocation2 + $0xe50] sm:$0xff] }
 0x326   : > { %8687 = vmatpush2.bf16.msra.mxu0 %v11873_v37  ;;  %v11969_v37 = vcombine.low %v827_v4, %v831_v13  ;;  %v811_v19 = vld [vmem:[#allocation2 + $0xe10] sm:$0xff]  ;;  %v11833_v34 = vcombine.low %v691_v0, %v695_v26  ;;  %v11961_v48 = vcombine.low %v819_v54, %v823_v46 }
 0x327   : > { %v8420_v60 = vpop.f32.mrf.mxu0  ;;  %8688 = vmatprep.subr.bf16.mxu0 %v11866_v1  ;;  %v683_v1 = vld [vmem:[#allocation2 + $0xa10] sm:$0xff] }
 0x328   : > { %8728 = vmatpush2.bf16.msra.mxu1 %v12001_v51  ;;  %v11962_v51 = vcombine.high %v819_v54, %v823_v46  ;;  %v815_v47 = vld [vmem:[#allocation2 + $0xe30] sm:$0xff] }
 0x329   : > { %8729 = vmatprep.subr.bf16.mxu1 %v11994_v63  ;;  %v687_v63 = vld [vmem:[#allocation2 + $0xa30] sm:$0xff]  ;;  %v11953_v52 = vcombine.low %v811_v19, %v815_v47 }
 0x32a   : > { %8689 = vmatpush2.bf16.msra.mxu0 %v11865_v62  ;;  %v11826_v21 = vcombine.high %v683_v1, %v687_v63  ;;  %v11954_v62 = vcombine.high %v811_v19, %v815_v47  ;;  %v931_v60 = vld [vmem:[#allocation2 + $0x11d0] sm:$0xff]  ;;  %v11825_v30 = vcombine.low %v683_v1, %v687_v63 }
 0x32b   : > { %8690 = vmatprep.subr.bf16.mxu0 %v11858_v6  ;;  %v1059_v6 = vld [vmem:[#allocation2 + $0x15d0] sm:$0xff] }
 0x32c   : > { %8730 = vmatpush2.bf16.msra.mxu1 %v11993_v44  ;;  %v935_v44 = vld [vmem:[#allocation2 + $0x11f0] sm:$0xff] }
 0x32d   : > { %8731 = vmatprep.subr.bf16.mxu1 %v11986_v3  ;;  %v1063_v3 = vld [vmem:[#allocation2 + $0x15f0] sm:$0xff]  ;;  %v12074_v57 = vcombine.high %v931_v60, %v935_v44  ;;  %v12073_v56 = vcombine.low %v931_v60, %v935_v44 }
 0x32e   : > { %8691 = vmatpush2.bf16.msra.mxu0 %v11857_v15  ;;  %v12202_v5 = vcombine.high %v1059_v6, %v1063_v3  ;;  %v923_v15 = vld [vmem:[#allocation2 + $0x1190] sm:$0xff]  ;;  %v12201_v12 = vcombine.low %v1059_v6, %v1063_v3 }
 0x32f   : > { %8692 = vmatprep.subr.bf16.mxu0 %v11850_v2  ;;  %v1051_v2 = vld [vmem:[#allocation2 + $0x1590] sm:$0xff] }
 0x330   : > { %8732 = vmatpush2.bf16.msra.mxu1 %v11985_v9  ;;  %v927_v9 = vld [vmem:[#allocation2 + $0x11b0] sm:$0xff] }
 0x331   : > { %8733 = vmatprep.subr.bf16.mxu1 %v11978_v33  ;;  %v1055_v33 = vld [vmem:[#allocation2 + $0x15b0] sm:$0xff]  ;;  %v12066_v4 = vcombine.high %v923_v15, %v927_v9  ;;  %v12065_v26 = vcombine.low %v923_v15, %v927_v9 }
 0x332   : > { %8693 = vmatpush2.bf16.msra.mxu0 %v11849_v14  ;;  %v12194_v13 = vcombine.high %v1051_v2, %v1055_v33  ;;  %v915_v14 = vld [vmem:[#allocation2 + $0x1150] sm:$0xff]  ;;  %v12193_v46 = vcombine.low %v1051_v2, %v1055_v33 }
 0x333   : > { %8694 = vmatprep.subr.bf16.mxu0 %v11842_v23  ;;  %v1043_v23 = vld [vmem:[#allocation2 + $0x1550] sm:$0xff] }
 0x334   : > { %8734 = vmatpush2.bf16.msra.mxu1 %v11977_v53  ;;  %v919_v53 = vld [vmem:[#allocation2 + $0x1170] sm:$0xff] }
 0x335   : > { %8735 = vmatprep.subr.bf16.mxu1 %v11970_v25  ;;  %v1047_v25 = vld [vmem:[#allocation2 + $0x1570] sm:$0xff] }
 0x336   : > { %8695 = vmatpush2.bf16.msra.mxu0 %v11841_v31  ;;  %v12058_v31 = vcombine.high %v915_v14, %v919_v53  ;;  %v911_v1 = vld [vmem:[#allocation2 + $0x1130] sm:$0xff] }
 0x337   : > { %8696 = vmatprep.subr.bf16.mxu0 %v11834_v41  ;;  %v12186_v41 = vcombine.high %v1043_v23, %v1047_v25  ;;  %v1035_v19 = vld [vmem:[#allocation2 + $0x1510] sm:$0xff] }
 0x338   : > { %8736 = vmatpush2.bf16.msra.mxu1 %v11969_v37  ;;  %v1039_v47 = vld [vmem:[#allocation2 + $0x1530] sm:$0xff] }
 0x339   : > { %8737 = vmatprep.subr.bf16.mxu1 %v11962_v51  ;;  %v907_v51 = vld [vmem:[#allocation2 + $0x1110] sm:$0xff]  ;;  %v12178_v60 = vcombine.high %v1035_v19, %v1039_v47 }
 0x33a   : > { %8697 = vmatpush2.bf16.msra.mxu0 %v11833_v34  ;;  %v12057_v34 = vcombine.low %v915_v14, %v919_v53  ;;  %v899_v44 = vld [vmem:[#allocation2 + $0x10d0] sm:$0xff] }
 0x33b   : > { %8698 = vmatprep.subr.bf16.mxu0 %v11826_v21  ;;  %v12050_v21 = vcombine.high %v907_v51, %v911_v1  ;;  %v903_v6 = vld [vmem:[#allocation2 + $0x10f0] sm:$0xff] }
 0x33c   : > { %8738 = vmatpush2.bf16.msra.mxu1 %v11961_v48  ;;  %v12185_v48 = vcombine.low %v1043_v23, %v1047_v25  ;;  %v1027_v3 = vld [vmem:[#allocation2 + $0x14d0] sm:$0xff] }
 0x33d   : > { %8739 = vmatprep.subr.bf16.mxu1 %v11954_v62  ;;  %v891_v15 = vld [vmem:[#allocation2 + $0x1090] sm:$0xff] }
 0x33e   : > { %8699 = vmatpush2.bf16.msra.mxu0 %v11825_v30  ;;  %v1031_v30 = vld [vmem:[#allocation2 + $0x14f0] sm:$0xff] }
 0x33f   : > { %8750 = vmatprep.subr.bf16.mxu0 %v12074_v57  ;;  %v12042_v57 = vcombine.high %v899_v44, %v903_v6  ;;  %v895_v9 = vld [vmem:[#allocation2 + $0x10b0] sm:$0xff] }
 0x340   : > { %8740 = vmatpush2.bf16.msra.mxu1 %v11953_v52  ;;  %v12177_v52 = vcombine.low %v1035_v19, %v1039_v47  ;;  %v1019_v2 = vld [vmem:[#allocation2 + $0x1490] sm:$0xff] }
 0x341   : > { %8791 = vmatprep.subr.bf16.mxu1 %v12202_v5  ;;  %8701 = vmatmul.mubr.bf16.vlgmr.msra.gmra.mxu0 %v13883_v39  ;;  %v12170_v5 = vcombine.high %v1027_v3, %v1031_v30  ;;  %v1023_v33 = vld [vmem:[#allocation2 + $0x14b0] sm:$0xff] }
 0x342   : > { %8751 = vmatpush1.bf16.msra.mxu0 %v12073_v56  ;;  %8782 = vmatprep.mubr.bf16.mxu0 %v13896_v22  ;;  %v12041_v56 = vcombine.low %v899_v44, %v903_v6  ;;  %v883_v14 = vld [vmem:[#allocation2 + $0x1050] sm:$0xff] }
 0x343   : > { %v8456_v0 = vpop.f32.mrf.mxu1  ;;  %8742 = vmatmul.mubr.bf16.vlgmr.msra.gmra.mxu1 %v13887_v40  ;;  %8752 = vmatprep.subr.bf16.mxu0 %v12066_v4  ;;  %v12034_v4 = vcombine.high %v891_v15, %v895_v9  ;;  %v887_v53 = vld [vmem:[#allocation2 + $0x1070] sm:$0xff] }
 0x344   : > { %v14078_v54 = vadd.f32 %v8456_v0, %v14070_v36  ;;  %8792 = vmatpush1.bf16.msra.mxu1 %v12201_v12  ;;  %8823 = vmatprep.mubr.bf16.mxu1 %v13901_v49  ;;  %v12169_v12 = vcombine.low %v1027_v3, %v1031_v30  ;;  %v1011_v23 = vld [vmem:[#allocation2 + $0x1450] sm:$0xff]  ;;  %v12033_v0 = vcombine.low %v891_v15, %v895_v9 }
 0x345   : > { %v8458_v37 = vpop.f32.mrf.mxu1  ;;  %8793 = vmatprep.subr.bf16.mxu1 %v12194_v13  ;;  %v12162_v13 = vcombine.high %v1019_v2, %v1023_v33  ;;  %v1015_v25 = vld [vmem:[#allocation2 + $0x1470] sm:$0xff]  ;;  %v12025_v19 = vcombine.low %v883_v14, %v887_v53 }
 0x346   : > { %v14082_v63 = vadd.f32 %v8458_v37, %v14073_v43  ;;  %8753 = vmatpush1.bf16.msra.mxu0 %v12065_v26  ;;  %v12049_v43 = vcombine.low %v907_v51, %v911_v1  ;;  %v12161_v26 = vcombine.low %v1019_v2, %v1023_v33  ;;  %v875_v37 = vld [vmem:[#allocation2 + $0x1010] sm:$0xff]  ;;  %v12153_v47 = vcombine.low %v1011_v23, %v1015_v25 }
 0x347   : > { %v8460_v36 = vpop.f32.mrf.mxu1  ;;  %8754 = vmatprep.subr.bf16.mxu0 %v12058_v31  ;;  %v12154_v31 = vcombine.high %v1011_v23, %v1015_v25  ;;  %v1003_v51 = vld [vmem:[#allocation2 + $0x1410] sm:$0xff] }
 0x348   : > { %8794 = vmatpush1.bf16.msra.mxu1 %v12193_v46  ;;  %v12026_v46 = vcombine.high %v883_v14, %v887_v53  ;;  %v1007_v1 = vld [vmem:[#allocation2 + $0x1430] sm:$0xff] }
 0x349   : > { %v8461_v62 = vpop.f32.mrf.mxu1  ;;  %8795 = vmatprep.subr.bf16.mxu1 %v12186_v41  ;;  %v879_v41 = vld [vmem:[#allocation2 + $0x1030] sm:$0xff]  ;;  %v12145_v6 = vcombine.low %v1003_v51, %v1007_v1 }
 0x34a   : > { %8755 = vmatpush1.bf16.msra.mxu0 %v12057_v34  ;;  %v12018_v36 = vcombine.high %v875_v37, %v879_v41  ;;  %v12146_v34 = vcombine.high %v1003_v51, %v1007_v1  ;;  %v1123_v62 = vld [vmem:[#allocation2 + $0x17d0] sm:$0xff]  ;;  %v12017_v44 = vcombine.low %v875_v37, %v879_v41 }
 0x34b   : > { %8756 = vmatprep.subr.bf16.mxu0 %v12050_v21  ;;  %v999_v21 = vld [vmem:[#allocation2 + $0x13f0] sm:$0xff] }
 0x34c   : > { %8796 = vmatpush1.bf16.msra.mxu1 %v12185_v48  ;;  %v995_v48 = vld [vmem:[#allocation2 + $0x13d0] sm:$0xff] }
 0x34d   : > { %8797 = vmatprep.subr.bf16.mxu1 %v12178_v60  ;;  %v1127_v60 = vld [vmem:[#allocation2 + $0x17f0] sm:$0xff]  ;;  %v12138_v3 = vcombine.high %v995_v48, %v999_v21  ;;  %v12137_v15 = vcombine.low %v995_v48, %v999_v21 }
 0x34e   : > { %8757 = vmatpush1.bf16.msra.mxu0 %v12049_v43  ;;  %v12266_v30 = vcombine.high %v1123_v62, %v1127_v60  ;;  %v987_v43 = vld [vmem:[#allocation2 + $0x1390] sm:$0xff]  ;;  %v12265_v9 = vcombine.low %v1123_v62, %v1127_v60 }
 0x34f   : > { %8758 = vmatprep.subr.bf16.mxu0 %v12042_v57  ;;  %v1115_v57 = vld [vmem:[#allocation2 + $0x1790] sm:$0xff] }
 0x350   : > { %8798 = vmatpush1.bf16.msra.mxu1 %v12177_v52  ;;  %v991_v52 = vld [vmem:[#allocation2 + $0x13b0] sm:$0xff] }
 0x351   : > { %8799 = vmatprep.subr.bf16.mxu1 %v12170_v5  ;;  %v1119_v5 = vld [vmem:[#allocation2 + $0x17b0] sm:$0xff]  ;;  %v12130_v2 = vcombine.high %v987_v43, %v991_v52  ;;  %v12129_v23 = vcombine.low %v987_v43, %v991_v52 }
 0x352   : > { %8759 = vmatpush1.bf16.msra.mxu0 %v12041_v56  ;;  %v12258_v33 = vcombine.high %v1115_v57, %v1119_v5  ;;  %v979_v56 = vld [vmem:[#allocation2 + $0x1350] sm:$0xff] }
 0x353   : > { %8760 = vmatprep.subr.bf16.mxu0 %v12034_v4  ;;  %v1111_v14 = vld [vmem:[#allocation2 + $0x1770] sm:$0xff] }
 0x354   : > { %8800 = vmatpush1.bf16.msra.mxu1 %v12169_v12  ;;  %v983_v12 = vld [vmem:[#allocation2 + $0x1370] sm:$0xff] }
 0x355   : > { %8801 = vmatprep.subr.bf16.mxu1 %v12162_v13  ;;  %v1107_v13 = vld [vmem:[#allocation2 + $0x1750] sm:$0xff] }
 0x356   : > { %8761 = vmatpush1.bf16.msra.mxu0 %v12033_v0  ;;  %v12257_v0 = vcombine.low %v1115_v57, %v1119_v5  ;;  %v971_v37 = vld [vmem:[#allocation2 + $0x1310] sm:$0xff] }
 0x357   : > { %8762 = vmatprep.subr.bf16.mxu0 %v12026_v46  ;;  %v975_v41 = vld [vmem:[#allocation2 + $0x1330] sm:$0xff] }
 0x358   : > { %8802 = vmatpush1.bf16.msra.mxu1 %v12161_v26  ;;  %v12122_v26 = vcombine.high %v979_v56, %v983_v12  ;;  %v1099_v1 = vld [vmem:[#allocation2 + $0x1710] sm:$0xff] }
 0x359   : > { %8803 = vmatprep.subr.bf16.mxu1 %v12154_v31  ;;  %v12250_v31 = vcombine.high %v1107_v13, %v1111_v14  ;;  %v963_v21 = vld [vmem:[#allocation2 + $0x12d0] sm:$0xff] }
 0x35a   : > { %8763 = vmatpush1.bf16.msra.mxu0 %v12025_v19  ;;  %v1103_v19 = vld [vmem:[#allocation2 + $0x1730] sm:$0xff] }
 0x35b   : > { %8764 = vmatprep.subr.bf16.mxu0 %v12018_v36  ;;  %v12249_v36 = vcombine.low %v1107_v13, %v1111_v14  ;;  %v12242_v48 = vcombine.high %v1099_v1, %v1103_v19  ;;  %v967_v62 = vld [vmem:[#allocation2 + $0x12f0] sm:$0xff] }
 0x35c   : > { %8804 = vmatpush1.bf16.msra.mxu1 %v12153_v47  ;;  %v1095_v60 = vld [vmem:[#allocation2 + $0x16f0] sm:$0xff] }
 0x35d   : > { %8805 = vmatprep.subr.bf16.mxu1 %v12146_v34  ;;  %v12114_v34 = vcombine.high %v971_v37, %v975_v41  ;;  %v955_v43 = vld [vmem:[#allocation2 + $0x1290] sm:$0xff] }
 0x35e   : > { %8765 = vmatpush1.bf16.msra.mxu0 %v12017_v44  ;;  %v12113_v44 = vcombine.low %v971_v37, %v975_v41  ;;  %v959_v52 = vld [vmem:[#allocation2 + $0x12b0] sm:$0xff] }
 0x35f   : > { %8766 = vmatprep.subr.bf16.mxu0 %v12138_v3  ;;  %v12106_v3 = vcombine.high %v963_v21, %v967_v62  ;;  %v1083_v57 = vld [vmem:[#allocation2 + $0x1690] sm:$0xff]  ;;  %v12097_v14 = vcombine.low %v955_v43, %v959_v52 }
 0x360   : > { %8806 = vmatpush1.bf16.msra.mxu1 %v12145_v6  ;;  %v12241_v6 = vcombine.low %v1099_v1, %v1103_v19  ;;  %v1087_v5 = vld [vmem:[#allocation2 + $0x16b0] sm:$0xff] }
 0x361   : > { %8807 = vmatprep.subr.bf16.mxu1 %v12266_v30  ;;  %v8497_v4 = vpop.f32.mrf.mxu0  ;;  %v1079_v13 = vld [vmem:[#allocation2 + $0x1670] sm:$0xff] }
 0x362   : > { %v14086_v53 = vadd.f32 %v8497_v4, %v14078_v54  ;;  %8767 = vmatpush2.bf16.msra.mxu0 %v12137_v15  ;;  %v12121_v54 = vcombine.low %v979_v56, %v983_v12  ;;  %v12105_v15 = vcombine.low %v963_v21, %v967_v62  ;;  %v947_v56 = vld [vmem:[#allocation2 + $0x1250] sm:$0xff] }
 0x363   : > { %v8499_v25 = vpop.f32.mrf.mxu0  ;;  %8768 = vmatprep.subr.bf16.mxu0 %v12130_v2  ;;  %v12098_v2 = vcombine.high %v955_v43, %v959_v52  ;;  %v951_v12 = vld [vmem:[#allocation2 + $0x1270] sm:$0xff] }
 0x364   : > { %8808 = vmatpush2.bf16.msra.mxu1 %v12265_v9  ;;  %v14089_v46 = vadd.f32 %v8499_v25, %v14082_v63  ;;  %v1091_v63 = vld [vmem:[#allocation2 + $0x16d0] sm:$0xff]  ;;  %v12090_v25 = vcombine.high %v947_v56, %v951_v12 }
 0x365   : > { %8809 = vmatprep.subr.bf16.mxu1 %v12258_v33  ;;  %v8501_v51 = vpop.f32.mrf.mxu0  ;;  %v12234_v30 = vcombine.high %v1091_v63, %v1095_v60  ;;  %v12233_v9 = vcombine.low %v1091_v63, %v1095_v60  ;;  %v12226_v33 = vcombine.high %v1083_v57, %v1087_v5  ;;  %v1075_v4 = vld [vmem:[#allocation2 + $0x1650] sm:$0xff] }
 0x366   : > { %8769 = vmatpush2.bf16.msra.mxu0 %v12129_v23  ;;  %v12225_v23 = vcombine.low %v1083_v57, %v1087_v5  ;;  %v1067_v37 = vld [vmem:[#allocation2 + $0x1610] sm:$0xff]  ;;  %v12089_v51 = vcombine.low %v947_v56, %v951_v12  ;;  %v12217_v1 = vcombine.low %v1075_v4, %v1079_v13 }
 0x367   : > { %v8502_v47 = vpop.f32.mrf.mxu0  ;;  %8770 = vmatprep.subr.bf16.mxu0 %v12122_v26  ;;  %v939_v26 = vld [vmem:[#allocation2 + $0x1210] sm:$0xff] }
 0x368   : > { %8810 = vmatpush2.bf16.msra.mxu1 %v12257_v0  ;;  %v12218_v0 = vcombine.high %v1075_v4, %v1079_v13  ;;  %v1071_v41 = vld [vmem:[#allocation2 + $0x1630] sm:$0xff] }
 0x369   : > { %8811 = vmatprep.subr.bf16.mxu1 %v12250_v31  ;;  %v943_v31 = vld [vmem:[#allocation2 + $0x1230] sm:$0xff]  ;;  %v12209_v62 = vcombine.low %v1067_v37, %v1071_v41 }
 0x36a   : > { %8771 = vmatpush2.bf16.msra.mxu0 %v12121_v54  ;;  %v12082_v19 = vcombine.high %v939_v26, %v943_v31  ;;  %v12210_v54 = vcombine.high %v1067_v37, %v1071_v41  ;;  %v1187_v47 = vld [vmem:[#allocation2 + $0x19d0] sm:$0xff]  ;;  %v12081_v21 = vcombine.low %v939_v26, %v943_v31 }
 0x36b   : > { %8772 = vmatprep.subr.bf16.mxu0 %v12114_v34  ;;  %v1315_v34 = vld [vmem:[#allocation2 + $0x1dd0] sm:$0xff] }
 0x36c   : > { %8812 = vmatpush2.bf16.msra.mxu1 %v12249_v36  ;;  %v1191_v36 = vld [vmem:[#allocation2 + $0x19f0] sm:$0xff] }
 0x36d   : > { %8813 = vmatprep.subr.bf16.mxu1 %v12242_v48  ;;  %v1319_v48 = vld [vmem:[#allocation2 + $0x1df0] sm:$0xff]  ;;  %v12330_v63 = vcombine.high %v1187_v47, %v1191_v36  ;;  %v12329_v43 = vcombine.low %v1187_v47, %v1191_v36 }
 0x36e   : > { %8773 = vmatpush2.bf16.msra.mxu0 %v12113_v44  ;;  %v12458_v60 = vcombine.high %v1315_v34, %v1319_v48  ;;  %v1179_v44 = vld [vmem:[#allocation2 + $0x1990] sm:$0xff]  ;;  %v12457_v52 = vcombine.low %v1315_v34, %v1319_v48 }
 0x36f   : > { %8774 = vmatprep.subr.bf16.mxu0 %v12106_v3  ;;  %v1307_v3 = vld [vmem:[#allocation2 + $0x1d90] sm:$0xff] }
 0x370   : > { %8814 = vmatpush2.bf16.msra.mxu1 %v12241_v6  ;;  %v1183_v6 = vld [vmem:[#allocation2 + $0x19b0] sm:$0xff] }
 0x371   : > { %8815 = vmatprep.subr.bf16.mxu1 %v12234_v30  ;;  %v1311_v30 = vld [vmem:[#allocation2 + $0x1db0] sm:$0xff]  ;;  %v12322_v57 = vcombine.high %v1179_v44, %v1183_v6  ;;  %v12321_v4 = vcombine.low %v1179_v44, %v1183_v6 }
 0x372   : > { %8775 = vmatpush2.bf16.msra.mxu0 %v12105_v15  ;;  %v12450_v5 = vcombine.high %v1307_v3, %v1311_v30  ;;  %v1171_v15 = vld [vmem:[#allocation2 + $0x1950] sm:$0xff] }
 0x373   : > { %8776 = vmatprep.subr.bf16.mxu0 %v12098_v2  ;;  %v1303_v56 = vld [vmem:[#allocation2 + $0x1d70] sm:$0xff] }
 0x374   : > { %8816 = vmatpush2.bf16.msra.mxu1 %v12233_v9  ;;  %v1175_v9 = vld [vmem:[#allocation2 + $0x1970] sm:$0xff] }
 0x375   : > { %8817 = vmatprep.subr.bf16.mxu1 %v12226_v33  ;;  %v1299_v33 = vld [vmem:[#allocation2 + $0x1d50] sm:$0xff]  ;;  %v12313_v47 = vcombine.low %v1171_v15, %v1175_v9 }
 0x376   : > { %8777 = vmatpush2.bf16.msra.mxu0 %v12097_v14  ;;  %v12442_v26 = vcombine.high %v1299_v33, %v1303_v56  ;;  %v1163_v31 = vld [vmem:[#allocation2 + $0x1910] sm:$0xff]  ;;  %v12441_v48 = vcombine.low %v1299_v33, %v1303_v56 }
 0x377   : > { %8778 = vmatprep.subr.bf16.mxu0 %v12090_v25  ;;  %v12314_v25 = vcombine.high %v1171_v15, %v1175_v9  ;;  %v1167_v37 = vld [vmem:[#allocation2 + $0x1930] sm:$0xff] }
 0x378   : > { %8818 = vmatpush2.bf16.msra.mxu1 %v12225_v23  ;;  %v12449_v23 = vcombine.low %v1307_v3, %v1311_v30  ;;  %v1283_v44 = vld [vmem:[#allocation2 + $0x1cd0] sm:$0xff]  ;;  %v12305_v3 = vcombine.low %v1163_v31, %v1167_v37 }
 0x379   : > { %8819 = vmatprep.subr.bf16.mxu1 %v12218_v0  ;;  %v1287_v6 = vld [vmem:[#allocation2 + $0x1cf0] sm:$0xff] }
 0x37a   : > { %8779 = vmatpush2.bf16.msra.mxu0 %v12089_v51  ;;  %v1275_v15 = vld [vmem:[#allocation2 + $0x1c90] sm:$0xff]  ;;  %v12425_v33 = vcombine.low %v1283_v44, %v1287_v6 }
 0x37b   : > { %8780 = vmatprep.subr.bf16.mxu0 %v12082_v19  ;;  %v1291_v19 = vld [vmem:[#allocation2 + $0x1d10] sm:$0xff] }
 0x37c   : > { %8820 = vmatpush2.bf16.msra.mxu1 %v12217_v1  ;;  %v1279_v9 = vld [vmem:[#allocation2 + $0x1cb0] sm:$0xff] }
 0x37d   : > { %8821 = vmatprep.subr.bf16.mxu1 %v12210_v54  ;;  %v1295_v54 = vld [vmem:[#allocation2 + $0x1d30] sm:$0xff] }
 0x37e   : > { %8781 = vmatpush2.bf16.msra.mxu0 %v12081_v21  ;;  %v12306_v21 = vcombine.high %v1163_v31, %v1167_v37  ;;  %v12433_v30 = vcombine.low %v1291_v19, %v1295_v54  ;;  %v1131_v37 = vld [vmem:[#allocation2 + $0x1810] sm:$0xff] }
 0x37f   : > { %8832 = vmatprep.subr.bf16.mxu0 %v12330_v63  ;;  %v12434_v63 = vcombine.high %v1291_v19, %v1295_v54  ;;  %v1263_v19 = vld [vmem:[#allocation2 + $0x1c30] sm:$0xff] }
 0x380   : > { %8822 = vmatpush2.bf16.msra.mxu1 %v12209_v62 }
 0x381   : > { %8873 = vmatprep.subr.bf16.mxu1 %v12458_v60  ;;  %v8579_v2 = vpop.f32.mrf.mxu0  ;;  %8783 = vmatmul.mubr.bf16.vlgmr.msra.gmra.mxu0 %v13913_v7  ;;  %v1155_v60 = vld [vmem:[#allocation2 + $0x18d0] sm:$0xff] }
 0x382   : > { %8833 = vmatpush1.bf16.msra.mxu0 %v12329_v43  ;;  %8864 = vmatprep.mubr.bf16.mxu0 %v13926_v42 }
 0x383   : > { %v8538_v12 = vpop.f32.mrf.mxu1  ;;  %8824 = vmatmul.mubr.bf16.vlgmr.msra.gmra.mxu1 %v13917_v8  ;;  %v8581_v14 = vpop.f32.mrf.mxu0  ;;  %8834 = vmatprep.subr.bf16.mxu0 %v12322_v57  ;;  %v1147_v57 = vld [vmem:[#allocation2 + $0x1890] sm:$0xff] }
 0x384   : > { %v8539_v13 = vadd.f32 %v8538_v12, %v14086_v53  ;;  %8874 = vmatpush1.bf16.msra.mxu1 %v12457_v52  ;;  %8905 = vmatprep.mubr.bf16.mxu1 %v13931_v18  ;;  %v12426_v52 = vcombine.high %v1283_v44, %v1287_v6  ;;  %v12418_v12 = vcombine.high %v1275_v15, %v1279_v9 }
 0x385   : > { %v8540_v0 = vpop.f32.mrf.mxu1  ;;  %8875 = vmatprep.subr.bf16.mxu1 %v12450_v5  ;;  %v8583_v1 = vpop.f32.mrf.mxu0  ;;  %v1151_v5 = vld [vmem:[#allocation2 + $0x18b0] sm:$0xff] }
 0x386   : > { %v14095_v41 = vadd.f32 %v8579_v2, %v8539_v13  ;;  %v8541_v51 = vadd.f32 %v8540_v0, %v14089_v46  ;;  %8835 = vmatpush1.bf16.msra.mxu0 %v12321_v4  ;;  %v1159_v46 = vld [vmem:[#allocation2 + $0x18f0] sm:$0xff]  ;;  %v12290_v56 = vcombine.high %v1147_v57, %v1151_v5  ;;  %v12417_v0 = vcombine.low %v1275_v15, %v1279_v9 }
 0x387   : > { %v8542_v53 = vpop.f32.mrf.mxu1  ;;  %v8584_v34 = vpop.f32.mrf.mxu0  ;;  %8836 = vmatprep.subr.bf16.mxu0 %v12314_v25  ;;  %v12298_v43 = vcombine.high %v1155_v60, %v1159_v46  ;;  %v12297_v2 = vcombine.low %v1155_v60, %v1159_v46  ;;  %v1139_v4 = vld [vmem:[#allocation2 + $0x1850] sm:$0xff]  ;;  %v12289_v25 = vcombine.low %v1147_v57, %v1151_v5 }
 0x388   : > { %v14099_v36 = vadd.f32 %v8581_v14, %v8541_v51  ;;  %8876 = vmatpush1.bf16.msra.mxu1 %v12449_v23  ;;  %v1143_v13 = vld [vmem:[#allocation2 + $0x1870] sm:$0xff] }
 0x389   : > { %v8543_v62 = vpop.f32.mrf.mxu1  ;;  %8877 = vmatprep.subr.bf16.mxu1 %v12442_v26  ;;  %v1267_v14 = vld [vmem:[#allocation2 + $0x1c50] sm:$0xff]  ;;  %v12282_v26 = vcombine.high %v1139_v4, %v1143_v13  ;;  %v12281_v54 = vcombine.low %v1139_v4, %v1143_v13 }
 0x38a   : > { %8837 = vmatpush1.bf16.msra.mxu0 %v12313_v47  ;;  %v1271_v23 = vld [vmem:[#allocation2 + $0x1c70] sm:$0xff] }
 0x38b   : > { %8838 = vmatprep.subr.bf16.mxu0 %v12306_v21  ;;  %v12410_v31 = vcombine.high %v1267_v14, %v1271_v23  ;;  %v1135_v51 = vld [vmem:[#allocation2 + $0x1830] sm:$0xff]  ;;  %v12409_v53 = vcombine.low %v1267_v14, %v1271_v23 }
 0x38c   : > { %8878 = vmatpush1.bf16.msra.mxu1 %v12441_v48  ;;  %v1259_v1 = vld [vmem:[#allocation2 + $0x1c10] sm:$0xff]  ;;  %v12274_v47 = vcombine.high %v1131_v37, %v1135_v51  ;;  %v12273_v60 = vcombine.low %v1131_v37, %v1135_v51 }
 0x38d   : > { %8879 = vmatprep.subr.bf16.mxu1 %v12434_v63  ;;  %v12402_v34 = vcombine.high %v1259_v1, %v1263_v19  ;;  %v1251_v48 = vld [vmem:[#allocation2 + $0x1bd0] sm:$0xff]  ;;  %v12401_v46 = vcombine.low %v1259_v1, %v1263_v19 }
 0x38e   : > { %8839 = vmatpush1.bf16.msra.mxu0 %v12305_v3  ;;  %v1255_v21 = vld [vmem:[#allocation2 + $0x1bf0] sm:$0xff] }
 0x38f   : > { %8840 = vmatprep.subr.bf16.mxu0 %v12298_v43  ;;  %v1379_v62 = vld [vmem:[#allocation2 + $0x1fd0] sm:$0xff]  ;;  %v12394_v44 = vcombine.high %v1251_v48, %v1255_v21  ;;  %v12393_v57 = vcombine.low %v1251_v48, %v1255_v21 }
 0x390   : > { %8880 = vmatpush1.bf16.msra.mxu1 %v12433_v30  ;;  %v1383_v63 = vld [vmem:[#allocation2 + $0x1ff0] sm:$0xff] }
 0x391   : > { %8881 = vmatprep.subr.bf16.mxu1 %v12426_v52  ;;  %v12522_v6 = vcombine.high %v1379_v62, %v1383_v63  ;;  %v1243_v3 = vld [vmem:[#allocation2 + $0x1b90] sm:$0xff]  ;;  %v12521_v5 = vcombine.low %v1379_v62, %v1383_v63 }
 0x392   : > { %8841 = vmatpush1.bf16.msra.mxu0 %v12297_v2  ;;  %v1247_v30 = vld [vmem:[#allocation2 + $0x1bb0] sm:$0xff] }
 0x393   : > { %8842 = vmatprep.subr.bf16.mxu0 %v12290_v56  ;;  %v1371_v43 = vld [vmem:[#allocation2 + $0x1f90] sm:$0xff]  ;;  %v12386_v15 = vcombine.high %v1243_v3, %v1247_v30  ;;  %v12385_v4 = vcombine.low %v1243_v3, %v1247_v30 }
 0x394   : > { %8882 = vmatpush1.bf16.msra.mxu1 %v12425_v33  ;;  %v1375_v52 = vld [vmem:[#allocation2 + $0x1fb0] sm:$0xff] }
 0x395   : > { %8883 = vmatprep.subr.bf16.mxu1 %v12418_v12  ;;  %v12514_v9 = vcombine.high %v1371_v43, %v1375_v52  ;;  %v1235_v2 = vld [vmem:[#allocation2 + $0x1b50] sm:$0xff]  ;;  %v12513_v13 = vcombine.low %v1371_v43, %v1375_v52 }
 0x396   : > { %8843 = vmatpush1.bf16.msra.mxu0 %v12289_v25  ;;  %v1239_v33 = vld [vmem:[#allocation2 + $0x1b70] sm:$0xff] }
 0x397   : > { %8844 = vmatprep.subr.bf16.mxu0 %v12282_v26  ;;  %v1363_v56 = vld [vmem:[#allocation2 + $0x1f50] sm:$0xff]  ;;  %v12378_v14 = vcombine.high %v1235_v2, %v1239_v33  ;;  %v12377_v37 = vcombine.low %v1235_v2, %v1239_v33 }
 0x398   : > { %8884 = vmatpush1.bf16.msra.mxu1 %v12417_v0  ;;  %v1367_v12 = vld [vmem:[#allocation2 + $0x1f70] sm:$0xff] }
 0x399   : > { %8885 = vmatprep.subr.bf16.mxu1 %v12410_v31  ;;  %v12506_v23 = vcombine.high %v1363_v56, %v1367_v12  ;;  %v1227_v25 = vld [vmem:[#allocation2 + $0x1b10] sm:$0xff]  ;;  %v12505_v51 = vcombine.low %v1363_v56, %v1367_v12 }
 0x39a   : > { %8845 = vmatpush1.bf16.msra.mxu0 %v12281_v54  ;;  %v1231_v0 = vld [vmem:[#allocation2 + $0x1b30] sm:$0xff] }
 0x39b   : > { %8846 = vmatprep.subr.bf16.mxu0 %v12274_v47  ;;  %v1355_v26 = vld [vmem:[#allocation2 + $0x1f10] sm:$0xff]  ;;  %v12370_v1 = vcombine.high %v1227_v25, %v1231_v0  ;;  %v12369_v48 = vcombine.low %v1227_v25, %v1231_v0 }
 0x39c   : > { %8886 = vmatpush1.bf16.msra.mxu1 %v12409_v53  ;;  %v1359_v31 = vld [vmem:[#allocation2 + $0x1f30] sm:$0xff] }
 0x39d   : > { %8887 = vmatprep.subr.bf16.mxu1 %v12402_v34  ;;  %v12498_v19 = vcombine.high %v1355_v26, %v1359_v31  ;;  %v1219_v54 = vld [vmem:[#allocation2 + $0x1ad0] sm:$0xff]  ;;  %v12497_v21 = vcombine.low %v1355_v26, %v1359_v31 }
 0x39e   : > { %8847 = vmatpush1.bf16.msra.mxu0 %v12273_v60  ;;  %v1223_v53 = vld [vmem:[#allocation2 + $0x1af0] sm:$0xff] }
 0x39f   : > { %8848 = vmatprep.subr.bf16.mxu0 %v12394_v44  ;;  %v1347_v47 = vld [vmem:[#allocation2 + $0x1ed0] sm:$0xff]  ;;  %v12362_v62 = vcombine.high %v1219_v54, %v1223_v53  ;;  %v12361_v3 = vcombine.low %v1219_v54, %v1223_v53  ;;  %v1597_v53 = vsub.s32 4, %v13936_v32 }
 0x3a0   : > { %8888 = vmatpush1.bf16.msra.mxu1 %v12401_v46  ;;  %v1351_v34 = vld [vmem:[#allocation2 + $0x1ef0] sm:$0xff] }
 0x3a1   : > { %8889 = vmatprep.subr.bf16.mxu1 %v12522_v6  ;;  %v12490_v63 = vcombine.high %v1347_v47, %v1351_v34  ;;  %v1211_v60 = vld [vmem:[#allocation2 + $0x1a90] sm:$0xff]  ;;  %v12489_v30 = vcombine.low %v1347_v47, %v1351_v34 }
 0x3a2   : > { %8849 = vmatpush2.bf16.msra.mxu0 %v12393_v57  ;;  %v1215_v46 = vld [vmem:[#allocation2 + $0x1ab0] sm:$0xff] }
 0x3a3   : > { %8850 = vmatprep.subr.bf16.mxu0 %v12386_v15  ;;  %v1339_v44 = vld [vmem:[#allocation2 + $0x1e90] sm:$0xff]  ;;  %v12354_v43 = vcombine.high %v1211_v60, %v1215_v46  ;;  %v12353_v2 = vcombine.low %v1211_v60, %v1215_v46 }
 0x3a4   : > { %8890 = vmatpush2.bf16.msra.mxu1 %v12521_v5  ;;  %v1343_v6 = vld [vmem:[#allocation2 + $0x1eb0] sm:$0xff] }
 0x3a5   : > { %8891 = vmatprep.subr.bf16.mxu1 %v12514_v9  ;;  %v12482_v52 = vcombine.high %v1339_v44, %v1343_v6  ;;  %v1203_v57 = vld [vmem:[#allocation2 + $0x1a50] sm:$0xff]  ;;  %v12481_v33 = vcombine.low %v1339_v44, %v1343_v6  ;;  %v13468_v44 = vld [vmem:[#allocation4] sm:$0xff] }
 0x3a6   : > { %8851 = vmatpush2.bf16.msra.mxu0 %v12385_v4  ;;  %v1207_v5 = vld [vmem:[#allocation2 + $0x1a70] sm:$0xff]  ;;  %v1598_v6 = vrot.slane %v13468_v44, %v1597_v53 }
 0x3a7   : > { %8852 = vmatprep.subr.bf16.mxu0 %v12378_v14  ;;  %v1331_v15 = vld [vmem:[#allocation2 + $0x1e50] sm:$0xff]  ;;  %v12346_v56 = vcombine.high %v1203_v57, %v1207_v5  ;;  %v12345_v25 = vcombine.low %v1203_v57, %v1207_v5 }
 0x3a8   : > { %8892 = vmatpush2.bf16.msra.mxu1 %v12513_v13  ;;  %v1335_v9 = vld [vmem:[#allocation2 + $0x1e70] sm:$0xff] }
 0x3a9   : > { %8893 = vmatprep.subr.bf16.mxu1 %v12506_v23  ;;  %v12474_v12 = vcombine.high %v1331_v15, %v1335_v9  ;;  %v1195_v4 = vld [vmem:[#allocation2 + $0x1a10] sm:$0xff]  ;;  %v12473_v0 = vcombine.low %v1331_v15, %v1335_v9 }
 0x3aa   : > { %8853 = vmatpush2.bf16.msra.mxu0 %v12377_v37  ;;  %v1199_v13 = vld [vmem:[#allocation2 + $0x1a30] sm:$0xff] }
 0x3ab   : > { %8854 = vmatprep.subr.bf16.mxu0 %v12370_v1  ;;  %v1323_v14 = vld [vmem:[#allocation2 + $0x1e10] sm:$0xff]  ;;  %v12338_v26 = vcombine.high %v1195_v4, %v1199_v13  ;;  %v12337_v54 = vcombine.low %v1195_v4, %v1199_v13 }
 0x3ac   : > { %8894 = vmatpush2.bf16.msra.mxu1 %v12505_v51  ;;  %v1327_v23 = vld [vmem:[#allocation2 + $0x1e30] sm:$0xff] }
 0x3ad   : > { %8895 = vmatprep.subr.bf16.mxu1 %v12498_v19  ;;  %v12466_v31 = vcombine.high %v1323_v14, %v1327_v23  ;;  %v1443_v37 = vld [vmem:[#allocation2 + $0x21d0] sm:$0xff]  ;;  %v12465_v47 = vcombine.low %v1323_v14, %v1327_v23 }
 0x3ae   : > { %8855 = vmatpush2.bf16.msra.mxu0 %v12369_v48  ;;  %v1447_v51 = vld [vmem:[#allocation2 + $0x21f0] sm:$0xff] }
 0x3af   : > { %8856 = vmatprep.subr.bf16.mxu0 %v12362_v62  ;;  %v1571_v1 = vld [vmem:[#allocation2 + $0x25d0] sm:$0xff]  ;;  %v12586_v34 = vcombine.high %v1443_v37, %v1447_v51 }
 0x3b0   : > { %8896 = vmatpush2.bf16.msra.mxu1 %v12497_v21  ;;  %v1575_v19 = vld [vmem:[#allocation2 + $0x25f0] sm:$0xff]  ;;  %v1601_v21 = vsub.s32 5, %v13936_v32 }
 0x3b1   : > { %8897 = vmatprep.subr.bf16.mxu1 %v12490_v63  ;;  %v12714_v48 = vcombine.high %v1571_v1, %v1575_v19  ;;  %v1435_v62 = vld [vmem:[#allocation2 + $0x2190] sm:$0xff] }
 0x3b2   : > { %8857 = vmatpush2.bf16.msra.mxu0 %v12361_v3  ;;  %v1439_v63 = vld [vmem:[#allocation2 + $0x21b0] sm:$0xff]  ;;  %v12585_v3 = vcombine.low %v1443_v37, %v1447_v51 }
 0x3b3   : > { %8858 = vmatprep.subr.bf16.mxu0 %v12354_v43  ;;  %v1563_v60 = vld [vmem:[#allocation2 + $0x2590] sm:$0xff]  ;;  %v12578_v43 = vcombine.high %v1435_v62, %v1439_v63  ;;  %v12577_v4 = vcombine.low %v1435_v62, %v1439_v63 }
 0x3b4   : > { %8898 = vmatpush2.bf16.msra.mxu1 %v12489_v30  ;;  %v1567_v46 = vld [vmem:[#allocation2 + $0x25b0] sm:$0xff]  ;;  %v12713_v30 = vcombine.low %v1571_v1, %v1575_v19 }
 0x3b5   : > { %8899 = vmatprep.subr.bf16.mxu1 %v12482_v52  ;;  %v1602_v52 = vrot.slane %v13468_v44, %v1601_v21  ;;  %v12706_v57 = vcombine.high %v1563_v60, %v1567_v46  ;;  %v1427_v5 = vld [vmem:[#allocation2 + $0x2150] sm:$0xff]  ;;  %v12705_v14 = vcombine.low %v1563_v60, %v1567_v46 }
 0x3b6   : > { %8859 = vmatpush2.bf16.msra.mxu0 %v12353_v2  ;;  %v1431_v15 = vld [vmem:[#allocation2 + $0x2170] sm:$0xff] }
 0x3b7   : > { %8860 = vmatprep.subr.bf16.mxu0 %v12346_v56  ;;  %v1555_v2 = vld [vmem:[#allocation2 + $0x2550] sm:$0xff]  ;;  %v12570_v23 = vcombine.high %v1427_v5, %v1431_v15 }
 0x3b8   : > { %8900 = vmatpush2.bf16.msra.mxu1 %v12481_v33  ;;  %v1559_v33 = vld [vmem:[#allocation2 + $0x2570] sm:$0xff] }
 0x3b9   : > { %8901 = vmatprep.subr.bf16.mxu1 %v12474_v12  ;;  %v1419_v37 = vld [vmem:[#allocation2 + $0x2110] sm:$0xff]  ;;  %v12697_v21 = vcombine.low %v1555_v2, %v1559_v33 }
 0x3ba   : > { %8861 = vmatpush2.bf16.msra.mxu0 %v12345_v25  ;;  %v1423_v51 = vld [vmem:[#allocation2 + $0x2130] sm:$0xff] }
 0x3bb   : > { %8862 = vmatprep.subr.bf16.mxu0 %v12338_v26  ;;  %v1547_v19 = vld [vmem:[#allocation2 + $0x2510] sm:$0xff]  ;;  %v12562_v62 = vcombine.high %v1419_v37, %v1423_v51 }
 0x3bc   : > { %8902 = vmatpush2.bf16.msra.mxu1 %v12473_v0  ;;  %v1411_v46 = vld [vmem:[#allocation2 + $0x20d0] sm:$0xff] }
 0x3bd   : > { %8903 = vmatprep.subr.bf16.mxu1 %v12466_v31  ;;  %v12698_v31 = vcombine.high %v1555_v2, %v1559_v33  ;;  %v1415_v44 = vld [vmem:[#allocation2 + $0x20f0] sm:$0xff] }
 0x3be   : > { %8863 = vmatpush2.bf16.msra.mxu0 %v12337_v54  ;;  %v1551_v54 = vld [vmem:[#allocation2 + $0x2530] sm:$0xff]  ;;  %v12553_v33 = vcombine.low %v1411_v46, %v1415_v44 }
 0x3bf   : > { %8914 = vmatprep.subr.bf16.mxu0 %v12586_v34  ;;  %v12569_v34 = vcombine.low %v1427_v5, %v1431_v15  ;;  %v12690_v60 = vcombine.high %v1547_v19, %v1551_v54  ;;  %v1403_v5 = vld [vmem:[#allocation2 + $0x2090] sm:$0xff] }
 0x3c0   : > { %8904 = vmatpush2.bf16.msra.mxu1 %v12465_v47  ;;  %v1407_v15 = vld [vmem:[#allocation2 + $0x20b0] sm:$0xff] }
 0x3c1   : > { %8955 = vmatprep.subr.bf16.mxu1 %v12714_v48  ;;  %v8620_v9 = vpop.f32.mrf.mxu0  ;;  %8865 = vmatmul.mubr.bf16.vlgmr.msra.gmra.mxu0 %v13942_v55  ;;  %v1535_v2 = vld [vmem:[#allocation2 + $0x24b0] sm:$0xff] }
 0x3c2   : > { %v8621_v56 = vadd.f32 %v8620_v9, %v1598_v6  ;;  %8915 = vmatpush1.bf16.msra.mxu0 %v12585_v3  ;;  %8946 = vmatprep.mubr.bf16.mxu0 %v13960_v11  ;;  %v1539_v6 = vld [vmem:[#allocation2 + $0x24d0] sm:$0xff] }
 0x3c3   : > { %v8661_v12 = vpop.f32.mrf.mxu1  ;;  %8906 = vmatmul.mubr.bf16.vlgmr.msra.gmra.mxu1 %v13948_v61  ;;  %v8622_v13 = vpop.f32.mrf.mxu0  ;;  %8916 = vmatprep.subr.bf16.mxu0 %v12578_v43  ;;  %v1543_v3 = vld [vmem:[#allocation2 + $0x24f0] sm:$0xff]  ;;  %v12689_v43 = vcombine.low %v1547_v19, %v1551_v54 }
 0x3c4   : > { %8956 = vmatpush1.bf16.msra.mxu1 %v12713_v30  ;;  %v14105_v25 = vadd.f32 %v8661_v12, %v8621_v56  ;;  %v8623_v0 = vadd.f32 %v8622_v13, %v1602_v52  ;;  %8987 = vmatprep.mubr.bf16.mxu1 %v13648_v27  ;;  %v12561_v30 = vcombine.low %v1419_v37, %v1423_v51  ;;  %v1531_v9 = vld [vmem:[#allocation2 + $0x2490] sm:$0xff] }
 0x3c5   : > { %v8663_v26 = vpop.f32.mrf.mxu1  ;;  %8957 = vmatprep.subr.bf16.mxu1 %v12706_v57  ;;  %v8624_v1 = vpop.f32.mrf.mxu0  ;;  %v12554_v52 = vcombine.high %v1411_v46, %v1415_v44  ;;  %v12682_v57 = vcombine.high %v1539_v6, %v1543_v3  ;;  %v12681_v56 = vcombine.low %v1539_v6, %v1543_v3  ;;  %v12546_v12 = vcombine.high %v1403_v5, %v1407_v15  ;;  %v1395_v13 = vld [vmem:[#allocation2 + $0x2050] sm:$0xff]  ;;  %v420_v46 = vld [vmem:[#allocation2 + $0x1d8] sm:$0xff] }
 0x3c6   : > { %v14109_v53 = vadd.f32 %v8663_v26, %v8623_v0  ;;  %8917 = vmatpush1.bf16.msra.mxu0 %v12577_v4  ;;  %v12674_v4 = vcombine.high %v1531_v9, %v1535_v2  ;;  %v1527_v0 = vld [vmem:[#allocation2 + $0x2470] sm:$0xff]  ;;  %v12545_v26 = vcombine.low %v1403_v5, %v1407_v15  ;;  %v424_v44 = vld [vmem:[#allocation2 + $0x1f8] sm:$0xff] }
 0x3c7   : > { %v8665_v47 = vpop.f32.mrf.mxu1  ;;  %v8625_v48 = vpop.f32.mrf.mxu0  ;;  %8918 = vmatprep.subr.bf16.mxu0 %v12570_v23  ;;  %v1523_v23 = vld [vmem:[#allocation2 + $0x2450] sm:$0xff]  ;;  %v412_v5 = vld [vmem:[#allocation2 + $0x198] sm:$0xff] }
 0x3c8   : > { %8958 = vmatpush1.bf16.msra.mxu1 %v12705_v14  ;;  %v1399_v14 = vld [vmem:[#allocation2 + $0x2070] sm:$0xff]  ;;  %v12666_v51 = vcombine.high %v1523_v23, %v1527_v0  ;;  %v12665_v48 = vcombine.low %v1523_v23, %v1527_v0  ;;  %v416_v15 = vld [vmem:[#allocation2 + $0x1b8] sm:$0xff]  ;;  %v13469_v23 = vld [vmem:[%s14555_s0 + $0x48] ss:$0 sps:$4 sm:$0xff]  }
 0x3c9   : > { %v8666_v63 = vpop.f32.mrf.mxu1  ;;  %8959 = vmatprep.subr.bf16.mxu1 %v12698_v31  ;;  %v12673_v31 = vcombine.low %v1531_v9, %v1535_v2  ;;  %v12538_v37 = vcombine.high %v1395_v13, %v1399_v14  ;;  %v1387_v1 = vld [vmem:[#allocation2 + $0x2010] sm:$0xff]  ;;  %v11563_v2 = vcombine.low %v420_v46, %v424_v44 }
 0x3ca   : > { %8919 = vmatpush1.bf16.msra.mxu0 %v12569_v34  ;;  %v1391_v19 = vld [vmem:[#allocation2 + $0x2030] sm:$0xff]  ;;  %v12537_v34 = vcombine.low %v1395_v13, %v1399_v14  ;;  %v404_v13 = vld [vmem:[#allocation2 + $0x158] sm:$0xff] }
 0x3cb   : > { %8920 = vmatprep.subr.bf16.mxu0 %v12562_v62  ;;  %v1515_v54 = vld [vmem:[#allocation2 + $0x2410] sm:$0xff]  ;;  %v12529_v6 = vcombine.low %v1387_v1, %v1391_v19  ;;  %v408_v14 = vld [vmem:[#allocation2 + $0x178] sm:$0xff] }
 0x3cc   : > { %8960 = vmatpush1.bf16.msra.mxu1 %v12697_v21  ;;  %v1519_v47 = vld [vmem:[#allocation2 + $0x2430] sm:$0xff]  ;;  %v12530_v21 = vcombine.high %v1387_v1, %v1391_v19  ;;  %v396_v19 = vld [vmem:[#allocation2 + $0x118] sm:$0xff] }
 0x3cd   : > { %8961 = vmatprep.subr.bf16.mxu1 %v12690_v60  ;;  %v12658_v62 = vcombine.high %v1515_v54, %v1519_v47  ;;  %v1507_v63 = vld [vmem:[#allocation2 + $0x23d0] sm:$0xff]  ;;  %v12657_v3 = vcombine.low %v1515_v54, %v1519_v47  ;;  %v400_v54 = vld [vmem:[#allocation2 + $0x138] sm:$0xff] }
 0x3ce   : > { %8921 = vmatpush1.bf16.msra.mxu0 %v12561_v30  ;;  %v1511_v60 = vld [vmem:[#allocation2 + $0x23f0] sm:$0xff] }
 0x3cf   : > { %8922 = vmatprep.subr.bf16.mxu0 %v12554_v52  ;;  %v12650_v30 = vcombine.high %v1507_v63, %v1511_v60  ;;  %v1499_v52 = vld [vmem:[#allocation2 + $0x2390] sm:$0xff]  ;;  %v12649_v9 = vcombine.low %v1507_v63, %v1511_v60  ;;  %v388_v60 = vld [vmem:[#allocation2 + $0xd8] sm:$0xff] }
 0x3d0   : > { %8962 = vmatpush1.bf16.msra.mxu1 %v12689_v43  ;;  %v11564_v43 = vcombine.high %v420_v46, %v424_v44  ;;  %v1487_v1 = vld [vmem:[#allocation2 + $0x2330] sm:$0xff]  ;;  %v392_v46 = vld [vmem:[#allocation2 + $0xf8] sm:$0xff] }
 0x3d1   : > { %8963 = vmatprep.subr.bf16.mxu1 %v12682_v57  ;;  %v1503_v57 = vld [vmem:[#allocation2 + $0x23b0] sm:$0xff] }
 0x3d2   : > { %8923 = vmatpush1.bf16.msra.mxu0 %v12553_v33  ;;  %v12642_v33 = vcombine.high %v1499_v52, %v1503_v57  ;;  %v12641_v0 = vcombine.low %v1499_v52, %v1503_v57  ;;  %v1479_v63 = vld [vmem:[#allocation2 + $0x22f0] sm:$0xff]  ;;  %v380_v52 = vld [vmem:[#allocation2 + $0x98] sm:$0xff] }
 0x3d3   : > { %8924 = vmatprep.subr.bf16.mxu0 %v12546_v12  ;;  %v1491_v12 = vld [vmem:[#allocation2 + $0x2350] sm:$0xff]  ;;  %v384_v57 = vld [vmem:[#allocation2 + $0xb8] sm:$0xff] }
 0x3d4   : > { %8964 = vmatpush1.bf16.msra.mxu1 %v12681_v56  ;;  %v11556_v56 = vcombine.high %v412_v5, %v416_v15 }
 0x3d5   : > { %8965 = vmatprep.subr.bf16.mxu1 %v12674_v4  ;;  %v1495_v4 = vld [vmem:[#allocation2 + $0x2370] sm:$0xff] }
 0x3d6   : > { %8925 = vmatpush1.bf16.msra.mxu0 %v12545_v26  ;;  %v11555_v26 = vcombine.low %v412_v5, %v416_v15  ;;  %v12633_v47 = vcombine.low %v1491_v12, %v1495_v4  ;;  %v11531_v15 = vcombine.low %v388_v60, %v392_v46 }
 0x3d7   : > { %8926 = vmatprep.subr.bf16.mxu0 %v12538_v37  ;;  %v11548_v37 = vcombine.high %v404_v13, %v408_v14 }
 0x3d8   : > { %8966 = vmatpush1.bf16.msra.mxu1 %v12673_v31  ;;  %v12634_v31 = vcombine.high %v1491_v12, %v1495_v4  ;;  %v372_v12 = vld [vmem:[#allocation2 + $0x58] sm:$0xff] }
 0x3d9   : > { %8967 = vmatprep.subr.bf16.mxu1 %v12666_v51  ;;  %v1483_v51 = vld [vmem:[#allocation2 + $0x2310] sm:$0xff]  ;;  %v376_v4 = vld [vmem:[#allocation2 + $0x78] sm:$0xff] }
 0x3da   : > { %8927 = vmatpush1.bf16.msra.mxu0 %v12537_v34  ;;  %v11547_v34 = vcombine.low %v404_v13, %v408_v14  ;;  %v12625_v44 = vcombine.low %v1483_v51, %v1487_v1  ;;  %v11523_v14 = vcombine.low %v380_v52, %v384_v57 }
 0x3db   : > { %8928 = vmatprep.subr.bf16.mxu0 %v12530_v21  ;;  %v11540_v21 = vcombine.high %v396_v19, %v400_v54 }
 0x3dc   : > { %8968 = vmatpush1.bf16.msra.mxu1 %v12665_v48  ;;  %v12626_v48 = vcombine.high %v1483_v51, %v1487_v1  ;;  %v368_v51 = vld [vmem:[#allocation2 + $0x38] sm:$0xff] }
 0x3dd   : > { %8969 = vmatprep.subr.bf16.mxu1 %v12658_v62  ;;  %v1475_v62 = vld [vmem:[#allocation2 + $0x22d0] sm:$0xff] }
 0x3de   : > { %8929 = vmatpush1.bf16.msra.mxu0 %v12529_v6  ;;  %v11539_v6 = vcombine.low %v396_v19, %v400_v54  ;;  %v12617_v5 = vcombine.low %v1475_v62, %v1479_v63  ;;  %v11515_v19 = vcombine.low %v372_v12, %v376_v4 }
 0x3df   : > { %8930 = vmatprep.subr.bf16.mxu0 %v12650_v30  ;;  %v1467_v30 = vld [vmem:[#allocation2 + $0x2290] sm:$0xff] }
 0x3e0   : > { %8970 = vmatpush1.bf16.msra.mxu1 %v12657_v3  ;;  %v11532_v3 = vcombine.high %v388_v60, %v392_v46 }
 0x3e1   : > { %8996 = vmatprep.subr.bf16.mxu1 %v11564_v43  ;;  %v1471_v43 = vld [vmem:[#allocation2 + $0x22b0] sm:$0xff] }
 0x3e2   : > { %8931 = vmatpush2.bf16.msra.mxu0 %v12649_v9  ;;  %v12610_v9 = vcombine.high %v1467_v30, %v1471_v43  ;;  %v12609_v13 = vcombine.low %v1467_v30, %v1471_v43  ;;  %v480_v30 = vld [vmem:[#allocation2 + $0x3b8] sm:$0xff] }
 0x3e3   : > { %8988 = vmatmul.mubr.bf16.vlgmr.msra.gmra.mxu1 %v13469_v23  ;;  %8932 = vmatprep.subr.bf16.mxu0 %v12642_v33  ;;  %v1459_v33 = vld [vmem:[#allocation2 + $0x2250] sm:$0xff] }
 0x3e4   : > { %8997 = vmatpush1.bf16.msra.mxu1 %v11563_v2  ;;  %9028 = vmatprep.mubr.bf16.mxu1 %v13838_v58  ;;  %v12618_v58 = vcombine.high %v1475_v62, %v1479_v63  ;;  %v11524_v2 = vcombine.high %v380_v52, %v384_v57  ;;  %v488_v62 = vld [vmem:[#allocation2 + $0x3f8] sm:$0xff] }
 0x3e5   : > { %8998 = vmatprep.subr.bf16.mxu1 %v11556_v56  ;;  %v1463_v56 = vld [vmem:[#allocation2 + $0x2270] sm:$0xff] }
 0x3e6   : > { %8933 = vmatpush2.bf16.msra.mxu0 %v12641_v0  ;;  %v12602_v23 = vcombine.high %v1459_v33, %v1463_v56  ;;  %v11516_v0 = vcombine.high %v372_v12, %v376_v4  ;;  %v12601_v1 = vcombine.low %v1459_v33, %v1463_v56  ;;  %v468_v33 = vld [vmem:[#allocation2 + $0x358] sm:$0xff] }
 0x3e7   : > { %8934 = vmatprep.subr.bf16.mxu0 %v12634_v31  ;;  %v1455_v31 = vld [vmem:[#allocation2 + $0x2230] sm:$0xff]  ;;  %v472_v56 = vld [vmem:[#allocation2 + $0x378] sm:$0xff] }
 0x3e8   : > { %8999 = vmatpush1.bf16.msra.mxu1 %v11555_v26  ;;  %v1451_v26 = vld [vmem:[#allocation2 + $0x2210] sm:$0xff] }
 0x3e9   : > { %9000 = vmatprep.subr.bf16.mxu1 %v11548_v37  ;;  %v364_v37 = vld [vmem:[#allocation2 + $0x18] sm:$0xff]  ;;  %v12594_v54 = vcombine.high %v1451_v26, %v1455_v31  ;;  %v12593_v63 = vcombine.low %v1451_v26, %v1455_v31 }
 0x3ea   : > { %8935 = vmatpush2.bf16.msra.mxu0 %v12633_v47  ;;  %v11508_v47 = vcombine.high %v364_v37, %v368_v51  ;;  %v11507_v60 = vcombine.low %v364_v37, %v368_v51  ;;  %v11612_v51 = vcombine.high %v468_v33, %v472_v56 }
 0x3eb   : > { %8936 = vmatprep.subr.bf16.mxu0 %v12626_v48  ;;  %v552_v48 = vld [vmem:[#allocation2 + $0x5f8] sm:$0xff] }
 0x3ec   : > { %9001 = vmatpush1.bf16.msra.mxu1 %v11547_v34  ;;  %v548_v34 = vld [vmem:[#allocation2 + $0x5d8] sm:$0xff] }
 0x3ed   : > { %9002 = vmatprep.subr.bf16.mxu1 %v11540_v21  ;;  %v484_v21 = vld [vmem:[#allocation2 + $0x3d8] sm:$0xff]  ;;  %v11692_v46 = vcombine.high %v548_v34, %v552_v48  ;;  %v11691_v43 = vcombine.low %v548_v34, %v552_v48 }
 0x3ee   : > { %8937 = vmatpush2.bf16.msra.mxu0 %v12625_v44  ;;  %v11628_v44 = vcombine.high %v484_v21, %v488_v62  ;;  %v11627_v52 = vcombine.low %v484_v21, %v488_v62  ;;  %v11611_v62 = vcombine.low %v468_v33, %v472_v56 }
 0x3ef   : > { %8938 = vmatprep.subr.bf16.mxu0 %v12618_v58  ;;  %v544_v58 = vld [vmem:[#allocation2 + $0x5b8] sm:$0xff] }
 0x3f0   : > { %9003 = vmatpush1.bf16.msra.mxu1 %v11539_v6  ;;  %v540_v6 = vld [vmem:[#allocation2 + $0x598] sm:$0xff] }
 0x3f1   : > { %9004 = vmatprep.subr.bf16.mxu1 %v11532_v3  ;;  %v476_v3 = vld [vmem:[#allocation2 + $0x398] sm:$0xff]  ;;  %v11684_v57 = vcombine.high %v540_v6, %v544_v58 }
 0x3f2   : > { %8939 = vmatpush2.bf16.msra.mxu0 %v12617_v5  ;;  %v11620_v5 = vcombine.high %v476_v3, %v480_v30 }
 0x3f3   : > { %8940 = vmatprep.subr.bf16.mxu0 %v12610_v9  ;;  %v536_v9 = vld [vmem:[#allocation2 + $0x578] sm:$0xff] }
 0x3f4   : > { %9005 = vmatpush1.bf16.msra.mxu1 %v11531_v15  ;;  %v532_v15 = vld [vmem:[#allocation2 + $0x558] sm:$0xff] }
 0x3f5   : > { %9006 = vmatprep.subr.bf16.mxu1 %v11524_v2  ;;  %v11675_v48 = vcombine.low %v532_v15, %v536_v9 }
 0x3f6   : > { %8941 = vmatpush2.bf16.msra.mxu0 %v12609_v13  ;;  %v11683_v13 = vcombine.low %v540_v6, %v544_v58  ;;  %v452_v6 = vld [vmem:[#allocation2 + $0x2d8] sm:$0xff] }
 0x3f7   : > { %8942 = vmatprep.subr.bf16.mxu0 %v12602_v23  ;;  %v11619_v23 = vcombine.low %v476_v3, %v480_v30  ;;  %v456_v58 = vld [vmem:[#allocation2 + $0x2f8] sm:$0xff] }
 0x3f8   : > { %9007 = vmatpush1.bf16.msra.mxu1 %v11523_v14  ;;  %v11595_v33 = vcombine.low %v452_v6, %v456_v58 }
 0x3f9   : > { %9008 = vmatprep.subr.bf16.mxu1 %v11516_v0  ;;  %v11676_v0 = vcombine.high %v532_v15, %v536_v9  ;;  %v444_v15 = vld [vmem:[#allocation2 + $0x298] sm:$0xff] }
 0x3fa   : > { %8943 = vmatpush2.bf16.msra.mxu0 %v12601_v1  ;;  %v524_v1 = vld [vmem:[#allocation2 + $0x518] sm:$0xff] }
 0x3fb   : > { %8944 = vmatprep.subr.bf16.mxu0 %v12594_v54  ;;  %v460_v54 = vld [vmem:[#allocation2 + $0x318] sm:$0xff] }
 0x3fc   : > { %9009 = vmatpush1.bf16.msra.mxu1 %v11515_v19  ;;  %v528_v19 = vld [vmem:[#allocation2 + $0x538] sm:$0xff] }
 0x3fd   : > { %9010 = vmatprep.subr.bf16.mxu1 %v11508_v47  ;;  %v464_v47 = vld [vmem:[#allocation2 + $0x338] sm:$0xff]  ;;  %v11667_v3 = vcombine.low %v524_v1, %v528_v19 }
 0x3fe   : > { %8945 = vmatpush2.bf16.msra.mxu0 %v12593_v63  ;;  %v11668_v63 = vcombine.high %v524_v1, %v528_v19  ;;  %v11603_v30 = vcombine.low %v460_v54, %v464_v47  ;;  %v448_v9 = vld [vmem:[#allocation2 + $0x2b8] sm:$0xff] }
 0x3ff   : > { %9037 = vmatprep.subr.bf16.mxu0 %v11692_v46  ;;  %v516_v46 = vld [vmem:[#allocation2 + $0x4d8] sm:$0xff] }
 0x400   : > { %9011 = vmatpush1.bf16.msra.mxu1 %v11507_v60  ;;  %v492_v1 = vld [vmem:[#allocation2 + $0x418] sm:$0xff] }
 0x401   : > { %9012 = vmatprep.subr.bf16.mxu1 %v11628_v44  ;;  %v8702_v2 = vpop.f32.mrf.mxu0  ;;  %8947 = vmatmul.mubr.bf16.vlgmr.msra.gmra.mxu0 %v13975_v24  ;;  %v520_v44 = vld [vmem:[#allocation2 + $0x4f8] sm:$0xff] }
 0x402   : > { %v8703_v12 = vadd.f32 %v8702_v2, %v14105_v25  ;;  %9038 = vmatpush1.bf16.msra.mxu0 %v11691_v43  ;;  %9069 = vmatprep.mubr.bf16.mxu0 %v13842_v59  ;;  %v11660_v43 = vcombine.high %v516_v46, %v520_v44  ;;  %v11659_v2 = vcombine.low %v516_v46, %v520_v44  ;;  %v496_v19 = vld [vmem:[#allocation2 + $0x438] sm:$0xff] }
 0x403   : > { %v8743_v4 = vpop.f32.mrf.mxu1  ;;  %v8704_v14 = vpop.f32.mrf.mxu0  ;;  %9039 = vmatprep.subr.bf16.mxu0 %v11684_v57  ;;  %v508_v57 = vld [vmem:[#allocation2 + $0x498] sm:$0xff]  ;;  %v11635_v46 = vcombine.low %v492_v1, %v496_v19 }
 0x404   : > { %9013 = vmatpush2.bf16.msra.mxu1 %v11627_v52  ;;  %v14118_v26 = vadd.f32 %v8743_v4, %v8703_v12  ;;  %v8705_v31 = vadd.f32 %v8704_v14, %v14109_v53  ;;  %v11604_v53 = vcombine.high %v460_v54, %v464_v47  ;;  %v11596_v52 = vcombine.high %v452_v6, %v456_v58  ;;  %v500_v4 = vld [vmem:[#allocation2 + $0x458] sm:$0xff] }
 0x405   : > { %v8745_v37 = vpop.f32.mrf.mxu1  ;;  %9014 = vmatprep.subr.bf16.mxu1 %v11620_v5  ;;  %v8706_v25 = vpop.f32.mrf.mxu0  ;;  %v512_v5 = vld [vmem:[#allocation2 + $0x4b8] sm:$0xff]  ;;  %v11588_v12 = vcombine.high %v444_v15, %v448_v9 }
 0x406   : > { %v14121_v34 = vadd.f32 %v8745_v37, %v8705_v31  ;;  %9040 = vmatpush1.bf16.msra.mxu0 %v11683_v13  ;;  %v11652_v56 = vcombine.high %v508_v57, %v512_v5  ;;  %v504_v13 = vld [vmem:[#allocation2 + $0x478] sm:$0xff]  ;;  %v11587_v31 = vcombine.low %v444_v15, %v448_v9 }
 0x407   : > { %v8747_v59 = vpop.f32.mrf.mxu1  ;;  %v8707_v21 = vpop.f32.mrf.mxu0  ;;  %9041 = vmatprep.subr.bf16.mxu0 %v11676_v0  ;;  %v436_v14 = vld [vmem:[#allocation2 + $0x258] sm:$0xff]  ;;  %v11651_v0 = vcombine.low %v508_v57, %v512_v5  ;;  %v11644_v37 = vcombine.high %v500_v4, %v504_v13  ;;  %v11643_v47 = vcombine.low %v500_v4, %v504_v13 }
 0x408   : > { %9015 = vmatpush2.bf16.msra.mxu1 %v11619_v23  ;;  %v440_v23 = vld [vmem:[#allocation2 + $0x278] sm:$0xff] }
 0x409   : > { %v8748_v60 = vpop.f32.mrf.mxu1  ;;  %9016 = vmatprep.subr.bf16.mxu1 %v11612_v51  ;;  %v11580_v51 = vcombine.high %v436_v14, %v440_v23  ;;  %v428_v25 = vld [vmem:[#allocation2 + $0x218] sm:$0xff]  ;;  %v11579_v59 = vcombine.low %v436_v14, %v440_v23 }
 0x40a   : > { %9042 = vmatpush1.bf16.msra.mxu0 %v11675_v48  ;;  %v432_v54 = vld [vmem:[#allocation2 + $0x238] sm:$0xff]  ;;  %v11636_v48 = vcombine.high %v492_v1, %v496_v19 }
 0x40b   : > { %9043 = vmatprep.subr.bf16.mxu0 %v11668_v63  ;;  %v11572_v21 = vcombine.high %v428_v25, %v432_v54  ;;  %v616_v63 = vld [vmem:[#allocation2 + $0x7f8] sm:$0xff]  ;;  %v11571_v44 = vcombine.low %v428_v25, %v432_v54 }
 0x40c   : > { %9017 = vmatpush2.bf16.msra.mxu1 %v11611_v62  ;;  %v612_v62 = vld [vmem:[#allocation2 + $0x7d8] sm:$0xff] }
 0x40d   : > { %9018 = vmatprep.subr.bf16.mxu1 %v11604_v53  ;;  %v676_v60 = vld [vmem:[#allocation2 + $0x9d8] sm:$0xff]  ;;  %v11756_v6 = vcombine.high %v612_v62, %v616_v63  ;;  %v11755_v57 = vcombine.low %v612_v62, %v616_v63 }
 0x40e   : > { %9044 = vmatpush1.bf16.msra.mxu0 %v11667_v3  ;;  %v680_v53 = vld [vmem:[#allocation2 + $0x9f8] sm:$0xff] }
 0x40f   : > { %9045 = vmatprep.subr.bf16.mxu0 %v11660_v43  ;;  %v11820_v58 = vcombine.high %v676_v60, %v680_v53  ;;  %v604_v3 = vld [vmem:[#allocation2 + $0x798] sm:$0xff]  ;;  %v11819_v5 = vcombine.low %v676_v60, %v680_v53 }
 0x410   : > { %9019 = vmatpush2.bf16.msra.mxu1 %v11603_v30  ;;  %v608_v30 = vld [vmem:[#allocation2 + $0x7b8] sm:$0xff] }
 0x411   : > { %9020 = vmatprep.subr.bf16.mxu1 %v11596_v52  ;;  %v668_v43 = vld [vmem:[#allocation2 + $0x998] sm:$0xff]  ;;  %v11748_v15 = vcombine.high %v604_v3, %v608_v30  ;;  %v11747_v4 = vcombine.low %v604_v3, %v608_v30 }
 0x412   : > { %9046 = vmatpush1.bf16.msra.mxu0 %v11659_v2  ;;  %v672_v52 = vld [vmem:[#allocation2 + $0x9b8] sm:$0xff] }
 0x413   : > { %9047 = vmatprep.subr.bf16.mxu0 %v11652_v56  ;;  %v11812_v9 = vcombine.high %v668_v43, %v672_v52  ;;  %v596_v2 = vld [vmem:[#allocation2 + $0x758] sm:$0xff]  ;;  %v11811_v13 = vcombine.low %v668_v43, %v672_v52 }
 0x414   : > { %9021 = vmatpush2.bf16.msra.mxu1 %v11595_v33  ;;  %v600_v33 = vld [vmem:[#allocation2 + $0x778] sm:$0xff] }
 0x415   : > { %9022 = vmatprep.subr.bf16.mxu1 %v11588_v12  ;;  %v660_v56 = vld [vmem:[#allocation2 + $0x958] sm:$0xff]  ;;  %v11740_v14 = vcombine.high %v596_v2, %v600_v33  ;;  %v11739_v1 = vcombine.low %v596_v2, %v600_v33 }
 0x416   : > { %9048 = vmatpush1.bf16.msra.mxu0 %v11651_v0  ;;  %v664_v12 = vld [vmem:[#allocation2 + $0x978] sm:$0xff] }
 0x417   : > { %9049 = vmatprep.subr.bf16.mxu0 %v11644_v37  ;;  %v11804_v23 = vcombine.high %v660_v56, %v664_v12  ;;  %v588_v0 = vld [vmem:[#allocation2 + $0x718] sm:$0xff]  ;;  %v11803_v19 = vcombine.low %v660_v56, %v664_v12 }
 0x418   : > { %9023 = vmatpush2.bf16.msra.mxu1 %v11587_v31  ;;  %v592_v31 = vld [vmem:[#allocation2 + $0x738] sm:$0xff] }
 0x419   : > { %9024 = vmatprep.subr.bf16.mxu1 %v11580_v51  ;;  %v652_v37 = vld [vmem:[#allocation2 + $0x918] sm:$0xff] }
 0x41a   : > { %9050 = vmatpush1.bf16.msra.mxu0 %v11643_v47  ;;  %v656_v51 = vld [vmem:[#allocation2 + $0x938] sm:$0xff] }
 0x41b   : > { %9051 = vmatprep.subr.bf16.mxu0 %v11636_v48  ;;  %v11796_v25 = vcombine.high %v652_v37, %v656_v51  ;;  %v580_v54 = vld [vmem:[#allocation2 + $0x6d8] sm:$0xff]  ;;  %v11795_v62 = vcombine.low %v652_v37, %v656_v51 }
 0x41c   : > { %9025 = vmatpush2.bf16.msra.mxu1 %v11579_v59  ;;  %v584_v47 = vld [vmem:[#allocation2 + $0x6f8] sm:$0xff] }
 0x41d   : > { %9026 = vmatprep.subr.bf16.mxu1 %v11572_v21  ;;  %v644_v59 = vld [vmem:[#allocation2 + $0x8d8] sm:$0xff]  ;;  %v11731_v21 = vcombine.low %v588_v0, %v592_v31 }
 0x41e   : > { %9052 = vmatpush1.bf16.msra.mxu0 %v11635_v46  ;;  %v648_v48 = vld [vmem:[#allocation2 + $0x8f8] sm:$0xff] }
 0x41f   : > { %9053 = vmatprep.subr.bf16.mxu0 %v11756_v6  ;;  %v11788_v63 = vcombine.high %v644_v59, %v648_v48  ;;  %v572_v60 = vld [vmem:[#allocation2 + $0x698] sm:$0xff]  ;;  %v11723_v6 = vcombine.low %v580_v54, %v584_v47 }
 0x420   : > { %9027 = vmatpush2.bf16.msra.mxu1 %v11571_v44  ;;  %v576_v53 = vld [vmem:[#allocation2 + $0x6b8] sm:$0xff] }
 0x421   : > { %9078 = vmatprep.subr.bf16.mxu1 %v11820_v58  ;;  %v636_v46 = vld [vmem:[#allocation2 + $0x898] sm:$0xff]  ;;  %v11787_v58 = vcombine.low %v644_v59, %v648_v48  ;;  %v11716_v3 = vcombine.high %v572_v60, %v576_v53 }
 0x422   : > { %9054 = vmatpush2.bf16.msra.mxu0 %v11755_v57  ;;  %v640_v44 = vld [vmem:[#allocation2 + $0x8b8] sm:$0xff] }
 0x423   : > { %9029 = vmatmul.mubr.bf16.vlgmr.msra.gmra.mxu1 %v13848_v16  ;;  %9055 = vmatprep.subr.bf16.mxu0 %v11748_v15  ;;  %v11732_v16 = vcombine.high %v588_v0, %v592_v31  ;;  %v11780_v30 = vcombine.high %v636_v46, %v640_v44  ;;  %v564_v43 = vld [vmem:[#allocation2 + $0x658] sm:$0xff]  ;;  %v11715_v15 = vcombine.low %v572_v60, %v576_v53 }
 0x424   : > { %9079 = vmatpush1.bf16.msra.mxu1 %v11819_v5  ;;  %9110 = vmatprep.mubr.bf16.mxu1 %v13866_v28  ;;  %v11724_v28 = vcombine.high %v580_v54, %v584_v47  ;;  %v568_v52 = vld [vmem:[#allocation2 + $0x678] sm:$0xff] }
 0x425   : > { %9080 = vmatprep.subr.bf16.mxu1 %v11812_v9  ;;  %v628_v57 = vld [vmem:[#allocation2 + $0x858] sm:$0xff]  ;;  %v11779_v9 = vcombine.low %v636_v46, %v640_v44  ;;  %v11708_v2 = vcombine.high %v564_v43, %v568_v52 }
 0x426   : > { %9056 = vmatpush2.bf16.msra.mxu0 %v11747_v4  ;;  %v632_v5 = vld [vmem:[#allocation2 + $0x878] sm:$0xff] }
 0x427   : > { %9057 = vmatprep.subr.bf16.mxu0 %v11740_v14  ;;  %v11772_v33 = vcombine.high %v628_v57, %v632_v5  ;;  %v556_v56 = vld [vmem:[#allocation2 + $0x618] sm:$0xff]  ;;  %v11707_v14 = vcombine.low %v564_v43, %v568_v52 }
 0x428   : > { %9081 = vmatpush1.bf16.msra.mxu1 %v11811_v13  ;;  %v560_v12 = vld [vmem:[#allocation2 + $0x638] sm:$0xff] }
 0x429   : > { %9082 = vmatprep.subr.bf16.mxu1 %v11804_v23  ;;  %v620_v4 = vld [vmem:[#allocation2 + $0x818] sm:$0xff]  ;;  %v11771_v23 = vcombine.low %v628_v57, %v632_v5  ;;  %v11700_v0 = vcombine.high %v556_v56, %v560_v12 }
 0x42a   : > { %9058 = vmatpush2.bf16.msra.mxu0 %v11739_v1  ;;  %v624_v13 = vld [vmem:[#allocation2 + $0x838] sm:$0xff] }
 0x42b   : > { %9059 = vmatprep.subr.bf16.mxu0 %v11732_v16  ;;  %v11764_v31 = vcombine.high %v620_v4, %v624_v13  ;;  %v804_v37 = vld [vmem:[#allocation2 + $0xdd8] sm:$0xff]  ;;  %v11699_v16 = vcombine.low %v556_v56, %v560_v12 }
 0x42c   : > { %9083 = vmatpush1.bf16.msra.mxu1 %v11803_v19  ;;  %v808_v51 = vld [vmem:[#allocation2 + $0xdf8] sm:$0xff] }
 0x42d   : > { %9084 = vmatprep.subr.bf16.mxu1 %v11796_v25  ;;  %v740_v1 = vld [vmem:[#allocation2 + $0xbd8] sm:$0xff]  ;;  %v11763_v25 = vcombine.low %v620_v4, %v624_v13  ;;  %v11948_v54 = vcombine.high %v804_v37, %v808_v51 }
 0x42e   : > { %9060 = vmatpush2.bf16.msra.mxu0 %v11731_v21  ;;  %v744_v19 = vld [vmem:[#allocation2 + $0xbf8] sm:$0xff] }
 0x42f   : > { %9061 = vmatprep.subr.bf16.mxu0 %v11724_v28  ;;  %v11884_v47 = vcombine.high %v740_v1, %v744_v19  ;;  %v796_v59 = vld [vmem:[#allocation2 + $0xd98] sm:$0xff]  ;;  %v11947_v28 = vcombine.low %v804_v37, %v808_v51 }
 0x430   : > { %9085 = vmatpush1.bf16.msra.mxu1 %v11795_v62  ;;  %v800_v48 = vld [vmem:[#allocation2 + $0xdb8] sm:$0xff] }
 0x431   : > { %9086 = vmatprep.subr.bf16.mxu1 %v11788_v63  ;;  %v732_v21 = vld [vmem:[#allocation2 + $0xb98] sm:$0xff]  ;;  %v11883_v63 = vcombine.low %v740_v1, %v744_v19  ;;  %v11940_v60 = vcombine.high %v796_v59, %v800_v48  ;;  %v11939_v52 = vcombine.low %v796_v59, %v800_v48 }
 0x432   : > { %9062 = vmatpush2.bf16.msra.mxu0 %v11723_v6  ;;  %v736_v62 = vld [vmem:[#allocation2 + $0xbb8] sm:$0xff] }
 0x433   : > { %9063 = vmatprep.subr.bf16.mxu0 %v11716_v3  ;;  %v11876_v53 = vcombine.high %v732_v21, %v736_v62  ;;  %v788_v46 = vld [vmem:[#allocation2 + $0xd58] sm:$0xff]  ;;  %v11875_v5 = vcombine.low %v732_v21, %v736_v62 }
 0x434   : > { %9087 = vmatpush1.bf16.msra.mxu1 %v11787_v58  ;;  %v792_v44 = vld [vmem:[#allocation2 + $0xd78] sm:$0xff] }
 0x435   : > { %9088 = vmatprep.subr.bf16.mxu1 %v11780_v30  ;;  %v724_v58 = vld [vmem:[#allocation2 + $0xb58] sm:$0xff] }
 0x436   : > { %9064 = vmatpush2.bf16.msra.mxu0 %v11715_v15  ;;  %v728_v3 = vld [vmem:[#allocation2 + $0xb78] sm:$0xff]  ;;  %v11932_v15 = vcombine.high %v788_v46, %v792_v44 }
 0x437   : > { %9065 = vmatprep.subr.bf16.mxu0 %v11708_v2  ;;  %v780_v56 = vld [vmem:[#allocation2 + $0xd18] sm:$0xff] }
 0x438   : > { %9089 = vmatpush1.bf16.msra.mxu1 %v11779_v9  ;;  %v784_v12 = vld [vmem:[#allocation2 + $0xd38] sm:$0xff] }
 0x439   : > { %9090 = vmatprep.subr.bf16.mxu1 %v11772_v33  ;;  %v716_v4 = vld [vmem:[#allocation2 + $0xb18] sm:$0xff]  ;;  %v11924_v37 = vcombine.high %v780_v56, %v784_v12 }
 0x43a   : > { %9066 = vmatpush2.bf16.msra.mxu0 %v11707_v14  ;;  %v720_v13 = vld [vmem:[#allocation2 + $0xb38] sm:$0xff] }
 0x43b   : > { %9067 = vmatprep.subr.bf16.mxu0 %v11700_v0  ;;  %v772_v1 = vld [vmem:[#allocation2 + $0xcd8] sm:$0xff] }
 0x43c   : > { %9091 = vmatpush1.bf16.msra.mxu1 %v11771_v23  ;;  %v11931_v23 = vcombine.low %v788_v46, %v792_v44  ;;  %v776_v19 = vld [vmem:[#allocation2 + $0xcf8] sm:$0xff] }
 0x43d   : > { %9092 = vmatprep.subr.bf16.mxu1 %v11764_v31  ;;  %v11867_v31 = vcombine.low %v724_v58, %v728_v3  ;;  %v11916_v59 = vcombine.high %v772_v1, %v776_v19  ;;  %v764_v21 = vld [vmem:[#allocation2 + $0xc98] sm:$0xff] }
 0x43e   : > { %9068 = vmatpush2.bf16.msra.mxu0 %v11699_v16  ;;  %v708_v16 = vld [vmem:[#allocation2 + $0xad8] sm:$0xff] }
 0x43f   : > { %9119 = vmatprep.subr.bf16.mxu0 %v11948_v54  ;;  %v11923_v54 = vcombine.low %v780_v56, %v784_v12  ;;  %v768_v62 = vld [vmem:[#allocation2 + $0xcb8] sm:$0xff] }
 0x440   : > { %9093 = vmatpush1.bf16.msra.mxu1 %v11763_v25  ;;  %v712_v25 = vld [vmem:[#allocation2 + $0xaf8] sm:$0xff]  ;;  %v11908_v46 = vcombine.high %v764_v21, %v768_v62 }
 0x441   : > { %9094 = vmatprep.subr.bf16.mxu1 %v11884_v47  ;;  %v8784_v6 = vpop.f32.mrf.mxu0  ;;  %9070 = vmatmul.mubr.bf16.vlgmr.msra.gmra.mxu0 %v13857_v20  ;;  %v11868_v20 = vcombine.high %v724_v58, %v728_v3  ;;  %v11859_v47 = vcombine.low %v716_v4, %v720_v13  ;;  %v11852_v48 = vcombine.high %v708_v16, %v712_v25  ;;  %v760_v58 = vld [vmem:[#allocation2 + $0xc78] sm:$0xff] }
 0x442   : > { %v8785_v30 = vadd.f32 %v8784_v6, %v14118_v26  ;;  %9120 = vmatpush1.bf16.msra.mxu0 %v11947_v28  ;;  %9151 = vmatprep.mubr.bf16.mxu0 %v13871_v29  ;;  %v700_v28 = vld [vmem:[#allocation2 + $0xa98] sm:$0xff] }
 0x443   : > { %v8825_v43 = vpop.f32.mrf.mxu1  ;;  %v8786_v57 = vpop.f32.mrf.mxu0  ;;  %9121 = vmatprep.subr.bf16.mxu0 %v11940_v60  ;;  %v11915_v60 = vcombine.low %v772_v1, %v776_v19  ;;  %v756_v6 = vld [vmem:[#allocation2 + $0xc58] sm:$0xff] }
 0x444   : > { %9095 = vmatpush2.bf16.msra.mxu1 %v11883_v63  ;;  %v14128_v9 = vadd.f32 %v8825_v43, %v8785_v30  ;;  %v8787_v2 = vadd.f32 %v8786_v57, %v14121_v34  ;;  %v11860_v34 = vcombine.high %v716_v4, %v720_v13  ;;  %v704_v63 = vld [vmem:[#allocation2 + $0xab8] sm:$0xff]  ;;  %v11907_v43 = vcombine.low %v764_v21, %v768_v62 }
 0x445   : > { %v8827_v33 = vpop.f32.mrf.mxu1  ;;  %9096 = vmatprep.subr.bf16.mxu1 %v11876_v53  ;;  %v8788_v26 = vpop.f32.mrf.mxu0  ;;  %v11851_v53 = vcombine.low %v708_v16, %v712_v25  ;;  %v11844_v44 = vcombine.high %v700_v28, %v704_v63  ;;  %v692_v3 = vld [vmem:[#allocation2 + $0xa58] sm:$0xff]  ;;  %v11900_v57 = vcombine.high %v756_v6, %v760_v58  ;;  %v11899_v56 = vcombine.low %v756_v6, %v760_v58 }
 0x446   : > { %v14131_v14 = vadd.f32 %v8827_v33, %v8787_v2  ;;  %9122 = vmatpush1.bf16.msra.mxu0 %v11939_v52  ;;  %v696_v30 = vld [vmem:[#allocation2 + $0xa78] sm:$0xff]  ;;  %v11843_v52 = vcombine.low %v700_v28, %v704_v63 }
 0x447   : > { %v8829_v29 = vpop.f32.mrf.mxu1  ;;  %v8789_v0 = vpop.f32.mrf.mxu0  ;;  %9123 = vmatprep.subr.bf16.mxu0 %v11932_v15  ;;  %v748_v15 = vld [vmem:[#allocation2 + $0xc18] sm:$0xff]  ;;  %v11835_v12 = vcombine.low %v692_v3, %v696_v30 }
 0x448   : > { %9097 = vmatpush2.bf16.msra.mxu1 %v11875_v5  ;;  %v11836_v5 = vcombine.high %v692_v3, %v696_v30  ;;  %v752_v2 = vld [vmem:[#allocation2 + $0xc38] sm:$0xff] }
 0x449   : > { %v8830_v51 = vpop.f32.mrf.mxu1  ;;  %9098 = vmatprep.subr.bf16.mxu1 %v11868_v20  ;;  %v684_v33 = vld [vmem:[#allocation2 + $0xa18] sm:$0xff]  ;;  %v11892_v26 = vcombine.high %v748_v15, %v752_v2 }
 0x44a   : > { %9124 = vmatpush1.bf16.msra.mxu0 %v11931_v23  ;;  %v688_v20 = vld [vmem:[#allocation2 + $0xa38] sm:$0xff] }
 0x44b   : > { %9125 = vmatprep.subr.bf16.mxu0 %v11924_v37  ;;  %v11828_v4 = vcombine.high %v684_v33, %v688_v20  ;;  %v868_v13 = vld [vmem:[#allocation2 + $0xfd8] sm:$0xff]  ;;  %v11827_v37 = vcombine.low %v684_v33, %v688_v20 }
 0x44c   : > { %9099 = vmatpush2.bf16.msra.mxu1 %v11867_v31  ;;  %v872_v29 = vld [vmem:[#allocation2 + $0xff8] sm:$0xff]  ;;  %v11891_v31 = vcombine.low %v748_v15, %v752_v2 }
 0x44d   : > { %9100 = vmatprep.subr.bf16.mxu1 %v11860_v34  ;;  %v932_v23 = vld [vmem:[#allocation2 + $0x11d8] sm:$0xff]  ;;  %v12012_v51 = vcombine.high %v868_v13, %v872_v29 }
 0x44e   : > { %9126 = vmatpush1.bf16.msra.mxu0 %v11923_v54  ;;  %v936_v0 = vld [vmem:[#allocation2 + $0x11f8] sm:$0xff]  ;;  %v12011_v54 = vcombine.low %v868_v13, %v872_v29 }
 0x44f   : > { %9127 = vmatprep.subr.bf16.mxu0 %v11916_v59  ;;  %v12076_v34 = vcombine.high %v932_v23, %v936_v0  ;;  %v860_v1 = vld [vmem:[#allocation2 + $0xf98] sm:$0xff] }
 0x450   : > { %9101 = vmatpush2.bf16.msra.mxu1 %v11859_v47  ;;  %v864_v19 = vld [vmem:[#allocation2 + $0xfb8] sm:$0xff]  ;;  %v12075_v47 = vcombine.low %v932_v23, %v936_v0 }
 0x451   : > { %9102 = vmatprep.subr.bf16.mxu1 %v11852_v48  ;;  %v924_v16 = vld [vmem:[#allocation2 + $0x1198] sm:$0xff]  ;;  %v12004_v59 = vcombine.high %v860_v1, %v864_v19 }
 0x452   : > { %9128 = vmatpush1.bf16.msra.mxu0 %v11915_v60  ;;  %v928_v25 = vld [vmem:[#allocation2 + $0x11b8] sm:$0xff]  ;;  %v12003_v60 = vcombine.low %v860_v1, %v864_v19 }
 0x453   : > { %9129 = vmatprep.subr.bf16.mxu0 %v11908_v46  ;;  %v12068_v48 = vcombine.high %v924_v16, %v928_v25  ;;  %v852_v21 = vld [vmem:[#allocation2 + $0xf58] sm:$0xff] }
 0x454   : > { %9103 = vmatpush2.bf16.msra.mxu1 %v11851_v53  ;;  %v856_v62 = vld [vmem:[#allocation2 + $0xf78] sm:$0xff]  ;;  %v12067_v53 = vcombine.low %v924_v16, %v928_v25 }
 0x455   : > { %9104 = vmatprep.subr.bf16.mxu1 %v11844_v44  ;;  %v916_v28 = vld [vmem:[#allocation2 + $0x1158] sm:$0xff]  ;;  %v11996_v46 = vcombine.high %v852_v21, %v856_v62 }
 0x456   : > { %9130 = vmatpush1.bf16.msra.mxu0 %v11907_v43  ;;  %v920_v63 = vld [vmem:[#allocation2 + $0x1178] sm:$0xff]  ;;  %v11995_v43 = vcombine.low %v852_v21, %v856_v62 }
 0x457   : > { %9131 = vmatprep.subr.bf16.mxu0 %v11900_v57  ;;  %v12060_v44 = vcombine.high %v916_v28, %v920_v63  ;;  %v844_v6 = vld [vmem:[#allocation2 + $0xf18] sm:$0xff] }
 0x458   : > { %9105 = vmatpush2.bf16.msra.mxu1 %v11843_v52  ;;  %v848_v58 = vld [vmem:[#allocation2 + $0xf38] sm:$0xff]  ;;  %v12059_v52 = vcombine.low %v916_v28, %v920_v63 }
 0x459   : > { %9106 = vmatprep.subr.bf16.mxu1 %v11836_v5  ;;  %v908_v3 = vld [vmem:[#allocation2 + $0x1118] sm:$0xff]  ;;  %v11987_v20 = vcombine.low %v844_v6, %v848_v58 }
 0x45a   : > { %9132 = vmatpush1.bf16.msra.mxu0 %v11899_v56  ;;  %v912_v30 = vld [vmem:[#allocation2 + $0x1138] sm:$0xff] }
 0x45b   : > { %9133 = vmatprep.subr.bf16.mxu0 %v11892_v26  ;;  %v12052_v57 = vcombine.high %v908_v3, %v912_v30  ;;  %v836_v5 = vld [vmem:[#allocation2 + $0xed8] sm:$0xff]  ;;  %v12051_v56 = vcombine.low %v908_v3, %v912_v30 }
 0x45c   : > { %9107 = vmatpush2.bf16.msra.mxu1 %v11835_v12  ;;  %v840_v15 = vld [vmem:[#allocation2 + $0xef8] sm:$0xff] }
 0x45d   : > { %9108 = vmatprep.subr.bf16.mxu1 %v11828_v4  ;;  %v900_v2 = vld [vmem:[#allocation2 + $0x10d8] sm:$0xff]  ;;  %v11979_v23 = vcombine.low %v836_v5, %v840_v15 }
 0x45e   : > { %9134 = vmatpush1.bf16.msra.mxu0 %v11891_v31  ;;  %v904_v33 = vld [vmem:[#allocation2 + $0x10f8] sm:$0xff] }
 0x45f   : > { %9135 = vmatprep.subr.bf16.mxu0 %v12012_v51  ;;  %v12044_v12 = vcombine.high %v900_v2, %v904_v33  ;;  %v828_v26 = vld [vmem:[#allocation2 + $0xe98] sm:$0xff]  ;;  %v12043_v0 = vcombine.low %v900_v2, %v904_v33 }
 0x460   : > { %9109 = vmatpush2.bf16.msra.mxu1 %v11827_v37  ;;  %v832_v4 = vld [vmem:[#allocation2 + $0xeb8] sm:$0xff] }
 0x461   : > { %9160 = vmatprep.subr.bf16.mxu1 %v12076_v34  ;;  %v892_v13 = vld [vmem:[#allocation2 + $0x1098] sm:$0xff]  ;;  %v11972_v31 = vcombine.high %v828_v26, %v832_v4  ;;  %v11971_v16 = vcombine.low %v828_v26, %v832_v4 }
 0x462   : > { %9136 = vmatpush2.bf16.msra.mxu0 %v12011_v54  ;;  %v896_v29 = vld [vmem:[#allocation2 + $0x10b8] sm:$0xff] }
 0x463   : > { %9111 = vmatmul.mubr.bf16.vlgmr.msra.gmra.mxu1 %v13883_v39  ;;  %9137 = vmatprep.subr.bf16.mxu0 %v12004_v59  ;;  %v11988_v39 = vcombine.high %v844_v6, %v848_v58  ;;  %v12036_v37 = vcombine.high %v892_v13, %v896_v29  ;;  %v820_v51 = vld [vmem:[#allocation2 + $0xe58] sm:$0xff]  ;;  %v12035_v25 = vcombine.low %v892_v13, %v896_v29 }
 0x464   : > { %9161 = vmatpush1.bf16.msra.mxu1 %v12075_v47  ;;  %9192 = vmatprep.mubr.bf16.mxu1 %v13896_v22  ;;  %v11980_v22 = vcombine.high %v836_v5, %v840_v15  ;;  %v824_v34 = vld [vmem:[#allocation2 + $0xe78] sm:$0xff] }
 0x465   : > { %9162 = vmatprep.subr.bf16.mxu1 %v12068_v48  ;;  %v884_v1 = vld [vmem:[#allocation2 + $0x1058] sm:$0xff]  ;;  %v11964_v54 = vcombine.high %v820_v51, %v824_v34  ;;  %v11963_v28 = vcombine.low %v820_v51, %v824_v34 }
 0x466   : > { %9138 = vmatpush2.bf16.msra.mxu0 %v12003_v60  ;;  %v888_v19 = vld [vmem:[#allocation2 + $0x1078] sm:$0xff] }
 0x467   : > { %9139 = vmatprep.subr.bf16.mxu0 %v11996_v46  ;;  %v12028_v47 = vcombine.high %v884_v1, %v888_v19  ;;  %v812_v59 = vld [vmem:[#allocation2 + $0xe18] sm:$0xff]  ;;  %v12027_v63 = vcombine.low %v884_v1, %v888_v19 }
 0x468   : > { %9163 = vmatpush1.bf16.msra.mxu1 %v12067_v53  ;;  %v816_v48 = vld [vmem:[#allocation2 + $0xe38] sm:$0xff] }
 0x469   : > { %9164 = vmatprep.subr.bf16.mxu1 %v12060_v44  ;;  %v876_v21 = vld [vmem:[#allocation2 + $0x1018] sm:$0xff]  ;;  %v11956_v60 = vcombine.high %v812_v59, %v816_v48  ;;  %v11955_v3 = vcombine.low %v812_v59, %v816_v48 }
 0x46a   : > { %9140 = vmatpush2.bf16.msra.mxu0 %v11995_v43  ;;  %v880_v62 = vld [vmem:[#allocation2 + $0x1038] sm:$0xff] }
 0x46b   : > { %9141 = vmatprep.subr.bf16.mxu0 %v11988_v39  ;;  %v12020_v53 = vcombine.high %v876_v21, %v880_v62  ;;  %v1060_v46 = vld [vmem:[#allocation2 + $0x15d8] sm:$0xff]  ;;  %v12019_v30 = vcombine.low %v876_v21, %v880_v62 }
 0x46c   : > { %9165 = vmatpush1.bf16.msra.mxu1 %v12059_v52  ;;  %v1064_v44 = vld [vmem:[#allocation2 + $0x15f8] sm:$0xff] }
 0x46d   : > { %9166 = vmatprep.subr.bf16.mxu1 %v12052_v57  ;;  %v996_v6 = vld [vmem:[#allocation2 + $0x13d8] sm:$0xff]  ;;  %v12204_v43 = vcombine.high %v1060_v46, %v1064_v44  ;;  %v12203_v2 = vcombine.low %v1060_v46, %v1064_v44 }
 0x46e   : > { %9142 = vmatpush2.bf16.msra.mxu0 %v11987_v20  ;;  %v1000_v58 = vld [vmem:[#allocation2 + $0x13f8] sm:$0xff] }
 0x46f   : > { %9143 = vmatprep.subr.bf16.mxu0 %v11980_v22  ;;  %v12140_v52 = vcombine.high %v996_v6, %v1000_v58  ;;  %v1052_v39 = vld [vmem:[#allocation2 + $0x1598] sm:$0xff]  ;;  %v12139_v33 = vcombine.low %v996_v6, %v1000_v58 }
 0x470   : > { %9167 = vmatpush1.bf16.msra.mxu1 %v12051_v56  ;;  %v1056_v57 = vld [vmem:[#allocation2 + $0x15b8] sm:$0xff] }
 0x471   : > { %9168 = vmatprep.subr.bf16.mxu1 %v12044_v12  ;;  %v988_v5 = vld [vmem:[#allocation2 + $0x1398] sm:$0xff]  ;;  %v12196_v20 = vcombine.high %v1052_v39, %v1056_v57 }
 0x472   : > { %9144 = vmatpush2.bf16.msra.mxu0 %v11979_v23  ;;  %v992_v15 = vld [vmem:[#allocation2 + $0x13b8] sm:$0xff] }
 0x473   : > { %9145 = vmatprep.subr.bf16.mxu0 %v11972_v31  ;;  %v12132_v56 = vcombine.high %v988_v5, %v992_v15  ;;  %v1044_v22 = vld [vmem:[#allocation2 + $0x1558] sm:$0xff] }
 0x474   : > { %9169 = vmatpush1.bf16.msra.mxu1 %v12043_v0  ;;  %v1048_v12 = vld [vmem:[#allocation2 + $0x1578] sm:$0xff]  ;;  %v12195_v0 = vcombine.low %v1052_v39, %v1056_v57 }
 0x475   : > { %9170 = vmatprep.subr.bf16.mxu1 %v12036_v37  ;;  %v980_v4 = vld [vmem:[#allocation2 + $0x1358] sm:$0xff]  ;;  %v12131_v37 = vcombine.low %v988_v5, %v992_v15  ;;  %v12188_v51 = vcombine.high %v1044_v22, %v1048_v12  ;;  %v12187_v48 = vcombine.low %v1044_v22, %v1048_v12 }
 0x476   : > { %9146 = vmatpush2.bf16.msra.mxu0 %v11971_v16  ;;  %v984_v13 = vld [vmem:[#allocation2 + $0x1378] sm:$0xff] }
 0x477   : > { %9147 = vmatprep.subr.bf16.mxu0 %v11964_v54  ;;  %v1036_v16 = vld [vmem:[#allocation2 + $0x1518] sm:$0xff]  ;;  %v12123_v62 = vcombine.low %v980_v4, %v984_v13 }
 0x478   : > { %9171 = vmatpush1.bf16.msra.mxu1 %v12035_v25  ;;  %v1040_v25 = vld [vmem:[#allocation2 + $0x1538] sm:$0xff] }
 0x479   : > { %9172 = vmatprep.subr.bf16.mxu1 %v12028_v47  ;;  %v972_v54 = vld [vmem:[#allocation2 + $0x1318] sm:$0xff]  ;;  %v12179_v6 = vcombine.low %v1036_v16, %v1040_v25 }
 0x47a   : > { %9148 = vmatpush2.bf16.msra.mxu0 %v11963_v28  ;;  %v976_v47 = vld [vmem:[#allocation2 + $0x1338] sm:$0xff]  ;;  %v12180_v28 = vcombine.high %v1036_v16, %v1040_v25 }
 0x47b   : > { %9149 = vmatprep.subr.bf16.mxu0 %v11956_v60  ;;  %v1028_v60 = vld [vmem:[#allocation2 + $0x14d8] sm:$0xff]  ;;  %v12115_v58 = vcombine.low %v972_v54, %v976_v47 }
 0x47c   : > { %9173 = vmatpush1.bf16.msra.mxu1 %v12027_v63  ;;  %v964_v46 = vld [vmem:[#allocation2 + $0x12d8] sm:$0xff] }
 0x47d   : > { %9174 = vmatprep.subr.bf16.mxu1 %v12020_v53  ;;  %v1032_v53 = vld [vmem:[#allocation2 + $0x14f8] sm:$0xff] }
 0x47e   : > { %9150 = vmatpush2.bf16.msra.mxu0 %v11955_v3  ;;  %v968_v44 = vld [vmem:[#allocation2 + $0x12f8] sm:$0xff]  ;;  %v12172_v3 = vcombine.high %v1028_v60, %v1032_v53  ;;  %v12171_v5 = vcombine.low %v1028_v60, %v1032_v53 }
 0x47f   : > { %9201 = vmatprep.subr.bf16.mxu0 %v12204_v43  ;;  %v1020_v43 = vld [vmem:[#allocation2 + $0x1498] sm:$0xff]  ;;  %v12107_v15 = vcombine.low %v964_v46, %v968_v44 }
 0x480   : > { %9175 = vmatpush1.bf16.msra.mxu1 %v12019_v30  ;;  %v12108_v30 = vcombine.high %v964_v46, %v968_v44  ;;  %v956_v39 = vld [vmem:[#allocation2 + $0x1298] sm:$0xff] }
 0x481   : > { %9176 = vmatprep.subr.bf16.mxu1 %v12140_v52  ;;  %v8866_v26 = vpop.f32.mrf.mxu0  ;;  %9152 = vmatmul.mubr.bf16.vlgmr.msra.gmra.mxu0 %v13887_v40  ;;  %v12124_v40 = vcombine.high %v980_v4, %v984_v13  ;;  %v1024_v52 = vld [vmem:[#allocation2 + $0x14b8] sm:$0xff] }
 0x482   : > { %v8867_v29 = vadd.f32 %v8866_v26, %v14128_v9  ;;  %9202 = vmatpush1.bf16.msra.mxu0 %v12203_v2  ;;  %9233 = vmatprep.mubr.bf16.mxu0 %v13901_v49  ;;  %v960_v57 = vld [vmem:[#allocation2 + $0x12b8] sm:$0xff]  ;;  %v12164_v2 = vcombine.high %v1020_v43, %v1024_v52  ;;  %v12163_v26 = vcombine.low %v1020_v43, %v1024_v52 }
 0x483   : > { %v8907_v23 = vpop.f32.mrf.mxu1  ;;  %v8868_v31 = vpop.f32.mrf.mxu0  ;;  %9203 = vmatprep.subr.bf16.mxu0 %v12196_v20  ;;  %v1012_v20 = vld [vmem:[#allocation2 + $0x1458] sm:$0xff]  ;;  %v12099_v4 = vcombine.low %v956_v39, %v960_v57 }
 0x484   : > { %9177 = vmatpush2.bf16.msra.mxu1 %v12139_v33  ;;  %v14138_v34 = vadd.f32 %v8907_v23, %v8867_v29  ;;  %v8869_v1 = vadd.f32 %v8868_v31, %v14131_v14  ;;  %v12116_v14 = vcombine.high %v972_v54, %v976_v47  ;;  %v12100_v33 = vcombine.high %v956_v39, %v960_v57  ;;  %v948_v22 = vld [vmem:[#allocation2 + $0x1258] sm:$0xff] }
 0x485   : > { %v8909_v19 = vpop.f32.mrf.mxu1  ;;  %9178 = vmatprep.subr.bf16.mxu1 %v12132_v56  ;;  %v8870_v9 = vpop.f32.mrf.mxu0  ;;  %v1016_v56 = vld [vmem:[#allocation2 + $0x1478] sm:$0xff] }
 0x486   : > { %v14141_v59 = vadd.f32 %v8909_v19, %v8869_v1  ;;  %9204 = vmatpush1.bf16.msra.mxu0 %v12195_v0  ;;  %v952_v12 = vld [vmem:[#allocation2 + $0x1278] sm:$0xff]  ;;  %v12156_v13 = vcombine.high %v1012_v20, %v1016_v56 }
 0x487   : > { %v8911_v49 = vpop.f32.mrf.mxu1  ;;  %v8871_v21 = vpop.f32.mrf.mxu0  ;;  %9205 = vmatprep.subr.bf16.mxu0 %v12188_v51  ;;  %v12092_v29 = vcombine.high %v948_v22, %v952_v12  ;;  %v1004_v23 = vld [vmem:[#allocation2 + $0x1418] sm:$0xff]  ;;  %v12155_v51 = vcombine.low %v1012_v20, %v1016_v56  ;;  %v12091_v1 = vcombine.low %v948_v22, %v952_v12 }
 0x488   : > { %9179 = vmatpush2.bf16.msra.mxu1 %v12131_v37  ;;  %v1008_v0 = vld [vmem:[#allocation2 + $0x1438] sm:$0xff] }
 0x489   : > { %v8912_v63 = vpop.f32.mrf.mxu1  ;;  %9180 = vmatprep.subr.bf16.mxu1 %v12124_v40  ;;  %v940_v31 = vld [vmem:[#allocation2 + $0x1218] sm:$0xff]  ;;  %v12148_v19 = vcombine.high %v1004_v23, %v1008_v0  ;;  %v12147_v47 = vcombine.low %v1004_v23, %v1008_v0 }
 0x48a   : > { %9206 = vmatpush1.bf16.msra.mxu0 %v12187_v48  ;;  %v944_v37 = vld [vmem:[#allocation2 + $0x1238] sm:$0xff] }
 0x48b   : > { %9207 = vmatprep.subr.bf16.mxu0 %v12180_v28  ;;  %v12084_v40 = vcombine.high %v940_v31, %v944_v37  ;;  %v1124_v16 = vld [vmem:[#allocation2 + $0x17d8] sm:$0xff]  ;;  %v12083_v49 = vcombine.low %v940_v31, %v944_v37 }
 0x48c   : > { %9181 = vmatpush2.bf16.msra.mxu1 %v12123_v62  ;;  %v1128_v25 = vld [vmem:[#allocation2 + $0x17f8] sm:$0xff] }
 0x48d   : > { %9182 = vmatprep.subr.bf16.mxu1 %v12116_v14  ;;  %v1188_v9 = vld [vmem:[#allocation2 + $0x19d8] sm:$0xff]  ;;  %v12268_v48 = vcombine.high %v1124_v16, %v1128_v25  ;;  %v12267_v60 = vcombine.low %v1124_v16, %v1128_v25 }
 0x48e   : > { %9208 = vmatpush1.bf16.msra.mxu0 %v12179_v6  ;;  %v1192_v54 = vld [vmem:[#allocation2 + $0x19f8] sm:$0xff] }
 0x48f   : > { %9209 = vmatprep.subr.bf16.mxu0 %v12172_v3  ;;  %v12332_v21 = vcombine.high %v1188_v9, %v1192_v54  ;;  %v1116_v62 = vld [vmem:[#allocation2 + $0x1798] sm:$0xff]  ;;  %v12331_v53 = vcombine.low %v1188_v9, %v1192_v54 }
 0x490   : > { %9183 = vmatpush2.bf16.msra.mxu1 %v12115_v58  ;;  %v1120_v28 = vld [vmem:[#allocation2 + $0x17b8] sm:$0xff] }
 0x491   : > { %9184 = vmatprep.subr.bf16.mxu1 %v12108_v30  ;;  %v1180_v63 = vld [vmem:[#allocation2 + $0x1998] sm:$0xff]  ;;  %v12260_v46 = vcombine.high %v1116_v62, %v1120_v28  ;;  %v12259_v52 = vcombine.low %v1116_v62, %v1120_v28 }
 0x492   : > { %9210 = vmatpush1.bf16.msra.mxu0 %v12171_v5  ;;  %v1184_v14 = vld [vmem:[#allocation2 + $0x19b8] sm:$0xff] }
 0x493   : > { %9211 = vmatprep.subr.bf16.mxu0 %v12164_v2  ;;  %v12324_v44 = vcombine.high %v1180_v63, %v1184_v14  ;;  %v1108_v6 = vld [vmem:[#allocation2 + $0x1758] sm:$0xff]  ;;  %v12323_v39 = vcombine.low %v1180_v63, %v1184_v14 }
 0x494   : > { %9185 = vmatpush2.bf16.msra.mxu1 %v12107_v15  ;;  %v1112_v58 = vld [vmem:[#allocation2 + $0x1778] sm:$0xff] }
 0x495   : > { %9186 = vmatprep.subr.bf16.mxu1 %v12100_v33  ;;  %v1172_v3 = vld [vmem:[#allocation2 + $0x1958] sm:$0xff]  ;;  %v12252_v57 = vcombine.high %v1108_v6, %v1112_v58  ;;  %v12251_v12 = vcombine.low %v1108_v6, %v1112_v58 }
 0x496   : > { %9212 = vmatpush1.bf16.msra.mxu0 %v12163_v26  ;;  %v1176_v30 = vld [vmem:[#allocation2 + $0x1978] sm:$0xff] }
 0x497   : > { %9213 = vmatprep.subr.bf16.mxu0 %v12156_v13  ;;  %v12316_v15 = vcombine.high %v1172_v3, %v1176_v30  ;;  %v1100_v2 = vld [vmem:[#allocation2 + $0x1718] sm:$0xff] }
 0x498   : > { %9187 = vmatpush2.bf16.msra.mxu1 %v12099_v4  ;;  %v1104_v33 = vld [vmem:[#allocation2 + $0x1738] sm:$0xff] }
 0x499   : > { %9188 = vmatprep.subr.bf16.mxu1 %v12092_v29  ;;  %v1164_v20 = vld [vmem:[#allocation2 + $0x1918] sm:$0xff]  ;;  %v12244_v26 = vcombine.high %v1100_v2, %v1104_v33  ;;  %v12243_v37 = vcombine.low %v1100_v2, %v1104_v33 }
 0x49a   : > { %9214 = vmatpush1.bf16.msra.mxu0 %v12155_v51  ;;  %v1168_v56 = vld [vmem:[#allocation2 + $0x1938] sm:$0xff] }
 0x49b   : > { %9215 = vmatprep.subr.bf16.mxu0 %v12148_v19  ;;  %v12308_v13 = vcombine.high %v1164_v20, %v1168_v56  ;;  %v1092_v29 = vld [vmem:[#allocation2 + $0x16d8] sm:$0xff] }
 0x49c   : > { %9189 = vmatpush2.bf16.msra.mxu1 %v12091_v1  ;;  %v1096_v23 = vld [vmem:[#allocation2 + $0x16f8] sm:$0xff] }
 0x49d   : > { %9190 = vmatprep.subr.bf16.mxu1 %v12084_v40  ;;  %v1156_v0 = vld [vmem:[#allocation2 + $0x18d8] sm:$0xff]  ;;  %v12236_v51 = vcombine.high %v1092_v29, %v1096_v23  ;;  %v12235_v9 = vcombine.low %v1092_v29, %v1096_v23 }
 0x49e   : > { %9216 = vmatpush1.bf16.msra.mxu0 %v12147_v47  ;;  %v1160_v31 = vld [vmem:[#allocation2 + $0x18f8] sm:$0xff] }
 0x49f   : > { %9217 = vmatprep.subr.bf16.mxu0 %v12268_v48  ;;  %v12300_v1 = vcombine.high %v1156_v0, %v1160_v31  ;;  %v1084_v19 = vld [vmem:[#allocation2 + $0x1698] sm:$0xff]  ;;  %v12299_v54 = vcombine.low %v1156_v0, %v1160_v31 }
 0x4a0   : > { %9191 = vmatpush2.bf16.msra.mxu1 %v12083_v49  ;;  %v1088_v40 = vld [vmem:[#allocation2 + $0x16b8] sm:$0xff] }
 0x4a1   : > { %9242 = vmatprep.subr.bf16.mxu1 %v12332_v21  ;;  %v1148_v16 = vld [vmem:[#allocation2 + $0x1898] sm:$0xff]  ;;  %v12228_v47 = vcombine.high %v1084_v19, %v1088_v40  ;;  %v12227_v63 = vcombine.low %v1084_v19, %v1088_v40 }
 0x4a2   : > { %9218 = vmatpush2.bf16.msra.mxu0 %v12267_v60  ;;  %v1152_v25 = vld [vmem:[#allocation2 + $0x18b8] sm:$0xff] }
 0x4a3   : > { %v14143_v43 = vpop.f32.mrf.mxu1  ;;  %9193 = vmatmul.mubr.bf16.vlgmr.msra.gmra.mxu1 %v13913_v7  ;;  %9219 = vmatprep.subr.bf16.mxu0 %v12260_v46  ;;  %v12315_v7 = vcombine.low %v1172_v3, %v1176_v30  ;;  %v12292_v49 = vcombine.high %v1148_v16, %v1152_v25  ;;  %v1076_v48 = vld [vmem:[#allocation2 + $0x1658] sm:$0xff]  ;;  %v12291_v14 = vcombine.low %v1148_v16, %v1152_v25 }
 0x4a4   : > { %9243 = vmatpush1.bf16.msra.mxu1 %v12331_v53  ;;  %9274 = vmatprep.mubr.bf16.mxu1 %v13926_v42  ;;  %v12307_v42 = vcombine.low %v1164_v20, %v1168_v56  ;;  %v1080_v21 = vld [vmem:[#allocation2 + $0x1678] sm:$0xff] }
 0x4a5   : > { %v14146_v5 = vpop.f32.mrf.mxu1  ;;  %9244 = vmatprep.subr.bf16.mxu1 %v12324_v44  ;;  %v1140_v62 = vld [vmem:[#allocation2 + $0x1858] sm:$0xff]  ;;  %v12220_v60 = vcombine.high %v1076_v48, %v1080_v21  ;;  %v12219_v3 = vcombine.low %v1076_v48, %v1080_v21 }
 0x4a6   : > { %9220 = vmatpush2.bf16.msra.mxu0 %v12259_v52  ;;  %v1144_v28 = vld [vmem:[#allocation2 + $0x1878] sm:$0xff] }
 0x4a7   : > { %v8993_v22 = vpop.f32.mrf.mxu1  ;;  %9221 = vmatprep.subr.bf16.mxu0 %v12252_v57  ;;  %v12284_v53 = vcombine.high %v1140_v62, %v1144_v28  ;;  %v1068_v46 = vld [vmem:[#allocation2 + $0x1618] sm:$0xff]  ;;  %v12283_v30 = vcombine.low %v1140_v62, %v1144_v28 }
 0x4a8   : > { %9245 = vmatpush1.bf16.msra.mxu1 %v12323_v39  ;;  %v1072_v44 = vld [vmem:[#allocation2 + $0x1638] sm:$0xff] }
 0x4a9   : > { %v8994_v4 = vpop.f32.mrf.mxu1  ;;  %9246 = vmatprep.subr.bf16.mxu1 %v12316_v15  ;;  %v1132_v6 = vld [vmem:[#allocation2 + $0x1818] sm:$0xff]  ;;  %v12212_v52 = vcombine.high %v1068_v46, %v1072_v44  ;;  %v12211_v20 = vcombine.low %v1068_v46, %v1072_v44 }
 0x4aa   : > { %9222 = vmatpush2.bf16.msra.mxu0 %v12251_v12  ;;  %v1136_v58 = vld [vmem:[#allocation2 + $0x1838] sm:$0xff] }
 0x4ab   : > { %9223 = vmatprep.subr.bf16.mxu0 %v12244_v26  ;;  %v12276_v39 = vcombine.high %v1132_v6, %v1136_v58  ;;  %v1316_v57 = vld [vmem:[#allocation2 + $0x1dd8] sm:$0xff]  ;;  %v12275_v56 = vcombine.low %v1132_v6, %v1136_v58 }
 0x4ac   : > { %9247 = vmatpush1.bf16.msra.mxu1 %v12315_v7  ;;  %v1320_v15 = vld [vmem:[#allocation2 + $0x1df8] sm:$0xff] }
 0x4ad   : > { %9248 = vmatprep.subr.bf16.mxu1 %v12308_v13  ;;  %v1252_v2 = vld [vmem:[#allocation2 + $0x1bd8] sm:$0xff]  ;;  %v12460_v22 = vcombine.high %v1316_v57, %v1320_v15  ;;  %v12459_v29 = vcombine.low %v1316_v57, %v1320_v15 }
 0x4ae   : > { %9224 = vmatpush2.bf16.msra.mxu0 %v12243_v37  ;;  %v1256_v33 = vld [vmem:[#allocation2 + $0x1bf8] sm:$0xff] }
 0x4af   : > { %9225 = vmatprep.subr.bf16.mxu0 %v12236_v51  ;;  %v12396_v12 = vcombine.high %v1252_v2, %v1256_v33  ;;  %v1308_v7 = vld [vmem:[#allocation2 + $0x1d98] sm:$0xff]  ;;  %v12395_v23 = vcombine.low %v1252_v2, %v1256_v33 }
 0x4b0   : > { %9249 = vmatpush1.bf16.msra.mxu1 %v12307_v42  ;;  %v1312_v26 = vld [vmem:[#allocation2 + $0x1db8] sm:$0xff] }
 0x4b1   : > { %9250 = vmatprep.subr.bf16.mxu1 %v12300_v1  ;;  %v1244_v4 = vld [vmem:[#allocation2 + $0x1b98] sm:$0xff]  ;;  %v12452_v0 = vcombine.high %v1308_v7, %v1312_v26  ;;  %v12451_v16 = vcombine.low %v1308_v7, %v1312_v26 }
 0x4b2   : > { %9226 = vmatpush2.bf16.msra.mxu0 %v12235_v9  ;;  %v1248_v13 = vld [vmem:[#allocation2 + $0x1bb8] sm:$0xff] }
 0x4b3   : > { %9227 = vmatprep.subr.bf16.mxu0 %v12228_v47  ;;  %v12388_v31 = vcombine.high %v1244_v4, %v1248_v13  ;;  %v1300_v37 = vld [vmem:[#allocation2 + $0x1d58] sm:$0xff]  ;;  %v12387_v9 = vcombine.low %v1244_v4, %v1248_v13 }
 0x4b4   : > { %9251 = vmatpush1.bf16.msra.mxu1 %v12299_v54  ;;  %v1304_v42 = vld [vmem:[#allocation2 + $0x1d78] sm:$0xff] }
 0x4b5   : > { %9252 = vmatprep.subr.bf16.mxu1 %v12292_v49  ;;  %v1236_v1 = vld [vmem:[#allocation2 + $0x1b58] sm:$0xff]  ;;  %v12444_v54 = vcombine.high %v1300_v37, %v1304_v42 }
 0x4b6   : > { %9228 = vmatpush2.bf16.msra.mxu0 %v12227_v63  ;;  %v1240_v19 = vld [vmem:[#allocation2 + $0x1b78] sm:$0xff] }
 0x4b7   : > { %9229 = vmatprep.subr.bf16.mxu0 %v12220_v60  ;;  %v1292_v48 = vld [vmem:[#allocation2 + $0x1d18] sm:$0xff]  ;;  %v12379_v60 = vcombine.low %v1236_v1, %v1240_v19 }
 0x4b8   : > { %9253 = vmatpush1.bf16.msra.mxu1 %v12291_v14  ;;  %v1296_v21 = vld [vmem:[#allocation2 + $0x1d38] sm:$0xff] }
 0x4b9   : > { %9254 = vmatprep.subr.bf16.mxu1 %v12284_v53  ;;  %v1232_v28 = vld [vmem:[#allocation2 + $0x1b38] sm:$0xff]  ;;  %v12435_v58 = vcombine.low %v1292_v48, %v1296_v21 }
 0x4ba   : > { %9230 = vmatpush2.bf16.msra.mxu0 %v12219_v3  ;;  %v1288_v46 = vld [vmem:[#allocation2 + $0x1cf8] sm:$0xff] }
 0x4bb   : > { %9231 = vmatprep.subr.bf16.mxu0 %v12212_v52  ;;  %v1220_v44 = vld [vmem:[#allocation2 + $0x1ad8] sm:$0xff] }
 0x4bc   : > { %9255 = vmatpush1.bf16.msra.mxu1 %v12283_v30  ;;  %v1224_v6 = vld [vmem:[#allocation2 + $0x1af8] sm:$0xff] }
 0x4bd   : > { %9256 = vmatprep.subr.bf16.mxu1 %v12276_v39  ;;  %v12364_v30 = vcombine.high %v1220_v44, %v1224_v6  ;;  %v1276_v52 = vld [vmem:[#allocation2 + $0x1c98] sm:$0xff]  ;;  %v12363_v33 = vcombine.low %v1220_v44, %v1224_v6 }
 0x4be   : > { %9232 = vmatpush2.bf16.msra.mxu0 %v12211_v20  ;;  %v1280_v39 = vld [vmem:[#allocation2 + $0x1cb8] sm:$0xff] }
 0x4bf   : > { %9283 = vmatprep.subr.bf16.mxu0 %v12460_v22  ;;  %v1212_v57 = vld [vmem:[#allocation2 + $0x1a98] sm:$0xff]  ;;  %v12420_v20 = vcombine.high %v1276_v52, %v1280_v39  ;;  %v12419_v4 = vcombine.low %v1276_v52, %v1280_v39 }
 0x4c0   : > { %9257 = vmatpush1.bf16.msra.mxu1 %v12275_v56  ;;  %v1216_v15 = vld [vmem:[#allocation2 + $0x1ab8] sm:$0xff] }
 0x4c1   : > { %9258 = vmatprep.subr.bf16.mxu1 %v12396_v12  ;;  %v8948_v51 = vpop.f32.mrf.mxu0  ;;  %9234 = vmatmul.mubr.bf16.vlgmr.msra.gmra.mxu0 %v13917_v8  ;;  %v12380_v8 = vcombine.high %v1236_v1, %v1240_v19  ;;  %v12356_v56 = vcombine.high %v1212_v57, %v1216_v15  ;;  %v1268_v22 = vld [vmem:[#allocation2 + $0x1c58] sm:$0xff]  ;;  %v12355_v13 = vcombine.low %v1212_v57, %v1216_v15 }
 0x4c2   : > { %v8949_v40 = vadd.f32 %v8948_v51, %v14138_v34  ;;  %9284 = vmatpush1.bf16.msra.mxu0 %v12459_v29  ;;  %9315 = vmatprep.mubr.bf16.mxu0 %v13931_v18  ;;  %v1228_v34 = vld [vmem:[#allocation2 + $0x1b18] sm:$0xff]  ;;  %v12443_v18 = vcombine.low %v1300_v37, %v1304_v42 }
 0x4c3   : > { %v8950_v25 = vpop.f32.mrf.mxu0  ;;  %9285 = vmatprep.subr.bf16.mxu0 %v12452_v0  ;;  %v12372_v53 = vcombine.high %v1228_v34, %v1232_v28  ;;  %v12371_v3 = vcombine.low %v1228_v34, %v1232_v28  ;;  %v1272_v12 = vld [vmem:[#allocation2 + $0x1c78] sm:$0xff] }
 0x4c4   : > { %9259 = vmatpush2.bf16.msra.mxu1 %v12395_v23  ;;  %v14153_v47 = vadd.f32 %v14143_v43, %v8949_v40  ;;  %v8951_v49 = vadd.f32 %v8950_v25, %v14141_v59  ;;  %v12436_v43 = vcombine.high %v1292_v48, %v1296_v21  ;;  %v1284_v59 = vld [vmem:[#allocation2 + $0x1cd8] sm:$0xff]  ;;  %v12412_v29 = vcombine.high %v1268_v22, %v1272_v12 }
 0x4c5   : > { %9260 = vmatprep.subr.bf16.mxu1 %v12388_v31  ;;  %v8952_v62 = vpop.f32.mrf.mxu0  ;;  %v12427_v2 = vcombine.low %v1284_v59, %v1288_v46  ;;  %v1204_v7 = vld [vmem:[#allocation2 + $0x1a58] sm:$0xff]  ;;  %v12411_v51 = vcombine.low %v1268_v22, %v1272_v12 }
 0x4c6   : > { %v14157_v63 = vadd.f32 %v14146_v5, %v8951_v49  ;;  %9286 = vmatpush1.bf16.msra.mxu0 %v12451_v16  ;;  %v12428_v5 = vcombine.high %v1284_v59, %v1288_v46  ;;  %v1208_v26 = vld [vmem:[#allocation2 + $0x1a78] sm:$0xff] }
 0x4c7   : > { %v8953_v14 = vpop.f32.mrf.mxu0  ;;  %9287 = vmatprep.subr.bf16.mxu0 %v12444_v54  ;;  %v12348_v23 = vcombine.high %v1204_v7, %v1208_v26  ;;  %v1260_v0 = vld [vmem:[#allocation2 + $0x1c18] sm:$0xff]  ;;  %v12347_v1 = vcombine.low %v1204_v7, %v1208_v26 }
 0x4c8   : > { %9261 = vmatpush2.bf16.msra.mxu1 %v12387_v9  ;;  %v1264_v31 = vld [vmem:[#allocation2 + $0x1c38] sm:$0xff] }
 0x4c9   : > { %9262 = vmatprep.subr.bf16.mxu1 %v12380_v8  ;;  %v1196_v37 = vld [vmem:[#allocation2 + $0x1a18] sm:$0xff]  ;;  %v12404_v19 = vcombine.high %v1260_v0, %v1264_v31  ;;  %v12403_v49 = vcombine.low %v1260_v0, %v1264_v31 }
 0x4ca   : > { %9288 = vmatpush1.bf16.msra.mxu0 %v12443_v18  ;;  %v1200_v42 = vld [vmem:[#allocation2 + $0x1a38] sm:$0xff] }
 0x4cb   : > { %9289 = vmatprep.subr.bf16.mxu0 %v12436_v43  ;;  %v12340_v40 = vcombine.high %v1196_v37, %v1200_v42  ;;  %v1380_v16 = vld [vmem:[#allocation2 + $0x1fd8] sm:$0xff]  ;;  %v12339_v8 = vcombine.low %v1196_v37, %v1200_v42 }
 0x4cc   : > { %9263 = vmatpush2.bf16.msra.mxu1 %v12379_v60  ;;  %v1384_v25 = vld [vmem:[#allocation2 + $0x1ff8] sm:$0xff] }
 0x4cd   : > { %9264 = vmatprep.subr.bf16.mxu1 %v12372_v53  ;;  %v1444_v9 = vld [vmem:[#allocation2 + $0x21d8] sm:$0xff]  ;;  %v12524_v48 = vcombine.high %v1380_v16, %v1384_v25  ;;  %v12523_v14 = vcombine.low %v1380_v16, %v1384_v25 }
 0x4ce   : > { %9290 = vmatpush1.bf16.msra.mxu0 %v12435_v58  ;;  %v1448_v54 = vld [vmem:[#allocation2 + $0x21f8] sm:$0xff] }
 0x4cf   : > { %9291 = vmatprep.subr.bf16.mxu0 %v12428_v5  ;;  %v12588_v21 = vcombine.high %v1444_v9, %v1448_v54  ;;  %v1372_v62 = vld [vmem:[#allocation2 + $0x1f98] sm:$0xff]  ;;  %v12587_v60 = vcombine.low %v1444_v9, %v1448_v54 }
 0x4d0   : > { %9265 = vmatpush2.bf16.msra.mxu1 %v12371_v3  ;;  %v1376_v34 = vld [vmem:[#allocation2 + $0x1fb8] sm:$0xff] }
 0x4d1   : > { %9266 = vmatprep.subr.bf16.mxu1 %v12364_v30  ;;  %v1436_v28 = vld [vmem:[#allocation2 + $0x2198] sm:$0xff]  ;;  %v12516_v43 = vcombine.high %v1372_v62, %v1376_v34  ;;  %v12515_v3 = vcombine.low %v1372_v62, %v1376_v34 }
 0x4d2   : > { %9292 = vmatpush1.bf16.msra.mxu0 %v12427_v2  ;;  %v1440_v18 = vld [vmem:[#allocation2 + $0x21b8] sm:$0xff] }
 0x4d3   : > { %9293 = vmatprep.subr.bf16.mxu0 %v12420_v20  ;;  %v12580_v53 = vcombine.high %v1436_v28, %v1440_v18  ;;  %v1364_v59 = vld [vmem:[#allocation2 + $0x1f58] sm:$0xff]  ;;  %v12579_v5 = vcombine.low %v1436_v28, %v1440_v18 }
 0x4d4   : > { %9267 = vmatpush2.bf16.msra.mxu1 %v12363_v33  ;;  %v1368_v46 = vld [vmem:[#allocation2 + $0x1f78] sm:$0xff] }
 0x4d5   : > { %9268 = vmatprep.subr.bf16.mxu1 %v12356_v56  ;;  %v1428_v44 = vld [vmem:[#allocation2 + $0x2158] sm:$0xff]  ;;  %v12508_v30 = vcombine.high %v1364_v59, %v1368_v46  ;;  %v12507_v56 = vcombine.low %v1364_v59, %v1368_v46  ;;  %v1605_v46 = vsub.s32 6, %v13936_v32 }
 0x4d6   : > { %9294 = vmatpush1.bf16.msra.mxu0 %v12419_v4  ;;  %v1432_v6 = vld [vmem:[#allocation2 + $0x2178] sm:$0xff] }
 0x4d7   : > { %9295 = vmatprep.subr.bf16.mxu0 %v12412_v29  ;;  %v12572_v39 = vcombine.high %v1428_v44, %v1432_v6  ;;  %v1356_v57 = vld [vmem:[#allocation2 + $0x1f18] sm:$0xff] }
 0x4d8   : > { %9269 = vmatpush2.bf16.msra.mxu1 %v12355_v13  ;;  %v1360_v15 = vld [vmem:[#allocation2 + $0x1f38] sm:$0xff] }
 0x4d9   : > { %9270 = vmatprep.subr.bf16.mxu1 %v12348_v23  ;;  %v1420_v2 = vld [vmem:[#allocation2 + $0x2118] sm:$0xff]  ;;  %v12500_v22 = vcombine.high %v1356_v57, %v1360_v15  ;;  %v12499_v23 = vcombine.low %v1356_v57, %v1360_v15 }
 0x4da   : > { %9296 = vmatpush1.bf16.msra.mxu0 %v12411_v51  ;;  %v1424_v33 = vld [vmem:[#allocation2 + $0x2138] sm:$0xff] }
 0x4db   : > { %9297 = vmatprep.subr.bf16.mxu0 %v12404_v19  ;;  %v12564_v7 = vcombine.high %v1420_v2, %v1424_v33  ;;  %v1348_v26 = vld [vmem:[#allocation2 + $0x1ed8] sm:$0xff] }
 0x4dc   : > { %9271 = vmatpush2.bf16.msra.mxu1 %v12347_v1  ;;  %v1352_v4 = vld [vmem:[#allocation2 + $0x1ef8] sm:$0xff] }
 0x4dd   : > { %9272 = vmatprep.subr.bf16.mxu1 %v12340_v40  ;;  %v1412_v13 = vld [vmem:[#allocation2 + $0x20d8] sm:$0xff]  ;;  %v12492_v0 = vcombine.high %v1348_v26, %v1352_v4  ;;  %v12491_v19 = vcombine.low %v1348_v26, %v1352_v4 }
 0x4de   : > { %9298 = vmatpush1.bf16.msra.mxu0 %v12403_v49  ;;  %v1416_v29 = vld [vmem:[#allocation2 + $0x20f8] sm:$0xff] }
 0x4df   : > { %9299 = vmatprep.subr.bf16.mxu0 %v12524_v48  ;;  %v12556_v31 = vcombine.high %v1412_v13, %v1416_v29  ;;  %v1340_v37 = vld [vmem:[#allocation2 + $0x1e98] sm:$0xff]  ;;  %v12555_v40 = vcombine.low %v1412_v13, %v1416_v29 }
 0x4e0   : > { %9273 = vmatpush2.bf16.msra.mxu1 %v12339_v8  ;;  %v1344_v42 = vld [vmem:[#allocation2 + $0x1eb8] sm:$0xff] }
 0x4e1   : > { %9324 = vmatprep.subr.bf16.mxu1 %v12588_v21  ;;  %v1404_v51 = vld [vmem:[#allocation2 + $0x2098] sm:$0xff]  ;;  %v12484_v16 = vcombine.high %v1340_v37, %v1344_v42  ;;  %v12483_v48 = vcombine.low %v1340_v37, %v1344_v42 }
 0x4e2   : > { %9300 = vmatpush2.bf16.msra.mxu0 %v12523_v14  ;;  %v1408_v1 = vld [vmem:[#allocation2 + $0x20b8] sm:$0xff] }
 0x4e3   : > { %v14159_v58 = vpop.f32.mrf.mxu1  ;;  %9275 = vmatmul.mubr.bf16.vlgmr.msra.gmra.mxu1 %v13942_v55  ;;  %9301 = vmatprep.subr.bf16.mxu0 %v12516_v43  ;;  %v12571_v55 = vcombine.low %v1428_v44, %v1432_v6  ;;  %v12548_v25 = vcombine.high %v1404_v51, %v1408_v1  ;;  %v1332_v9 = vld [vmem:[#allocation2 + $0x1e58] sm:$0xff]  ;;  %v12547_v21 = vcombine.low %v1404_v51, %v1408_v1 }
 0x4e4   : > { %9325 = vmatpush1.bf16.msra.mxu1 %v12587_v60  ;;  %9356 = vmatprep.mubr.bf16.mxu1 %v13960_v11  ;;  %v12563_v11 = vcombine.low %v1420_v2, %v1424_v33  ;;  %v1336_v54 = vld [vmem:[#allocation2 + $0x1e78] sm:$0xff]  ;;  %v13470_v33 = vld [vmem:[#allocation4] sm:$0xff] }
 0x4e5   : > { %v14162_v52 = vpop.f32.mrf.mxu1  ;;  %9326 = vmatprep.subr.bf16.mxu1 %v12580_v53  ;;  %v1396_v49 = vld [vmem:[#allocation2 + $0x2058] sm:$0xff]  ;;  %v12476_v62 = vcombine.high %v1332_v9, %v1336_v54  ;;  %v12475_v43 = vcombine.low %v1332_v9, %v1336_v54 }
 0x4e6   : > { %9302 = vmatpush2.bf16.msra.mxu0 %v12515_v3  ;;  %v1400_v8 = vld [vmem:[#allocation2 + $0x2078] sm:$0xff] }
 0x4e7   : > { %v9034_v20 = vpop.f32.mrf.mxu1  ;;  %9303 = vmatprep.subr.bf16.mxu0 %v12508_v30  ;;  %v12540_v34 = vcombine.high %v1396_v49, %v1400_v8  ;;  %v1324_v28 = vld [vmem:[#allocation2 + $0x1e18] sm:$0xff]  ;;  %v12539_v53 = vcombine.low %v1396_v49, %v1400_v8 }
 0x4e8   : > { %9327 = vmatpush1.bf16.msra.mxu1 %v12579_v5  ;;  %v1328_v18 = vld [vmem:[#allocation2 + $0x1e38] sm:$0xff]  ;;  %v1606_v20 = vrot.slane %v13470_v33, %v1605_v46 }
 0x4e9   : > { %v9035_v12 = vpop.f32.mrf.mxu1  ;;  %9328 = vmatprep.subr.bf16.mxu1 %v12572_v39  ;;  %v1388_v14 = vld [vmem:[#allocation2 + $0x2018] sm:$0xff]  ;;  %v12468_v59 = vcombine.high %v1324_v28, %v1328_v18  ;;  %v1609_v39 = vsub.s32 7, %v13936_v32  ;;  %v12467_v57 = vcombine.low %v1324_v28, %v1328_v18 }
 0x4ea   : > { %9304 = vmatpush2.bf16.msra.mxu0 %v12507_v56  ;;  %v1392_v60 = vld [vmem:[#allocation2 + $0x2038] sm:$0xff] }
 0x4eb   : > { %9305 = vmatprep.subr.bf16.mxu0 %v12500_v22  ;;  %v12532_v44 = vcombine.high %v1388_v14, %v1392_v60  ;;  %v1572_v6 = vld [vmem:[#allocation2 + $0x25d8] sm:$0xff]  ;;  %v12531_v15 = vcombine.low %v1388_v14, %v1392_v60  ;;  %v1610_v26 = vrot.slane %v13470_v33, %v1609_v39 }
 0x4ec   : > { %9329 = vmatpush1.bf16.msra.mxu1 %v12571_v55  ;;  %v1576_v3 = vld [vmem:[#allocation2 + $0x25f8] sm:$0xff] }
 0x4ed   : > { %9330 = vmatprep.subr.bf16.mxu1 %v12564_v7  ;;  %v1508_v5 = vld [vmem:[#allocation2 + $0x23d8] sm:$0xff]  ;;  %v12716_v2 = vcombine.high %v1572_v6, %v1576_v3  ;;  %v12715_v4 = vcombine.low %v1572_v6, %v1576_v3  ;;  %v9033_v1 = vadd.f32 %v14162_v52, %v1610_v26 }
 0x4ee   : > { %9306 = vmatpush2.bf16.msra.mxu0 %v12499_v23  ;;  %v1512_v30 = vld [vmem:[#allocation2 + $0x23f8] sm:$0xff]  ;;  %v9031_v23 = vadd.f32 %v14159_v58, %v1606_v20 }
 0x4ef   : > { %9307 = vmatprep.subr.bf16.mxu0 %v12492_v0  ;;  %v12652_v56 = vcombine.high %v1508_v5, %v1512_v30  ;;  %v1564_v55 = vld [vmem:[#allocation2 + $0x2598] sm:$0xff]  ;;  %v12651_v13 = vcombine.low %v1508_v5, %v1512_v30 }
 0x4f0   : > { %9331 = vmatpush1.bf16.msra.mxu1 %v12563_v11  ;;  %v1568_v22 = vld [vmem:[#allocation2 + $0x25b8] sm:$0xff] }
 0x4f1   : > { %9332 = vmatprep.subr.bf16.mxu1 %v12556_v31  ;;  %v1500_v12 = vld [vmem:[#allocation2 + $0x2398] sm:$0xff]  ;;  %v12708_v29 = vcombine.high %v1564_v55, %v1568_v22 }
 0x4f2   : > { %9308 = vmatpush2.bf16.msra.mxu0 %v12491_v19  ;;  %v1504_v7 = vld [vmem:[#allocation2 + $0x23b8] sm:$0xff] }
 0x4f3   : > { %9309 = vmatprep.subr.bf16.mxu0 %v12484_v16  ;;  %v12644_v11 = vcombine.high %v1500_v12, %v1504_v7  ;;  %v1556_v0 = vld [vmem:[#allocation2 + $0x2558] sm:$0xff]  ;;  %v12643_v58 = vcombine.low %v1500_v12, %v1504_v7 }
 0x4f4   : > { %9333 = vmatpush1.bf16.msra.mxu1 %v12555_v40  ;;  %v1560_v31 = vld [vmem:[#allocation2 + $0x2578] sm:$0xff]  ;;  %v12707_v40 = vcombine.low %v1564_v55, %v1568_v22 }
 0x4f5   : > { %9334 = vmatprep.subr.bf16.mxu1 %v12548_v25  ;;  %v1492_v42 = vld [vmem:[#allocation2 + $0x2358] sm:$0xff]  ;;  %v12700_v25 = vcombine.high %v1556_v0, %v1560_v31 }
 0x4f6   : > { %9310 = vmatpush2.bf16.msra.mxu0 %v12483_v48  ;;  %v1496_v51 = vld [vmem:[#allocation2 + $0x2378] sm:$0xff] }
 0x4f7   : > { %9311 = vmatprep.subr.bf16.mxu0 %v12476_v62  ;;  %v12636_v54 = vcombine.high %v1492_v42, %v1496_v51  ;;  %v1552_v49 = vld [vmem:[#allocation2 + $0x2538] sm:$0xff] }
 0x4f8   : > { %9335 = vmatpush1.bf16.msra.mxu1 %v12547_v21  ;;  %v1484_v48 = vld [vmem:[#allocation2 + $0x2318] sm:$0xff]  ;;  %v12699_v21 = vcombine.low %v1556_v0, %v1560_v31 }
 0x4f9   : > { %9336 = vmatprep.subr.bf16.mxu1 %v12540_v34  ;;  %v1488_v52 = vld [vmem:[#allocation2 + $0x2338] sm:$0xff]  ;;  %v12635_v34 = vcombine.low %v1492_v42, %v1496_v51 }
 0x4fa   : > { %9312 = vmatpush2.bf16.msra.mxu0 %v12475_v43  ;;  %v12628_v28 = vcombine.high %v1484_v48, %v1488_v52  ;;  %v1540_v18 = vld [vmem:[#allocation2 + $0x24d8] sm:$0xff] }
 0x4fb   : > { %9313 = vmatprep.subr.bf16.mxu0 %v12468_v59  ;;  %v1544_v14 = vld [vmem:[#allocation2 + $0x24f8] sm:$0xff]  ;;  %v12627_v59 = vcombine.low %v1484_v48, %v1488_v52 }
 0x4fc   : > { %9337 = vmatpush1.bf16.msra.mxu1 %v12539_v53  ;;  %v1476_v60 = vld [vmem:[#allocation2 + $0x22d8] sm:$0xff]  ;;  %v12684_v46 = vcombine.high %v1540_v18, %v1544_v14  ;;  %v12683_v39 = vcombine.low %v1540_v18, %v1544_v14 }
 0x4fd   : > { %9338 = vmatprep.subr.bf16.mxu1 %v12532_v44  ;;  %v1480_v43 = vld [vmem:[#allocation2 + $0x22f8] sm:$0xff] }
 0x4fe   : > { %9314 = vmatpush2.bf16.msra.mxu0 %v12467_v57  ;;  %v12620_v44 = vcombine.high %v1476_v60, %v1480_v43  ;;  %v1532_v6 = vld [vmem:[#allocation2 + $0x2498] sm:$0xff]  ;;  %v12619_v57 = vcombine.low %v1476_v60, %v1480_v43 }
 0x4ff   : > { %9365 = vmatprep.subr.bf16.mxu0 %v12716_v2  ;;  %v1536_v3 = vld [vmem:[#allocation2 + $0x24b8] sm:$0xff] }
 0x500   : > { %9339 = vmatpush1.bf16.msra.mxu1 %v12531_v15  ;;  %v1468_v5 = vld [vmem:[#allocation2 + $0x2298] sm:$0xff]  ;;  %v12676_v15 = vcombine.high %v1532_v6, %v1536_v3  ;;  %v12675_v22 = vcombine.low %v1532_v6, %v1536_v3 }
 0x501   : > { %9340 = vmatprep.subr.bf16.mxu1 %v12652_v56  ;;  %v9071_v37 = vpop.f32.mrf.mxu0  ;;  %9316 = vmatmul.mubr.bf16.vlgmr.msra.gmra.mxu0 %v13948_v61  ;;  %v1548_v61 = vld [vmem:[#allocation2 + $0x2518] sm:$0xff] }
 0x502   : > { %v14170_v19 = vadd.f32 %v9071_v37, %v9031_v23  ;;  %9366 = vmatpush1.bf16.msra.mxu0 %v12715_v4  ;;  %9397 = vmatprep.mubr.bf16.mxu0 %v13648_v27  ;;  %v12692_v27 = vcombine.high %v1548_v61, %v1552_v49  ;;  %v12691_v53 = vcombine.low %v1548_v61, %v1552_v49  ;;  %v1472_v30 = vld [vmem:[#allocation2 + $0x22b8] sm:$0xff] }
 0x503   : > { %v9073_v16 = vpop.f32.mrf.mxu0  ;;  %9367 = vmatprep.subr.bf16.mxu0 %v12708_v29  ;;  %v12612_v2 = vcombine.high %v1468_v5, %v1472_v30  ;;  %v1524_v33 = vld [vmem:[#allocation2 + $0x2458] sm:$0xff]  ;;  %v12611_v12 = vcombine.low %v1468_v5, %v1472_v30 }
 0x504   : > { %9341 = vmatpush2.bf16.msra.mxu1 %v12651_v13  ;;  %v14173_v9 = vadd.f32 %v9073_v16, %v9033_v1  ;;  %v1528_v20 = vld [vmem:[#allocation2 + $0x2478] sm:$0xff]  ;;  %v9407_v16 = vmax.f32 %v14019_v35, 0.0 }
 0x505   : > { %9342 = vmatprep.subr.bf16.mxu1 %v12644_v11  ;;  %v9075_v8 = vpop.f32.mrf.mxu0  ;;  %v1460_v56 = vld [vmem:[#allocation2 + $0x2258] sm:$0xff]  ;;  %v12668_v7 = vcombine.high %v1524_v33, %v1528_v20  ;;  %v12667_v11 = vcombine.low %v1524_v33, %v1528_v20 }
 0x506   : > { %9368 = vmatpush1.bf16.msra.mxu0 %v12707_v40  ;;  %v1464_v55 = vld [vmem:[#allocation2 + $0x2278] sm:$0xff]  ;;  %v14182_v49 = vpack.c.bf16 %v9407_v16, %v9407_v16  ;;  %v13471_v8 = vld [vmem:[%s14555_s0 + $0x48] ss:$0 sps:$4 sm:$0xff]  }
 0x507   : > { %v9076_v62 = vpop.f32.mrf.mxu0  ;;  %9369 = vmatprep.subr.bf16.mxu0 %v12700_v25  ;;  %v12604_v26 = vcombine.high %v1460_v56, %v1464_v55  ;;  %v1516_v4 = vld [vmem:[#allocation2 + $0x2418] sm:$0xff]  ;;  %v12603_v0 = vcombine.low %v1460_v56, %v1464_v55 }
 0x508   : > { %9343 = vmatpush2.bf16.msra.mxu1 %v12643_v58  ;;  %v1520_v13 = vld [vmem:[#allocation2 + $0x2438] sm:$0xff]  ;;  %v9409_v58 = vmax.f32 %v14099_v36, 0.0 }
 0x509   : > { %9344 = vmatprep.subr.bf16.mxu1 %v12636_v54  ;;  %v1452_v29 = vld [vmem:[#allocation2 + $0x2218] sm:$0xff]  ;;  %v12660_v31 = vcombine.high %v1516_v4, %v1520_v13  ;;  %v12659_v42 = vcombine.low %v1516_v4, %v1520_v13 }
 0x50a   : > { %9370 = vmatpush1.bf16.msra.mxu0 %v12699_v21  ;;  %v1456_v23 = vld [vmem:[#allocation2 + $0x2238] sm:$0xff]  ;;  %v14188_v36 = vpack.c.bf16 %v9409_v58, %v9409_v58 }
 0x50b   : > { %9371 = vmatprep.subr.bf16.mxu0 %v12692_v27  ;;  %v12596_v37 = vcombine.high %v1452_v29, %v1456_v23  ;;  %v12595_v51 = vcombine.low %v1452_v29, %v1456_v23  ;;  %v13084_v1 = vld [vmem:[%s13820_s10 + $0xe4] ss:$16 sps:$4 sm:$0xff]   ;;  %v13082_v25 = vld [vmem:[%s13820_s10 + $0xe0] ss:$16 sps:$4 sm:$0xff]  }
 0x50c   : > { %9345 = vmatpush2.bf16.msra.mxu1 %v12635_v34  ;;  %v13087_v40 = vld [vmem:[%s13820_s10 + $0x2e4] ss:$16 sps:$4 sm:$0xff]   ;;  %v13085_v54 = vld [vmem:[%s13820_s10 + $0x2e0] ss:$16 sps:$4 sm:$0xff]  }
 0x50d   : > { %9346 = vmatprep.subr.bf16.mxu1 %v12628_v28  ;;  %v13090_v61 = vld [vmem:[%s13820_s10 + $0xc4] ss:$16 sps:$4 sm:$0xff]   ;;  %v13088_v52 = vld [vmem:[%s13820_s10 + $0xc0] ss:$16 sps:$4 sm:$0xff]  }
 0x50e   : > { %9372 = vmatpush1.bf16.msra.mxu0 %v12691_v53  ;;  %v13093_v35 = vld [vmem:[%s13820_s10 + $0x2c4] ss:$16 sps:$4 sm:$0xff]   ;;  %v13091_v62 = vld [vmem:[%s13820_s10 + $0x2c0] ss:$16 sps:$4 sm:$0xff]  }
 0x50f   : > { %9373 = vmatprep.subr.bf16.mxu0 %v12684_v46  ;;  %v13096_v34 = vld [vmem:[%s13820_s10 + $0xa4] ss:$16 sps:$4 sm:$0xff]   ;;  %v13094_v18 = vld [vmem:[%s13820_s10 + $0xa0] ss:$16 sps:$4 sm:$0xff]  }
 0x510   : > { %9347 = vmatpush2.bf16.msra.mxu1 %v12627_v59  ;;  %v13097_v14 = vld [vmem:[%s13820_s10 + $0x2a0] ss:$16 sps:$4 sm:$0xff]   ;;  %v13102_v60 = vld [vmem:[%s13820_s10 + $0x84] ss:$16 sps:$4 sm:$0xff]  }
 0x511   : > { %9348 = vmatprep.subr.bf16.mxu1 %v12620_v44  ;;  %v13105_v53 = vld [vmem:[%s13820_s10 + $0x284] ss:$16 sps:$4 sm:$0xff]   ;;  %v13103_v59 = vld [vmem:[%s13820_s10 + $0x280] ss:$16 sps:$4 sm:$0xff]  }
 0x512   : > { %9374 = vmatpush1.bf16.msra.mxu0 %v12683_v39  ;;  %v13108_v46 = vld [vmem:[%s13820_s10 + $0x64] ss:$16 sps:$4 sm:$0xff]   ;;  %v13106_v6 = vld [vmem:[%s13820_s10 + $0x60] ss:$16 sps:$4 sm:$0xff]  }
 0x513   : > { %9375 = vmatprep.subr.bf16.mxu0 %v12676_v15  ;;  %v13111_v44 = vld [vmem:[%s13820_s10 + $0x264] ss:$16 sps:$4 sm:$0xff]   ;;  %v13109_v3 = vld [vmem:[%s13820_s10 + $0x260] ss:$16 sps:$4 sm:$0xff]  }
 0x514   : > { %9349 = vmatpush2.bf16.msra.mxu1 %v12619_v57  ;;  %v13114_v5 = vld [vmem:[%s13820_s10 + $0x44] ss:$16 sps:$4 sm:$0xff]   ;;  %v13112_v39 = vld [vmem:[%s13820_s10 + $0x40] ss:$16 sps:$4 sm:$0xff]  }
 0x515   : > { %9350 = vmatprep.subr.bf16.mxu1 %v12612_v2  ;;  %v13117_v30 = vld [vmem:[%s13820_s10 + $0x244] ss:$16 sps:$4 sm:$0xff]   ;;  %v13115_v57 = vld [vmem:[%s13820_s10 + $0x240] ss:$16 sps:$4 sm:$0xff]  }
 0x516   : > { %9376 = vmatpush1.bf16.msra.mxu0 %v12675_v22  ;;  %v13120_v15 = vld [vmem:[%s13820_s10 + $0x24] ss:$16 sps:$4 sm:$0xff]   ;;  %v13118_v33 = vld [vmem:[%s13820_s10 + $0x20] ss:$16 sps:$4 sm:$0xff]  }
 0x517   : > { %9377 = vmatprep.subr.bf16.mxu0 %v12668_v7  ;;  %v13123_v2 = vld [vmem:[%s13820_s10 + $0x224] ss:$16 sps:$4 sm:$0xff]   ;;  %v13121_v20 = vld [vmem:[%s13820_s10 + $0x220] ss:$16 sps:$4 sm:$0xff]  }
 0x518   : > { %9351 = vmatpush2.bf16.msra.mxu1 %v12611_v12  ;;  %v13126_v56 = vld [vmem:[%s13820_s10 + $0x4] ss:$16 sps:$4 sm:$0xff]   ;;  %v13124_v22 = vld [vmem:[%s13820_s10] ss:$16 sps:$4 sm:$0xff]  }
 0x519   : > { %9352 = vmatprep.subr.bf16.mxu1 %v12604_v26  ;;  %v13129_v55 = vld [vmem:[%s13820_s10 + $0x204] ss:$16 sps:$4 sm:$0xff]   ;;  %v13127_v12 = vld [vmem:[%s13820_s10 + $0x200] ss:$16 sps:$4 sm:$0xff]  }
 0x51a   : > { %9378 = vmatpush1.bf16.msra.mxu0 %v12667_v11  ;;  %v13132_v7 = vld [vmem:[%s13820_s10 + $0x1e4] ss:$16 sps:$4 sm:$0xff]   ;;  %v13130_v4 = vld [vmem:[%s13820_s10 + $0x1e0] ss:$16 sps:$4 sm:$0xff]  }
 0x51b   : > { %9379 = vmatprep.subr.bf16.mxu0 %v12660_v31  ;;  %v13135_v26 = vld [vmem:[%s13820_s10 + $0x3e4] ss:$16 sps:$4 sm:$0xff]   ;;  %v13133_v13 = vld [vmem:[%s13820_s10 + $0x3e0] ss:$16 sps:$4 sm:$0xff]  }
 0x51c   : > { %9353 = vmatpush2.bf16.msra.mxu1 %v12603_v0  ;;  %v13138_v29 = vld [vmem:[%s13820_s10 + $0x1c4] ss:$16 sps:$4 sm:$0xff]   ;;  %v13136_v31 = vld [vmem:[%s13820_s10 + $0x1c0] ss:$16 sps:$4 sm:$0xff]  }
 0x51d   : > { %9354 = vmatprep.subr.bf16.mxu1 %v12596_v37  ;;  %v13141_v23 = vld [vmem:[%s13820_s10 + $0x3c4] ss:$16 sps:$4 sm:$0xff]   ;;  %v13142_v58 = vld [vmem:[%s13820_s10 + $0x1a0] ss:$16 sps:$4 sm:$0xff]  }
 0x51e   : > { %9380 = vmatpush1.bf16.msra.mxu0 %v12659_v42  ;;  %v13139_v42 = vld [vmem:[%s13820_s10 + $0x3c0] ss:$16 sps:$4 sm:$0xff]  }
 0x51f   : > { %10980 = vmatprep.subr.bf16.mxu0 %v13084_v1 }
 0x520   : > { %9355 = vmatpush2.bf16.msra.mxu1 %v12595_v51  ;;  %v13144_v51 = vld [vmem:[%s13820_s10 + $0x1a4] ss:$16 sps:$4 sm:$0xff]  }
 0x521   : > { %11021 = vmatprep.subr.bf16.mxu1 %v13087_v40  ;;  %9398 = vmatmul.mubr.bf16.vlgmr.msra.gmra.mxu0 %v13471_v8  ;;  %v13147_v40 = vld [vmem:[%s13820_s10 + $0x3a4] ss:$16 sps:$4 sm:$0xff]  }
 0x522   : > { %10981 = vmatpush1.bf16.msra.mxu0 %v13082_v25  ;;  %11012 = vmatprep.mubr.bf16.mxu0 %v14182_v49  ;;  %v13153_v8 = vld [vmem:[%s13820_s10 + $0x384] ss:$16 sps:$4 sm:$0xff]  }
 0x523   : > { %v9112_v48 = vpop.f32.mrf.mxu1  ;;  %9357 = vmatmul.mubr.bf16.vlgmr.msra.gmra.mxu1 %v13975_v24  ;;  %10982 = vmatprep.subr.bf16.mxu0 %v13090_v61  ;;  %v13099_v24 = vld [vmem:[%s13820_s10 + $0x2a4] ss:$16 sps:$4 sm:$0xff]  }
 0x524   : > { %v14193_v21 = vadd.f32 %v9112_v48, %v14170_v19  ;;  %11022 = vmatpush1.bf16.msra.mxu1 %v13085_v54  ;;  %11053 = vmatprep.mubr.bf16.mxu1 %v14188_v36  ;;  %v13145_v54 = vld [vmem:[%s13820_s10 + $0x3a0] ss:$16 sps:$4 sm:$0xff]   ;;  %v13150_v61 = vld [vmem:[%s13820_s10 + $0x184] ss:$16 sps:$4 sm:$0xff]  }
 0x525   : > { %v9114_v27 = vpop.f32.mrf.mxu1  ;;  %11023 = vmatprep.subr.bf16.mxu1 %v13093_v35  ;;  %v13148_v35 = vld [vmem:[%s13820_s10 + $0x180] ss:$16 sps:$4 sm:$0xff]  }
 0x526   : > { %v14201_v28 = vadd.f32 %v9114_v27, %v14173_v9  ;;  %10983 = vmatpush1.bf16.msra.mxu0 %v13088_v52  ;;  %v13100_v9 = vld [vmem:[%s13820_s10 + $0x80] ss:$16 sps:$4 sm:$0xff]   ;;  %v13156_v52 = vld [vmem:[%s13820_s10 + $0x164] ss:$16 sps:$4 sm:$0xff]  }
 0x527   : > { %v9116_v19 = vpop.f32.mrf.mxu1  ;;  %10984 = vmatprep.subr.bf16.mxu0 %v13096_v34  ;;  %v13151_v48 = vld [vmem:[%s13820_s10 + $0x380] ss:$16 sps:$4 sm:$0xff]   ;;  %v13162_v27 = vld [vmem:[%s13820_s10 + $0x144] ss:$16 sps:$4 sm:$0xff]  }
 0x528   : > { %11024 = vmatpush1.bf16.msra.mxu1 %v13091_v62  ;;  %v13154_v62 = vld [vmem:[%s13820_s10 + $0x160] ss:$16 sps:$4 sm:$0xff]  }
 0x529   : > { %v9117_v43 = vpop.f32.mrf.mxu1  ;;  %11025 = vmatprep.subr.bf16.mxu1 %v13099_v24  ;;  %v13157_v34 = vld [vmem:[%s13820_s10 + $0x360] ss:$16 sps:$4 sm:$0xff]   ;;  %v13165_v24 = vld [vmem:[%s13820_s10 + $0x344] ss:$16 sps:$4 sm:$0xff]  }
 0x52a   : > { %10985 = vmatpush1.bf16.msra.mxu0 %v13094_v18  ;;  %v13163_v19 = vld [vmem:[%s13820_s10 + $0x340] ss:$16 sps:$4 sm:$0xff]   ;;  %v13168_v18 = vld [vmem:[%s13820_s10 + $0x124] ss:$16 sps:$4 sm:$0xff]  }
 0x52b   : > { %10986 = vmatprep.subr.bf16.mxu0 %v13102_v60  ;;  %v13166_v60 = vld [vmem:[%s13820_s10 + $0x120] ss:$16 sps:$4 sm:$0xff]  }
 0x52c   : > { %11026 = vmatpush1.bf16.msra.mxu1 %v13097_v14  ;;  %v13171_v14 = vld [vmem:[%s13820_s10 + $0x324] ss:$16 sps:$4 sm:$0xff]   ;;  %v13169_v43 = vld [vmem:[%s13820_s10 + $0x320] ss:$16 sps:$4 sm:$0xff]  }
 0x52d   : > { %11027 = vmatprep.subr.bf16.mxu1 %v13105_v53  ;;  %v13174_v53 = vld [vmem:[%s13820_s10 + $0x104] ss:$16 sps:$4 sm:$0xff]  }
 0x52e   : > { %10987 = vmatpush1.bf16.msra.mxu0 %v13100_v9  ;;  %v13177_v9 = vld [vmem:[%s13820_s10 + $0x304] ss:$16 sps:$4 sm:$0xff]  }
 0x52f   : > { %10988 = vmatprep.subr.bf16.mxu0 %v13108_v46  ;;  %v9406_v46 = vmax.f32 %v14015_v17, 0.0  ;;  %v13183_v17 = vld [vmem:[%s13820_s10 + $0x4c4] ss:$16 sps:$4 sm:$0xff]  }
 0x530   : > { %11028 = vmatpush1.bf16.msra.mxu1 %v13103_v59  ;;  %v13172_v59 = vld [vmem:[%s13820_s10 + $0x100] ss:$16 sps:$4 sm:$0xff]  }
 0x531   : > { %11029 = vmatprep.subr.bf16.mxu1 %v13111_v44  ;;  %v13175_v44 = vld [vmem:[%s13820_s10 + $0x300] ss:$16 sps:$4 sm:$0xff]  }
 0x532   : > { %10989 = vmatpush1.bf16.msra.mxu0 %v13106_v6  ;;  %v13180_v6 = vld [vmem:[%s13820_s10 + $0x4e4] ss:$16 sps:$4 sm:$0xff]  }
 0x533   : > { %10990 = vmatprep.subr.bf16.mxu0 %v13114_v5  ;;  %v13237_v5 = vld [vmem:[%s13820_s10 + $0x6e4] ss:$16 sps:$4 sm:$0xff]  }
 0x534   : > { %11030 = vmatpush1.bf16.msra.mxu1 %v13109_v3  ;;  %v9408_v3 = vmax.f32 %v14095_v41, 0.0  ;;  %v13243_v41 = vld [vmem:[%s13820_s10 + $0x6c4] ss:$16 sps:$4 sm:$0xff]  }
 0x535   : > { %11031 = vmatprep.subr.bf16.mxu1 %v13117_v30  ;;  %v9411_v30 = vmax.f32 %v14157_v63, 0.0 }
 0x536   : > { %10991 = vmatpush1.bf16.msra.mxu0 %v13112_v39  ;;  %v13178_v39 = vld [vmem:[%s13820_s10 + $0x4e0] ss:$16 sps:$4 sm:$0xff]  }
 0x537   : > { %10992 = vmatprep.subr.bf16.mxu0 %v13120_v15  ;;  %v14272_v15 = vpack.c.bf16 %v9408_v3, %v9408_v3  ;;  %v13297_v3 = vld [vmem:[%s13820_s10 + $0x7a4] ss:$16 sps:$4 sm:$0xff]  }
 0x538   : > { %11032 = vmatpush1.bf16.msra.mxu1 %v13115_v57  ;;  %v14269_v57 = vpack.c.bf16 %v9406_v46, %v9406_v46 }
 0x539   : > { %11033 = vmatprep.subr.bf16.mxu1 %v13123_v2  ;;  %v13235_v2 = vld [vmem:[%s13820_s10 + $0x6e0] ss:$16 sps:$4 sm:$0xff]  }
 0x53a   : > { %10993 = vmatpush1.bf16.msra.mxu0 %v13118_v33  ;;  %v14275_v33 = vpack.c.bf16 %v9411_v30, %v9411_v30 }
 0x53b   : > { %10994 = vmatprep.subr.bf16.mxu0 %v13126_v56 }
 0x53c   : > { %11034 = vmatpush1.bf16.msra.mxu1 %v13121_v20  ;;  %v13181_v20 = vld [vmem:[%s13820_s10 + $0x4c0] ss:$16 sps:$4 sm:$0xff]  }
 0x53d   : > { %11035 = vmatprep.subr.bf16.mxu1 %v13129_v55  ;;  %v13186_v55 = vld [vmem:[%s13820_s10 + $0x4a4] ss:$16 sps:$4 sm:$0xff]  }
 0x53e   : > { %10995 = vmatpush1.bf16.msra.mxu0 %v13124_v22 }
 0x53f   : > { %10996 = vmatprep.subr.bf16.mxu0 %v13132_v7 }
 0x540   : > { %11036 = vmatpush1.bf16.msra.mxu1 %v13127_v12  ;;  %v13241_v12 = vld [vmem:[%s13820_s10 + $0x6c0] ss:$16 sps:$4 sm:$0xff]  }
 0x541   : > { %11037 = vmatprep.subr.bf16.mxu1 %v13135_v26  ;;  %v9153_v11 = vpop.f32.mrf.mxu0  ;;  %v13249_v26 = vld [vmem:[%s13820_s10 + $0x6a4] ss:$16 sps:$4 sm:$0xff]  }
 0x542   : > { %v14232_v0 = vadd.f32 %v9153_v11, %v14193_v21  ;;  %10997 = vmatpush2.bf16.msra.mxu0 %v13130_v4  ;;  %v13159_v21 = vld [vmem:[%s13820_s10 + $0x364] ss:$16 sps:$4 sm:$0xff]   ;;  %v13247_v11 = vld [vmem:[%s13820_s10 + $0x6a0] ss:$16 sps:$4 sm:$0xff]  }
 0x543   : > { %v9155_v37 = vpop.f32.mrf.mxu0  ;;  %10998 = vmatprep.subr.bf16.mxu0 %v13138_v29  ;;  %v13189_v29 = vld [vmem:[%s13820_s10 + $0x484] ss:$16 sps:$4 sm:$0xff]  }
 0x544   : > { %11038 = vmatpush2.bf16.msra.mxu1 %v13133_v13  ;;  %v14238_v1 = vadd.f32 %v9155_v37, %v14201_v28  ;;  %v13160_v28 = vld [vmem:[%s13820_s10 + $0x140] ss:$16 sps:$4 sm:$0xff]   ;;  %v13192_v37 = vld [vmem:[%s13820_s10 + $0x464] ss:$16 sps:$4 sm:$0xff]  }
 0x545   : > { %11039 = vmatprep.subr.bf16.mxu1 %v13141_v23  ;;  %v9157_v16 = vpop.f32.mrf.mxu0  ;;  %v13184_v13 = vld [vmem:[%s13820_s10 + $0x4a0] ss:$16 sps:$4 sm:$0xff]  }
 0x546   : > { %10999 = vmatpush2.bf16.msra.mxu0 %v13136_v31  ;;  %v13187_v31 = vld [vmem:[%s13820_s10 + $0x480] ss:$16 sps:$4 sm:$0xff]  }
 0x547   : > { %v9158_v25 = vpop.f32.mrf.mxu0  ;;  %11000 = vmatprep.subr.bf16.mxu0 %v13144_v51  ;;  %v13261_v51 = vld [vmem:[%s13820_s10 + $0x664] ss:$16 sps:$4 sm:$0xff]   ;;  %v13259_v16 = vld [vmem:[%s13820_s10 + $0x660] ss:$16 sps:$4 sm:$0xff]  }
 0x548   : > { %11040 = vmatpush2.bf16.msra.mxu1 %v13139_v42  ;;  %v13253_v42 = vld [vmem:[%s13820_s10 + $0x680] ss:$16 sps:$4 sm:$0xff]  }
 0x549   : > { %11041 = vmatprep.subr.bf16.mxu1 %v13147_v40  ;;  %v13195_v40 = vld [vmem:[%s13820_s10 + $0x444] ss:$16 sps:$4 sm:$0xff]   ;;  %v13193_v25 = vld [vmem:[%s13820_s10 + $0x440] ss:$16 sps:$4 sm:$0xff]  }
 0x54a   : > { %11001 = vmatpush2.bf16.msra.mxu0 %v13142_v58  ;;  %v13267_v58 = vld [vmem:[%s13820_s10 + $0x644] ss:$16 sps:$4 sm:$0xff]  }
 0x54b   : > { %11002 = vmatprep.subr.bf16.mxu0 %v13150_v61  ;;  %v13265_v61 = vld [vmem:[%s13820_s10 + $0x640] ss:$16 sps:$4 sm:$0xff]  }
 0x54c   : > { %11042 = vmatpush2.bf16.msra.mxu1 %v13145_v54  ;;  %v13198_v54 = vld [vmem:[%s13820_s10 + $0x424] ss:$16 sps:$4 sm:$0xff]  }
 0x54d   : > { %11043 = vmatprep.subr.bf16.mxu1 %v13153_v8  ;;  %v13273_v8 = vld [vmem:[%s13820_s10 + $0x624] ss:$16 sps:$4 sm:$0xff]  }
 0x54e   : > { %11003 = vmatpush2.bf16.msra.mxu0 %v13148_v35  ;;  %v13196_v35 = vld [vmem:[%s13820_s10 + $0x420] ss:$16 sps:$4 sm:$0xff]  }
 0x54f   : > { %11004 = vmatprep.subr.bf16.mxu0 %v13156_v52  ;;  %v13271_v52 = vld [vmem:[%s13820_s10 + $0x620] ss:$16 sps:$4 sm:$0xff]  }
 0x550   : > { %11044 = vmatpush2.bf16.msra.mxu1 %v13151_v48  ;;  %v13201_v48 = vld [vmem:[%s13820_s10 + $0x404] ss:$16 sps:$4 sm:$0xff]  }
 0x551   : > { %11045 = vmatprep.subr.bf16.mxu1 %v13159_v21  ;;  %v13279_v21 = vld [vmem:[%s13820_s10 + $0x604] ss:$16 sps:$4 sm:$0xff]  }
 0x552   : > { %11005 = vmatpush2.bf16.msra.mxu0 %v13154_v62  ;;  %v13199_v62 = vld [vmem:[%s13820_s10 + $0x400] ss:$16 sps:$4 sm:$0xff]  }
 0x553   : > { %11006 = vmatprep.subr.bf16.mxu0 %v13162_v27  ;;  %v13277_v27 = vld [vmem:[%s13820_s10 + $0x600] ss:$16 sps:$4 sm:$0xff]  }
 0x554   : > { %11046 = vmatpush2.bf16.msra.mxu1 %v13157_v34  ;;  %v13204_v34 = vld [vmem:[%s13820_s10 + $0x5e4] ss:$16 sps:$4 sm:$0xff]  }
 0x555   : > { %11047 = vmatprep.subr.bf16.mxu1 %v13165_v24  ;;  %v13285_v24 = vld [vmem:[%s13820_s10 + $0x7e4] ss:$16 sps:$4 sm:$0xff]  }
 0x556   : > { %11007 = vmatpush2.bf16.msra.mxu0 %v13160_v28  ;;  %v13202_v28 = vld [vmem:[%s13820_s10 + $0x5e0] ss:$16 sps:$4 sm:$0xff]  }
 0x557   : > { %11008 = vmatprep.subr.bf16.mxu0 %v13168_v18  ;;  %v13283_v18 = vld [vmem:[%s13820_s10 + $0x7e0] ss:$16 sps:$4 sm:$0xff]  }
 0x558   : > { %11048 = vmatpush2.bf16.msra.mxu1 %v13163_v19  ;;  %v13207_v19 = vld [vmem:[%s13820_s10 + $0x5c4] ss:$16 sps:$4 sm:$0xff]  }
 0x559   : > { %11049 = vmatprep.subr.bf16.mxu1 %v13171_v14 }
 0x55a   : > { %11009 = vmatpush2.bf16.msra.mxu0 %v13166_v60  ;;  %v13291_v60 = vld [vmem:[%s13820_s10 + $0x7c4] ss:$16 sps:$4 sm:$0xff]  }
 0x55b   : > { %11010 = vmatprep.subr.bf16.mxu0 %v13174_v53  ;;  %v13205_v53 = vld [vmem:[%s13820_s10 + $0x5c0] ss:$16 sps:$4 sm:$0xff]  }
 0x55c   : > { %11050 = vmatpush2.bf16.msra.mxu1 %v13169_v43 }
 0x55d   : > { %11051 = vmatprep.subr.bf16.mxu1 %v13177_v9 }
 0x55e   : > { %11011 = vmatpush2.bf16.msra.mxu0 %v13172_v59  ;;  %v13210_v59 = vld [vmem:[%s13820_s10 + $0x5a4] ss:$16 sps:$4 sm:$0xff]  }
 0x55f   : > { %11062 = vmatprep.subr.bf16.mxu0 %v13180_v6 }
 0x560   : > { %11052 = vmatpush2.bf16.msra.mxu1 %v13175_v44  ;;  %v13289_v44 = vld [vmem:[%s13820_s10 + $0x7c0] ss:$16 sps:$4 sm:$0xff]  }
 0x561   : > { %11103 = vmatprep.subr.bf16.mxu1 %v13237_v5  ;;  %11013 = vmatmul.mubr.bf16.vlgmr.msra.gmra.mxu0 %v14269_v57  ;;  %v13208_v5 = vld [vmem:[%s13820_s10 + $0x5a0] ss:$16 sps:$4 sm:$0xff]  }
 0x562   : > { %11063 = vmatpush1.bf16.msra.mxu0 %v13178_v39  ;;  %11094 = vmatprep.mubr.bf16.mxu0 %v14275_v33  ;;  %v13213_v39 = vld [vmem:[%s13820_s10 + $0x584] ss:$16 sps:$4 sm:$0xff]  }
 0x563   : > { %v9194_v63 = vpop.f32.mrf.mxu1  ;;  %11054 = vmatmul.mubr.bf16.vlgmr.msra.gmra.mxu1 %v14272_v15  ;;  %11064 = vmatprep.subr.bf16.mxu0 %v13183_v17  ;;  %v13295_v17 = vld [vmem:[%s13820_s10 + $0x7a0] ss:$16 sps:$4 sm:$0xff]  }
 0x564   : > { %v14282_v56 = vadd.f32 %v9194_v63, %v14232_v0  ;;  %11104 = vmatpush1.bf16.msra.mxu1 %v13235_v2  ;;  %v13255_v0 = vld [vmem:[%s13820_s10 + $0x684] ss:$16 sps:$4 sm:$0xff]  }
 0x565   : > { %v9196_v22 = vpop.f32.mrf.mxu1  ;;  %11105 = vmatprep.subr.bf16.mxu1 %v13243_v41  ;;  %v13303_v2 = vld [vmem:[%s13820_s10 + $0x784] ss:$16 sps:$4 sm:$0xff]   ;;  %v13211_v41 = vld [vmem:[%s13820_s10 + $0x580] ss:$16 sps:$4 sm:$0xff]  }
 0x566   : > { %v14288_v7 = vadd.f32 %v9196_v22, %v14238_v1  ;;  %11065 = vmatpush1.bf16.msra.mxu0 %v13181_v20  ;;  %v13190_v1 = vld [vmem:[%s13820_s10 + $0x460] ss:$16 sps:$4 sm:$0xff]   ;;  %v13216_v63 = vld [vmem:[%s13820_s10 + $0x564] ss:$16 sps:$4 sm:$0xff]  }
 0x567   : > { %v9198_v4 = vpop.f32.mrf.mxu1  ;;  %11066 = vmatprep.subr.bf16.mxu0 %v13186_v55  ;;  %v13301_v20 = vld [vmem:[%s13820_s10 + $0x780] ss:$16 sps:$4 sm:$0xff]   ;;  %v13219_v22 = vld [vmem:[%s13820_s10 + $0x544] ss:$16 sps:$4 sm:$0xff]  }
 0x568   : > { %11106 = vmatpush1.bf16.msra.mxu1 %v13241_v12  ;;  %v13214_v55 = vld [vmem:[%s13820_s10 + $0x560] ss:$16 sps:$4 sm:$0xff]   ;;  %v13222_v4 = vld [vmem:[%s13820_s10 + $0x524] ss:$16 sps:$4 sm:$0xff]  }
 0x569   : > { %v9199_v23 = vpop.f32.mrf.mxu1  ;;  %11107 = vmatprep.subr.bf16.mxu1 %v13249_v26  ;;  %v13307_v12 = vld [vmem:[%s13820_s10 + $0x760] ss:$16 sps:$4 sm:$0xff]  }
 0x56a   : > { %11067 = vmatpush1.bf16.msra.mxu0 %v13184_v13  ;;  %v13217_v26 = vld [vmem:[%s13820_s10 + $0x540] ss:$16 sps:$4 sm:$0xff]  }
 0x56b   : > { %11068 = vmatprep.subr.bf16.mxu0 %v13189_v29  ;;  %v13313_v13 = vld [vmem:[%s13820_s10 + $0x740] ss:$16 sps:$4 sm:$0xff]   ;;  %v13321_v29 = vld [vmem:[%s13820_s10 + $0x724] ss:$16 sps:$4 sm:$0xff]  }
 0x56c   : > { %11108 = vmatpush1.bf16.msra.mxu1 %v13247_v11  ;;  %v13220_v23 = vld [vmem:[%s13820_s10 + $0x520] ss:$16 sps:$4 sm:$0xff]   ;;  %v13225_v11 = vld [vmem:[%s13820_s10 + $0x504] ss:$16 sps:$4 sm:$0xff]  }
 0x56d   : > { %11109 = vmatprep.subr.bf16.mxu1 %v13255_v0  ;;  %v13319_v0 = vld [vmem:[%s13820_s10 + $0x720] ss:$16 sps:$4 sm:$0xff]  }
 0x56e   : > { %11069 = vmatpush1.bf16.msra.mxu0 %v13187_v31  ;;  %v13327_v31 = vld [vmem:[%s13820_s10 + $0x704] ss:$16 sps:$4 sm:$0xff]  }
 0x56f   : > { %11070 = vmatprep.subr.bf16.mxu0 %v13192_v37  ;;  %v13223_v37 = vld [vmem:[%s13820_s10 + $0x500] ss:$16 sps:$4 sm:$0xff]  }
 0x570   : > { %11110 = vmatpush1.bf16.msra.mxu1 %v13253_v42  ;;  %v9410_v42 = vmax.f32 %v14153_v47, 0.0 }
 0x571   : > { %11111 = vmatprep.subr.bf16.mxu1 %v13261_v51  ;;  %v13228_v51 = vld [vmem:[%s13820_s10 + $0xec] ss:$16 sps:$4 sm:$0xff]  }
 0x572   : > { %11071 = vmatpush1.bf16.msra.mxu0 %v13190_v1  ;;  %v13325_v1 = vld [vmem:[%s13820_s10 + $0x700] ss:$16 sps:$4 sm:$0xff]  }
 0x573   : > { %11072 = vmatprep.subr.bf16.mxu0 %v13195_v40  ;;  %v13333_v40 = vld [vmem:[%s13820_s10 + $0x2ec] ss:$16 sps:$4 sm:$0xff]  }
 0x574   : > { %11112 = vmatpush1.bf16.msra.mxu1 %v13259_v16  ;;  %v13226_v16 = vld [vmem:[%s13820_s10 + $0xe8] ss:$16 sps:$4 sm:$0xff]  }
 0x575   : > { %11113 = vmatprep.subr.bf16.mxu1 %v13267_v58  ;;  %v14355_v58 = vpack.c.bf16 %v9410_v42, %v9410_v42 }
 0x576   : > { %11073 = vmatpush1.bf16.msra.mxu0 %v13193_v25  ;;  %v13231_v25 = vld [vmem:[%s13820_s10 + $0xcc] ss:$16 sps:$4 sm:$0xff]  }
 0x577   : > { %11074 = vmatprep.subr.bf16.mxu0 %v13198_v54  ;;  %v13229_v54 = vld [vmem:[%s13820_s10 + $0xc8] ss:$16 sps:$4 sm:$0xff]  }
 0x578   : > { %11114 = vmatpush1.bf16.msra.mxu1 %v13265_v61  ;;  %v13234_v61 = vld [vmem:[%s13820_s10 + $0xac] ss:$16 sps:$4 sm:$0xff]  }
 0x579   : > { %11115 = vmatprep.subr.bf16.mxu1 %v13273_v8 }
 0x57a   : > { %11075 = vmatpush1.bf16.msra.mxu0 %v13196_v35 }
 0x57b   : > { %11076 = vmatprep.subr.bf16.mxu0 %v13201_v48  ;;  %v13232_v48 = vld [vmem:[%s13820_s10 + $0xa8] ss:$16 sps:$4 sm:$0xff]  }
 0x57c   : > { %11116 = vmatpush1.bf16.msra.mxu1 %v13271_v52  ;;  %v13240_v52 = vld [vmem:[%s13820_s10 + $0x8c] ss:$16 sps:$4 sm:$0xff]  }
 0x57d   : > { %11117 = vmatprep.subr.bf16.mxu1 %v13279_v21 }
 0x57e   : > { %11077 = vmatpush1.bf16.msra.mxu0 %v13199_v62  ;;  %v13238_v62 = vld [vmem:[%s13820_s10 + $0x88] ss:$16 sps:$4 sm:$0xff]  }
 0x57f   : > { %11078 = vmatprep.subr.bf16.mxu0 %v13204_v34  ;;  %v13244_v34 = vld [vmem:[%s13820_s10 + $0x68] ss:$16 sps:$4 sm:$0xff]  }
 0x580   : > { %11118 = vmatpush1.bf16.msra.mxu1 %v13277_v27  ;;  %v13252_v27 = vld [vmem:[%s13820_s10 + $0x4c] ss:$16 sps:$4 sm:$0xff]  }
 0x581   : > { %v9235_v14 = vpop.f32.mrf.mxu0  ;;  %11119 = vmatprep.subr.bf16.mxu1 %v13285_v24  ;;  %v13250_v24 = vld [vmem:[%s13820_s10 + $0x48] ss:$16 sps:$4 sm:$0xff]  }
 0x582   : > { %v14320_v43 = vadd.f32 %v9235_v14, %v14282_v56  ;;  %11079 = vmatpush2.bf16.msra.mxu0 %v13202_v28  ;;  %v13309_v56 = vld [vmem:[%s13820_s10 + $0x764] ss:$16 sps:$4 sm:$0xff]   ;;  %v13258_v28 = vld [vmem:[%s13820_s10 + $0x2c] ss:$16 sps:$4 sm:$0xff]   ;;  %v13262_v14 = vld [vmem:[%s13820_s10 + $0x8] ss:$16 sps:$4 sm:$0xff]  }
 0x583   : > { %v9237_v9 = vpop.f32.mrf.mxu0  ;;  %11080 = vmatprep.subr.bf16.mxu0 %v13207_v19  ;;  %v13256_v19 = vld [vmem:[%s13820_s10 + $0x28] ss:$16 sps:$4 sm:$0xff]  }
 0x584   : > { %v14325_v46 = vadd.f32 %v9237_v9, %v14288_v7  ;;  %11120 = vmatpush2.bf16.msra.mxu1 %v13283_v18  ;;  %v13315_v7 = vld [vmem:[%s13820_s10 + $0x744] ss:$16 sps:$4 sm:$0xff]   ;;  %v13264_v18 = vld [vmem:[%s13820_s10 + $0xc] ss:$16 sps:$4 sm:$0xff]  }
 0x585   : > { %v9239_v6 = vpop.f32.mrf.mxu0  ;;  %11121 = vmatprep.subr.bf16.mxu1 %v13291_v60  ;;  %v13270_v60 = vld [vmem:[%s13820_s10 + $0x1ec] ss:$16 sps:$4 sm:$0xff]  }
 0x586   : > { %11081 = vmatpush2.bf16.msra.mxu0 %v13205_v53  ;;  %v13268_v53 = vld [vmem:[%s13820_s10 + $0x1e8] ss:$16 sps:$4 sm:$0xff]   ;;  %v13276_v9 = vld [vmem:[%s13820_s10 + $0x1cc] ss:$16 sps:$4 sm:$0xff]  }
 0x587   : > { %v9240_v30 = vpop.f32.mrf.mxu0  ;;  %11082 = vmatprep.subr.bf16.mxu0 %v13210_v59 }
 0x588   : > { %11122 = vmatpush2.bf16.msra.mxu1 %v13289_v44  ;;  %v13274_v44 = vld [vmem:[%s13820_s10 + $0x1c8] ss:$16 sps:$4 sm:$0xff]  }
 0x589   : > { %11123 = vmatprep.subr.bf16.mxu1 %v13297_v3  ;;  %v13282_v3 = vld [vmem:[%s13820_s10 + $0x1ac] ss:$16 sps:$4 sm:$0xff]   ;;  %v13280_v30 = vld [vmem:[%s13820_s10 + $0x1a8] ss:$16 sps:$4 sm:$0xff]  }
 0x58a   : > { %11083 = vmatpush2.bf16.msra.mxu0 %v13208_v5 }
 0x58b   : > { %11084 = vmatprep.subr.bf16.mxu0 %v13213_v39 }
 0x58c   : > { %11124 = vmatpush2.bf16.msra.mxu1 %v13295_v17  ;;  %v13288_v17 = vld [vmem:[%s13820_s10 + $0x18c] ss:$16 sps:$4 sm:$0xff]  }
 0x58d   : > { %11125 = vmatprep.subr.bf16.mxu1 %v13303_v2  ;;  %v13286_v2 = vld [vmem:[%s13820_s10 + $0x188] ss:$16 sps:$4 sm:$0xff]  }
 0x58e   : > { %11085 = vmatpush2.bf16.msra.mxu0 %v13211_v41  ;;  %v13294_v41 = vld [vmem:[%s13820_s10 + $0x16c] ss:$16 sps:$4 sm:$0xff]  }
 0x58f   : > { %11086 = vmatprep.subr.bf16.mxu0 %v13216_v63  ;;  %v13292_v63 = vld [vmem:[%s13820_s10 + $0x168] ss:$16 sps:$4 sm:$0xff]  }
 0x590   : > { %11126 = vmatpush2.bf16.msra.mxu1 %v13301_v20  ;;  %v13300_v20 = vld [vmem:[%s13820_s10 + $0x14c] ss:$16 sps:$4 sm:$0xff]  }
 0x591   : > { %11127 = vmatprep.subr.bf16.mxu1 %v13309_v56  ;;  %v13298_v56 = vld [vmem:[%s13820_s10 + $0x148] ss:$16 sps:$4 sm:$0xff]  }
 0x592   : > { %11087 = vmatpush2.bf16.msra.mxu0 %v13214_v55  ;;  %v13306_v55 = vld [vmem:[%s13820_s10 + $0x12c] ss:$16 sps:$4 sm:$0xff]  }
 0x593   : > { %11088 = vmatprep.subr.bf16.mxu0 %v13219_v22  ;;  %v13304_v22 = vld [vmem:[%s13820_s10 + $0x128] ss:$16 sps:$4 sm:$0xff]  }
 0x594   : > { %11128 = vmatpush2.bf16.msra.mxu1 %v13307_v12  ;;  %v13312_v12 = vld [vmem:[%s13820_s10 + $0x10c] ss:$16 sps:$4 sm:$0xff]  }
 0x595   : > { %11129 = vmatprep.subr.bf16.mxu1 %v13315_v7  ;;  %v13310_v7 = vld [vmem:[%s13820_s10 + $0x108] ss:$16 sps:$4 sm:$0xff]  }
 0x596   : > { %11089 = vmatpush2.bf16.msra.mxu0 %v13217_v26  ;;  %v13318_v26 = vld [vmem:[%s13820_s10 + $0x4ec] ss:$16 sps:$4 sm:$0xff]  }
 0x597   : > { %11090 = vmatprep.subr.bf16.mxu0 %v13222_v4  ;;  %v13316_v4 = vld [vmem:[%s13820_s10 + $0x4e8] ss:$16 sps:$4 sm:$0xff]  }
 0x598   : > { %11130 = vmatpush2.bf16.msra.mxu1 %v13313_v13 }
 0x599   : > { %11131 = vmatprep.subr.bf16.mxu1 %v13321_v29  ;;  %v13324_v29 = vld [vmem:[%s13820_s10 + $0x4cc] ss:$16 sps:$4 sm:$0xff]  }
 0x59a   : > { %11091 = vmatpush2.bf16.msra.mxu0 %v13220_v23 }
 0x59b   : > { %11092 = vmatprep.subr.bf16.mxu0 %v13225_v11 }
 0x59c   : > { %11132 = vmatpush2.bf16.msra.mxu1 %v13319_v0 }
 0x59d   : > { %11133 = vmatprep.subr.bf16.mxu1 %v13327_v31 }
 0x59e   : > { %11093 = vmatpush2.bf16.msra.mxu0 %v13223_v37  ;;  %v13322_v37 = vld [vmem:[%s13820_s10 + $0x4c8] ss:$16 sps:$4 sm:$0xff]  }
 0x59f   : > { %11144 = vmatprep.subr.bf16.mxu0 %v13228_v51 }
 0x5a0   : > { %11134 = vmatpush2.bf16.msra.mxu1 %v13325_v1 }
 0x5a1   : > { %11095 = vmatmul.mubr.bf16.vlgmr.msra.gmra.mxu0 %v14355_v58  ;;  %11185 = vmatprep.subr.bf16.mxu1 %v13333_v40 }
 0x5a2   : > { %11145 = vmatpush1.bf16.msra.mxu0 %v13226_v16  ;;  %11176 = vmatprep.mubr.bf16.mxu0 %v14182_v49  ;;  %v13246_v49 = vld [vmem:[%s13820_s10 + $0x6c] ss:$16 sps:$4 sm:$0xff]  }
 0x5a3   : > { %v14359_v47 = vpop.f32.mrf.mxu1  ;;  %11146 = vmatprep.subr.bf16.mxu0 %v13231_v25 }
 0x5a4   : > { %v9277_v13 = vadd.f32 %v14359_v47, %v14320_v43  ;;  %v13330_v43 = vld [vmem:[%s13820_s10 + $0x4ac] ss:$16 sps:$4 sm:$0xff]  }
 0x5a5   : > { %v14364_v8 = vpop.f32.mrf.mxu1 }
 0x5a6   : > { %11147 = vmatpush1.bf16.msra.mxu0 %v13229_v54  ;;  %v9279_v23 = vadd.f32 %v14364_v8, %v14325_v46 }
 0x5a7   : > { %v9280_v35 = vpop.f32.mrf.mxu1  ;;  %11148 = vmatprep.subr.bf16.mxu0 %v13234_v61  ;;  %v13336_v61 = vld [vmem:[%s13820_s10 + $0x48c] ss:$16 sps:$4 sm:$0xff]  }
 0x5a9   : > { %v9281_v21 = vpop.f32.mrf.mxu1 }
 0x5aa   : > { %11149 = vmatpush1.bf16.msra.mxu0 %v13232_v48 }
 0x5ab   : > { %11150 = vmatprep.subr.bf16.mxu0 %v13240_v52  ;;  %v13334_v52 = vld [vmem:[%s13820_s10 + $0x488] ss:$16 sps:$4 sm:$0xff]  }
 0x5ae   : > { %11151 = vmatpush1.bf16.msra.mxu0 %v13238_v62  ;;  %v13331_v62 = vld [vmem:[%s13820_s10 + $0x2e8] ss:$16 sps:$4 sm:$0xff]  }
 0x5af   : > { %11152 = vmatprep.subr.bf16.mxu0 %v13246_v49 }
 0x5b2   : > { %11153 = vmatpush1.bf16.msra.mxu0 %v13244_v34  ;;  %v13339_v34 = vld [vmem:[%s13820_s10 + $0x2cc] ss:$16 sps:$4 sm:$0xff]  }
 0x5b3   : > { %11154 = vmatprep.subr.bf16.mxu0 %v13252_v27  ;;  %v13342_v27 = vld [vmem:[%s13820_s10 + $0x46c] ss:$16 sps:$4 sm:$0xff]  }
 0x5b6   : > { %11155 = vmatpush1.bf16.msra.mxu0 %v13250_v24  ;;  %v13340_v24 = vld [vmem:[%s13820_s10 + $0x468] ss:$16 sps:$4 sm:$0xff]  }
 0x5b7   : > { %11156 = vmatprep.subr.bf16.mxu0 %v13258_v28  ;;  %v13337_v28 = vld [vmem:[%s13820_s10 + $0x2c8] ss:$16 sps:$4 sm:$0xff]  }
 0x5ba   : > { %11157 = vmatpush1.bf16.msra.mxu0 %v13256_v19  ;;  %v13348_v19 = vld [vmem:[%s13820_s10 + $0x44c] ss:$16 sps:$4 sm:$0xff]  }
 0x5bb   : > { %11158 = vmatprep.subr.bf16.mxu0 %v13264_v18  ;;  %v13345_v18 = vld [vmem:[%s13820_s10 + $0x2ac] ss:$16 sps:$4 sm:$0xff]  }
 0x5be   : > { %11159 = vmatpush1.bf16.msra.mxu0 %v13262_v14  ;;  %v13346_v14 = vld [vmem:[%s13820_s10 + $0x448] ss:$16 sps:$4 sm:$0xff]  }
 0x5bf   : > { %11160 = vmatprep.subr.bf16.mxu0 %v13270_v60  ;;  %v13343_v60 = vld [vmem:[%s13820_s10 + $0x2a8] ss:$16 sps:$4 sm:$0xff]  }
 0x5c1   : > { %v9317_v59 = vpop.f32.mrf.mxu0 }
 0x5c2   : > { %11161 = vmatpush2.bf16.msra.mxu0 %v13268_v53  ;;  %v9318_v11 = vadd.f32 %v9317_v59, %v9277_v13  ;;  %v13354_v53 = vld [vmem:[%s13820_s10 + $0x42c] ss:$16 sps:$4 sm:$0xff]   ;;  %v13349_v59 = vld [vmem:[%s13820_s10 + $0x288] ss:$16 sps:$4 sm:$0xff]  }
 0x5c3   : > { %v9319_v6 = vpop.f32.mrf.mxu0  ;;  %11162 = vmatprep.subr.bf16.mxu0 %v13276_v9  ;;  %v13351_v9 = vld [vmem:[%s13820_s10 + $0x28c] ss:$16 sps:$4 sm:$0xff]   ;;  %v13382_v13 = vld [vmem:[%s13820_s10 + $0x588] ss:$16 sps:$4 sm:$0xff]  }
 0x5c4   : > { %v9320_v42 = vadd.f32 %v9319_v6, %v9279_v23  ;;  %v13357_v6 = vld [vmem:[%s13820_s10 + $0x26c] ss:$16 sps:$4 sm:$0xff]  }
 0x5c5   : > { %v9321_v5 = vpop.f32.mrf.mxu0  ;;  %v13390_v23 = vld [vmem:[%s13820_s10 + $0x56c] ss:$16 sps:$4 sm:$0xff]  }
 0x5c6   : > { %11163 = vmatpush2.bf16.msra.mxu0 %v13274_v44  ;;  %v13360_v44 = vld [vmem:[%s13820_s10 + $0x40c] ss:$16 sps:$4 sm:$0xff]   ;;  %v13355_v5 = vld [vmem:[%s13820_s10 + $0x268] ss:$16 sps:$4 sm:$0xff]  }
 0x5c7   : > { %v9322_v39 = vpop.f32.mrf.mxu0  ;;  %11164 = vmatprep.subr.bf16.mxu0 %v13282_v3  ;;  %v13358_v3 = vld [vmem:[%s13820_s10 + $0x408] ss:$16 sps:$4 sm:$0xff]  }
 0x5c8   : > { %v13363_v39 = vld [vmem:[%s13820_s10 + $0x24c] ss:$16 sps:$4 sm:$0xff]  }
 0x5ca   : > { %11165 = vmatpush2.bf16.msra.mxu0 %v13280_v30  ;;  %v13366_v30 = vld [vmem:[%s13820_s10 + $0x5ec] ss:$16 sps:$4 sm:$0xff]  }
 0x5cb   : > { %11166 = vmatprep.subr.bf16.mxu0 %v13288_v17  ;;  %v13364_v17 = vld [vmem:[%s13820_s10 + $0x5e8] ss:$16 sps:$4 sm:$0xff]  }
 0x5ce   : > { %11167 = vmatpush2.bf16.msra.mxu0 %v13286_v2  ;;  %v13361_v2 = vld [vmem:[%s13820_s10 + $0x248] ss:$16 sps:$4 sm:$0xff]  }
 0x5cf   : > { %11168 = vmatprep.subr.bf16.mxu0 %v13294_v41  ;;  %v13372_v41 = vld [vmem:[%s13820_s10 + $0x5cc] ss:$16 sps:$4 sm:$0xff]  }
 0x5d2   : > { %11169 = vmatpush2.bf16.msra.mxu0 %v13292_v63  ;;  %v13369_v63 = vld [vmem:[%s13820_s10 + $0x22c] ss:$16 sps:$4 sm:$0xff]  }
 0x5d3   : > { %11170 = vmatprep.subr.bf16.mxu0 %v13300_v20  ;;  %v13370_v20 = vld [vmem:[%s13820_s10 + $0x5c8] ss:$16 sps:$4 sm:$0xff]  }
 0x5d6   : > { %11171 = vmatpush2.bf16.msra.mxu0 %v13298_v56  ;;  %v13367_v56 = vld [vmem:[%s13820_s10 + $0x228] ss:$16 sps:$4 sm:$0xff]  }
 0x5d7   : > { %11172 = vmatprep.subr.bf16.mxu0 %v13306_v55  ;;  %v13378_v55 = vld [vmem:[%s13820_s10 + $0x5ac] ss:$16 sps:$4 sm:$0xff]  }
 0x5da   : > { %11173 = vmatpush2.bf16.msra.mxu0 %v13304_v22  ;;  %v13375_v22 = vld [vmem:[%s13820_s10 + $0x20c] ss:$16 sps:$4 sm:$0xff]  }
 0x5db   : > { %11174 = vmatprep.subr.bf16.mxu0 %v13312_v12  ;;  %v13376_v12 = vld [vmem:[%s13820_s10 + $0x5a8] ss:$16 sps:$4 sm:$0xff]  }
 0x5de   : > { %11175 = vmatpush2.bf16.msra.mxu0 %v13310_v7  ;;  %v13373_v7 = vld [vmem:[%s13820_s10 + $0x208] ss:$16 sps:$4 sm:$0xff]  }
 0x5df   : > { %11226 = vmatprep.subr.bf16.mxu0 %v13318_v26  ;;  %v13384_v26 = vld [vmem:[%s13820_s10 + $0x58c] ss:$16 sps:$4 sm:$0xff]  }
 0x5e1   : > { %v9399_v0 = vpop.f32.mrf.mxu0  ;;  %11177 = vmatmul.mubr.bf16.vlgmr.msra.gmra.mxu0 %v14269_v57  ;;  %v13328_v57 = vld [vmem:[%s13820_s10 + $0x4a8] ss:$16 sps:$4 sm:$0xff]  }
 0x5e2   : > { %11227 = vmatpush1.bf16.msra.mxu0 %v13316_v4  ;;  %11258 = vmatprep.mubr.bf16.mxu0 %v14275_v33  ;;  %v13381_v4 = vld [vmem:[%s13820_s10 + $0x3ec] ss:$16 sps:$4 sm:$0xff]  }
 0x5e3   : > { %v9358_v31 = vpop.f32.mrf.mxu1  ;;  %v9401_v1 = vpop.f32.mrf.mxu0  ;;  %11228 = vmatprep.subr.bf16.mxu0 %v13324_v29  ;;  %v13379_v29 = vld [vmem:[%s13820_s10 + $0x3e8] ss:$16 sps:$4 sm:$0xff]  }
 0x5e4   : > { %v9359_v51 = vadd.f32 %v9358_v31, %v9318_v11  ;;  %v13387_v11 = vld [vmem:[%s13820_s10 + $0x3cc] ss:$16 sps:$4 sm:$0xff]   ;;  %v13385_v31 = vld [vmem:[%s13820_s10 + $0x3c8] ss:$16 sps:$4 sm:$0xff]  }
 0x5e5   : > { %v9360_v40 = vpop.f32.mrf.mxu1  ;;  %v9403_v25 = vpop.f32.mrf.mxu0 }
 0x5e6   : > { %v9400_v16 = vadd.f32 %v9399_v0, %v9359_v51  ;;  %v9361_v46 = vadd.f32 %v9360_v40, %v9320_v42  ;;  %11229 = vmatpush1.bf16.msra.mxu0 %v13322_v37  ;;  %v13388_v0 = vld [vmem:[%s13820_s10 + $0x568] ss:$16 sps:$4 sm:$0xff]   ;;  %v13396_v37 = vld [vmem:[%s13820_s10 + $0x54c] ss:$16 sps:$4 sm:$0xff]  }
 0x5e7   : > { %v9362_v47 = vpop.f32.mrf.mxu1  ;;  %v9404_v33 = vpop.f32.mrf.mxu0  ;;  %11230 = vmatprep.subr.bf16.mxu0 %v13330_v43  ;;  %v13393_v42 = vld [vmem:[%s13820_s10 + $0x3ac] ss:$16 sps:$4 sm:$0xff]   ;;  %v13394_v51 = vld [vmem:[%s13820_s10 + $0x548] ss:$16 sps:$4 sm:$0xff]  }
 0x5e8   : > { %v9402_v54 = vadd.f32 %v9401_v1, %v9361_v46  ;;  %v9412_v8 = vmax.f32 %v9400_v16, 0.0  ;;  %v13391_v1 = vld [vmem:[%s13820_s10 + $0x3a8] ss:$16 sps:$4 sm:$0xff]   ;;  %v13402_v43 = vld [vmem:[%s13820_s10 + $0x52c] ss:$16 sps:$4 sm:$0xff]  }
 0x5e9   : > { %v9363_v35 = vpop.f32.mrf.mxu1  ;;  %v13399_v40 = vld [vmem:[%s13820_s10 + $0x38c] ss:$16 sps:$4 sm:$0xff]   ;;  %v13400_v16 = vld [vmem:[%s13820_s10 + $0x528] ss:$16 sps:$4 sm:$0xff]   ;;  %v14465_v33 = vld [vmem:[%s292_s6] sm:$0xf] }
 0x5ea   : > { %v9413_v48 = vmax.f32 %v9402_v54, 0.0  ;;  %11231 = vmatpush1.bf16.msra.mxu0 %v13328_v57  ;;  %v14410_v49 = vpack.c.bf16 %v9412_v8, %v9412_v8  ;;  %v13397_v46 = vld [vmem:[%s13820_s10 + $0x388] ss:$16 sps:$4 sm:$0xff]   ;;  %v13408_v25 = vld [vmem:[%s13820_s10 + $0x50c] ss:$16 sps:$4 sm:$0xff]   ;;  %v9683_v8 = vrot.slane %v14465_v33, %v1581_v45 }
 0x5eb   : > { %11232 = vmatprep.subr.bf16.mxu0 %v13336_v61  ;;  %v13405_v47 = vld [vmem:[%s13820_s10 + $0x36c] ss:$16 sps:$4 sm:$0xff]   ;;  %v13406_v57 = vld [vmem:[%s13820_s10 + $0x508] ss:$16 sps:$4 sm:$0xff]  }
 0x5ec   : > { %v14407_v21 = vpack.c.bf16 %v9413_v48, %v9413_v48  ;;  %v13403_v54 = vld [vmem:[%s13820_s10 + $0x368] ss:$16 sps:$4 sm:$0xff]   ;;  %v13411_v61 = vld [vmem:[%s13820_s10 + $0x34c] ss:$16 sps:$4 sm:$0xff]   ;;  %v9687_v48 = vrot.slane %v14465_v33, %v1585_v50 }
 0x5ed   : > { %v13409_v35 = vld [vmem:[%s13820_s10 + $0x348] ss:$16 sps:$4 sm:$0xff]  }
 0x5ee   : > { %11135 = vmatprep.mubr.bf16.mxu1 %v14407_v21  ;;  %11233 = vmatpush1.bf16.msra.mxu0 %v13334_v52  ;;  %v13414_v52 = vld [vmem:[%s13820_s10 + $0x32c] ss:$16 sps:$4 sm:$0xff]  }
 0x5ef   : > { %11136 = vmatmul.mubr.bf16.vlgmr.msra.gmra.mxu1 %v14410_v49  ;;  %11234 = vmatprep.subr.bf16.mxu0 %v13342_v27 }
 0x5f0   : > { %11186 = vmatpush1.bf16.msra.mxu1 %v13331_v62  ;;  %11217 = vmatprep.mubr.bf16.mxu1 %v14188_v36  ;;  %v13352_v36 = vld [vmem:[%s13820_s10 + $0x428] ss:$16 sps:$4 sm:$0xff]  }
 0x5f1   : > { %11187 = vmatprep.subr.bf16.mxu1 %v13339_v34 }
 0x5f2   : > { %11235 = vmatpush1.bf16.msra.mxu0 %v13340_v24 }
 0x5f3   : > { %11236 = vmatprep.subr.bf16.mxu0 %v13348_v19 }
 0x5f4   : > { %11188 = vmatpush1.bf16.msra.mxu1 %v13337_v28  ;;  %v13412_v28 = vld [vmem:[%s13820_s10 + $0x328] ss:$16 sps:$4 sm:$0xff]  }
 0x5f5   : > { %11189 = vmatprep.subr.bf16.mxu1 %v13345_v18 }
 0x5f6   : > { %11237 = vmatpush1.bf16.msra.mxu0 %v13346_v14  ;;  %v13417_v14 = vld [vmem:[%s13820_s10 + $0x30c] ss:$16 sps:$4 sm:$0xff]  }
 0x5f7   : > { %11238 = vmatprep.subr.bf16.mxu0 %v13354_v53 }
 0x5f8   : > { %11190 = vmatpush1.bf16.msra.mxu1 %v13343_v60 }
 0x5f9   : > { %11191 = vmatprep.subr.bf16.mxu1 %v13351_v9  ;;  %v13415_v9 = vld [vmem:[%s13820_s10 + $0x308] ss:$16 sps:$4 sm:$0xff]  }
 0x5fa   : > { %11239 = vmatpush1.bf16.msra.mxu0 %v13352_v36 }
 0x5fb   : > { %11240 = vmatprep.subr.bf16.mxu0 %v13360_v44  ;;  %v13418_v44 = vld [vmem:[%s13820_s10 + $0x6e8] ss:$16 sps:$4 sm:$0xff]  }
 0x5fc   : > { %11192 = vmatpush1.bf16.msra.mxu1 %v13349_v59  ;;  %v13420_v59 = vld [vmem:[%s13820_s10 + $0x6ec] ss:$16 sps:$4 sm:$0xff]  }
 0x5fd   : > { %11193 = vmatprep.subr.bf16.mxu1 %v13357_v6  ;;  %v13423_v6 = vld [vmem:[%s13820_s10 + $0x6cc] ss:$16 sps:$4 sm:$0xff]  }
 0x5fe   : > { %11241 = vmatpush1.bf16.msra.mxu0 %v13358_v3  ;;  %v13421_v3 = vld [vmem:[%s13820_s10 + $0x6c8] ss:$16 sps:$4 sm:$0xff]  }
 0x5ff   : > { %11242 = vmatprep.subr.bf16.mxu0 %v13366_v30  ;;  %v13424_v30 = vld [vmem:[%s13820_s10 + $0x6a8] ss:$16 sps:$4 sm:$0xff]  }
 0x600   : > { %11194 = vmatpush1.bf16.msra.mxu1 %v13355_v5  ;;  %v13426_v5 = vld [vmem:[%s13820_s10 + $0x6ac] ss:$16 sps:$4 sm:$0xff]  }
 0x601   : > { %11195 = vmatprep.subr.bf16.mxu1 %v13363_v39  ;;  %v13429_v39 = vld [vmem:[%s13820_s10 + $0x68c] ss:$16 sps:$4 sm:$0xff]  }
 0x602   : > { %11243 = vmatpush2.bf16.msra.mxu0 %v13364_v17  ;;  %v13427_v17 = vld [vmem:[%s13820_s10 + $0x688] ss:$16 sps:$4 sm:$0xff]  }
 0x603   : > { %11244 = vmatprep.subr.bf16.mxu0 %v13372_v41  ;;  %v13433_v41 = vld [vmem:[%s13820_s10 + $0x648] ss:$16 sps:$4 sm:$0xff]  }
 0x604   : > { %11196 = vmatpush1.bf16.msra.mxu1 %v13361_v2  ;;  %v13430_v2 = vld [vmem:[%s13820_s10 + $0x668] ss:$16 sps:$4 sm:$0xff]  }
 0x605   : > { %11197 = vmatprep.subr.bf16.mxu1 %v13369_v63  ;;  %v13438_v63 = vld [vmem:[%s13820_s10 + $0x62c] ss:$16 sps:$4 sm:$0xff]  }
 0x606   : > { %11245 = vmatpush2.bf16.msra.mxu0 %v13370_v20  ;;  %v13436_v20 = vld [vmem:[%s13820_s10 + $0x628] ss:$16 sps:$4 sm:$0xff]  }
 0x607   : > { %11246 = vmatprep.subr.bf16.mxu0 %v13378_v55  ;;  %v13439_v55 = vld [vmem:[%s13820_s10 + $0x608] ss:$16 sps:$4 sm:$0xff]  }
 0x608   : > { %11198 = vmatpush1.bf16.msra.mxu1 %v13367_v56  ;;  %v13441_v56 = vld [vmem:[%s13820_s10 + $0x60c] ss:$16 sps:$4 sm:$0xff]  }
 0x609   : > { %11199 = vmatprep.subr.bf16.mxu1 %v13375_v22  ;;  %v13444_v22 = vld [vmem:[%s13820_s10 + $0x7ec] ss:$16 sps:$4 sm:$0xff]  }
 0x60a   : > { %11247 = vmatpush2.bf16.msra.mxu0 %v13376_v12  ;;  %v13442_v12 = vld [vmem:[%s13820_s10 + $0x7e8] ss:$16 sps:$4 sm:$0xff]  }
 0x60b   : > { %11248 = vmatprep.subr.bf16.mxu0 %v13384_v26  ;;  %v13445_v26 = vld [vmem:[%s13820_s10 + $0x7c8] ss:$16 sps:$4 sm:$0xff]  }
 0x60c   : > { %11200 = vmatpush1.bf16.msra.mxu1 %v13373_v7  ;;  %v13447_v7 = vld [vmem:[%s13820_s10 + $0x7cc] ss:$16 sps:$4 sm:$0xff]  }
 0x60d   : > { %11201 = vmatprep.subr.bf16.mxu1 %v13381_v4  ;;  %v13450_v4 = vld [vmem:[%s13820_s10 + $0x7ac] ss:$16 sps:$4 sm:$0xff]  }
 0x60e   : > { %11249 = vmatpush2.bf16.msra.mxu0 %v13382_v13  ;;  %v13448_v13 = vld [vmem:[%s13820_s10 + $0x7a8] ss:$16 sps:$4 sm:$0xff]  }
 0x60f   : > { %11250 = vmatprep.subr.bf16.mxu0 %v13390_v23  ;;  %v13451_v23 = vld [vmem:[%s13820_s10 + $0x788] ss:$16 sps:$4 sm:$0xff]  }
 0x610   : > { %11202 = vmatpush2.bf16.msra.mxu1 %v13379_v29  ;;  %v13453_v29 = vld [vmem:[%s13820_s10 + $0x78c] ss:$16 sps:$4 sm:$0xff]  }
 0x611   : > { %11203 = vmatprep.subr.bf16.mxu1 %v13387_v11  ;;  %v13456_v11 = vld [vmem:[%s13820_s10 + $0x76c] ss:$16 sps:$4 sm:$0xff]  }
 0x612   : > { %11251 = vmatpush2.bf16.msra.mxu0 %v13388_v0  ;;  %v13454_v0 = vld [vmem:[%s13820_s10 + $0x768] ss:$16 sps:$4 sm:$0xff]  }
 0x613   : > { %11252 = vmatprep.subr.bf16.mxu0 %v13396_v37  ;;  %v13457_v37 = vld [vmem:[%s13820_s10 + $0x748] ss:$16 sps:$4 sm:$0xff]  }
 0x614   : > { %11204 = vmatpush2.bf16.msra.mxu1 %v13385_v31  ;;  %v13459_v31 = vld [vmem:[%s13820_s10 + $0x74c] ss:$16 sps:$4 sm:$0xff]  }
 0x615   : > { %11205 = vmatprep.subr.bf16.mxu1 %v13393_v42  ;;  %v13462_v42 = vld [vmem:[%s13820_s10 + $0x72c] ss:$16 sps:$4 sm:$0xff]  }
 0x616   : > { %11253 = vmatpush2.bf16.msra.mxu0 %v13394_v51 }
 0x617   : > { %11254 = vmatprep.subr.bf16.mxu0 %v13402_v43 }
 0x618   : > { %11206 = vmatpush2.bf16.msra.mxu1 %v13391_v1 }
 0x619   : > { %11207 = vmatprep.subr.bf16.mxu1 %v13399_v40  ;;  %v13460_v40 = vld [vmem:[%s13820_s10 + $0x728] ss:$16 sps:$4 sm:$0xff]  }
 0x61a   : > { %11255 = vmatpush2.bf16.msra.mxu0 %v13400_v16 }
 0x61b   : > { %11256 = vmatprep.subr.bf16.mxu0 %v13408_v25 }
 0x61c   : > { %11208 = vmatpush2.bf16.msra.mxu1 %v13397_v46  ;;  %v13465_v46 = vld [vmem:[%s13820_s10 + $0x70c] ss:$16 sps:$4 sm:$0xff]  }
 0x61d   : > { %11209 = vmatprep.subr.bf16.mxu1 %v13405_v47 }
 0x61e   : > { %11257 = vmatpush2.bf16.msra.mxu0 %v13406_v57  ;;  %v13463_v57 = vld [vmem:[%s13820_s10 + $0x708] ss:$16 sps:$4 sm:$0xff]  }
 0x620   : > { %11210 = vmatpush2.bf16.msra.mxu1 %v13403_v54 }
 0x621   : > { %11211 = vmatprep.subr.bf16.mxu1 %v13411_v61  ;;  %v11014_v62 = vpop.f32.mrf.mxu0  ;;  %11259 = vmatmul.mubr.bf16.vlgmr.msra.gmra.mxu0 %v14355_v58 }
 0x622   : > { %v11015_v34 = vadd.f32 %v11014_v62, %v9683_v8 }
 0x623   : > { %v11055_v27 = vpop.f32.mrf.mxu1  ;;  %v11016_v24 = vpop.f32.mrf.mxu0 }
 0x624   : > { %11212 = vmatpush2.bf16.msra.mxu1 %v13409_v35  ;;  %v14478_v45 = vadd.f32 %v11055_v27, %v11015_v34  ;;  %v11017_v19 = vadd.f32 %v11016_v24, %v9687_v48 }
 0x625   : > { %v11057_v18 = vpop.f32.mrf.mxu1  ;;  %11213 = vmatprep.subr.bf16.mxu1 %v13414_v52  ;;  %v11018_v50 = vpop.f32.mrf.mxu0 }
 0x626   : > { %v14481_v60 = vadd.f32 %v11057_v18, %v11017_v19  ;;  %v9691_v50 = vrot.slane %v14465_v33, %v1589_v10 }
 0x627   : > { %v11059_v58 = vpop.f32.mrf.mxu1  ;;  %v11019_v53 = vpop.f32.mrf.mxu0 }
 0x628   : > { %11214 = vmatpush2.bf16.msra.mxu1 %v13412_v28 }
 0x629   : > { %v11060_v36 = vpop.f32.mrf.mxu1  ;;  %11215 = vmatprep.subr.bf16.mxu1 %v13417_v14 }
 0x62c   : > { %11216 = vmatpush2.bf16.msra.mxu1 %v13415_v9 }
 0x62d   : > { %11267 = vmatprep.subr.bf16.mxu1 %v13420_v59 }
 0x62f   : > { %11218 = vmatmul.mubr.bf16.vlgmr.msra.gmra.mxu1 %v14272_v15  ;;  %v13432_v15 = vld [vmem:[%s13820_s10 + $0x66c] ss:$16 sps:$4 sm:$0xff]  }
 0x630   : > { %11268 = vmatpush1.bf16.msra.mxu1 %v13418_v44  ;;  %11299 = vmatprep.mubr.bf16.mxu1 %v14407_v21  ;;  %v13435_v21 = vld [vmem:[%s13820_s10 + $0x64c] ss:$16 sps:$4 sm:$0xff]  }
 0x631   : > { %11269 = vmatprep.subr.bf16.mxu1 %v13423_v6 }
 0x634   : > { %11270 = vmatpush1.bf16.msra.mxu1 %v13421_v3 }
 0x635   : > { %11271 = vmatprep.subr.bf16.mxu1 %v13426_v5 }
 0x638   : > { %11272 = vmatpush1.bf16.msra.mxu1 %v13424_v30 }
 0x639   : > { %11273 = vmatprep.subr.bf16.mxu1 %v13429_v39 }
 0x63c   : > { %11274 = vmatpush1.bf16.msra.mxu1 %v13427_v17 }
 0x63d   : > { %11275 = vmatprep.subr.bf16.mxu1 %v13432_v15 }
 0x640   : > { %11276 = vmatpush1.bf16.msra.mxu1 %v13430_v2 }
 0x641   : > { %11277 = vmatprep.subr.bf16.mxu1 %v13435_v21 }
 0x644   : > { %11278 = vmatpush1.bf16.msra.mxu1 %v13433_v41 }
 0x645   : > { %11279 = vmatprep.subr.bf16.mxu1 %v13438_v63 }
 0x648   : > { %11280 = vmatpush1.bf16.msra.mxu1 %v13436_v20 }
 0x649   : > { %11281 = vmatprep.subr.bf16.mxu1 %v13441_v56 }
 0x64c   : > { %11282 = vmatpush1.bf16.msra.mxu1 %v13439_v55 }
 0x64d   : > { %11283 = vmatprep.subr.bf16.mxu1 %v13444_v22 }
 0x650   : > { %11284 = vmatpush2.bf16.msra.mxu1 %v13442_v12 }
 0x651   : > { %11285 = vmatprep.subr.bf16.mxu1 %v13447_v7 }
 0x654   : > { %11286 = vmatpush2.bf16.msra.mxu1 %v13445_v26 }
 0x655   : > { %11287 = vmatprep.subr.bf16.mxu1 %v13450_v4 }
 0x658   : > { %11288 = vmatpush2.bf16.msra.mxu1 %v13448_v13 }
 0x659   : > { %11289 = vmatprep.subr.bf16.mxu1 %v13453_v29 }
 0x65c   : > { %11290 = vmatpush2.bf16.msra.mxu1 %v13451_v23 }
 0x65d   : > { %11291 = vmatprep.subr.bf16.mxu1 %v13456_v11 }
 0x660   : > { %11292 = vmatpush2.bf16.msra.mxu1 %v13454_v0 }
 0x661   : > { %11293 = vmatprep.subr.bf16.mxu1 %v13459_v31  ;;  %v11096_v51 = vpop.f32.mrf.mxu0 }
 0x662   : > { %v11097_v1 = vadd.f32 %v11096_v51, %v14478_v45 }
 0x663   : > { %v11098_v43 = vpop.f32.mrf.mxu0 }
 0x664   : > { %11294 = vmatpush2.bf16.msra.mxu1 %v13457_v37  ;;  %v11099_v16 = vadd.f32 %v11098_v43, %v14481_v60  ;;  %v9695_v60 = vrot.slane %v14465_v33, %v1593_v38 }
 0x665   : > { %11295 = vmatprep.subr.bf16.mxu1 %v13462_v42  ;;  %v11100_v25 = vpop.f32.mrf.mxu0 }
 0x667   : > { %v11101_v47 = vpop.f32.mrf.mxu0 }
 0x668   : > { %11296 = vmatpush2.bf16.msra.mxu1 %v13460_v40 }
 0x669   : > { %11297 = vmatprep.subr.bf16.mxu1 %v13465_v46 }
 0x66c   : > { %11298 = vmatpush2.bf16.msra.mxu1 %v13463_v57 }
 0x66f   : > { %11300 = vmatmul.mubr.bf16.vlgmr.msra.gmra.mxu1 %v14410_v49 }
 0x6a1   : > { %v11178_v54 = vpop.f32.mrf.mxu0 }
 0x6a2   : > { %v11179_v58 = vadd.f32 %v11178_v54, %v9691_v50 }
 0x6a3   : > { %v11180_v61 = vpop.f32.mrf.mxu0 }
 0x6a4   : > { %v11181_v9 = vadd.f32 %v11180_v61, %v9695_v60 }
 0x6a5   : > { %v11182_v8 = vpop.f32.mrf.mxu0 }
 0x6a7   : > { %v11183_v35 = vpop.f32.mrf.mxu0 }
 0x6af   : > { %v11137_v48 = vpop.f32.mrf.mxu1 }
 0x6b0   : > { %v11138_v52 = vadd.f32 %v11137_v48, %v11097_v1 }
 0x6b1   : > { %v11139_v62 = vpop.f32.mrf.mxu1 }
 0x6b2   : > { %v11308_v34 = vmax.f32 %v11138_v52, 0.0  ;;  %v11140_v49 = vadd.f32 %v11139_v62, %v11099_v16 }
 0x6b3   : > { %v11141_v27 = vpop.f32.mrf.mxu1 }
 0x6b4   : > { %11312 = vst [vmem:[%s14525_s7] sm:$0xff] %v11308_v34  ;;  %v11309_v24 = vmax.f32 %v11140_v49, 0.0 }
 0x6b5   : > { %v11142_v28 = vpop.f32.mrf.mxu1 }
 0x6b6   : > { %11313 = vst [vmem:[%s14525_s7 + $0x8] sm:$0xff] %v11309_v24 }
 0x6e1   : > { %v11260_v45 = vpop.f32.mrf.mxu0 }
 0x6e3   : > { %v11262_v19 = vpop.f32.mrf.mxu0 }
 0x6e5   : > { %v11264_v18 = vpop.f32.mrf.mxu0 }
 0x6e7   : > { %v11265_v14 = vpop.f32.mrf.mxu0 }
 0x6ef   : > { %v11219_v53 = vpop.f32.mrf.mxu1 }
 0x6f0   : > { %v11220_v36 = vadd.f32 %v11219_v53, %v11179_v58 }
 0x6f1   : > { %v11221_v59 = vpop.f32.mrf.mxu1 }
 0x6f2   : > { %v11222_v44 = vadd.f32 %v11221_v59, %v11181_v9  ;;  %v11261_v6 = vadd.f32 %v11260_v45, %v11220_v36 }
 0x6f3   : > { %v11223_v3 = vpop.f32.mrf.mxu1 }
 0x6f4   : > { %v11263_v5 = vadd.f32 %v11262_v19, %v11222_v44 }
 0x6f5   : > { %v11224_v30 = vpop.f32.mrf.mxu1 }
 0x72f   : > { %v11301_v39 = vpop.f32.mrf.mxu1 }
 0x730   : > { %v11302_v17 = vadd.f32 %v11301_v39, %v11261_v6 }
 0x731   : > { %v11303_v15 = vpop.f32.mrf.mxu1 }
 0x732   : > { %v11310_v10 = vmax.f32 %v11302_v17, 0.0  ;;  %v11304_v2 = vadd.f32 %v11303_v15, %v11263_v5 }
 0x733   : > { %v11305_v32 = vpop.f32.mrf.mxu1 }
 0x734   : > { %11314 = vst [vmem:[%s14525_s7 + $0x10] sm:$0xff] %v11310_v10  ;;  %v11311_v38 = vmax.f32 %v11304_v2, 0.0 }
 0x735   : > { %v11306_v33 = vpop.f32.mrf.mxu1 }
 0x736   : > { %11315 = vst [vmem:[%s14525_s7 + $0x18] sm:$0xff] %v11311_v38 }
 0x737 PF: > { %s17_s23 = sadd.s32 1, %s13638_s23   ;;  %s14577_s18 = smov %s13622_s19 }
 0x738   : > { %p14_p12 = scmp.ge.s32.totalorder %s17_s23, 4   ;;  %s14578_s19 = smov %s13626_s20 }
 0x739   : > { %s14579_s20 = smov %s13772_s30  ;;  %s14580_s21 = smov %s13634_s22 }
 0x73a   : > { %s14581_s22 = smov %s14583_s8  ;;  %16 = sbr.rel (!%p14_p12) target bundleno = 6 (0x6), region = 101 }
 0x73f   :  { %11346 = vsyncpa [#allocation3], 1 }
 0x740   :  { %11348 = vsyncpa [#allocation3 + $0x1], 1 }
 0x741   :  { %11349 = vsyncpa [#allocation5], 1 }

</bundles_post_ra>
